<compile_context>
chip_gen: v7x
topology: tpu7x:2x2x1
jax: 0.10.0
libtpu: 0.0.40
codegen_flags: <defaults>
</compile_context>

<pallas_src>
import functools

import jax
import jax.numpy as jnp
from jax.experimental import pallas as pl
from jax.experimental.pallas import tpu as pltpu


def _round_up(x, m):
    return (x + m - 1) // m * m


_SMALL_B = 64            # grid-less path only for tiny (inference) batches
_MAX_TILE_B = 512        # cap batch-tile rows for the gridded path
_VMEM_LIMIT = 48 << 20   # <= 64 MiB physical on v7x; plenty on v5e/v6e


def _pick_batch_tiling(B):
    """Always >= 2 tiles when gridding (v7x has 2 TensorCores), tile rows a
    multiple of 64 so padding never adds a whole extra tile."""
    num_tiles = max(2, -(-B // _MAX_TILE_B))
    tile = _round_up(-(-B // num_tiles), 64)
    return tile, tile * num_tiles


# ---------------------------------------------------------------------------
# Kernels
# ---------------------------------------------------------------------------

def _mlp_small_kernel(x_ref, w1_ref, b1_ref, w2q_ref, s2_ref, b2_ref,
                      w3q_ref, s3_ref, b3_ref, w4_ref, b4_ref, o_ref, xs_ref):
    """Grid-less small-batch path: x is raw f32 (B, F); pad/cast in-kernel.
    w2/w3 arrive int8 + per-output-channel scales and are dequantized on the
    VPU (DMA-bound path -> halved weight bytes dominate)."""
    B, F = x_ref.shape
    A = o_ref.shape[1]

    # In-kernel pad + cast of x (removes the bracketing XLA pad dispatch).
    xs_ref[...] = jnp.zeros_like(xs_ref)
    xs_ref[0:B, 0:F] = x_ref[...]

    h = jnp.dot(xs_ref[...].astype(jnp.bfloat16), w1_ref[...],
                preferred_element_type=jnp.float32)
    h = jnp.maximum(h + b1_ref[...], 0.0)

    w2 = (w2q_ref[...].astype(jnp.float32) * s2_ref[...]).astype(jnp.bfloat16)
    h = jnp.dot(h.astype(jnp.bfloat16), w2, preferred_element_type=jnp.float32)
    h = jnp.maximum(h + b2_ref[...], 0.0)

    w3 = (w3q_ref[...].astype(jnp.float32) * s3_ref[...]).astype(jnp.bfloat16)
    h = jnp.dot(h.astype(jnp.bfloat16), w3, preferred_element_type=jnp.float32)
    h = jnp.maximum(h + b3_ref[...], 0.0)

    out = jnp.dot(h.astype(jnp.bfloat16), w4_ref[...],
                  preferred_element_type=jnp.float32) + b4_ref[...]
    # Write the unpadded (B, action_size) result directly -> no wrapper slice.
    o_ref[...] = out[0:B, 0:A]


def _mlp_grid_kernel(x_ref, w1_ref, b1_ref, w2_ref, b2_ref, w3_ref, b3_ref,
                     w4_ref, b4_ref, o_ref):
    """Gridded (training-size) path: bf16 weights resident, one batch tile
    per grid step. Matmul inputs bf16, accumulation/elementwise f32."""
    h = jnp.dot(x_ref[...], w1_ref[...], preferred_element_type=jnp.float32)
    h = jnp.maximum(h + b1_ref[...], 0.0)
    h = jnp.dot(h.astype(jnp.bfloat16), w2_ref[...],
                preferred_element_type=jnp.float32)
    h = jnp.maximum(h + b2_ref[...], 0.0)
    h = jnp.dot(h.astype(jnp.bfloat16), w3_ref[...],
                preferred_element_type=jnp.float32)
    h = jnp.maximum(h + b3_ref[...], 0.0)
    o_ref[...] = (jnp.dot(h.astype(jnp.bfloat16), w4_ref[...],
                          preferred_element_type=jnp.float32)
                  + b4_ref[...])


# ---------------------------------------------------------------------------
# Parameter preparation (one-time; do NOT call per forward)
# ---------------------------------------------------------------------------

def prepare_params(params, action_size):
    """Pad feature dims to lane multiples, cast weights to bf16, and build an
    int8 (per-output-channel) copy of w2/w3 for the DMA-bound small-batch
    path. Biases stay f32 as (1, H) rows."""
    F, H1 = params["w1"].shape
    H2 = params["w2"].shape[1]
    H3 = params["w3"].shape[1]
    Fp = _round_up(F, 128)
    Ap = _round_up(action_size, 128)

    w1 = jnp.zeros((Fp, H1), jnp.bfloat16).at[:F, :].set(
        params["w1"].astype(jnp.bfloat16))
    w2 = params["w2"].astype(jnp.bfloat16)
    w3 = params["w3"].astype(jnp.bfloat16)
    w4 = jnp.zeros((H3, Ap), jnp.bfloat16).at[:, :action_size].set(
        params["w4"].astype(jnp.bfloat16))

    b1 = params["b1"].reshape(1, H1).astype(jnp.float32)
    b2 = params["b2"].reshape(1, H2).astype(jnp.float32)
    b3 = params["b3"].reshape(1, H3).astype(jnp.float32)
    b4 = jnp.zeros((1, Ap), jnp.float32).at[:, :action_size].set(
        params["b4"].reshape(1, action_size).astype(jnp.float32))

    def quant(w):
        w = w.astype(jnp.float32)
        scale = jnp.maximum(jnp.max(jnp.abs(w), axis=0, keepdims=True) / 127.0,
                            1e-8)
        q = jnp.clip(jnp.round(w / scale), -127.0, 127.0).astype(jnp.int8)
        return q, scale.astype(jnp.float32)

    w2q, s2 = quant(params["w2"])
    w3q, s3 = quant(params["w3"])

    return dict(w1=w1, b1=b1, w2=w2, b2=b2, w3=w3, b3=b3, w4=w4, b4=b4,
                w2q=w2q, s2=s2, w3q=w3q, s3=s3)


# ---------------------------------------------------------------------------
# Forward
# ---------------------------------------------------------------------------

@functools.partial(jax.jit, static_argnames=("action_size",))
def dexp_forward(x, prepped, action_size):
    """Forward pass of DExpNetwork.

    x: (B, flat_input_size) float32
    prepped: output of prepare_params
    returns: (B, action_size) float32
    """
    B, F = x.shape
    w1, b1 = prepped["w1"], prepped["b1"]
    w2, b2 = prepped["w2"], prepped["b2"]
    w3, b3 = prepped["w3"], prepped["b3"]
    w4, b4 = prepped["w4"], prepped["b4"]
    Fp, H1 = w1.shape
    H2 = w2.shape[1]
    H3 = w3.shape[1]
    Ap = w4.shape[1]

    if B <= _SMALL_B:
        # Tiny / inference batch: single grid-less invocation, int8 w2/w3,
        # pad/cast/slice all inside the kernel.
        Bp = _round_up(B, 16)   # bf16 packs two rows per sublane
        vmem = pl.BlockSpec(memory_space=pltpu.MemorySpace.VMEM)
        out = pl.pallas_call(
            _mlp_small_kernel,
            out_shape=jax.ShapeDtypeStruct((B, action_size), jnp.float32),
            in_specs=[vmem] * 11,
            out_specs=vmem,
            scratch_shapes=[pltpu.VMEM((Bp, Fp), jnp.float32)],
            compiler_params=pltpu.CompilerParams(
                vmem_limit_bytes=_VMEM_LIMIT),
        )(x, w1, b1,
          prepped["w2q"], prepped["s2"], b2,
          prepped["w3q"], prepped["s3"], b3,
          w4, b4)
        return out

    # Large (training / replay) batch: 1-D batch grid, always >= 2 tiles so
    # v7x's two TensorCores split the work; bf16 weights resident and
    # single-buffered (constant index map + Buffered(1)).
    tile, Bp = _pick_batch_tiling(B)
    xp = jnp.zeros((Bp, Fp), jnp.bfloat16).at[:B, :F].set(
        x.astype(jnp.bfloat16))
    grid = (Bp // tile,)

    def resident(shape):
        return pl.BlockSpec(shape, lambda i: (0, 0),
                            pipeline_mode=pl.Buffered(1))

    in_specs = [
        pl.BlockSpec((tile, Fp), lambda i: (i, 0)),   # x tile (double-buffered)
        resident((Fp, H1)), resident((1, H1)),        # w1, b1
        resident((H1, H2)), resident((1, H2)),        # w2, b2
        resident((H2, H3)), resident((1, H3)),        # w3, b3
        resident((H3, Ap)), resident((1, Ap)),        # w4, b4
    ]
    out = pl.pallas_call(
        _mlp_grid_kernel,
        out_shape=jax.ShapeDtypeStruct((Bp, Ap), jnp.float32),
        grid=grid,
        in_specs=in_specs,
        out_specs=pl.BlockSpec((tile, Ap), lambda i: (i, 0)),
        compiler_params=pltpu.CompilerParams(
            dimension_semantics=("parallel",),
            vmem_limit_bytes=_VMEM_LIMIT),
    )(xp, w1, b1, w2, b2, w3, b3, w4, b4)
    return out[:B, :action_size]


# ---------------------------------------------------------------------------
# Init + references
# ---------------------------------------------------------------------------

def init_params(key, flat_input_size, action_size):
    """torch.nn.Linear-style init: U(-1/sqrt(fan_in), 1/sqrt(fan_in))."""
    dims = [(flat_input_size, 1024), (1024, 1024), (1024, 512),
            (512, action_size)]
    params = {}
    for i, (fan_in, fan_out) in enumerate(dims, start=1):
        key, kw, kb = jax.random.split(key, 3)
        bound = 1.0 / jnp.sqrt(fan_in)
        params[f"w{i}"] = jax.random.uniform(
            kw, (fan_in, fan_out), jnp.float32, -bound, bound)
        params[f"b{i}"] = jax.random.uniform(
            kb, (fan_out,), jnp.float32, -bound, bound)
    return params


def _q(a):
    return a.astype(jnp.bfloat16).astype(jnp.float32)


def _deq(wq, scale):
    return _q(wq.astype(jnp.float32) * scale)


def reference_grid_path(x, params):
    """Mirrors the gridded kernel's numerics (bf16 matmul inputs, f32 acc)."""
    h = jnp.maximum(_q(x) @ _q(params["w1"]) + params["b1"], 0.0)
    h = jnp.maximum(_q(h) @ _q(params["w2"]) + params["b2"], 0.0)
    h = jnp.maximum(_q(h) @ _q(params["w3"]) + params["b3"], 0.0)
    return _q(h) @ _q(params["w4"]) + params["b4"]


def reference_small_path(x, params, prepped):
    """Mirrors the small-batch kernel's numerics (int8 weight-only w2/w3)."""
    h = jnp.maximum(_q(x) @ _q(params["w1"]) + params["b1"], 0.0)
    h = jnp.maximum(_q(h) @ _deq(prepped["w2q"], prepped["s2"]) + params["b2"],
                    0.0)
    h = jnp.maximum(_q(h) @ _deq(prepped["w3q"], prepped["s3"]) + params["b3"],
                    0.0)
    return _q(h) @ _q(params["w4"]) + params["b4"]


# ---------------------------------------------------------------------------
# Test
# ---------------------------------------------------------------------------

if __name__ == "__main__":
    # Quoridor config: board_size=5, split_board=True, include_turn=True
    board_size = 5
    split_board = True
    include_turn = True
    board_input_size = board_size * board_size * (2 if split_board else 1)   # 50
    walls_input_size = (board_size - 1) * (board_size - 1) * 2               # 32
    flat_input_size = (board_input_size + walls_input_size
                       + (3 if include_turn else 2))                         # 85
    action_size = (board_size * board_size
                   + 2 * (board_size - 1) * (board_size - 1))                # 57

    key = jax.random.PRNGKey(0)
    key, kx_s, kx_m, kx_l = jax.random.split(key, 4)
    params = init_params(key, flat_input_size, action_size)
    prepped = prepare_params(params, action_size)
    prepped = jax.tree_util.tree_map(jax.block_until_ready, prepped)

    # Small (inference) batch -> grid-less, int8-weight, all-in-kernel path.
    x_s = jax.random.normal(kx_s, (4, flat_input_size), jnp.float32)
    out_s = jax.block_until_ready(dexp_forward(x_s, prepped, action_size))
    ref_s = reference_small_path(x_s, params, prepped)
    assert out_s.shape == (4, action_size), out_s.shape
    assert jnp.allclose(out_s, ref_s, atol=2e-3, rtol=2e-3), \
        "small-batch mismatch vs reference"

    # Mid batch (96) -> gridded path with 2 tiles of 64 rows + row padding.
    x_m = jax.random.normal(kx_m, (96, flat_input_size), jnp.float32)
    out_m = jax.block_until_ready(dexp_forward(x_m, prepped, action_size))
    ref_m = reference_grid_path(x_m, params)
    assert out_m.shape == (96, action_size), out_m.shape
    assert jnp.allclose(out_m, ref_m, atol=2e-3, rtol=2e-3), \
        "mid-batch mismatch vs reference"

    # Large (training) batch (512) -> gridded path, 2 tiles of 256 rows.
    x_l = jax.random.normal(kx_l, (512, flat_input_size), jnp.float32)
    out_l = jax.block_until_ready(dexp_forward(x_l, prepped, action_size))
    ref_l = reference_grid_path(x_l, params)
    assert out_l.shape == (512, action_size), out_l.shape
    assert jnp.allclose(out_l, ref_l, atol=2e-3, rtol=2e-3), \
        "large-batch mismatch vs reference"

    print("KERNEL_OK")
</pallas_src>

<mosaic_0001>
module attributes {stable_mosaic.version = 11 : i64} {
  func.func @_mlp_small_kernel(%arg0: memref<4x85xf32, #tpu.memory_space<vmem>>, %arg1: memref<128x1024xbf16, #tpu.memory_space<vmem>>, %arg2: memref<1x1024xf32, #tpu.memory_space<vmem>>, %arg3: memref<1024x1024xi8, #tpu.memory_space<vmem>>, %arg4: memref<1x1024xf32, #tpu.memory_space<vmem>>, %arg5: memref<1x1024xf32, #tpu.memory_space<vmem>>, %arg6: memref<1024x512xi8, #tpu.memory_space<vmem>>, %arg7: memref<1x512xf32, #tpu.memory_space<vmem>>, %arg8: memref<1x512xf32, #tpu.memory_space<vmem>>, %arg9: memref<512x128xbf16, #tpu.memory_space<vmem>>, %arg10: memref<1x128xf32, #tpu.memory_space<vmem>>, %arg11: memref<4x57xf32, #tpu.memory_space<vmem>>, %arg12: memref<16x128xf32, #tpu.memory_space<vmem>>) attributes {dimension_semantics = [], scalar_prefetch = 0 : i64, scratch_operands = 1 : i64, tpu.core_type = #tpu.core_type<tc>} {
    %cst = arith.constant 0.000000e+00 : f32
    %0 = vector.broadcast %cst : f32 to vector<16x128xf32>
    %c0 = arith.constant 0 : index
    %c0_0 = arith.constant 0 : index
    %1 = vector.load %arg12[%c0, %c0_0] : memref<16x128xf32, #tpu.memory_space<vmem>>, vector<16x128xf32>
    tpu.vector_store %arg12[%c0, %c0_0], %0 {strides = array<i32>} : memref<16x128xf32, #tpu.memory_space<vmem>>, vector<16x128xf32>,
    %c0_1 = arith.constant 0 : index
    %c0_2 = arith.constant 0 : index
    %2 = vector.load %arg0[%c0_1, %c0_2] : memref<4x85xf32, #tpu.memory_space<vmem>>, vector<4x85xf32>
    %c0_3 = arith.constant 0 : index
    %c0_4 = arith.constant 0 : index
    %3 = vector.load %arg12[%c0_3, %c0_4] : memref<16x128xf32, #tpu.memory_space<vmem>>, vector<4x85xf32>
    tpu.vector_store %arg12[%c0_3, %c0_4], %2 {strides = array<i32>} : memref<16x128xf32, #tpu.memory_space<vmem>>, vector<4x85xf32>,
    %c0_5 = arith.constant 0 : index
    %c0_6 = arith.constant 0 : index
    %4 = vector.load %arg12[%c0_5, %c0_6] : memref<16x128xf32, #tpu.memory_space<vmem>>, vector<16x128xf32>
    %5 = arith.truncf %4 : vector<16x128xf32> to vector<16x128xbf16>
    %c0_7 = arith.constant 0 : index
    %c0_8 = arith.constant 0 : index
    %6 = vector.load %arg1[%c0_7, %c0_8] : memref<128x1024xbf16, #tpu.memory_space<vmem>>, vector<128x1024xbf16>
    %cst_9 = arith.constant dense<0.000000e+00> : vector<16x1024xf32>
    %7 = tpu.matmul %5, %6, %cst_9 {dimension_numbers = #tpu.dot_dimension_numbers<[1], [0], [0], [1], [0, 0, 1, 1], [], []>} : vector<16x128xbf16>, vector<128x1024xbf16>, vector<16x1024xf32> -> vector<16x1024xf32>
    %c0_10 = arith.constant 0 : index
    %c0_11 = arith.constant 0 : index
    %8 = vector.load %arg2[%c0_10, %c0_11] : memref<1x1024xf32, #tpu.memory_space<vmem>>, vector<1x1024xf32>
    %9 = vector.broadcast %8 : vector<1x1024xf32> to vector<16x1024xf32>
    %10 = arith.addf %7, %9 : vector<16x1024xf32>
    %cst_12 = arith.constant 0.000000e+00 : f32
    %11 = vector.broadcast %cst_12 : f32 to vector<16x1024xf32>
    %12 = arith.maximumf %10, %11 : vector<16x1024xf32>
    %c0_13 = arith.constant 0 : index
    %c0_14 = arith.constant 0 : index
    %13 = vector.load %arg3[%c0_13, %c0_14] : memref<1024x1024xi8, #tpu.memory_space<vmem>>, vector<1024x1024xi8>
    %14 = arith.sitofp %13 : vector<1024x1024xi8> to vector<1024x1024xf32>
    %c0_15 = arith.constant 0 : index
    %c0_16 = arith.constant 0 : index
    %15 = vector.load %arg4[%c0_15, %c0_16] : memref<1x1024xf32, #tpu.memory_space<vmem>>, vector<1x1024xf32>
    %16 = vector.broadcast %15 : vector<1x1024xf32> to vector<1024x1024xf32>
    %17 = arith.mulf %14, %16 : vector<1024x1024xf32>
    %18 = arith.truncf %17 : vector<1024x1024xf32> to vector<1024x1024xbf16>
    %19 = arith.truncf %12 : vector<16x1024xf32> to vector<16x1024xbf16>
    %cst_17 = arith.constant dense<0.000000e+00> : vector<16x1024xf32>
    %20 = tpu.matmul %19, %18, %cst_17 {dimension_numbers = #tpu.dot_dimension_numbers<[1], [0], [0], [1], [0, 0, 1, 1], [], []>} : vector<16x1024xbf16>, vector<1024x1024xbf16>, vector<16x1024xf32> -> vector<16x1024xf32>
    %c0_18 = arith.constant 0 : index
    %c0_19 = arith.constant 0 : index
    %21 = vector.load %arg5[%c0_18, %c0_19] : memref<1x1024xf32, #tpu.memory_space<vmem>>, vector<1x1024xf32>
    %22 = vector.broadcast %21 : vector<1x1024xf32> to vector<16x1024xf32>
    %23 = arith.addf %20, %22 : vector<16x1024xf32>
    %cst_20 = arith.constant 0.000000e+00 : f32
    %24 = vector.broadcast %cst_20 : f32 to vector<16x1024xf32>
    %25 = arith.maximumf %23, %24 : vector<16x1024xf32>
    %c0_21 = arith.constant 0 : index
    %c0_22 = arith.constant 0 : index
    %26 = vector.load %arg6[%c0_21, %c0_22] : memref<1024x512xi8, #tpu.memory_space<vmem>>, vector<1024x512xi8>
    %27 = arith.sitofp %26 : vector<1024x512xi8> to vector<1024x512xf32>
    %c0_23 = arith.constant 0 : index
    %c0_24 = arith.constant 0 : index
    %28 = vector.load %arg7[%c0_23, %c0_24] : memref<1x512xf32, #tpu.memory_space<vmem>>, vector<1x512xf32>
    %29 = vector.broadcast %28 : vector<1x512xf32> to vector<1024x512xf32>
    %30 = arith.mulf %27, %29 : vector<1024x512xf32>
    %31 = arith.truncf %30 : vector<1024x512xf32> to vector<1024x512xbf16>
    %32 = arith.truncf %25 : vector<16x1024xf32> to vector<16x1024xbf16>
    %cst_25 = arith.constant dense<0.000000e+00> : vector<16x512xf32>
    %33 = tpu.matmul %32, %31, %cst_25 {dimension_numbers = #tpu.dot_dimension_numbers<[1], [0], [0], [1], [0, 0, 1, 1], [], []>} : vector<16x1024xbf16>, vector<1024x512xbf16>, vector<16x512xf32> -> vector<16x512xf32>
    %c0_26 = arith.constant 0 : index
    %c0_27 = arith.constant 0 : index
    %34 = vector.load %arg8[%c0_26, %c0_27] : memref<1x512xf32, #tpu.memory_space<vmem>>, vector<1x512xf32>
    %35 = vector.broadcast %34 : vector<1x512xf32> to vector<16x512xf32>
    %36 = arith.addf %33, %35 : vector<16x512xf32>
    %cst_28 = arith.constant 0.000000e+00 : f32
    %37 = vector.broadcast %cst_28 : f32 to vector<16x512xf32>
    %38 = arith.maximumf %36, %37 : vector<16x512xf32>
    %39 = arith.truncf %38 : vector<16x512xf32> to vector<16x512xbf16>
    %c0_29 = arith.constant 0 : index
    %c0_30 = arith.constant 0 : index
    %40 = vector.load %arg9[%c0_29, %c0_30] : memref<512x128xbf16, #tpu.memory_space<vmem>>, vector<512x128xbf16>
    %cst_31 = arith.constant dense<0.000000e+00> : vector<16x128xf32>
    %41 = tpu.matmul %39, %40, %cst_31 {dimension_numbers = #tpu.dot_dimension_numbers<[1], [0], [0], [1], [0, 0, 1, 1], [], []>} : vector<16x512xbf16>, vector<512x128xbf16>, vector<16x128xf32> -> vector<16x128xf32>
    %c0_32 = arith.constant 0 : index
    %c0_33 = arith.constant 0 : index
    %42 = vector.load %arg10[%c0_32, %c0_33] : memref<1x128xf32, #tpu.memory_space<vmem>>, vector<1x128xf32>
    %43 = vector.broadcast %42 : vector<1x128xf32> to vector<16x128xf32>
    %44 = arith.addf %41, %43 : vector<16x128xf32>
    %45 = vector.extract_strided_slice %44 {offsets = [0, 0], sizes = [4, 57], strides = [1, 1]} : vector<16x128xf32> to vector<4x57xf32>
    %c0_34 = arith.constant 0 : index
    %c0_35 = arith.constant 0 : index
    %46 = vector.load %arg11[%c0_34, %c0_35] : memref<4x57xf32, #tpu.memory_space<vmem>>, vector<4x57xf32>
    tpu.vector_store %arg11[%c0_34, %c0_35], %45 {strides = array<i32>} : memref<4x57xf32, #tpu.memory_space<vmem>>, vector<4x57xf32>,
    return
  }
}

</mosaic_0001>

<bundles_post_ra>
// kernel: dexp_forward.1
= control target key start
LH: loop header
LB: loop body
LE: loop exit
PB: predicated region body
PF: predicated region fallthrough
CT: control target
= control target key end

     0   :  { %16 = vsyncpa [#allocation4], 0  ;;  %s13153_s0 = inlined_call_operand.hbm [shape: f32[4,85], index: 0, kind: input, shape index: {}]   ;;  %s13154_s1 = inlined_call_operand.hbm [shape: bf16[128,1024], index: 1, kind: input, shape index: {}]   ;;  %s13155_s2 = inlined_call_operand.hbm [shape: f32[1,1024], index: 2, kind: input, shape index: {}]   ;;  %s13156_s3 = inlined_call_operand.hbm [shape: s8[1024,1024], index: 3, kind: input, shape index: {}]   ;;  %s13157_s4 = inlined_call_operand.vmem [shape: f32[1,1024], index: 4, kind: input, shape index: {}]   ;;  %s13158_s5 = inlined_call_operand.hbm [shape: f32[1,1024], index: 5, kind: input, shape index: {}]   ;;  %s13159_s6 = inlined_call_operand.hbm [shape: s8[1024,512], index: 6, kind: input, shape index: {}]   ;;  %s13160_s7 = inlined_call_operand.vmem [shape: f32[1,512], index: 7, kind: input, shape index: {}]   ;;  %s13161_s8 = inlined_call_operand.hbm [shape: f32[1,512], index: 8, kind: input, shape index: {}]   ;;  %s13162_s9 = inlined_call_operand.hbm [shape: bf16[512,128], index: 9, kind: input, shape index: {}]   ;;  %s13163_s10 = inlined_call_operand.vmem [shape: f32[1,128], index: 10, kind: input, shape index: {}]   ;;  %s13164_s11 = inlined_call_operand.hbm [shape: f32[4,57], index: 11, kind: output, shape index: {}]  }
   0x1   :  { %17 = vsyncpa [#allocation7], 0 }
   0x2   :  { %18 = vsyncpa [#allocation10], 0 }
   0x3   :  { %19 = vsyncpa [#allocation13], 0 }
   0x4   :  { %20 = vsyncpa [#allocation16], 0 }
   0x5   :  { %21 = vsyncpa [#allocation5], 0  ;;  %s8591_s17 = smov [#allocation6]   ;;  %s8381_s21 = scalar_lea.hbm %s13154_s1, 8192 }
   0x6   :  { %s37_s18 = sshll.u32 %s8591_s17, 4  ;;  %p8382_p0 = scmp.ne.s32.totalorder %s13154_s1, %s8381_s21  ;;  %s38_s18 = int_to_ptr.vmem [resolvable:$true] %s37_s18 }
   0x7   :  { %p8385_p1 = scmp.lt.u32.totalorder %s8381_s21, %s13154_s1 }
   0x9   :  { %p8387_p2 = pnand %p8385_p1, %p8382_p0 }
   0xb   :  { %8390 = shalt.err (!%p8387_p2)
}
   0xc   :  { %s8391_s26 = scalar_lea.vmem %s38_s18, 8192  ;;  %p8396_p4 = scmp.lt.s32.totalorder %s38_s18, %s38_s18 }
   0xd   :  { %p8392_p3 = scmp.ne.s32.totalorder %s38_s18, %s8391_s26  ;;  %p8397_p5 = scmp.lt.s32.totalorder %s8391_s26, %s8391_s26 }
   0xf   :  { %p8398_p6 = por %p8397_p5, %p8396_p4 }
  0x11   :  { %p8399_p7 = pnand %p8398_p6, %p8392_p3 }
  0x13   :  { %8402 = shalt.err (!%p8399_p7)
}
  0x14   :  { %s8592_s27 = smov 512   ;;  %s8593_s28 = smov 32  }
  0x15   :  { %43 = dma.hbm_to_vmem [thread:$0]  %s13154_s1, 8192, %s38_s18, [#allocation7], %s8592_s27, %s8592_s27, %s8593_s28  }
  0x16   :  { %s8594_s12 = smov [#allocation9]   ;;  %s8403_s16 = scalar_lea.hbm %s13156_s3, 32768 }
  0x17   :  { %s59_s13 = sshll.u32 %s8594_s12, 4  ;;  %p8404_p8 = scmp.ne.s32.totalorder %s13156_s3, %s8403_s16  ;;  %s60_s13 = int_to_ptr.vmem [resolvable:$true] %s59_s13 }
  0x18   :  { %p8407_p9 = scmp.lt.u32.totalorder %s8403_s16, %s13156_s3 }
  0x1a   :  { %p8409_p10 = pnand %p8407_p9, %p8404_p8 }
  0x1c   :  { %8412 = shalt.err (!%p8409_p10)
}
  0x1d   :  { %s8413_s22 = scalar_lea.vmem %s60_s13, 32768  ;;  %p8418_p12 = scmp.lt.s32.totalorder %s60_s13, %s60_s13 }
  0x1e   :  { %p8414_p11 = scmp.ne.s32.totalorder %s60_s13, %s8413_s22  ;;  %p8419_p13 = scmp.lt.s32.totalorder %s8413_s22, %s8413_s22 }
  0x20   :  { %p8420_p0 = por %p8419_p13, %p8418_p12 }
  0x22   :  { %p8421_p1 = pnand %p8420_p0, %p8414_p11 }
  0x24   :  { %8424 = shalt.err (!%p8421_p1)
}
  0x25   :  { %s8595_s1 = smov 1024   ;;  %s8596_s18 = smov 64  }
  0x26   :  { %65 = dma.hbm_to_vmem [thread:$0]  %s13156_s3, 32768, %s60_s13, [#allocation10], %s8595_s1, %s8595_s1, %s8596_s18  }
  0x27   :  { %s8597_s25 = smov [#allocation12]   ;;  %s8598_s29 = smov [#allocation3]  }
  0x28   :  { %s83_s26 = sshll.u32 %s8597_s25, 4  ;;  %s28_s30 = sshll.u32 %s8598_s29, 4  ;;  %s84_s26 = int_to_ptr.vmem [resolvable:$true] %s83_s26  ;;  %s29_s30 = int_to_ptr.vmem [resolvable:$true] %s28_s30 }
  0x29   :  { %s8425_s15 = scalar_lea.hbm %s13159_s6, 16384 }
  0x2a   :  { %p8426_p2 = scmp.ne.s32.totalorder %s13159_s6, %s8425_s15  ;;  %p8429_p3 = scmp.lt.u32.totalorder %s8425_s15, %s13159_s6 }
  0x2c   :  { %p8431_p4 = pnand %p8429_p3, %p8426_p2 }
  0x2e   :  { %8434 = shalt.err (!%p8431_p4)
}
  0x2f   :  { %s8435_s3 = scalar_lea.vmem %s84_s26, 16384  ;;  %p8440_p6 = scmp.lt.s32.totalorder %s84_s26, %s84_s26 }
  0x30   :  { %p8436_p5 = scmp.ne.s32.totalorder %s84_s26, %s8435_s3  ;;  %p8441_p7 = scmp.lt.s32.totalorder %s8435_s3, %s8435_s3 }
  0x32   :  { %p8442_p8 = por %p8441_p7, %p8440_p6 }
  0x34   :  { %p8443_p9 = pnand %p8442_p8, %p8436_p5 }
  0x36   :  { %8446 = shalt.err (!%p8443_p9)
}
  0x37   :  { %89 = dma.hbm_to_vmem [thread:$0]  %s13159_s6, 16384, %s84_s26, [#allocation13], %s8592_s27, %s8592_s27, %s8593_s28  }
  0x38   :  { %s8447_s23 = scalar_lea.hbm %s13153_s0, 64 }
  0x39   :  { %p8448_p10 = scmp.ne.s32.totalorder %s13153_s0, %s8447_s23  ;;  %p8451_p11 = scmp.lt.u32.totalorder %s8447_s23, %s13153_s0 }
  0x3b   :  { %p8453_p12 = pnand %p8451_p11, %p8448_p10 }
  0x3d   :  { %8456 = shalt.err (!%p8453_p12)
}
  0x3e   :  { %s8457_s14 = scalar_lea.vmem %s29_s30, 64  ;;  %p8462_p0 = scmp.lt.s32.totalorder %s29_s30, %s29_s30 }
  0x3f   :  { %p8458_p13 = scmp.ne.s32.totalorder %s29_s30, %s8457_s14  ;;  %p8463_p1 = scmp.lt.s32.totalorder %s8457_s14, %s8457_s14 }
  0x41   :  { %p8464_p2 = por %p8463_p1, %p8462_p0 }
  0x43   :  { %p8465_p3 = pnand %p8464_p2, %p8458_p13 }
  0x45   :  { %8468 = shalt.err (!%p8465_p3)
}
  0x46   :  { %31 = dma.hbm_to_vmem [thread:$0]  %s13153_s0, 64, %s29_s30, [#allocation4]  }
  0x47   :  { %s8599_s28 = smov [#allocation8]   ;;  %s8600_s15 = smov [#allocation11]  }
  0x48   :  { %s50_s26 = sshll.u32 %s8599_s28, 4  ;;  %s74_s16 = sshll.u32 %s8600_s15, 4  ;;  %s51_s26 = int_to_ptr.vmem [resolvable:$true] %s50_s26  ;;  %s75_s16 = int_to_ptr.vmem [resolvable:$true] %s74_s16 }
  0x49   :  { %s8469_s20 = scalar_lea.hbm %s13155_s2, 128 }
  0x4a   :  { %p8470_p4 = scmp.ne.s32.totalorder %s13155_s2, %s8469_s20  ;;  %p8473_p5 = scmp.lt.u32.totalorder %s8469_s20, %s13155_s2 }
  0x4c   :  { %p8475_p6 = pnand %p8473_p5, %p8470_p4 }
  0x4e   :  { %8478 = shalt.err (!%p8475_p6)
}
  0x4f   :  { %s8479_s0 = scalar_lea.vmem %s51_s26, 128  ;;  %p8484_p8 = scmp.lt.s32.totalorder %s51_s26, %s51_s26 }
  0x50   :  { %p8480_p7 = scmp.ne.s32.totalorder %s51_s26, %s8479_s0  ;;  %p8485_p9 = scmp.lt.s32.totalorder %s8479_s0, %s8479_s0 }
  0x52   :  { %p8486_p10 = por %p8485_p9, %p8484_p8 }
  0x54   :  { %p8487_p11 = pnand %p8486_p10, %p8480_p7 }
  0x56   :  { %8490 = shalt.err (!%p8487_p11)
}
  0x57   :  { %53 = dma.hbm_to_vmem [thread:$0]  %s13155_s2, 128, %s51_s26, [#allocation7]  }
  0x58   :  { %s8491_s25 = scalar_lea.hbm %s13158_s5, 128 }
  0x59   :  { %p8492_p12 = scmp.ne.s32.totalorder %s13158_s5, %s8491_s25  ;;  %p8495_p13 = scmp.lt.u32.totalorder %s8491_s25, %s13158_s5 }
  0x5b   :  { %p8497_p0 = pnand %p8495_p13, %p8492_p12 }
  0x5d   :  { %8500 = shalt.err (!%p8497_p0)
}
  0x5e   :  { %s8501_s27 = scalar_lea.vmem %s75_s16, 128  ;;  %p8506_p2 = scmp.lt.s32.totalorder %s75_s16, %s75_s16 }
  0x5f   :  { %p8502_p1 = scmp.ne.s32.totalorder %s75_s16, %s8501_s27  ;;  %p8507_p3 = scmp.lt.s32.totalorder %s8501_s27, %s8501_s27 }
  0x61   :  { %p8508_p4 = por %p8507_p3, %p8506_p2 }
  0x63   :  { %p8509_p5 = pnand %p8508_p4, %p8502_p1 }
  0x65   :  { %8512 = shalt.err (!%p8509_p5)
}
  0x66   :  { %77 = dma.hbm_to_vmem [thread:$0]  %s13158_s5, 128, %s75_s16, [#allocation10]  }
  0x67   :  { %s8601_s26 = smov [#allocation14]   ;;  %s8602_s17 = smov [#allocation15]  }
  0x68   :  { %s98_s15 = sshll.u32 %s8601_s26, 4  ;;  %s107_s19 = sshll.u32 %s8602_s17, 4  ;;  %s99_s15 = int_to_ptr.vmem [resolvable:$true] %s98_s15  ;;  %s8746_s19 = int_to_ptr.vmem [resolvable:$true] %s107_s19 }
  0x69   :  { %s8513_s13 = scalar_lea.hbm %s13161_s8, 64 }
  0x6a   :  { %p8514_p6 = scmp.ne.s32.totalorder %s13161_s8, %s8513_s13  ;;  %p8517_p7 = scmp.lt.u32.totalorder %s8513_s13, %s13161_s8 }
  0x6c   :  { %p8519_p8 = pnand %p8517_p7, %p8514_p6 }
  0x6e   :  { %8522 = shalt.err (!%p8519_p8)
}
  0x6f   :  { %s8523_s5 = scalar_lea.vmem %s99_s15, 64  ;;  %p8528_p10 = scmp.lt.s32.totalorder %s99_s15, %s99_s15 }
  0x70   :  { %p8524_p9 = scmp.ne.s32.totalorder %s99_s15, %s8523_s5  ;;  %p8529_p11 = scmp.lt.s32.totalorder %s8523_s5, %s8523_s5 }
  0x72   :  { %p8530_p12 = por %p8529_p11, %p8528_p10 }
  0x74   :  { %p8531_p13 = pnand %p8530_p12, %p8524_p9 }
  0x76   :  { %8534 = shalt.err (!%p8531_p13)
}
  0x77   :  { %101 = dma.hbm_to_vmem [thread:$0]  %s13161_s8, 64, %s99_s15, [#allocation13]  }
  0x78   :  { %s8535_s25 = scalar_lea.hbm %s13162_s9, 4096 }
  0x79   :  { %p8536_p0 = scmp.ne.s32.totalorder %s13162_s9, %s8535_s25  ;;  %p8539_p1 = scmp.lt.u32.totalorder %s8535_s25, %s13162_s9 }
  0x7b   :  { %p8541_p2 = pnand %p8539_p1, %p8536_p0 }
  0x7d   :  { %8544 = shalt.err (!%p8541_p2)
}
  0x7e   :  { %s8545_s27 = scalar_lea.vmem %s8746_s19, 4096  ;;  %p8550_p4 = scmp.lt.s32.totalorder %s8746_s19, %s8746_s19 }
  0x7f   :  { %p8546_p3 = scmp.ne.s32.totalorder %s8746_s19, %s8545_s27  ;;  %p8551_p5 = scmp.lt.s32.totalorder %s8545_s27, %s8545_s27 }
  0x81   :  { %p8552_p6 = por %p8551_p5, %p8550_p4 }
  0x83   :  { %p8553_p7 = pnand %p8552_p6, %p8546_p3 }
  0x85   :  { %8556 = shalt.err (!%p8553_p7)
}
  0x86   :  { %s8603_s8 = smov 4  }
  0x87   :  { %113 = dma.hbm_to_vmem [thread:$0]  %s13162_s9, 4096, %s8746_s19, [#allocation16], %s8596_s18, %s8596_s18, %s8603_s8  }
  0x88   :  { %8579 = dma.done.wait [#allocation4], 64  }
  0x89   :  { %8580 = vsyncadd [#allocation4], 4294967232 }
  0x8a   :  { %8581 = dma.done.wait [#allocation7], 8320  }
  0x8b   :  { %8582 = vsyncadd [#allocation7], 4294958976 }
  0x8c   :  { %8583 = dma.done.wait [#allocation10], 32896  }
  0x8d   :  { %8584 = vsyncadd [#allocation10], 4294934400 }
  0x8e   :  { %8585 = dma.done.wait [#allocation13], 16448  }
  0x8f   :  { %8586 = vsyncadd [#allocation13], 4294950848 }
  0x90   :  { %8587 = dma.done.wait [#allocation16], 4096  }
  0x91   :  { %8588 = vsyncadd [#allocation16], 4294963200  ;;  %v13165_v0 = vmov 0   ;;  %v8605_v1 = vmov 0.0   ;;  %v215_v2 = vlaneseq  ;;  %v149_v3 = vld [vmem:[#allocation6] sm:$0xff]  ;;  %vm144_vm0 = vcmask 691200  }
  0x92   :  { %607 = vmatprep.mubr.bf16.mxu0 %v13165_v0  ;;  %141 = vst [vmem:[#allocation2] sm:$0xff] %v8605_v1  ;;  %650 = vmatprep.mubr.bf16.mxu1 %v13165_v0  ;;  %v153_v4 = vld [vmem:[#allocation6 + $0x20] sm:$0xff]  ;;  %v143_v23 = vld [vmem:[#allocation3] sm:$0xf]  ;;  %v150_v24 = vld [vmem:[#allocation6 + $0x8] sm:$0xff]  ;;  %s8606_s13 = smov [#allocation17]  }
  0x93   :  { %v157_v5 = vld [vmem:[#allocation6 + $0x40] sm:$0xff]  ;;  %v8092_v6 = vcombine.high %v149_v3, %v153_v4  ;;  %v8091_v7 = vcombine.low %v149_v3, %v153_v4  ;;  %v8788_v13 = vshrl.u32 %v215_v2, 7  ;;  %145 = vst.msk [vmem:[#allocation2] sm:$0xf] %vm144_vm0, %v143_v23  ;;  %v154_v27 = vld [vmem:[#allocation6 + $0x28] sm:$0xff]  ;;  %v8871_v62 = vld [vmem:[#allocation6 + $0x10] sm:$0xff] }
  0x94   :  { %v161_v8 = vld [vmem:[#allocation6 + $0x60] sm:$0xff]  ;;  %v158_v28 = vld [vmem:[#allocation6 + $0x48] sm:$0xff]  ;;  %v8094_v30 = vcombine.high %v150_v24, %v154_v27  ;;  %v8093_v31 = vcombine.low %v150_v24, %v154_v27  ;;  %v8873_v63 = vld [vmem:[#allocation6 + $0x30] sm:$0xff]  ;;  %s8078_s21 = sshll.u32 %s8606_s13, 4  ;;  %vm8070_vm1 = vcmask 461824   ;;  %s8079_s21 = int_to_ptr.vmem [resolvable:$true] %s8078_s21 }
  0x95   :  { %v8100_v9 = vcombine.high %v157_v5, %v161_v8  ;;  %v8782_v10 = vld [vmem:[#allocation6 + $0x80] sm:$0xff]  ;;  %575 = vmatprep.subr.bf16.mxu0 %v8092_v6  ;;  %13339 = vst [vmem:[#allocation24_spill] sm:$0xff] %v8788_v13  ;;  %v8099_v14 = vcombine.low %v157_v5, %v161_v8  ;;  %v162_v29 = vld [vmem:[#allocation6 + $0x68] sm:$0xff]  ;;  %v8818_v36 = vsub.s32 1, %v8788_v13  ;;  %v8831_v42 = vsub.s32 3, %v8788_v13  ;;  %v8875_v2 = vld [vmem:[#allocation6 + $0x50] sm:$0xff]  ;;  %p8562_p9 = scmp.lt.s32.totalorder %s8079_s21, %s8079_s21 }
  0x96   :  { %v8784_v11 = vld [vmem:[#allocation6 + $0xa0] sm:$0xff]  ;;  %576 = vmatpush1.bf16.msra.mxu0 %v8091_v7  ;;  %v8102_v32 = vcombine.high %v158_v28, %v162_v29  ;;  %v8811_v33 = vld [vmem:[#allocation6 + $0x88] sm:$0xff]  ;;  %v8834_v43 = vsub.s32 0, %v8788_v13  ;;  %618 = vmatprep.subr.bf16.mxu1 %v8094_v30  ;;  %v8849_v50 = vsub.s32 2, %v8788_v13  ;;  %v8101_v54 = vcombine.low %v158_v28, %v162_v29  ;;  %v8885_v7 = vld [vmem:[#allocation6 + $0x70] sm:$0xff]  ;;  %s8557_s22 = scalar_lea.vmem %s8079_s21, 64 }
  0x97   :  { %v8786_v12 = vld [vmem:[#allocation6 + $0xc0] sm:$0xff]  ;;  %577 = vmatprep.subr.bf16.mxu0 %v8100_v9  ;;  %v8108_v18 = vcombine.high %v8782_v10, %v8784_v11  ;;  %v8813_v34 = vld [vmem:[#allocation6 + $0xa8] sm:$0xff]  ;;  %13340 = vst [vmem:[#allocation25_spill] sm:$0xff] %v8818_v36  ;;  %v8107_v37 = vcombine.low %v8782_v10, %v8784_v11  ;;  %13341 = vst [vmem:[#allocation26_spill] sm:$0xff] %v8831_v42  ;;  %619 = vmatpush1.bf16.msra.mxu1 %v8093_v31  ;;  %p8558_p8 = scmp.ne.s32.totalorder %s8079_s21, %s8557_s22  ;;  %p8563_p10 = scmp.lt.s32.totalorder %s8557_s22, %s8557_s22 }
  0x98   :  { %v8790_v15 = vld [vmem:[#allocation6 + $0xe0] sm:$0xff]  ;;  %v8815_v35 = vld [vmem:[#allocation6 + $0xc8] sm:$0xff]  ;;  %13342 = vst [vmem:[#allocation27_spill] sm:$0xff] %v8834_v43  ;;  %13343 = vst [vmem:[#allocation28_spill] sm:$0xff] %v8849_v50  ;;  %620 = vmatprep.subr.bf16.mxu1 %v8102_v32  ;;  %v8110_v61 = vcombine.high %v8811_v33, %v8813_v34  ;;  %v8109_v3 = vcombine.low %v8811_v33, %v8813_v34 }
  0x99   :  { %v8792_v16 = vld [vmem:[#allocation6 + $0x100] sm:$0xff]  ;;  %v8116_v38 = vcombine.high %v8786_v12, %v8790_v15  ;;  %v8824_v39 = vld [vmem:[#allocation6 + $0xe8] sm:$0xff]  ;;  %v8115_v44 = vcombine.low %v8786_v12, %v8790_v15  ;;  %v8887_v8 = vld [vmem:[#allocation6 + $0x90] sm:$0xff]  ;;  %p8564_p11 = por %p8563_p10, %p8562_p9 }
  0x9a   :  { %v8794_v17 = vld [vmem:[#allocation6 + $0x120] sm:$0xff]  ;;  %578 = vmatpush1.bf16.msra.mxu0 %v8099_v14  ;;  %v8826_v40 = vld [vmem:[#allocation6 + $0x108] sm:$0xff]  ;;  %v8118_v4 = vcombine.high %v8815_v35, %v8824_v39  ;;  %v8117_v5 = vcombine.low %v8815_v35, %v8824_v39  ;;  %v8889_v9 = vld [vmem:[#allocation6 + $0xb0] sm:$0xff] }
  0x9b   :  { %v8798_v19 = vld [vmem:[#allocation6 + $0x140] sm:$0xff]  ;;  %v8828_v41 = vld [vmem:[#allocation6 + $0x128] sm:$0xff]  ;;  %579 = vmatprep.subr.bf16.mxu0 %v8108_v18  ;;  %v8124_v45 = vcombine.high %v8792_v16, %v8794_v17  ;;  %v8123_v46 = vcombine.low %v8792_v16, %v8794_v17  ;;  %v8899_v18 = vld [vmem:[#allocation6 + $0xd0] sm:$0xff]  ;;  %621 = vmatpush1.bf16.msra.mxu1 %v8101_v54  ;;  %p8565_p12 = pnand %p8564_p11, %p8558_p8 }
  0x9c   :  { %v8800_v20 = vld [vmem:[#allocation6 + $0x160] sm:$0xff]  ;;  %v8842_v47 = vld [vmem:[#allocation6 + $0x148] sm:$0xff]  ;;  %v8126_v6 = vcombine.high %v8826_v40, %v8828_v41  ;;  %v8901_v23 = vld [vmem:[#allocation6 + $0xf0] sm:$0xff]  ;;  %622 = vmatprep.subr.bf16.mxu1 %v8110_v61 }
  0x9d   :  { %v8802_v21 = vld [vmem:[#allocation6 + $0x180] sm:$0xff]  ;;  %v8844_v48 = vld [vmem:[#allocation6 + $0x168] sm:$0xff]  ;;  %v8132_v51 = vcombine.high %v8798_v19, %v8800_v20  ;;  %v8131_v52 = vcombine.low %v8798_v19, %v8800_v20  ;;  %v8911_v30 = vld [vmem:[#allocation6 + $0x110] sm:$0xff]  ;;  %v13352_v19 = vcombine.low %v8826_v40, %v8828_v41 }
  0x9e   :  { %v8804_v22 = vld [vmem:[#allocation6 + $0x1a0] sm:$0xff]  ;;  %v8846_v49 = vld [vmem:[#allocation6 + $0x188] sm:$0xff]  ;;  %580 = vmatpush1.bf16.msra.mxu0 %v8107_v37  ;;  %v8913_v31 = vld [vmem:[#allocation6 + $0x130] sm:$0xff] }
  0x9f   :  { %v8806_v25 = vld [vmem:[#allocation6 + $0x1c0] sm:$0xff]  ;;  %v8857_v55 = vld [vmem:[#allocation6 + $0x1a8] sm:$0xff]  ;;  %581 = vmatprep.subr.bf16.mxu0 %v8116_v38  ;;  %v8915_v32 = vld [vmem:[#allocation6 + $0x150] sm:$0xff]  ;;  %623 = vmatpush1.bf16.msra.mxu1 %v8109_v3  ;;  %v13354_v41 = vcombine.low %v8802_v21, %v8804_v22 }
  0xa0   :  { %v8808_v26 = vld [vmem:[#allocation6 + $0x1e0] sm:$0xff]  ;;  %v8859_v56 = vld [vmem:[#allocation6 + $0x1c8] sm:$0xff]  ;;  %v8925_v54 = vld [vmem:[#allocation6 + $0x170] sm:$0xff]  ;;  %624 = vmatprep.subr.bf16.mxu1 %v8118_v4 }
  0xa1   :  { %v8861_v57 = vld [vmem:[#allocation6 + $0x1e8] sm:$0xff]  ;;  %v8927_v28 = vld [vmem:[#allocation6 + $0x190] sm:$0xff]  ;;  %v8944_v24 = vld [vmem:[#allocation6 + $0x18] sm:$0xff] }
  0xa2   :  { %v146_v10 = vld [vmem:[#allocation2] sm:$0xff]  ;;  %582 = vmatpush1.bf16.msra.mxu0 %v8115_v44  ;;  %v8954_v37 = vld [vmem:[#allocation6 + $0x38] sm:$0xff]  ;;  %v3067_v11 = vld [vmem:[%s13157_s4] sm:$0xff] }
  0xa3   :  { %v8929_v0 = vld [vmem:[#allocation6 + $0x1b0] sm:$0xff]  ;;  %v8932_v61 = vpack.c.bf16 %v8605_v1, %v146_v10  ;;  %583 = vmatprep.subr.bf16.mxu0 %v8124_v45  ;;  %v8956_v29 = vld [vmem:[#allocation6 + $0x58] sm:$0xff]  ;;  %625 = vmatpush1.bf16.msra.mxu1 %v8117_v5  ;;  %v766_v53 = vld [vmem:[#allocation9 + $0x18] sm:$0xff]  ;;  %v9040_v5 = vrot.slane %v3067_v11, %v8818_v36  ;;  %v9048_v13 = vrot.slane %v3067_v11, %v8831_v42 }
  0xa4   :  { %v8940_v38 = vld [vmem:[#allocation6 + $0x1d0] sm:$0xff]  ;;  %v8958_v33 = vld [vmem:[#allocation6 + $0x78] sm:$0xff]  ;;  %626 = vmatprep.subr.bf16.mxu1 %v8126_v6  ;;  %v1030_v1 = vunpack.c.1.s8 %v766_v53  ;;  %v13351_v6 = vcombine.high %v8802_v21, %v8804_v22  ;;  %v9091_v21 = vrot.slane %v3067_v11, %v8849_v50 }
  0xa5   :  { %13344 = vst [vmem:[#allocation29_spill] sm:$0xff] %v8940_v38  ;;  %v8942_v27 = vld [vmem:[#allocation6 + $0x1f0] sm:$0xff]  ;;  %v8968_v34 = vld [vmem:[#allocation6 + $0x98] sm:$0xff] }
  0xa6   :  { %13345 = vst [vmem:[#allocation30_spill] sm:$0xff] %v8942_v27  ;;  %v8970_v60 = vld [vmem:[#allocation6 + $0xb8] sm:$0xff]  ;;  %584 = vmatpush1.bf16.msra.mxu0 %v8123_v46  ;;  %v764_v17 = vld [vmem:[#allocation9 + $0x8] sm:$0xff]  ;;  %v763_v46 = vld [vmem:[#allocation9] sm:$0xff]  ;;  %v9054_v27 = vrot.slane %v3067_v11, %v8834_v43  ;;  %v2054_v20 = vcvt.s32.f32 %v1030_v1 }
  0xa7   :  { %v8972_v15 = vld [vmem:[#allocation6 + $0xd8] sm:$0xff]  ;;  %585 = vmatprep.subr.bf16.mxu0 %v8132_v51  ;;  %v1020_v35 = vunpack.c.0.s8 %v764_v17  ;;  %v1028_v39 = vunpack.c.1.s8 %v764_v17  ;;  %v1022_v51 = vunpack.c.0.s8 %v766_v53  ;;  %627 = vmatpush1.bf16.msra.mxu1 %v13352_v19  ;;  %v1036_v22 = vunpack.c.2.s8 %v764_v17 }
  0xa8   :  { %v8982_v10 = vld [vmem:[#allocation6 + $0xf8] sm:$0xff]  ;;  %v9077_v1 = vmul.f32 %v9048_v13, %v2054_v20  ;;  %v1044_v19 = vunpack.c.3.s8 %v764_v17  ;;  %v1038_v20 = vunpack.c.2.s8 %v766_v53 }
  0xa9   :  { %v8984_v14 = vld [vmem:[#allocation6 + $0x118] sm:$0xff]  ;;  %v2044_v36 = vcvt.s32.f32 %v1020_v35 }
  0xaa   :  { %v8986_v59 = vld [vmem:[#allocation6 + $0x138] sm:$0xff]  ;;  %586 = vmatpush1.bf16.msra.mxu0 %v8131_v52  ;;  %v2068_v17 = vcvt.s32.f32 %v1044_v19 }
  0xab   :  { %v8999_v45 = vld [vmem:[#allocation6 + $0x158] sm:$0xff]  ;;  %587 = vmatprep.subr.bf16.mxu0 %v13351_v6  ;;  %v9064_v35 = vmul.f32 %v9040_v5, %v2044_v36  ;;  %v13356_v6 = vcombine.low %v8842_v47, %v8844_v48 }
  0xac   :  { %v9001_v58 = vld [vmem:[#allocation6 + $0x178] sm:$0xff] }
  0xad   :  { %13346 = vst [vmem:[#allocation31_spill] sm:$0xff] %v9001_v58  ;;  %v9003_v12 = vld [vmem:[#allocation6 + $0x198] sm:$0xff]  ;;  %v13353_v58 = vcombine.high %v8842_v47, %v8844_v48  ;;  %v2060_v47 = vcvt.s32.f32 %v1036_v22  ;;  %v1046_v48 = vunpack.c.3.s8 %v766_v53 }
  0xae   :  { %13347 = vst [vmem:[#allocation32_spill] sm:$0xff] %v9003_v12  ;;  %v9016_v44 = vld [vmem:[#allocation6 + $0x1b8] sm:$0xff]  ;;  %v2046_v12 = vcvt.s32.f32 %v1022_v51  ;;  %588 = vmatpush1.bf16.msra.mxu0 %v13354_v41  ;;  %v9109_v41 = vld [vmem:[#allocation9 + $0x48] sm:$0xff] }
  0xaf   :  { %13348 = vst [vmem:[#allocation33_spill] sm:$0xff] %v9016_v44  ;;  %v9018_v4 = vld [vmem:[#allocation6 + $0x1d8] sm:$0xff]  ;;  %v2052_v44 = vcvt.s32.f32 %v1028_v39  ;;  %628 = vmatprep.subr.bf16.mxu1 %v13353_v58  ;;  %v2070_v53 = vcvt.s32.f32 %v1046_v48 }
  0xb0   :  { %13349 = vst [vmem:[#allocation34_spill] sm:$0xff] %v9018_v4  ;;  %v9020_v3 = vld [vmem:[#allocation6 + $0x1f8] sm:$0xff]  ;;  %v1027_v4 = vunpack.c.1.s8 %v763_v46  ;;  %v9070_v39 = vmul.f32 %v9048_v13, %v2046_v12  ;;  %v13355_v12 = vcombine.high %v8806_v25, %v8808_v26  ;;  %629 = vmatpush1.bf16.msra.mxu1 %v13356_v6  ;;  %v2062_v6 = vcvt.s32.f32 %v1038_v20 }
  0xb1   :  { %13350 = vst [vmem:[#allocation35_spill] sm:$0xff] %v9020_v3  ;;  %v9042_v16 = vld [vmem:[#allocation9 + $0x10] sm:$0xff]  ;;  %v1019_v3 = vunpack.c.0.s8 %v763_v46  ;;  %v9067_v51 = vmul.f32 %v9040_v5, %v2052_v44  ;;  %v9141_v48 = vmul.f32 %v9048_v13, %v2070_v53 }
  0xb2   :  { %v2051_v42 = vcvt.s32.f32 %v1027_v4  ;;  %v1021_v38 = vunpack.c.0.s8 %v9042_v16  ;;  %v1029_v40 = vunpack.c.1.s8 %v9042_v16  ;;  %589 = vmatprep.subr.bf16.mxu0 %v13355_v12  ;;  %v13358_v12 = vcombine.low %v8806_v25, %v8808_v26 }
  0xb3   :  { %v2043_v52 = vcvt.s32.f32 %v1019_v3  ;;  %v1037_v22 = vunpack.c.2.s8 %v9042_v16  ;;  %v9123_v3 = vld [vmem:[#allocation9 + $0x58] sm:$0xff]  ;;  %v13360_v25 = vcombine.low %v8846_v49, %v8857_v55  ;;  %v9129_v26 = vmul.f32 %v9040_v5, %v2068_v17 }
  0xb4   :  { %v9083_v36 = vmul.f32 %v9054_v27, %v2051_v42  ;;  %v2045_v44 = vcvt.s32.f32 %v1021_v38  ;;  %v2053_v4 = vcvt.s32.f32 %v1029_v40  ;;  %590 = vmatpush1.bf16.msra.mxu0 %v13358_v12  ;;  %v1035_v42 = vunpack.c.2.s8 %v763_v46  ;;  %v9134_v12 = vld [vmem:[#allocation9 + $0x40] sm:$0xff] }
  0xb5   :  { %v9080_v58 = vmul.f32 %v9054_v27, %v2043_v52  ;;  %v13357_v52 = vcombine.high %v8846_v49, %v8857_v55  ;;  %v1043_v38 = vunpack.c.3.s8 %v763_v46  ;;  %v9132_v46 = vmul.f32 %v9048_v13, %v2062_v6  ;;  %v9145_v6 = vld [vmem:[#allocation9 + $0x50] sm:$0xff] }
  0xb6   :  { %v9104_v11 = vmul.f32 %v9091_v21, %v2045_v44  ;;  %v9107_v40 = vmul.f32 %v9091_v21, %v2053_v4  ;;  %v9120_v4 = vmul.f32 %v9040_v5, %v2060_v47  ;;  %v2059_v19 = vcvt.s32.f32 %v1035_v42 }
  0xb7   :  { %630 = vmatprep.subr.bf16.mxu1 %v13357_v52  ;;  %v13359_v52 = vcombine.high %v8871_v62, %v8873_v63  ;;  %v2067_v20 = vcvt.s32.f32 %v1043_v38  ;;  %608 = vmatmul.mubr.bf16.vlgmr.msra.gmra.mrb[0].mxu0 %v8932_v61  ;;  %v13361_v47 = vcombine.high %v8859_v56, %v8861_v57  ;;  %v1045_v49 = vunpack.c.3.s8 %v9042_v16 }
  0xb8   :  { %631 = vmatpush1.bf16.msra.mxu1 %v13360_v25  ;;  %v2061_v55 = vcvt.s32.f32 %v1037_v22  ;;  %v1052_v17 = vunpack.c.0.s8 %v9109_v41  ;;  %v13362_v42 = vcombine.low %v8871_v62, %v8873_v63  ;;  %v13363_v38 = vmov 0  }
  0xb9   :  { %661 = vmatprep.subr.bf16.mxu0 %v13359_v52  ;;  %632 = vmatprep.subr.bf16.mxu1 %v13361_v47  ;;  %v9154_v25 = vmul.f32 %v9054_v27, %v2059_v19  ;;  %v9157_v53 = vmul.f32 %v9054_v27, %v2067_v20  ;;  %v1060_v16 = vunpack.c.1.s8 %v9109_v41  ;;  %v13364_v22 = vcombine.high %v8875_v2, %v8885_v7 }
  0xba   :  { %662 = vmatpush1.bf16.msra.mxu0 %v13362_v42  ;;  %693 = vmatprep.mubr.bf16.mxu0 %v13363_v38  ;;  %v2069_v63 = vcvt.s32.f32 %v1045_v49  ;;  %v9166_v47 = vmul.f32 %v9091_v21, %v2061_v55  ;;  %v2076_v42 = vcvt.s32.f32 %v1052_v17  ;;  %v13365_v19 = vcombine.low %v8859_v56, %v8861_v57 }
  0xbb   :  { %663 = vmatprep.subr.bf16.mxu0 %v13364_v22  ;;  %v2084_v44 = vcvt.s32.f32 %v1060_v16  ;;  %v1054_v52 = vunpack.c.0.s8 %v9123_v3  ;;  %v1062_v22 = vunpack.c.1.s8 %v9123_v3  ;;  %v13366_v62 = vcombine.high %v8944_v24, %v8954_v37 }
  0xbc   :  { %633 = vmatpush1.bf16.msra.mxu1 %v13365_v19  ;;  %v9179_v49 = vmul.f32 %v9091_v21, %v2069_v63  ;;  %v9182_v55 = vmul.f32 %v9040_v5, %v2076_v42  ;;  %v1051_v56 = vunpack.c.0.s8 %v9134_v12  ;;  %v1059_v57 = vunpack.c.1.s8 %v9134_v12 }
  0xbd   :  { %704 = vmatprep.subr.bf16.mxu1 %v13366_v62  ;;  %v13367_v17 = vcombine.low %v8875_v2, %v8885_v7  ;;  %v9190_v16 = vmul.f32 %v9040_v5, %v2084_v44  ;;  %v2078_v19 = vcvt.s32.f32 %v1054_v52  ;;  %v2086_v20 = vcvt.s32.f32 %v1062_v22 }
  0xbe   :  { %v1053_v62 = vunpack.c.0.s8 %v9145_v6  ;;  %v13368_v63 = vcombine.high %v8887_v8, %v8889_v9  ;;  %v2075_v50 = vcvt.s32.f32 %v1051_v56  ;;  %v2083_v43 = vcvt.s32.f32 %v1059_v57 }
  0xbf   :  { %664 = vmatpush1.bf16.msra.mxu0 %v13367_v17  ;;  %651 = vmatmul.mubr.bf16.vlgmr.msra.gmra.mrb[0].mxu1 %v8932_v61  ;;  %v1061_v2 = vunpack.c.1.s8 %v9145_v6  ;;  %v13369_v7 = vcombine.low %v8944_v24, %v8954_v37  ;;  %v9207_v52 = vmul.f32 %v9048_v13, %v2078_v19  ;;  %v9210_v22 = vmul.f32 %v9048_v13, %v2086_v20 }
  0xc0   :  { %665 = vmatprep.subr.bf16.mxu0 %v13368_v63  ;;  %736 = vmatprep.mubr.bf16.mxu1 %v13363_v38  ;;  %v2077_v17 = vcvt.s32.f32 %v1053_v62  ;;  %v13370_v56 = vcombine.high %v8956_v29, %v8958_v33  ;;  %v9216_v57 = vmul.f32 %v9054_v27, %v2075_v50  ;;  %v9219_v24 = vmul.f32 %v9054_v27, %v2083_v43 }
  0xc1   :  { %705 = vmatpush1.bf16.msra.mxu1 %v13369_v7  ;;  %v2085_v37 = vcvt.s32.f32 %v1061_v2  ;;  %v1068_v38 = vunpack.c.2.s8 %v9109_v41  ;;  %v13371_v19 = vcombine.low %v8887_v8, %v8889_v9  ;;  %v1076_v63 = vunpack.c.3.s8 %v9109_v41  ;;  %v9232_v7 = vld [vmem:[#allocation9 + $0x88] sm:$0xff] }
  0xc2   :  { %706 = vmatprep.subr.bf16.mxu1 %v13370_v56  ;;  %v9228_v62 = vmul.f32 %v9091_v21, %v2077_v17  ;;  %v1070_v50 = vunpack.c.2.s8 %v9123_v3  ;;  %v13372_v43 = vcombine.high %v8899_v18, %v8901_v23  ;;  %v1078_v17 = vunpack.c.3.s8 %v9123_v3 }
  0xc3   :  { %666 = vmatpush1.bf16.msra.mxu0 %v13371_v19  ;;  %v9240_v9 = vmul.f32 %v9091_v21, %v2085_v37  ;;  %v2092_v2 = vcvt.s32.f32 %v1068_v38  ;;  %v13373_v41 = vcombine.low %v8956_v29, %v8958_v33  ;;  %v2100_v56 = vcvt.s32.f32 %v1076_v63  ;;  %v9257_v33 = vld [vmem:[#allocation9 + $0x98] sm:$0xff]  ;;  %v9268_v37 = vld [vmem:[#allocation9 + $0x80] sm:$0xff] }
  0xc4   :  { %667 = vmatprep.subr.bf16.mxu0 %v13372_v43  ;;  %v2094_v19 = vcvt.s32.f32 %v1070_v50  ;;  %v1067_v20 = vunpack.c.2.s8 %v9134_v12  ;;  %v1075_v42 = vunpack.c.3.s8 %v9134_v12  ;;  %v13374_v43 = vcombine.high %v8968_v34, %v8970_v60 }
  0xc5   :  { %707 = vmatpush1.bf16.msra.mxu1 %v13373_v41  ;;  %v9254_v38 = vmul.f32 %v9040_v5, %v2092_v2  ;;  %v2102_v3 = vcvt.s32.f32 %v1078_v17  ;;  %v1069_v29 = vunpack.c.2.s8 %v9145_v6  ;;  %v13375_v63 = vcombine.low %v8899_v18, %v8901_v23 }
  0xc6   :  { %708 = vmatprep.subr.bf16.mxu1 %v13374_v43  ;;  %v9263_v12 = vmul.f32 %v9040_v5, %v2100_v56  ;;  %v9266_v50 = vmul.f32 %v9048_v13, %v2094_v19  ;;  %v2091_v41 = vcvt.s32.f32 %v1067_v20  ;;  %v2099_v43 = vcvt.s32.f32 %v1075_v42 }
  0xc7   :  { %668 = vmatpush1.bf16.msra.mxu0 %v13375_v63  ;;  %v13377_v2 = vcombine.high %v8911_v30, %v8913_v31  ;;  %v9274_v17 = vmul.f32 %v9048_v13, %v2102_v3  ;;  %v1077_v18 = vunpack.c.3.s8 %v9145_v6  ;;  %v2093_v23 = vcvt.s32.f32 %v1069_v29  ;;  %v9278_v63 = vld [vmem:[#allocation9 + $0x90] sm:$0xff] }
  0xc8   :  { %13376 = vst [vmem:[#allocation36_spill] sm:$0xff] %v9266_v50  ;;  %v1084_v56 = vunpack.c.0.s8 %v9232_v7  ;;  %v13379_v20 = vcombine.low %v8968_v34, %v8970_v60  ;;  %v9286_v19 = vmul.f32 %v9054_v27, %v2091_v41  ;;  %v9289_v3 = vmul.f32 %v9054_v27, %v2099_v43 }
  0xc9   :  { %669 = vmatprep.subr.bf16.mxu0 %v13377_v2  ;;  %13378 = vst [vmem:[#allocation37_spill] sm:$0xff] %v9274_v17  ;;  %v1092_v6 = vunpack.c.1.s8 %v9232_v7  ;;  %v13380_v29 = vcombine.high %v8972_v15, %v8982_v10  ;;  %v2101_v60 = vcvt.s32.f32 %v1077_v18  ;;  %v9298_v34 = vmul.f32 %v9091_v21, %v2093_v23 }
  0xca   :  { %709 = vmatpush1.bf16.msra.mxu1 %v13379_v20  ;;  %v2108_v20 = vcvt.s32.f32 %v1084_v56  ;;  %v13381_v41 = vcombine.low %v8911_v30, %v8913_v31  ;;  %v1086_v8 = vunpack.c.0.s8 %v9257_v33  ;;  %v13382_v2 = vcombine.high %v8915_v32, %v8925_v54 }
  0xcb   :  { %710 = vmatprep.subr.bf16.mxu1 %v13380_v29  ;;  %v2116_v42 = vcvt.s32.f32 %v1092_v6  ;;  %v1094_v29 = vunpack.c.1.s8 %v9257_v33  ;;  %v9311_v18 = vmul.f32 %v9091_v21, %v2101_v60  ;;  %v1083_v30 = vunpack.c.0.s8 %v9268_v37 }
  0xcc   :  { %670 = vmatpush1.bf16.msra.mxu0 %v13381_v41  ;;  %v9314_v23 = vmul.f32 %v9040_v5, %v2108_v20  ;;  %v1091_v31 = vunpack.c.1.s8 %v9268_v37  ;;  %v13383_v56 = vcombine.low %v8972_v15, %v8982_v10  ;;  %v2110_v41 = vcvt.s32.f32 %v1086_v8  ;;  %v13394_v10 = vld [vmem:[#allocation29_spill] sm:$0xff] }
  0xcd   :  { %671 = vmatprep.subr.bf16.mxu0 %v13382_v2  ;;  %v9322_v6 = vmul.f32 %v9040_v5, %v2116_v42  ;;  %v2118_v43 = vcvt.s32.f32 %v1094_v29  ;;  %v1085_v2 = vunpack.c.0.s8 %v9278_v63  ;;  %v13384_v60 = vcombine.high %v8984_v14, %v8986_v59 }
  0xce   :  { %711 = vmatpush1.bf16.msra.mxu1 %v13383_v56  ;;  %v2107_v44 = vcvt.s32.f32 %v1083_v30  ;;  %v2115_v50 = vcvt.s32.f32 %v1091_v31  ;;  %v1093_v17 = vunpack.c.1.s8 %v9278_v63  ;;  %v13385_v15 = vcombine.low %v8915_v32, %v8925_v54 }
  0xcf   :  { %712 = vmatprep.subr.bf16.mxu1 %v13384_v60  ;;  %v9337_v8 = vmul.f32 %v9048_v13, %v2110_v41  ;;  %v9340_v42 = vmul.f32 %v9048_v13, %v2118_v43  ;;  %v2109_v29 = vcvt.s32.f32 %v1085_v2  ;;  %v13387_v30 = vcombine.high %v8927_v28, %v8929_v0 }
  0xd0   :  { %672 = vmatpush1.bf16.msra.mxu0 %v13385_v15  ;;  %v9346_v31 = vmul.f32 %v9054_v27, %v2107_v44  ;;  %v9349_v32 = vmul.f32 %v9054_v27, %v2115_v50  ;;  %v2117_v54 = vcvt.s32.f32 %v1093_v17  ;;  %v1100_v56 = vunpack.c.2.s8 %v9232_v7  ;;  %v13390_v50 = vld [vmem:[#allocation31_spill] sm:$0xff]  ;;  %v13395_v17 = vld [vmem:[#allocation30_spill] sm:$0xff] }
  0xd1   :  { %13386 = vst [vmem:[#allocation38_spill] sm:$0xff] %v9337_v8  ;;  %673 = vmatprep.subr.bf16.mxu0 %v13387_v30  ;;  %v13388_v41 = vcombine.low %v8984_v14, %v8986_v59  ;;  %v9358_v2 = vmul.f32 %v9091_v21, %v2109_v29  ;;  %v1108_v60 = vunpack.c.3.s8 %v9232_v7  ;;  %v1102_v44 = vunpack.c.2.s8 %v9257_v33 }
  0xd2   :  { %v13391_v15 = vcombine.high %v8999_v45, %v13390_v50  ;;  %v9368_v59 = vmul.f32 %v9091_v21, %v2117_v54  ;;  %v2124_v14 = vcvt.s32.f32 %v1100_v56  ;;  %v1110_v30 = vunpack.c.3.s8 %v9257_v33  ;;  %v13400_v54 = vld [vmem:[#allocation33_spill] sm:$0xff] }
  0xd3   :  { %713 = vmatpush1.bf16.msra.mxu1 %v13388_v41  ;;  %13389 = vst [vmem:[#allocation39_spill] sm:$0xff] %v9358_v2  ;;  %v13393_v29 = vcombine.low %v8927_v28, %v8929_v0  ;;  %v2132_v7 = vcvt.s32.f32 %v1108_v60  ;;  %v2126_v41 = vcvt.s32.f32 %v1102_v44  ;;  %v1099_v43 = vunpack.c.2.s8 %v9268_v37 }
  0xd4   :  { %714 = vmatprep.subr.bf16.mxu1 %v13391_v15  ;;  %13392 = vst [vmem:[#allocation31_spill] sm:$0xff] %v9368_v59  ;;  %v1107_v20 = vunpack.c.3.s8 %v9268_v37  ;;  %v9376_v15 = vld [vmem:[#allocation9 + $0xc8] sm:$0xff]  ;;  %v13396_v8 = vcombine.high %v13394_v10, %v13395_v17  ;;  %v9384_v33 = vmul.f32 %v9040_v5, %v2124_v14  ;;  %v2134_v0 = vcvt.s32.f32 %v1110_v30 }
  0xd5   :  { %674 = vmatpush1.bf16.msra.mxu0 %v13393_v29  ;;  %v1101_v28 = vunpack.c.2.s8 %v9278_v63  ;;  %v13397_v56 = vcombine.low %v8999_v45, %v13390_v50  ;;  %v9391_v37 = vmul.f32 %v9040_v5, %v2132_v7  ;;  %v9394_v60 = vmul.f32 %v9048_v13, %v2126_v41  ;;  %v13399_v29 = vld [vmem:[#allocation32_spill] sm:$0xff]  ;;  %v9404_v50 = vld [vmem:[#allocation9 + $0xd8] sm:$0xff]  ;;  %v9418_v41 = vld [vmem:[#allocation9 + $0xc0] sm:$0xff] }
  0xd6   :  { %675 = vmatprep.subr.bf16.mxu0 %v13396_v8  ;;  %v2123_v8 = vcvt.s32.f32 %v1099_v43  ;;  %v2131_v44 = vcvt.s32.f32 %v1107_v20  ;;  %v13401_v2 = vcombine.high %v13399_v29, %v13400_v54  ;;  %v9400_v14 = vmul.f32 %v9048_v13, %v2134_v0 }
  0xd7   :  { %715 = vmatpush1.bf16.msra.mxu1 %v13397_v56  ;;  %13398 = vst [vmem:[#allocation29_spill] sm:$0xff] %v9394_v60  ;;  %v1109_v30 = vunpack.c.3.s8 %v9278_v63  ;;  %v2125_v59 = vcvt.s32.f32 %v1101_v28  ;;  %v1116_v45 = vunpack.c.0.s8 %v9376_v15  ;;  %v13403_v7 = vcombine.low %v13394_v10, %v13395_v17 }
  0xd8   :  { %716 = vmatprep.subr.bf16.mxu1 %v13401_v2  ;;  %13402 = vst [vmem:[#allocation30_spill] sm:$0xff] %v9400_v14  ;;  %v9412_v43 = vmul.f32 %v9054_v27, %v2123_v8  ;;  %v9415_v2 = vmul.f32 %v9054_v27, %v2131_v44  ;;  %v1124_v63 = vunpack.c.1.s8 %v9376_v15  ;;  %v13406_v0 = vpack.c.bf16 %v9067_v51, %v9064_v35  ;;  %v9428_v8 = vld [vmem:[#allocation9 + $0xd0] sm:$0xff] }
  0xd9   :  { %676 = vmatpush1.bf16.msra.mxu0 %v13403_v7  ;;  %v2133_v17 = vcvt.s32.f32 %v1109_v30  ;;  %v9426_v28 = vmul.f32 %v9091_v21, %v2125_v59  ;;  %v2140_v56 = vcvt.s32.f32 %v1116_v45  ;;  %v13407_v44 = vcombine.low %v13399_v29, %v13400_v54  ;;  %v13408_v30 = vld [vmem:[#allocation34_spill] sm:$0xff]  ;;  %v13409_v59 = vld [vmem:[#allocation35_spill] sm:$0xff] }
  0xda   :  { %13404 = vst [vmem:[#allocation32_spill] sm:$0xff] %v9412_v43  ;;  %13405 = vst [vmem:[#allocation33_spill] sm:$0xff] %v9415_v2  ;;  %4695 = vmatprep.subr.bf16.mxu0 %v13406_v0  ;;  %v2148_v20 = vcvt.s32.f32 %v1124_v63  ;;  %v1118_v35 = vunpack.c.0.s8 %v9404_v50  ;;  %v1126_v51 = vunpack.c.1.s8 %v9404_v50  ;;  %v13410_v0 = vcombine.high %v13408_v30, %v13409_v59 }
  0xdb   :  { %717 = vmatpush1.bf16.msra.mxu1 %v13407_v44  ;;  %v9442_v45 = vmul.f32 %v9091_v21, %v2133_v17  ;;  %v9445_v54 = vmul.f32 %v9040_v5, %v2140_v56  ;;  %v1115_v29 = vunpack.c.0.s8 %v9418_v41  ;;  %v1123_v63 = vunpack.c.1.s8 %v9418_v41 }
  0xdc   :  { %694 = vmatmul.mubr.bf16.vlgmr.msra.gmra.mrb[4].mxu0 %v8932_v61  ;;  %718 = vmatprep.subr.bf16.mxu1 %v13410_v0  ;;  %v13411_v44 = vpack.c.bf16 %v9083_v36, %v9080_v58  ;;  %v9453_v10 = vmul.f32 %v9040_v5, %v2148_v20  ;;  %v2142_v7 = vcvt.s32.f32 %v1118_v35  ;;  %v2150_v60 = vcvt.s32.f32 %v1126_v51 }
  0xdd   :  { %v1117_v0 = vunpack.c.0.s8 %v9428_v8  ;;  %v13412_v17 = vpack.c.bf16 %v9129_v26, %v9120_v4  ;;  %v4175_v56 = vpack.c.bf16 %v9442_v45, %v9426_v28  ;;  %v2139_v14 = vcvt.s32.f32 %v1115_v29 }
  0xde   :  { %4696 = vmatpush1.bf16.msra.mxu0 %v13411_v44  ;;  %v2147_v43 = vcvt.s32.f32 %v1123_v63  ;;  %v1125_v2 = vunpack.c.1.s8 %v9428_v8  ;;  %v13413_v58 = vcombine.low %v13408_v30, %v13409_v59  ;;  %v4182_v36 = vpack.c.bf16 %v9453_v10, %v9445_v54 }
  0xdf   :  { %4697 = vmatprep.subr.bf16.mxu0 %v13412_v17  ;;  %v9468_v20 = vmul.f32 %v9048_v13, %v2142_v7  ;;  %v9471_v4 = vmul.f32 %v9048_v13, %v2150_v60  ;;  %v2141_v26 = vcvt.s32.f32 %v1117_v0  ;;  %v13414_v35 = vpack.c.bf16 %v9077_v1, %v9070_v39  ;;  %v13440_v54 = vld [vmem:[#allocation30_spill] sm:$0xff] }
  0xe0   :  { %719 = vmatpush1.bf16.msra.mxu1 %v13413_v58  ;;  %v9477_v51 = vmul.f32 %v9054_v27, %v2139_v14  ;;  %v9480_v30 = vmul.f32 %v9054_v27, %v2147_v43  ;;  %v2149_v59 = vcvt.s32.f32 %v1125_v2  ;;  %v1132_v29 = vunpack.c.2.s8 %v9376_v15 }
  0xe1   :  { %4867 = vmatprep.subr.bf16.mxu1 %v13414_v35  ;;  %v13415_v7 = vpack.c.bf16 %v9157_v53, %v9154_v25  ;;  %v4184_v60 = vpack.c.bf16 %v9471_v4, %v9468_v20  ;;  %v9489_v63 = vmul.f32 %v9091_v21, %v2141_v26  ;;  %v1140_v39 = vunpack.c.3.s8 %v9376_v15 }
  0xe2   :  { %v1134_v1 = vunpack.c.2.s8 %v9404_v50  ;;  %v13416_v14 = vpack.c.bf16 %v9190_v16, %v9182_v55  ;;  %v4181_v25 = vpack.c.bf16 %v9480_v30, %v9477_v51  ;;  %v9500_v53 = vmul.f32 %v9091_v21, %v2149_v59  ;;  %v9508_v16 = vld [vmem:[#allocation9 + $0x108] sm:$0xff]  ;;  %v9664_v30 = vld [vmem:[#allocation9 + $0x150] sm:$0xff] }
  0xe3   :  { %4698 = vmatpush1.bf16.msra.mxu0 %v13415_v7  ;;  %737 = vmatmul.mubr.bf16.vlgmr.msra.gmra.mrb[4].mxu1 %v8932_v61  ;;  %v2156_v43 = vcvt.s32.f32 %v1132_v29  ;;  %v1142_v2 = vunpack.c.3.s8 %v9404_v50  ;;  %v13417_v15 = vpack.c.bf16 %v9107_v40, %v9104_v11  ;;  %v2164_v44 = vcvt.s32.f32 %v1140_v39 }
  0xe4   :  { %4699 = vmatprep.subr.bf16.mxu0 %v13416_v14  ;;  %v2158_v0 = vcvt.s32.f32 %v1134_v1  ;;  %v1131_v61 = vunpack.c.2.s8 %v9418_v41  ;;  %v1139_v55 = vunpack.c.3.s8 %v9418_v41  ;;  %v13418_v17 = vpack.c.bf16 %v9141_v48, %v9132_v46 }
  0xe5   :  { %4868 = vmatpush1.bf16.msra.mxu1 %v13417_v15  ;;  %v4183_v58 = vpack.c.bf16 %v9500_v53, %v9489_v63  ;;  %v9516_v50 = vmul.f32 %v9040_v5, %v2156_v43  ;;  %v2166_v11 = vcvt.s32.f32 %v1142_v2  ;;  %v1133_v40 = vunpack.c.2.s8 %v9428_v8 }
  0xe6   :  { %4869 = vmatprep.subr.bf16.mxu1 %v13418_v17  ;;  %v13419_v26 = vpack.c.bf16 %v9219_v24, %v9216_v57  ;;  %v9523_v41 = vmul.f32 %v9040_v5, %v2164_v44  ;;  %v9526_v35 = vmul.f32 %v9048_v13, %v2158_v0  ;;  %v2155_v46 = vcvt.s32.f32 %v1131_v61  ;;  %v798_v24 = vld [vmem:[#allocation9 + $0x118] sm:$0xff]  ;;  %v9556_v0 = vld [vmem:[#allocation9 + $0x110] sm:$0xff] }
  0xe7   :  { %v2163_v48 = vcvt.s32.f32 %v1139_v55  ;;  %v13420_v59 = vpack.c.bf16 %v9263_v12, %v9254_v38  ;;  %v9532_v29 = vmul.f32 %v9048_v13, %v2166_v11  ;;  %v1141_v7 = vunpack.c.3.s8 %v9428_v8  ;;  %v795_v8 = vld [vmem:[#allocation9 + $0x100] sm:$0xff] }
  0xe8   :  { %4700 = vmatpush1.bf16.msra.mxu0 %v13419_v26  ;;  %v2157_v39 = vcvt.s32.f32 %v1133_v40  ;;  %v1148_v57 = vunpack.c.0.s8 %v9508_v16  ;;  %v13421_v1 = vpack.c.bf16 %v9179_v49, %v9166_v47  ;;  %v4190_v14 = vpack.c.bf16 %v9523_v41, %v9516_v50 }
  0xe9   :  { %4701 = vmatprep.subr.bf16.mxu0 %v13420_v59  ;;  %v9542_v43 = vmul.f32 %v9054_v27, %v2155_v46  ;;  %v9545_v38 = vmul.f32 %v9054_v27, %v2163_v48  ;;  %v1156_v12 = vunpack.c.1.s8 %v9508_v16  ;;  %v13422_v2 = vpack.c.bf16 %v9210_v22, %v9207_v52 }
  0xea   :  { %4870 = vmatpush1.bf16.msra.mxu1 %v13421_v1  ;;  %v4192_v47 = vpack.c.bf16 %v9532_v29, %v9526_v35  ;;  %v2165_v49 = vcvt.s32.f32 %v1141_v7  ;;  %v9554_v15 = vmul.f32 %v9091_v21, %v2157_v39  ;;  %v2172_v44 = vcvt.s32.f32 %v1148_v57  ;;  %v13427_v39 = vld [vmem:[#allocation36_spill] sm:$0xff] }
  0xeb   :  { %4871 = vmatprep.subr.bf16.mxu1 %v13422_v2  ;;  %v13423_v61 = vpack.c.bf16 %v9289_v3, %v9286_v19  ;;  %v4189_v55 = vpack.c.bf16 %v9545_v38, %v9542_v43  ;;  %v2180_v17 = vcvt.s32.f32 %v1156_v12  ;;  %v1150_v52 = vunpack.c.0.s8 %v798_v24 }
  0xec   :  { %v1158_v22 = vunpack.c.1.s8 %v798_v24  ;;  %v13424_v11 = vpack.c.bf16 %v9322_v6, %v9314_v23  ;;  %v9567_v40 = vmul.f32 %v9091_v21, %v2165_v49  ;;  %v9570_v26 = vmul.f32 %v9040_v5, %v2172_v44  ;;  %v13426_v6 = vld [vmem:[#allocation37_spill] sm:$0xff] }
  0xed   :  { %4702 = vmatpush1.bf16.msra.mxu0 %v13423_v61  ;;  %v1147_v46 = vunpack.c.0.s8 %v795_v8  ;;  %v1155_v48 = vunpack.c.1.s8 %v795_v8  ;;  %v13425_v19 = vpack.c.bf16 %v9240_v9, %v9228_v62  ;;  %v9576_v3 = vmul.f32 %v9040_v5, %v2180_v17 }
  0xee   :  { %4703 = vmatprep.subr.bf16.mxu0 %v13424_v11  ;;  %v2174_v59 = vcvt.s32.f32 %v1150_v52  ;;  %v2182_v7 = vcvt.s32.f32 %v1158_v22  ;;  %v1149_v23 = vunpack.c.0.s8 %v9556_v0  ;;  %v13428_v57 = vpack.c.bf16 %v13426_v6, %v13427_v39  ;;  %v13434_v39 = vld [vmem:[#allocation33_spill] sm:$0xff] }
  0xef   :  { %4872 = vmatpush1.bf16.msra.mxu1 %v13425_v19  ;;  %v4191_v1 = vpack.c.bf16 %v9567_v40, %v9554_v15  ;;  %v2171_v12 = vcvt.s32.f32 %v1147_v46  ;;  %v2179_v2 = vcvt.s32.f32 %v1155_v48  ;;  %v1157_v49 = vunpack.c.1.s8 %v9556_v0 }
  0xf0   :  { %4873 = vmatprep.subr.bf16.mxu1 %v13428_v57  ;;  %v13429_v62 = vpack.c.bf16 %v9349_v32, %v9346_v31  ;;  %v4198_v9 = vpack.c.bf16 %v9576_v3, %v9570_v26  ;;  %v9591_v44 = vmul.f32 %v9048_v13, %v2174_v59  ;;  %v9594_v61 = vmul.f32 %v9048_v13, %v2182_v7  ;;  %v13432_v59 = vld [vmem:[#allocation38_spill] sm:$0xff]  ;;  %v13435_v57 = vld [vmem:[#allocation32_spill] sm:$0xff] }
  0xf1   :  { %v2173_v17 = vcvt.s32.f32 %v1149_v23  ;;  %v13430_v52 = vpack.c.bf16 %v9391_v37, %v9384_v33  ;;  %v9600_v22 = vmul.f32 %v9054_v27, %v2171_v12  ;;  %v9603_v31 = vmul.f32 %v9054_v27, %v2179_v2 }
  0xf2   :  { %4704 = vmatpush1.bf16.msra.mxu0 %v13429_v62  ;;  %v2181_v32 = vcvt.s32.f32 %v1157_v49  ;;  %v1164_v11 = vunpack.c.2.s8 %v9508_v16  ;;  %v13431_v46 = vpack.c.bf16 %v9311_v18, %v9298_v34  ;;  %v4200_v48 = vpack.c.bf16 %v9594_v61, %v9591_v44 }
  0xf3   :  { %4705 = vmatprep.subr.bf16.mxu0 %v13430_v52  ;;  %v9612_v19 = vmul.f32 %v9091_v21, %v2173_v17  ;;  %v1172_v33 = vunpack.c.3.s8 %v9508_v16  ;;  %v1166_v37 = vunpack.c.2.s8 %v798_v24  ;;  %v13433_v7 = vpack.c.bf16 %v9340_v42, %v13432_v59  ;;  %v9626_v17 = vld [vmem:[#allocation9 + $0x148] sm:$0xff] }
  0xf4   :  { %4874 = vmatpush1.bf16.msra.mxu1 %v13431_v46  ;;  %v4197_v23 = vpack.c.bf16 %v9603_v31, %v9600_v22  ;;  %v9621_v6 = vmul.f32 %v9091_v21, %v2181_v32  ;;  %v2188_v34 = vcvt.s32.f32 %v1164_v11  ;;  %v1174_v18 = vunpack.c.3.s8 %v798_v24  ;;  %v13437_v11 = vld [vmem:[#allocation31_spill] sm:$0xff] }
  0xf5   :  { %4875 = vmatprep.subr.bf16.mxu1 %v13433_v7  ;;  %v13436_v12 = vpack.c.bf16 %v13434_v39, %v13435_v57  ;;  %v2196_v2 = vcvt.s32.f32 %v1172_v33  ;;  %v2190_v49 = vcvt.s32.f32 %v1166_v37  ;;  %v1163_v16 = vunpack.c.2.s8 %v795_v8  ;;  %v13438_v46 = vld [vmem:[#allocation39_spill] sm:$0xff] }
  0xf6   :  { %v1171_v62 = vunpack.c.3.s8 %v795_v8  ;;  %v4199_v42 = vpack.c.bf16 %v9621_v6, %v9612_v19  ;;  %v3254_v52 = vmul.f32 %v9040_v5, %v2188_v34  ;;  %v2198_v24 = vcvt.s32.f32 %v1174_v18 }
  0xf7   :  { %4706 = vmatpush1.bf16.msra.mxu0 %v13436_v12  ;;  %v1165_v32 = vunpack.c.2.s8 %v9556_v0  ;;  %v13439_v33 = vpack.c.bf16 %v13437_v11, %v13438_v46  ;;  %v3262_v8 = vmul.f32 %v9040_v5, %v2196_v2  ;;  %v9640_v37 = vmul.f32 %v9048_v13, %v2190_v49  ;;  %v806_v12 = vld [vmem:[#allocation9 + $0x158] sm:$0xff]  ;;  %v803_v11 = vld [vmem:[#allocation9 + $0x140] sm:$0xff] }
  0xf8   :  { %4707 = vmatprep.subr.bf16.mxu0 %v4182_v36  ;;  %v2187_v59 = vcvt.s32.f32 %v1163_v16  ;;  %v2195_v10 = vcvt.s32.f32 %v1171_v62  ;;  %v13441_v36 = vld [vmem:[#allocation29_spill] sm:$0xff]  ;;  %v9646_v34 = vmul.f32 %v9048_v13, %v2198_v24  ;;  %v1173_v18 = vunpack.c.3.s8 %v9556_v0 }
  0xf9   :  { %4876 = vmatpush1.bf16.msra.mxu1 %v13439_v33  ;;  %v13442_v7 = vpack.c.bf16 %v13440_v54, %v13441_v36  ;;  %v2189_v39 = vcvt.s32.f32 %v1165_v32  ;;  %v1180_v57 = vunpack.c.0.s8 %v9626_v17  ;;  %v4206_v2 = vpack.c.bf16 %v3262_v8, %v3254_v52 }
  0xfa   :  { %v3253_v49 = vmul.f32 %v9054_v27, %v2187_v59  ;;  %v3261_v16 = vmul.f32 %v9054_v27, %v2195_v10  ;;  %v1188_v62 = vunpack.c.1.s8 %v9626_v17  ;;  %v4208_v0 = vpack.c.bf16 %v9646_v34, %v9640_v37 }
  0xfb   :  { %4877 = vmatprep.subr.bf16.mxu1 %v13442_v7  ;;  %4708 = vmatpush1.bf16.msra.mxu0 %v4181_v25  ;;  %v2197_v24 = vcvt.s32.f32 %v1173_v18  ;;  %v9662_v32 = vmul.f32 %v9091_v21, %v2189_v39  ;;  %v2204_v51 = vcvt.s32.f32 %v1180_v57  ;;  %v1182_v46 = vunpack.c.0.s8 %v806_v12  ;;  %v9717_v57 = vld [vmem:[#allocation9 + $0x188] sm:$0xff] }
  0xfc   :  { %4709 = vmatprep.subr.bf16.mxu0 %v4190_v14  ;;  %v4205_v25 = vpack.c.bf16 %v3261_v16, %v3253_v49  ;;  %v2212_v52 = vcvt.s32.f32 %v1188_v62  ;;  %v1190_v33 = vunpack.c.1.s8 %v806_v12  ;;  %v1179_v14 = vunpack.c.0.s8 %v803_v11 }
  0xfd   :  { %4878 = vmatpush1.bf16.msra.mxu1 %v4175_v56  ;;  %v9673_v50 = vmul.f32 %v9091_v21, %v2197_v24  ;;  %v3270_v41 = vmul.f32 %v9040_v5, %v2204_v51  ;;  %v1187_v8 = vunpack.c.1.s8 %v803_v11  ;;  %v2206_v45 = vcvt.s32.f32 %v1182_v46  ;;  %v811_v46 = vld [vmem:[#allocation9 + $0x180] sm:$0xff] }
  0xfe   :  { %4879 = vmatprep.subr.bf16.mxu1 %v4184_v60  ;;  %v3278_v28 = vmul.f32 %v9040_v5, %v2212_v52  ;;  %v2214_v56 = vcvt.s32.f32 %v1190_v33  ;;  %v1181_v59 = vunpack.c.0.s8 %v9664_v30  ;;  %v2203_v4 = vcvt.s32.f32 %v1179_v14 }
  0xff   :  { %4710 = vmatpush1.bf16.msra.mxu0 %v4189_v55  ;;  %v4207_v20 = vpack.c.bf16 %v9673_v50, %v9662_v32  ;;  %v2211_v60 = vcvt.s32.f32 %v1187_v8  ;;  %v1189_v10 = vunpack.c.1.s8 %v9664_v30  ;;  %v9691_v38 = vmul.f32 %v9048_v13, %v2206_v45  ;;  %v9741_v8 = vld [vmem:[#allocation9 + $0x190] sm:$0xff] }
 0x100   :  { %4711 = vmatprep.subr.bf16.mxu0 %v4198_v9  ;;  %v4214_v43 = vpack.c.bf16 %v3278_v28, %v3270_v41  ;;  %v9694_v55 = vmul.f32 %v9048_v13, %v2214_v56  ;;  %v2205_v26 = vcvt.s32.f32 %v1181_v59  ;;  %v3269_v3 = vmul.f32 %v9054_v27, %v2203_v4 }
 0x101   :  { %4880 = vmatpush1.bf16.msra.mxu1 %v4183_v58  ;;  %v3277_v9 = vmul.f32 %v9054_v27, %v2211_v60  ;;  %v2213_v54 = vcvt.s32.f32 %v1189_v10  ;;  %v1196_v63 = vunpack.c.2.s8 %v9626_v17  ;;  %v1204_v35 = vunpack.c.3.s8 %v9626_v17 }
 0x102   :  { %4881 = vmatprep.subr.bf16.mxu1 %v4192_v47  ;;  %v4216_v53 = vpack.c.bf16 %v9694_v55, %v9691_v38  ;;  %v9708_v58 = vmul.f32 %v9091_v21, %v2205_v26  ;;  %v1198_v29 = vunpack.c.2.s8 %v806_v12  ;;  %v1206_v18 = vunpack.c.3.s8 %v806_v12 }
 0x103   :  { %4712 = vmatpush1.bf16.msra.mxu0 %v4197_v23  ;;  %v4213_v47 = vpack.c.bf16 %v3277_v9, %v3269_v3  ;;  %v9712_v36 = vmul.f32 %v9091_v21, %v2213_v54  ;;  %v2220_v7 = vcvt.s32.f32 %v1196_v63  ;;  %v2228_v22 = vcvt.s32.f32 %v1204_v35 }
 0x104   :  { %4713 = vmatprep.subr.bf16.mxu0 %v4206_v2  ;;  %v2222_v31 = vcvt.s32.f32 %v1198_v29  ;;  %v1195_v23 = vunpack.c.2.s8 %v803_v11  ;;  %v1203_v39 = vunpack.c.3.s8 %v803_v11  ;;  %v2230_v12 = vcvt.s32.f32 %v1206_v18  ;;  %v814_v11 = vld [vmem:[#allocation9 + $0x198] sm:$0xff] }
 0x105   :  { %4882 = vmatpush1.bf16.msra.mxu1 %v4191_v1  ;;  %v4215_v17 = vpack.c.bf16 %v9712_v36, %v9708_v58  ;;  %v3286_v2 = vmul.f32 %v9040_v5, %v2220_v7  ;;  %v1197_v49 = vunpack.c.2.s8 %v9664_v30  ;;  %v3294_v15 = vmul.f32 %v9040_v5, %v2228_v22 }
 0x106   :  { %4883 = vmatprep.subr.bf16.mxu1 %v4200_v48  ;;  %v3288_v40 = vmul.f32 %v9048_v13, %v2222_v31  ;;  %v2219_v1 = vcvt.s32.f32 %v1195_v23  ;;  %v2227_v16 = vcvt.s32.f32 %v1203_v39  ;;  %v3296_v62 = vmul.f32 %v9048_v13, %v2230_v12 }
 0x107   :  { %4714 = vmatpush1.bf16.msra.mxu0 %v4205_v25  ;;  %v1205_v44 = vunpack.c.3.s8 %v9664_v30  ;;  %v2221_v61 = vcvt.s32.f32 %v1197_v49  ;;  %v1212_v48 = vunpack.c.0.s8 %v9717_v57  ;;  %v4222_v24 = vpack.c.bf16 %v3294_v15, %v3286_v2  ;;  %v9759_v2 = vld [vmem:[#allocation8] sm:$0xff] }
 0x108   :  { %4715 = vmatprep.subr.bf16.mxu0 %v4214_v43  ;;  %v3285_v51 = vmul.f32 %v9054_v27, %v2219_v1  ;;  %v3293_v25 = vmul.f32 %v9054_v27, %v2227_v16  ;;  %v1220_v52 = vunpack.c.1.s8 %v9717_v57  ;;  %v4224_v30 = vpack.c.bf16 %v3296_v62, %v3288_v40  ;;  %v820_v62 = vld [vmem:[#allocation9 + $0x1c8] sm:$0xff] }
 0x109   :  { %4884 = vmatpush1.bf16.msra.mxu1 %v4199_v42  ;;  %v2229_v33 = vcvt.s32.f32 %v1205_v44  ;;  %v3287_v41 = vmul.f32 %v9091_v21, %v2221_v61  ;;  %v2236_v14 = vcvt.s32.f32 %v1212_v48  ;;  %v1214_v42 = vunpack.c.0.s8 %v814_v11 }
 0x10a   :  { %4885 = vmatprep.subr.bf16.mxu1 %v4208_v0  ;;  %v4221_v19 = vpack.c.bf16 %v3293_v25, %v3285_v51  ;;  %v2244_v6 = vcvt.s32.f32 %v1220_v52  ;;  %v1222_v28 = vunpack.c.1.s8 %v814_v11  ;;  %v1211_v59 = vunpack.c.0.s8 %v811_v46  ;;  %v822_v51 = vld [vmem:[#allocation9 + $0x1d8] sm:$0xff] }
 0x10b   :  { %4716 = vmatpush1.bf16.msra.mxu0 %v4213_v47  ;;  %v3295_v45 = vmul.f32 %v9091_v21, %v2229_v33  ;;  %v3302_v56 = vmul.f32 %v9040_v5, %v2236_v14  ;;  %v1219_v37 = vunpack.c.1.s8 %v811_v46  ;;  %v2238_v0 = vcvt.s32.f32 %v1214_v42  ;;  %v9778_v42 = vld [vmem:[#allocation9 + $0x1d0] sm:$0xff] }
 0x10c   :  { %4717 = vmatprep.subr.bf16.mxu0 %v4222_v24  ;;  %v3310_v34 = vmul.f32 %v9040_v5, %v2244_v6  ;;  %v2246_v4 = vcvt.s32.f32 %v1222_v28  ;;  %v1213_v60 = vunpack.c.0.s8 %v9741_v8  ;;  %v2235_v43 = vcvt.s32.f32 %v1211_v59 }
 0x10d   :  { %4886 = vmatpush1.bf16.msra.mxu1 %v4207_v20  ;;  %v4223_v10 = vpack.c.bf16 %v3295_v45, %v3287_v41  ;;  %v2243_v38 = vcvt.s32.f32 %v1219_v37  ;;  %v1221_v55 = vunpack.c.1.s8 %v9741_v8  ;;  %v3304_v3 = vmul.f32 %v9048_v13, %v2238_v0  ;;  %v819_v41 = vld [vmem:[#allocation9 + $0x1c0] sm:$0xff] }
 0x10e   :  { %4887 = vmatprep.subr.bf16.mxu1 %v4216_v53  ;;  %v4230_v26 = vpack.c.bf16 %v3310_v34, %v3302_v56  ;;  %v3312_v9 = vmul.f32 %v9048_v13, %v2246_v4  ;;  %v2237_v32 = vcvt.s32.f32 %v1213_v60  ;;  %v3301_v50 = vmul.f32 %v9054_v27, %v2235_v43 }
 0x10f   :  { %4718 = vmatpush1.bf16.msra.mxu0 %v4221_v19  ;;  %v3309_v20 = vmul.f32 %v9054_v27, %v2243_v38  ;;  %v2245_v54 = vcvt.s32.f32 %v1221_v55  ;;  %v1228_v63 = vunpack.c.2.s8 %v9717_v57  ;;  %v1236_v35 = vunpack.c.3.s8 %v9717_v57 }
 0x110   :  { %4719 = vmatprep.subr.bf16.mxu0 %v4230_v26  ;;  %v4232_v53 = vpack.c.bf16 %v3312_v9, %v3304_v3  ;;  %v3303_v58 = vmul.f32 %v9091_v21, %v2237_v32  ;;  %v1230_v29 = vunpack.c.2.s8 %v814_v11  ;;  %v1238_v18 = vunpack.c.3.s8 %v814_v11  ;;  %v13443_v11 = vld [vmem:[#allocation27_spill] sm:$0xff] }
 0x111   :  { %4888 = vmatpush1.bf16.msra.mxu1 %v4215_v17  ;;  %v4229_v47 = vpack.c.bf16 %v3309_v20, %v3301_v50  ;;  %v3311_v36 = vmul.f32 %v9091_v21, %v2245_v54  ;;  %v2252_v7 = vcvt.s32.f32 %v1228_v63  ;;  %v2260_v22 = vcvt.s32.f32 %v1236_v35 }
 0x112   :  { %4889 = vmatprep.subr.bf16.mxu1 %v4224_v30  ;;  %v2254_v31 = vcvt.s32.f32 %v1230_v29  ;;  %v1227_v23 = vunpack.c.2.s8 %v811_v46  ;;  %v1235_v39 = vunpack.c.3.s8 %v811_v46  ;;  %v2262_v49 = vcvt.s32.f32 %v1238_v18  ;;  %v13444_v30 = vld [vmem:[#allocation25_spill] sm:$0xff] }
 0x113   :  { %4720 = vmatpush1.bf16.msra.mxu0 %v4229_v47  ;;  %v4231_v17 = vpack.c.bf16 %v3311_v36, %v3303_v58  ;;  %v3318_v12 = vmul.f32 %v9040_v5, %v2252_v7  ;;  %v1229_v57 = vunpack.c.2.s8 %v9741_v8  ;;  %v3326_v15 = vmul.f32 %v9040_v5, %v2260_v22 }
 0x114   :  { %v3320_v40 = vmul.f32 %v9048_v13, %v2254_v31  ;;  %v2251_v1 = vcvt.s32.f32 %v1227_v23  ;;  %v2259_v16 = vcvt.s32.f32 %v1235_v39  ;;  %v3328_v44 = vmul.f32 %v9048_v13, %v2262_v49 }
 0x115   :  { %4890 = vmatpush1.bf16.msra.mxu1 %v4223_v10  ;;  %v1237_v61 = vunpack.c.3.s8 %v9741_v8  ;;  %v2253_v48 = vcvt.s32.f32 %v1229_v57  ;;  %v9769_v24 = vrot.slane %v9759_v2, %v13443_v11  ;;  %v4238_v25 = vpack.c.bf16 %v3326_v15, %v3318_v12 }
 0x116   :  { %4891 = vmatprep.subr.bf16.mxu1 %v4232_v53  ;;  %v3317_v52 = vmul.f32 %v9054_v27, %v2251_v1  ;;  %v3325_v46 = vmul.f32 %v9054_v27, %v2259_v16  ;;  %v9775_v33 = vrot.slane %v9759_v2, %v13444_v30  ;;  %v4240_v14 = vpack.c.bf16 %v3328_v44, %v3320_v40  ;;  %v828_v16 = vld [vmem:[#allocation9 + $0x208] sm:$0xff]  ;;  %v851_v30 = vld [vmem:[#allocation9 + $0x2c0] sm:$0xff] }
 0x117   :  { %v2261_v19 = vcvt.s32.f32 %v1237_v61  ;;  %v3319_v8 = vmul.f32 %v9091_v21, %v2253_v48  ;;  %v1244_v6 = vunpack.c.0.s8 %v820_v62  ;;  %4721 = vmatprep.subr.bf16.mxu0 %v4238_v25  ;;  %v1252_v45 = vunpack.c.1.s8 %v820_v62 }
 0x118   :  { %v4237_v28 = vpack.c.bf16 %v3325_v46, %v3317_v52  ;;  %v1246_v56 = vunpack.c.0.s8 %v822_v51  ;;  %v1254_v59 = vunpack.c.1.s8 %v822_v51  ;;  %v1243_v0 = vunpack.c.0.s8 %v819_v41 }
 0x119   :  { %4892 = vmatpush1.bf16.msra.mxu1 %v4231_v17  ;;  %v3327_v37 = vmul.f32 %v9091_v21, %v2261_v19  ;;  %v2268_v34 = vcvt.s32.f32 %v1244_v6  ;;  %v1251_v4 = vunpack.c.1.s8 %v819_v41  ;;  %v2276_v60 = vcvt.s32.f32 %v1252_v45 }
 0x11a   :  { %4893 = vmatprep.subr.bf16.mxu1 %v4240_v14  ;;  %4722 = vmatpush1.bf16.msra.mxu0 %v4237_v28  ;;  %v2270_v10 = vcvt.s32.f32 %v1246_v56  ;;  %v2278_v43 = vcvt.s32.f32 %v1254_v59  ;;  %v1245_v38 = vunpack.c.0.s8 %v9778_v42  ;;  %v2267_v3 = vcvt.s32.f32 %v1243_v0  ;;  %v830_v14 = vld [vmem:[#allocation9 + $0x218] sm:$0xff]  ;;  %v827_v28 = vld [vmem:[#allocation9 + $0x200] sm:$0xff] }
 0x11b   :  { %v4239_v55 = vpack.c.bf16 %v3327_v37, %v3319_v8  ;;  %v3334_v26 = vmul.f32 %v9040_v5, %v2268_v34  ;;  %v2275_v9 = vcvt.s32.f32 %v1251_v4  ;;  %v3342_v32 = vmul.f32 %v9040_v5, %v2276_v60  ;;  %v829_v60 = vld [vmem:[#allocation9 + $0x210] sm:$0xff] }
 0x11c   :  { %v3336_v50 = vmul.f32 %v9048_v13, %v2270_v10  ;;  %v3344_v20 = vmul.f32 %v9048_v13, %v2278_v43  ;;  %v1253_v54 = vunpack.c.1.s8 %v9778_v42  ;;  %v3333_v63 = vmul.f32 %v9054_v27, %v2267_v3 }
 0x11d   :  { %4894 = vmatpush1.bf16.msra.mxu1 %v4239_v55  ;;  %v3341_v53 = vmul.f32 %v9054_v27, %v2275_v9  ;;  %v2269_v58 = vcvt.s32.f32 %v1245_v38  ;;  %v1260_v35 = vunpack.c.2.s8 %v820_v62  ;;  %v4246_v29 = vpack.c.bf16 %v3342_v32, %v3334_v26 }
 0x11e   :  { %v4248_v47 = vpack.c.bf16 %v3344_v20, %v3336_v50  ;;  %v2277_v36 = vcvt.s32.f32 %v1253_v54  ;;  %v1268_v7 = vunpack.c.3.s8 %v820_v62  ;;  %v1262_v23 = vunpack.c.2.s8 %v822_v51 }
 0x11f   :  { %v4245_v18 = vpack.c.bf16 %v3341_v53, %v3333_v63  ;;  %v3335_v22 = vmul.f32 %v9091_v21, %v2269_v58  ;;  %v2284_v31 = vcvt.s32.f32 %v1260_v35  ;;  %4723 = vmatprep.subr.bf16.mxu0 %v4246_v29  ;;  %v1270_v12 = vunpack.c.3.s8 %v822_v51 }
 0x120   :  { %4895 = vmatprep.subr.bf16.mxu1 %v4248_v47  ;;  %v3343_v39 = vmul.f32 %v9091_v21, %v2277_v36  ;;  %v2292_v17 = vcvt.s32.f32 %v1268_v7  ;;  %v1259_v49 = vunpack.c.2.s8 %v819_v41  ;;  %v2286_v15 = vcvt.s32.f32 %v1262_v23 }
 0x121   :  { %4724 = vmatpush1.bf16.msra.mxu0 %v4245_v18  ;;  %v3350_v57 = vmul.f32 %v9040_v5, %v2284_v31  ;;  %v1267_v40 = vunpack.c.3.s8 %v819_v41  ;;  %v1261_v1 = vunpack.c.2.s8 %v9778_v42  ;;  %v2294_v61 = vcvt.s32.f32 %v1270_v12 }
 0x122   :  { %v4247_v62 = vpack.c.bf16 %v3343_v39, %v3335_v22  ;;  %v3358_v44 = vmul.f32 %v9040_v5, %v2292_v17  ;;  %v2283_v48 = vcvt.s32.f32 %v1259_v49  ;;  %v3352_v25 = vmul.f32 %v9048_v13, %v2286_v15 }
 0x123   :  { %v2291_v52 = vcvt.s32.f32 %v1267_v40  ;;  %v1269_v46 = vunpack.c.3.s8 %v9778_v42  ;;  %v2285_v51 = vcvt.s32.f32 %v1261_v1  ;;  %v3360_v8 = vmul.f32 %v9048_v13, %v2294_v61 }
 0x124   :  { %4896 = vmatpush1.bf16.msra.mxu1 %v4247_v62  ;;  %v4254_v19 = vpack.c.bf16 %v3358_v44, %v3350_v57  ;;  %v3349_v41 = vmul.f32 %v9054_v27, %v2283_v48  ;;  %v1276_v6 = vunpack.c.0.s8 %v828_v16  ;;  %v1284_v37 = vunpack.c.1.s8 %v828_v16 }
 0x125   :  { %v3357_v45 = vmul.f32 %v9054_v27, %v2291_v52  ;;  %v2293_v56 = vcvt.s32.f32 %v1269_v46  ;;  %v3351_v59 = vmul.f32 %v9091_v21, %v2285_v51  ;;  %v4256_v34 = vpack.c.bf16 %v3360_v8, %v3352_v25  ;;  %v836_v25 = vld [vmem:[#allocation9 + $0x248] sm:$0xff] }
 0x126   :  { %4725 = vmatprep.subr.bf16.mxu0 %v4254_v19  ;;  %v2300_v0 = vcvt.s32.f32 %v1276_v6  ;;  %v1278_v42 = vunpack.c.0.s8 %v830_v14  ;;  %v1286_v4 = vunpack.c.1.s8 %v830_v14  ;;  %v2308_v38 = vcvt.s32.f32 %v1284_v37  ;;  %v852_v52 = vld [vmem:[#allocation9 + $0x2c8] sm:$0xff] }
 0x127   :  { %v4253_v10 = vpack.c.bf16 %v3357_v45, %v3349_v41  ;;  %v3359_v43 = vmul.f32 %v9091_v21, %v2293_v56  ;;  %v1275_v55 = vunpack.c.0.s8 %v827_v28  ;;  %4897 = vmatprep.subr.bf16.mxu1 %v4256_v34  ;;  %v1283_v32 = vunpack.c.1.s8 %v827_v28  ;;  %v838_v45 = vld [vmem:[#allocation9 + $0x258] sm:$0xff]  ;;  %v835_v34 = vld [vmem:[#allocation9 + $0x240] sm:$0xff] }
 0x128   :  { %v3366_v26 = vmul.f32 %v9040_v5, %v2300_v0  ;;  %v2302_v3 = vcvt.s32.f32 %v1278_v42  ;;  %v2310_v9 = vcvt.s32.f32 %v1286_v4  ;;  %v3374_v20 = vmul.f32 %v9040_v5, %v2308_v38 }
 0x129   :  { %4726 = vmatpush1.bf16.msra.mxu0 %v4253_v10  ;;  %v4255_v50 = vpack.c.bf16 %v3359_v43, %v3351_v59  ;;  %v2299_v54 = vcvt.s32.f32 %v1275_v55  ;;  %v1277_v63 = vunpack.c.0.s8 %v829_v60  ;;  %v2307_v35 = vcvt.s32.f32 %v1283_v32 }
 0x12a   :  { %v3368_v53 = vmul.f32 %v9048_v13, %v2302_v3  ;;  %v3376_v58 = vmul.f32 %v9048_v13, %v2310_v9  ;;  %v1285_v29 = vunpack.c.1.s8 %v829_v60  ;;  %v4262_v47 = vpack.c.bf16 %v3374_v20, %v3366_v26  ;;  %v837_v26 = vld [vmem:[#allocation9 + $0x250] sm:$0xff] }
 0x12b   :  { %4898 = vmatpush1.bf16.msra.mxu1 %v4255_v50  ;;  %v9806_v36 = vmul.f32 %v9054_v27, %v2299_v54  ;;  %v2301_v7 = vcvt.s32.f32 %v1277_v63  ;;  %v1292_v18 = vunpack.c.2.s8 %v828_v16  ;;  %v9809_v31 = vmul.f32 %v9054_v27, %v2307_v35 }
 0x12c   :  { %v4264_v22 = vpack.c.bf16 %v3376_v58, %v3368_v53  ;;  %v2309_v23 = vcvt.s32.f32 %v1285_v29  ;;  %v1300_v39 = vunpack.c.3.s8 %v828_v16  ;;  %4738 = vmatprep.subr.bf16.mxu0 %v4262_v47  ;;  %v1294_v49 = vunpack.c.2.s8 %v830_v14 }
 0x12d   :  { %v9812_v17 = vmul.f32 %v9091_v21, %v2301_v7  ;;  %v2316_v12 = vcvt.s32.f32 %v1292_v18  ;;  %v1302_v57 = vunpack.c.3.s8 %v830_v14  ;;  %v1291_v62 = vunpack.c.2.s8 %v827_v28 }
 0x12e   :  { %4910 = vmatprep.subr.bf16.mxu1 %v4264_v22  ;;  %v9817_v40 = vmul.f32 %v9091_v21, %v2309_v23  ;;  %v2324_v1 = vcvt.s32.f32 %v1300_v39  ;;  %v2318_v16 = vcvt.s32.f32 %v1294_v49  ;;  %v1299_v48 = vunpack.c.3.s8 %v827_v28 }
 0x12f   :  { %v9820_v44 = vmul.f32 %v9040_v5, %v2316_v12  ;;  %v2326_v61 = vcvt.s32.f32 %v1302_v57  ;;  %v2315_v51 = vcvt.s32.f32 %v1291_v62  ;;  %v1293_v14 = vunpack.c.2.s8 %v829_v60 }
 0x130   :  { %v9825_v46 = vmul.f32 %v9040_v5, %v2324_v1  ;;  %v9828_v19 = vmul.f32 %v9048_v13, %v2318_v16  ;;  %v2323_v41 = vcvt.s32.f32 %v1299_v48  ;;  %v1301_v6 = vunpack.c.3.s8 %v829_v60 }
 0x131   :  { %v9831_v8 = vmul.f32 %v9048_v13, %v2326_v61  ;;  %v9836_v56 = vmul.f32 %v9054_v27, %v2315_v51  ;;  %v2317_v59 = vcvt.s32.f32 %v1293_v14  ;;  %v1308_v37 = vunpack.c.0.s8 %v836_v25 }
 0x132   :  { %v9841_v42 = vmul.f32 %v9054_v27, %v2323_v41  ;;  %v2325_v4 = vcvt.s32.f32 %v1301_v6  ;;  %v1316_v10 = vunpack.c.1.s8 %v836_v25  ;;  %v1310_v38 = vunpack.c.0.s8 %v838_v45 }
 0x133   :  { %v9844_v60 = vmul.f32 %v9091_v21, %v2317_v59  ;;  %v2332_v43 = vcvt.s32.f32 %v1308_v37  ;;  %v1318_v55 = vunpack.c.1.s8 %v838_v45  ;;  %v1307_v50 = vunpack.c.0.s8 %v835_v34 }
 0x134   :  { %v9849_v9 = vmul.f32 %v9091_v21, %v2325_v4  ;;  %v2340_v32 = vcvt.s32.f32 %v1316_v10  ;;  %v2334_v54 = vcvt.s32.f32 %v1310_v38  ;;  %v1315_v53 = vunpack.c.1.s8 %v835_v34 }
 0x135   :  { %v9852_v20 = vmul.f32 %v9040_v5, %v2332_v43  ;;  %v2342_v63 = vcvt.s32.f32 %v1318_v55  ;;  %v2331_v29 = vcvt.s32.f32 %v1307_v50  ;;  %v1309_v47 = vunpack.c.0.s8 %v837_v26  ;;  %v844_v55 = vld [vmem:[#allocation9 + $0x288] sm:$0xff] }
 0x136   :  { %v9857_v35 = vmul.f32 %v9040_v5, %v2340_v32  ;;  %v9860_v7 = vmul.f32 %v9048_v13, %v2334_v54  ;;  %v2339_v22 = vcvt.s32.f32 %v1315_v53  ;;  %v1317_v23 = vunpack.c.1.s8 %v837_v26 }
 0x137   :  { %v9863_v18 = vmul.f32 %v9048_v13, %v2342_v63  ;;  %v9868_v12 = vmul.f32 %v9054_v27, %v2331_v29  ;;  %v2333_v49 = vcvt.s32.f32 %v1309_v47  ;;  %v1324_v57 = vunpack.c.2.s8 %v836_v25 }
 0x138   :  { %v9873_v62 = vmul.f32 %v9054_v27, %v2339_v22  ;;  %v2341_v16 = vcvt.s32.f32 %v1317_v23  ;;  %v1332_v61 = vunpack.c.3.s8 %v836_v25  ;;  %v1326_v14 = vunpack.c.2.s8 %v838_v45  ;;  %v846_v22 = vld [vmem:[#allocation9 + $0x298] sm:$0xff] }
 0x139   :  { %v9876_v48 = vmul.f32 %v9091_v21, %v2333_v49  ;;  %v2348_v51 = vcvt.s32.f32 %v1324_v57  ;;  %v1334_v41 = vunpack.c.3.s8 %v838_v45  ;;  %v1323_v4 = vunpack.c.2.s8 %v835_v34 }
 0x13a   :  { %v9881_v59 = vmul.f32 %v9091_v21, %v2341_v16  ;;  %v2356_v37 = vcvt.s32.f32 %v1332_v61  ;;  %v2350_v43 = vcvt.s32.f32 %v1326_v14  ;;  %v1331_v25 = vunpack.c.3.s8 %v835_v34  ;;  %v843_v16 = vld [vmem:[#allocation9 + $0x280] sm:$0xff] }
 0x13b   :  { %v9884_v10 = vmul.f32 %v9040_v5, %v2348_v51  ;;  %v2358_v38 = vcvt.s32.f32 %v1334_v41  ;;  %v2347_v50 = vcvt.s32.f32 %v1323_v4  ;;  %v1325_v54 = vunpack.c.2.s8 %v837_v26 }
 0x13c   :  { %v9889_v45 = vmul.f32 %v9040_v5, %v2356_v37  ;;  %v9892_v63 = vmul.f32 %v9048_v13, %v2350_v43  ;;  %v2355_v29 = vcvt.s32.f32 %v1331_v25  ;;  %v1333_v47 = vunpack.c.3.s8 %v837_v26 }
 0x13d   :  { %v9895_v53 = vmul.f32 %v9048_v13, %v2358_v38  ;;  %v9900_v23 = vmul.f32 %v9054_v27, %v2347_v50  ;;  %v2349_v49 = vcvt.s32.f32 %v1325_v54  ;;  %v1340_v57 = vunpack.c.0.s8 %v844_v55  ;;  %v845_v38 = vld [vmem:[#allocation9 + $0x290] sm:$0xff] }
 0x13e   :  { %v9905_v51 = vmul.f32 %v9054_v27, %v2355_v29  ;;  %v2357_v14 = vcvt.s32.f32 %v1333_v47  ;;  %v1348_v41 = vunpack.c.1.s8 %v844_v55  ;;  %v1342_v4 = vunpack.c.0.s8 %v846_v22 }
 0x13f   :  { %v9908_v26 = vmul.f32 %v9091_v21, %v2349_v49  ;;  %v2364_v37 = vcvt.s32.f32 %v1340_v57  ;;  %v1350_v43 = vunpack.c.1.s8 %v846_v22  ;;  %v1339_v61 = vunpack.c.0.s8 %v843_v16 }
 0x140   :  { %v9913_v50 = vmul.f32 %v9091_v21, %v2357_v14  ;;  %v2372_v54 = vcvt.s32.f32 %v1348_v41  ;;  %v2366_v47 = vcvt.s32.f32 %v1342_v4  ;;  %v1347_v32 = vunpack.c.1.s8 %v843_v16 }
 0x141   :  { %v9916_v29 = vmul.f32 %v9040_v5, %v2364_v37  ;;  %v2374_v34 = vcvt.s32.f32 %v1350_v43  ;;  %v2363_v6 = vcvt.s32.f32 %v1339_v61  ;;  %v1341_v1 = vunpack.c.0.s8 %v845_v38 }
 0x142   :  { %v9921_v57 = vmul.f32 %v9040_v5, %v2372_v54  ;;  %v9924_v25 = vmul.f32 %v9048_v13, %v2366_v47  ;;  %v2371_v41 = vcvt.s32.f32 %v1347_v32  ;;  %v1349_v37 = vunpack.c.1.s8 %v845_v38 }
 0x143   :  { %v9927_v14 = vmul.f32 %v9048_v13, %v2374_v34  ;;  %v9932_v43 = vmul.f32 %v9054_v27, %v2363_v6  ;;  %v2365_v49 = vcvt.s32.f32 %v1341_v1  ;;  %v1356_v39 = vunpack.c.2.s8 %v844_v55 }
 0x144   :  { %v9937_v54 = vmul.f32 %v9054_v27, %v2371_v41  ;;  %v2373_v47 = vcvt.s32.f32 %v1349_v37  ;;  %v1364_v58 = vunpack.c.3.s8 %v844_v55  ;;  %v1358_v3 = vunpack.c.2.s8 %v846_v22 }
 0x145   :  { %13445 = vst [vmem:[#allocation34_spill] sm:$0xff] %v9932_v43  ;;  %v9940_v34 = vmul.f32 %v9091_v21, %v2365_v49  ;;  %v2380_v32 = vcvt.s32.f32 %v1356_v39  ;;  %v1366_v0 = vunpack.c.3.s8 %v846_v22  ;;  %v1355_v28 = vunpack.c.2.s8 %v843_v16 }
 0x146   :  { %13446 = vst [vmem:[#allocation35_spill] sm:$0xff] %v9937_v54  ;;  %v9945_v1 = vmul.f32 %v9091_v21, %v2373_v47  ;;  %v2388_v4 = vcvt.s32.f32 %v1364_v58  ;;  %v2382_v41 = vcvt.s32.f32 %v1358_v3  ;;  %v1363_v55 = vunpack.c.3.s8 %v843_v16  ;;  %v854_v3 = vld [vmem:[#allocation9 + $0x2d8] sm:$0xff] }
 0x147   :  { %13447 = vst [vmem:[#allocation37_spill] sm:$0xff] %v9940_v34  ;;  %v9948_v61 = vmul.f32 %v9040_v5, %v2380_v32  ;;  %v2390_v37 = vcvt.s32.f32 %v1366_v0  ;;  %v2379_v49 = vcvt.s32.f32 %v1355_v28  ;;  %v1357_v6 = vunpack.c.2.s8 %v845_v38 }
 0x148   :  { %13448 = vst [vmem:[#allocation36_spill] sm:$0xff] %v9945_v1  ;;  %v9953_v22 = vmul.f32 %v9040_v5, %v2388_v4  ;;  %v9956_v47 = vmul.f32 %v9048_v13, %v2382_v41  ;;  %v2387_v32 = vcvt.s32.f32 %v1363_v55  ;;  %v1365_v15 = vunpack.c.3.s8 %v845_v38 }
 0x149   :  { %13449 = vst [vmem:[#allocation38_spill] sm:$0xff] %v9948_v61  ;;  %v9959_v58 = vmul.f32 %v9048_v13, %v2390_v37  ;;  %v9964_v16 = vmul.f32 %v9054_v27, %v2379_v49  ;;  %v2381_v39 = vcvt.s32.f32 %v1357_v6  ;;  %v1372_v4 = vunpack.c.0.s8 %v852_v52  ;;  %v853_v61 = vld [vmem:[#allocation9 + $0x2d0] sm:$0xff] }
 0x14a   :  { %13450 = vst [vmem:[#allocation33_spill] sm:$0xff] %v9953_v22  ;;  %13451 = vst [vmem:[#allocation32_spill] sm:$0xff] %v9956_v47  ;;  %v9969_v41 = vmul.f32 %v9054_v27, %v2387_v32  ;;  %v2389_v37 = vcvt.s32.f32 %v1365_v15  ;;  %v1380_v11 = vunpack.c.1.s8 %v852_v52  ;;  %v1374_v34 = vunpack.c.0.s8 %v854_v3 }
 0x14b   :  { %13452 = vst [vmem:[#allocation31_spill] sm:$0xff] %v9959_v58  ;;  %13453 = vst [vmem:[#allocation39_spill] sm:$0xff] %v9964_v16  ;;  %v9972_v38 = vmul.f32 %v9091_v21, %v2381_v39  ;;  %v2396_v55 = vcvt.s32.f32 %v1372_v4  ;;  %v1382_v0 = vunpack.c.1.s8 %v854_v3  ;;  %v1371_v28 = vunpack.c.0.s8 %v851_v30 }
 0x14c   :  { %13454 = vst [vmem:[#allocation30_spill] sm:$0xff] %v9969_v41  ;;  %v9977_v49 = vmul.f32 %v9091_v21, %v2389_v37  ;;  %v2404_v22 = vcvt.s32.f32 %v1380_v11  ;;  %v2398_v15 = vcvt.s32.f32 %v1374_v34  ;;  %v1379_v58 = vunpack.c.1.s8 %v851_v30 }
 0x14d   :  { %13455 = vst [vmem:[#allocation29_spill] sm:$0xff] %v9972_v38  ;;  %v9980_v32 = vmul.f32 %v9040_v5, %v2396_v55  ;;  %v2406_v47 = vcvt.s32.f32 %v1382_v0  ;;  %v2395_v1 = vcvt.s32.f32 %v1371_v28  ;;  %v1373_v43 = vunpack.c.0.s8 %v853_v61 }
 0x14e   :  { %13456 = vst [vmem:[#allocation40_spill] sm:$0xff] %v9977_v49  ;;  %v9985_v4 = vmul.f32 %v9040_v5, %v2404_v22  ;;  %v9988_v6 = vmul.f32 %v9048_v13, %v2398_v15  ;;  %v2403_v37 = vcvt.s32.f32 %v1379_v58  ;;  %v1381_v55 = vunpack.c.1.s8 %v853_v61 }
 0x14f   :  { %13457 = vst [vmem:[#allocation41_spill] sm:$0xff] %v9980_v32  ;;  %v9991_v11 = vmul.f32 %v9048_v13, %v2406_v47  ;;  %v9996_v0 = vmul.f32 %v9054_v27, %v2395_v1  ;;  %v2397_v39 = vcvt.s32.f32 %v1373_v43  ;;  %v1388_v38 = vunpack.c.2.s8 %v852_v52 }
 0x150   :  { %13458 = vst [vmem:[#allocation42_spill] sm:$0xff] %v9985_v4  ;;  %13459 = vst [vmem:[#allocation43_spill] sm:$0xff] %v9988_v6  ;;  %v10001_v28 = vmul.f32 %v9054_v27, %v2403_v37  ;;  %v2405_v15 = vcvt.s32.f32 %v1381_v55  ;;  %v1396_v49 = vunpack.c.3.s8 %v852_v52  ;;  %v1390_v16 = vunpack.c.2.s8 %v854_v3  ;;  %v860_v6 = vld [vmem:[#allocation9 + $0x308] sm:$0xff] }
 0x151   :  { %13460 = vst [vmem:[#allocation44_spill] sm:$0xff] %v9991_v11  ;;  %13461 = vst [vmem:[#allocation45_spill] sm:$0xff] %v9996_v0  ;;  %v10004_v47 = vmul.f32 %v9091_v21, %v2397_v39  ;;  %v2412_v58 = vcvt.s32.f32 %v1388_v38  ;;  %v1398_v41 = vunpack.c.3.s8 %v854_v3  ;;  %v1387_v32 = vunpack.c.2.s8 %v851_v30 }
 0x152   :  { %13462 = vst [vmem:[#allocation46_spill] sm:$0xff] %v10001_v28  ;;  %v10009_v43 = vmul.f32 %v9091_v21, %v2405_v15  ;;  %v2420_v34 = vcvt.s32.f32 %v1396_v49  ;;  %v2414_v37 = vcvt.s32.f32 %v1390_v16  ;;  %v1395_v52 = vunpack.c.3.s8 %v851_v30  ;;  %v862_v16 = vld [vmem:[#allocation9 + $0x318] sm:$0xff] }
 0x153   :  { %13463 = vst [vmem:[#allocation47_spill] sm:$0xff] %v10004_v47  ;;  %v10012_v22 = vmul.f32 %v9040_v5, %v2412_v58  ;;  %v2422_v55 = vcvt.s32.f32 %v1398_v41  ;;  %v2411_v39 = vcvt.s32.f32 %v1387_v32  ;;  %v1389_v1 = vunpack.c.2.s8 %v853_v61  ;;  %v859_v47 = vld [vmem:[#allocation9 + $0x300] sm:$0xff] }
 0x154   :  { %13464 = vst [vmem:[#allocation48_spill] sm:$0xff] %v10009_v43  ;;  %v10017_v3 = vmul.f32 %v9040_v5, %v2420_v34  ;;  %v10020_v15 = vmul.f32 %v9048_v13, %v2414_v37  ;;  %v2419_v58 = vcvt.s32.f32 %v1395_v52  ;;  %v1397_v0 = vunpack.c.3.s8 %v853_v61 }
 0x155   :  { %13465 = vst [vmem:[#allocation49_spill] sm:$0xff] %v10012_v22  ;;  %v10023_v49 = vmul.f32 %v9048_v13, %v2422_v55  ;;  %v10028_v41 = vmul.f32 %v9054_v27, %v2411_v39  ;;  %v2413_v38 = vcvt.s32.f32 %v1389_v1  ;;  %v1404_v34 = vunpack.c.0.s8 %v860_v6  ;;  %v861_v22 = vld [vmem:[#allocation9 + $0x310] sm:$0xff] }
 0x156   :  { %13466 = vst [vmem:[#allocation50_spill] sm:$0xff] %v10017_v3  ;;  %13467 = vst [vmem:[#allocation51_spill] sm:$0xff] %v10020_v15  ;;  %v10033_v37 = vmul.f32 %v9054_v27, %v2419_v58  ;;  %v2421_v55 = vcvt.s32.f32 %v1397_v0  ;;  %v1412_v43 = vunpack.c.1.s8 %v860_v6  ;;  %v1406_v28 = vunpack.c.0.s8 %v862_v16 }
 0x157   :  { %13468 = vst [vmem:[#allocation52_spill] sm:$0xff] %v10023_v49  ;;  %13469 = vst [vmem:[#allocation53_spill] sm:$0xff] %v10028_v41  ;;  %v10036_v61 = vmul.f32 %v9091_v21, %v2413_v38  ;;  %v2428_v52 = vcvt.s32.f32 %v1404_v34  ;;  %v1414_v30 = vunpack.c.1.s8 %v862_v16  ;;  %v1403_v32 = vunpack.c.0.s8 %v859_v47 }
 0x158   :  { %13470 = vst [vmem:[#allocation54_spill] sm:$0xff] %v10033_v37  ;;  %v10041_v39 = vmul.f32 %v9091_v21, %v2421_v55  ;;  %v2436_v3 = vcvt.s32.f32 %v1412_v43  ;;  %v2430_v0 = vcvt.s32.f32 %v1406_v28  ;;  %v1411_v49 = vunpack.c.1.s8 %v859_v47 }
 0x159   :  { %13471 = vst [vmem:[#allocation55_spill] sm:$0xff] %v10036_v61  ;;  %v10044_v58 = vmul.f32 %v9040_v5, %v2428_v52  ;;  %v2438_v15 = vcvt.s32.f32 %v1414_v30  ;;  %v2427_v11 = vcvt.s32.f32 %v1403_v32  ;;  %v1405_v4 = vunpack.c.0.s8 %v861_v22 }
 0x15a   :  { %13472 = vst [vmem:[#allocation56_spill] sm:$0xff] %v10041_v39  ;;  %v10049_v34 = vmul.f32 %v9040_v5, %v2436_v3  ;;  %v10052_v1 = vmul.f32 %v9048_v13, %v2430_v0  ;;  %v2435_v55 = vcvt.s32.f32 %v1411_v49  ;;  %v1413_v52 = vunpack.c.1.s8 %v861_v22 }
 0x15b   :  { %13473 = vst [vmem:[#allocation57_spill] sm:$0xff] %v10044_v58  ;;  %v10055_v43 = vmul.f32 %v9048_v13, %v2438_v15  ;;  %v10060_v30 = vmul.f32 %v9054_v27, %v2427_v11  ;;  %v2429_v38 = vcvt.s32.f32 %v1405_v4  ;;  %v1420_v61 = vunpack.c.2.s8 %v860_v6 }
 0x15c   :  { %13474 = vst [vmem:[#allocation58_spill] sm:$0xff] %v10049_v34  ;;  %13475 = vst [vmem:[#allocation59_spill] sm:$0xff] %v10052_v1  ;;  %v10065_v32 = vmul.f32 %v9054_v27, %v2435_v55  ;;  %v2437_v0 = vcvt.s32.f32 %v1413_v52  ;;  %v1428_v39 = vunpack.c.3.s8 %v860_v6  ;;  %v1422_v41 = vunpack.c.2.s8 %v862_v16  ;;  %v868_v1 = vld [vmem:[#allocation9 + $0x348] sm:$0xff] }
 0x15d   :  { %13476 = vst [vmem:[#allocation60_spill] sm:$0xff] %v10055_v43  ;;  %13477 = vst [vmem:[#allocation61_spill] sm:$0xff] %v10060_v30  ;;  %v10068_v15 = vmul.f32 %v9091_v21, %v2429_v38  ;;  %v2444_v49 = vcvt.s32.f32 %v1420_v61  ;;  %v1430_v37 = vunpack.c.3.s8 %v862_v16  ;;  %v1419_v58 = vunpack.c.2.s8 %v859_v47 }
 0x15e   :  { %13478 = vst [vmem:[#allocation62_spill] sm:$0xff] %v10065_v32  ;;  %v10073_v4 = vmul.f32 %v9091_v21, %v2437_v0  ;;  %v2452_v28 = vcvt.s32.f32 %v1428_v39  ;;  %v2446_v55 = vcvt.s32.f32 %v1422_v41  ;;  %v1427_v6 = vunpack.c.3.s8 %v859_v47  ;;  %v870_v41 = vld [vmem:[#allocation9 + $0x358] sm:$0xff] }
 0x15f   :  { %13479 = vst [vmem:[#allocation63_spill] sm:$0xff] %v10068_v15  ;;  %v10076_v3 = vmul.f32 %v9040_v5, %v2444_v49  ;;  %v2454_v52 = vcvt.s32.f32 %v1430_v37  ;;  %v2443_v38 = vcvt.s32.f32 %v1419_v58  ;;  %v1421_v11 = vunpack.c.2.s8 %v861_v22  ;;  %v867_v15 = vld [vmem:[#allocation9 + $0x340] sm:$0xff] }
 0x160   :  { %13480 = vst [vmem:[#allocation64_spill] sm:$0xff] %v10073_v4  ;;  %v10081_v16 = vmul.f32 %v9040_v5, %v2452_v28  ;;  %v10084_v0 = vmul.f32 %v9048_v13, %v2446_v55  ;;  %v2451_v49 = vcvt.s32.f32 %v1427_v6  ;;  %v1429_v30 = vunpack.c.3.s8 %v861_v22 }
 0x161   :  { %13481 = vst [vmem:[#allocation65_spill] sm:$0xff] %v10076_v3  ;;  %v10087_v39 = vmul.f32 %v9048_v13, %v2454_v52  ;;  %v10092_v37 = vmul.f32 %v9054_v27, %v2443_v38  ;;  %v2445_v61 = vcvt.s32.f32 %v1421_v11  ;;  %v1436_v28 = vunpack.c.0.s8 %v868_v1  ;;  %v869_v3 = vld [vmem:[#allocation9 + $0x350] sm:$0xff] }
 0x162   :  { %13482 = vst [vmem:[#allocation66_spill] sm:$0xff] %v10081_v16  ;;  %13483 = vst [vmem:[#allocation67_spill] sm:$0xff] %v10084_v0  ;;  %v10097_v55 = vmul.f32 %v9054_v27, %v2451_v49  ;;  %v2453_v52 = vcvt.s32.f32 %v1429_v30  ;;  %v1444_v4 = vunpack.c.1.s8 %v868_v1  ;;  %v1438_v32 = vunpack.c.0.s8 %v870_v41 }
 0x163   :  { %13484 = vst [vmem:[#allocation68_spill] sm:$0xff] %v10087_v39  ;;  %13485 = vst [vmem:[#allocation69_spill] sm:$0xff] %v10092_v37  ;;  %v10100_v22 = vmul.f32 %v9091_v21, %v2445_v61  ;;  %v2460_v6 = vcvt.s32.f32 %v1436_v28  ;;  %v1446_v47 = vunpack.c.1.s8 %v870_v41  ;;  %v1435_v58 = vunpack.c.0.s8 %v867_v15 }
 0x164   :  { %13486 = vst [vmem:[#allocation70_spill] sm:$0xff] %v10097_v55  ;;  %v10105_v38 = vmul.f32 %v9091_v21, %v2453_v52  ;;  %v2468_v16 = vcvt.s32.f32 %v1444_v4  ;;  %v2462_v30 = vcvt.s32.f32 %v1438_v32  ;;  %v1443_v39 = vunpack.c.1.s8 %v867_v15 }
 0x165   :  { %13487 = vst [vmem:[#allocation71_spill] sm:$0xff] %v10100_v22  ;;  %v10108_v49 = vmul.f32 %v9040_v5, %v2460_v6  ;;  %v2470_v0 = vcvt.s32.f32 %v1446_v47  ;;  %v2459_v43 = vcvt.s32.f32 %v1435_v58  ;;  %v1437_v34 = vunpack.c.0.s8 %v869_v3 }
 0x166   :  { %13488 = vst [vmem:[#allocation72_spill] sm:$0xff] %v10105_v38  ;;  %v10113_v28 = vmul.f32 %v9040_v5, %v2468_v16  ;;  %v10116_v11 = vmul.f32 %v9048_v13, %v2462_v30  ;;  %v2467_v52 = vcvt.s32.f32 %v1443_v39  ;;  %v1445_v6 = vunpack.c.1.s8 %v869_v3 }
 0x167   :  { %13489 = vst [vmem:[#allocation73_spill] sm:$0xff] %v10108_v49  ;;  %v10119_v4 = vmul.f32 %v9048_v13, %v2470_v0  ;;  %v10124_v47 = vmul.f32 %v9054_v27, %v2459_v43  ;;  %v2461_v61 = vcvt.s32.f32 %v1437_v34  ;;  %v1452_v22 = vunpack.c.2.s8 %v868_v1 }
 0x168   :  { %13490 = vst [vmem:[#allocation74_spill] sm:$0xff] %v10113_v28  ;;  %13491 = vst [vmem:[#allocation75_spill] sm:$0xff] %v10116_v11  ;;  %v10129_v58 = vmul.f32 %v9054_v27, %v2467_v52  ;;  %v2469_v30 = vcvt.s32.f32 %v1445_v6  ;;  %v1460_v38 = vunpack.c.3.s8 %v868_v1  ;;  %v1454_v37 = vunpack.c.2.s8 %v870_v41  ;;  %v876_v11 = vld [vmem:[#allocation9 + $0x388] sm:$0xff] }
 0x169   :  { %13492 = vst [vmem:[#allocation76_spill] sm:$0xff] %v10119_v4  ;;  %13493 = vst [vmem:[#allocation77_spill] sm:$0xff] %v10124_v47  ;;  %v10132_v0 = vmul.f32 %v9091_v21, %v2461_v61  ;;  %v2476_v39 = vcvt.s32.f32 %v1452_v22  ;;  %v1462_v55 = vunpack.c.3.s8 %v870_v41  ;;  %v1451_v49 = vunpack.c.2.s8 %v867_v15 }
 0x16a   :  { %13494 = vst [vmem:[#allocation78_spill] sm:$0xff] %v10129_v58  ;;  %v10137_v34 = vmul.f32 %v9091_v21, %v2469_v30  ;;  %v2484_v32 = vcvt.s32.f32 %v1460_v38  ;;  %v2478_v52 = vcvt.s32.f32 %v1454_v37  ;;  %v1459_v1 = vunpack.c.3.s8 %v867_v15  ;;  %v878_v37 = vld [vmem:[#allocation9 + $0x398] sm:$0xff] }
 0x16b   :  { %13495 = vst [vmem:[#allocation79_spill] sm:$0xff] %v10132_v0  ;;  %v10140_v16 = vmul.f32 %v9040_v5, %v2476_v39  ;;  %v2486_v6 = vcvt.s32.f32 %v1462_v55  ;;  %v2475_v61 = vcvt.s32.f32 %v1451_v49  ;;  %v1453_v43 = vunpack.c.2.s8 %v869_v3  ;;  %v875_v0 = vld [vmem:[#allocation9 + $0x380] sm:$0xff] }
 0x16c   :  { %13496 = vst [vmem:[#allocation80_spill] sm:$0xff] %v10137_v34  ;;  %v10145_v41 = vmul.f32 %v9040_v5, %v2484_v32  ;;  %v10148_v30 = vmul.f32 %v9048_v13, %v2478_v52  ;;  %v2483_v39 = vcvt.s32.f32 %v1459_v1  ;;  %v1461_v47 = vunpack.c.3.s8 %v869_v3 }
 0x16d   :  { %13497 = vst [vmem:[#allocation81_spill] sm:$0xff] %v10140_v16  ;;  %v10151_v38 = vmul.f32 %v9048_v13, %v2486_v6  ;;  %v10156_v55 = vmul.f32 %v9054_v27, %v2475_v61  ;;  %v2477_v22 = vcvt.s32.f32 %v1453_v43  ;;  %v1468_v32 = vunpack.c.0.s8 %v876_v11  ;;  %v877_v16 = vld [vmem:[#allocation9 + $0x390] sm:$0xff] }
 0x16e   :  { %13498 = vst [vmem:[#allocation82_spill] sm:$0xff] %v10145_v41  ;;  %13499 = vst [vmem:[#allocation83_spill] sm:$0xff] %v10148_v30  ;;  %v10161_v52 = vmul.f32 %v9054_v27, %v2483_v39  ;;  %v2485_v6 = vcvt.s32.f32 %v1461_v47  ;;  %v1476_v34 = vunpack.c.1.s8 %v876_v11  ;;  %v1470_v58 = vunpack.c.0.s8 %v878_v37 }
 0x16f   :  { %13500 = vst [vmem:[#allocation84_spill] sm:$0xff] %v10151_v38  ;;  %13501 = vst [vmem:[#allocation85_spill] sm:$0xff] %v10156_v55  ;;  %v10164_v3 = vmul.f32 %v9091_v21, %v2477_v22  ;;  %v2492_v1 = vcvt.s32.f32 %v1468_v32  ;;  %v1478_v15 = vunpack.c.1.s8 %v878_v37  ;;  %v1467_v49 = vunpack.c.0.s8 %v875_v0 }
 0x170   :  { %13502 = vst [vmem:[#allocation86_spill] sm:$0xff] %v10161_v52  ;;  %v10169_v61 = vmul.f32 %v9091_v21, %v2485_v6  ;;  %v2500_v41 = vcvt.s32.f32 %v1476_v34  ;;  %v2494_v47 = vcvt.s32.f32 %v1470_v58  ;;  %v1475_v38 = vunpack.c.1.s8 %v875_v0 }
 0x171   :  { %13503 = vst [vmem:[#allocation87_spill] sm:$0xff] %v10164_v3  ;;  %v10172_v39 = vmul.f32 %v9040_v5, %v2492_v1  ;;  %v2502_v30 = vcvt.s32.f32 %v1478_v15  ;;  %v2491_v4 = vcvt.s32.f32 %v1467_v49  ;;  %v1469_v28 = vunpack.c.0.s8 %v877_v16  ;;  %v13510_v3 = vld [vmem:[#allocation28_spill] sm:$0xff] }
 0x172   :  { %13504 = vst [vmem:[#allocation88_spill] sm:$0xff] %v10169_v61  ;;  %v10177_v32 = vmul.f32 %v9040_v5, %v2500_v41  ;;  %v10180_v43 = vmul.f32 %v9048_v13, %v2494_v47  ;;  %v2499_v6 = vcvt.s32.f32 %v1475_v38  ;;  %v1477_v1 = vunpack.c.1.s8 %v877_v16  ;;  %v13512_v38 = vld [vmem:[#allocation26_spill] sm:$0xff] }
 0x173   :  { %13505 = vst [vmem:[#allocation89_spill] sm:$0xff] %v10172_v39  ;;  %v10183_v34 = vmul.f32 %v9048_v13, %v2502_v30  ;;  %v10188_v15 = vmul.f32 %v9054_v27, %v2491_v4  ;;  %v2493_v22 = vcvt.s32.f32 %v1469_v28  ;;  %v10192_v41 = vrot.slane %v9759_v2, %v13510_v3 }
 0x174   :  { %13506 = vst [vmem:[#allocation90_spill] sm:$0xff] %v10177_v32  ;;  %13507 = vst [vmem:[#allocation91_spill] sm:$0xff] %v10180_v43  ;;  %v10197_v47 = vmul.f32 %v9054_v27, %v2499_v6  ;;  %v2501_v30 = vcvt.s32.f32 %v1477_v1  ;;  %v10201_v61 = vrot.slane %v9759_v2, %v13512_v38  ;;  %v1484_v4 = vunpack.c.2.s8 %v876_v11 }
 0x175   :  { %13508 = vst [vmem:[#allocation92_spill] sm:$0xff] %v10183_v34  ;;  %13509 = vst [vmem:[#allocation93_spill] sm:$0xff] %v10188_v15  ;;  %v10204_v58 = vmul.f32 %v9091_v21, %v2493_v22  ;;  %v1492_v28 = vunpack.c.3.s8 %v876_v11  ;;  %v1486_v39 = vunpack.c.2.s8 %v878_v37  ;;  %v1494_v49 = vunpack.c.3.s8 %v878_v37  ;;  %v884_v11 = vld [vmem:[#allocation9 + $0x3c8] sm:$0xff] }
 0x176   :  { %13511 = vst [vmem:[#allocation94_spill] sm:$0xff] %v10197_v47  ;;  %v10209_v32 = vmul.f32 %v9091_v21, %v2501_v30  ;;  %v1483_v6 = vunpack.c.2.s8 %v875_v0  ;;  %v2508_v43 = vcvt.s32.f32 %v1484_v4  ;;  %v1491_v55 = vunpack.c.3.s8 %v875_v0  ;;  %v886_v4 = vld [vmem:[#allocation9 + $0x3d8] sm:$0xff] }
 0x177   :  { %13513 = vst [vmem:[#allocation95_spill] sm:$0xff] %v10204_v58  ;;  %v2516_v1 = vcvt.s32.f32 %v1492_v28  ;;  %v2510_v34 = vcvt.s32.f32 %v1486_v39  ;;  %v2518_v22 = vcvt.s32.f32 %v1494_v49  ;;  %v1485_v52 = vunpack.c.2.s8 %v877_v16 }
 0x178   :  { %13514 = vst [vmem:[#allocation96_spill] sm:$0xff] %v10209_v32  ;;  %v2507_v38 = vcvt.s32.f32 %v1483_v6  ;;  %v10214_v54 = vmul.f32 %v9040_v5, %v2508_v43  ;;  %v2515_v30 = vcvt.s32.f32 %v1491_v55  ;;  %v1493_v49 = vunpack.c.3.s8 %v877_v16  ;;  %v885_v32 = vld [vmem:[#allocation9 + $0x3d0] sm:$0xff] }
 0x179   :  { %v10217_v3 = vmul.f32 %v9040_v5, %v2516_v1  ;;  %v10220_v37 = vmul.f32 %v9048_v13, %v2510_v34  ;;  %v10223_v0 = vmul.f32 %v9048_v13, %v2518_v22  ;;  %v2509_v28 = vcvt.s32.f32 %v1485_v52  ;;  %v883_v34 = vld [vmem:[#allocation9 + $0x3c0] sm:$0xff] }
 0x17a   :  { %13515 = vst [vmem:[#allocation97_spill] sm:$0xff] %v10214_v54  ;;  %v10226_v39 = vmul.f32 %v9054_v27, %v2507_v38  ;;  %v10231_v6 = vmul.f32 %v9054_v27, %v2515_v30  ;;  %v1500_v1 = vunpack.c.0.s8 %v884_v11  ;;  %v1508_v2 = vunpack.c.1.s8 %v884_v11 }
 0x17b   :  { %13516 = vst [vmem:[#allocation98_spill] sm:$0xff] %v10217_v3  ;;  %13517 = vst [vmem:[#allocation99_spill] sm:$0xff] %v10220_v37  ;;  %v2517_v58 = vcvt.s32.f32 %v1493_v49  ;;  %v10236_v22 = vmul.f32 %v9091_v21, %v2509_v28  ;;  %v1502_v38 = vunpack.c.0.s8 %v886_v4  ;;  %v1510_v54 = vunpack.c.1.s8 %v886_v4 }
 0x17c   :  { %13518 = vst [vmem:[#allocation100_spill] sm:$0xff] %v10223_v0  ;;  %13519 = vst [vmem:[#allocation101_spill] sm:$0xff] %v10226_v39  ;;  %v2524_v52 = vcvt.s32.f32 %v1500_v1  ;;  %v2532_v43 = vcvt.s32.f32 %v1508_v2  ;;  %v1499_v15 = vunpack.c.0.s8 %v883_v34  ;;  %v1507_v47 = vunpack.c.1.s8 %v883_v34 }
 0x17d   :  { %13520 = vst [vmem:[#allocation102_spill] sm:$0xff] %v10231_v6  ;;  %13521 = vst [vmem:[#allocation103_spill] sm:$0xff] %v10236_v22  ;;  %v10241_v30 = vmul.f32 %v9091_v21, %v2517_v58  ;;  %v2526_v3 = vcvt.s32.f32 %v1502_v38  ;;  %v2534_v28 = vcvt.s32.f32 %v1510_v54  ;;  %v1501_v37 = vunpack.c.0.s8 %v885_v32 }
 0x17e   :  { %v10244_v55 = vmul.f32 %v9040_v5, %v2524_v52  ;;  %v10247_v49 = vmul.f32 %v9040_v5, %v2532_v43  ;;  %v2523_v1 = vcvt.s32.f32 %v1499_v15  ;;  %v2531_v58 = vcvt.s32.f32 %v1507_v47 }
 0x17f   :  { %13522 = vst [vmem:[#allocation104_spill] sm:$0xff] %v10241_v30  ;;  %v10252_v2 = vmul.f32 %v9048_v13, %v2526_v3  ;;  %v10257_v39 = vmul.f32 %v9048_v13, %v2534_v28  ;;  %v1509_v52 = vunpack.c.1.s8 %v885_v32  ;;  %v2525_v6 = vcvt.s32.f32 %v1501_v37 }
 0x180   :  { %13523 = vst [vmem:[#allocation105_spill] sm:$0xff] %v10244_v55  ;;  %13524 = vst [vmem:[#allocation106_spill] sm:$0xff] %v10247_v49  ;;  %v10260_v43 = vmul.f32 %v9054_v27, %v2523_v1  ;;  %v10263_v54 = vmul.f32 %v9054_v27, %v2531_v58  ;;  %v1516_v16 = vunpack.c.2.s8 %v884_v11  ;;  %v1524_v22 = vunpack.c.3.s8 %v884_v11 }
 0x181   :  { %13525 = vst [vmem:[#allocation107_spill] sm:$0xff] %v10252_v2  ;;  %v2533_v15 = vcvt.s32.f32 %v1509_v52  ;;  %v10268_v47 = vmul.f32 %v9091_v21, %v2525_v6  ;;  %v1518_v38 = vunpack.c.2.s8 %v886_v4  ;;  %v1526_v1 = vunpack.c.3.s8 %v886_v4  ;;  %v10281_v2 = vld [vmem:[#allocation9 + $0x408] sm:$0xff] }
 0x182   :  { %13526 = vst [vmem:[#allocation108_spill] sm:$0xff] %v10260_v43  ;;  %13527 = vst [vmem:[#allocation109_spill] sm:$0xff] %v10263_v54  ;;  %v2540_v37 = vcvt.s32.f32 %v1516_v16  ;;  %v2548_v55 = vcvt.s32.f32 %v1524_v22  ;;  %v1515_v30 = vunpack.c.2.s8 %v883_v34  ;;  %v1523_v11 = vunpack.c.3.s8 %v883_v34 }
 0x183   :  { %13528 = vst [vmem:[#allocation110_spill] sm:$0xff] %v10268_v47  ;;  %v10273_v49 = vmul.f32 %v9091_v21, %v2533_v15  ;;  %v2542_v58 = vcvt.s32.f32 %v1518_v38  ;;  %v2550_v6 = vcvt.s32.f32 %v1526_v1  ;;  %v1517_v3 = vunpack.c.2.s8 %v885_v32 }
 0x184   :  { %v10276_v0 = vmul.f32 %v9040_v5, %v2540_v37  ;;  %v10279_v52 = vmul.f32 %v9040_v5, %v2548_v55  ;;  %v2539_v16 = vcvt.s32.f32 %v1515_v30  ;;  %v2547_v38 = vcvt.s32.f32 %v1523_v11 }
 0x185   :  { %13529 = vst [vmem:[#allocation111_spill] sm:$0xff] %v10273_v49  ;;  %v10286_v4 = vmul.f32 %v9048_v13, %v2542_v58  ;;  %v10291_v37 = vmul.f32 %v9048_v13, %v2550_v6  ;;  %v1525_v55 = vunpack.c.3.s8 %v885_v32  ;;  %v2541_v1 = vcvt.s32.f32 %v1517_v3  ;;  %v10307_v3 = vld [vmem:[#allocation9 + $0x418] sm:$0xff] }
 0x186   :  { %13530 = vst [vmem:[#allocation112_spill] sm:$0xff] %v10276_v0  ;;  %13531 = vst [vmem:[#allocation113_spill] sm:$0xff] %v10279_v52  ;;  %v10295_v54 = vmul.f32 %v9054_v27, %v2539_v16  ;;  %v10298_v58 = vmul.f32 %v9054_v27, %v2547_v38  ;;  %v1532_v30 = vunpack.c.0.s8 %v10281_v2  ;;  %v1540_v52 = vunpack.c.1.s8 %v10281_v2 }
 0x187   :  { %13532 = vst [vmem:[#allocation114_spill] sm:$0xff] %v10286_v4  ;;  %13533 = vst [vmem:[#allocation115_spill] sm:$0xff] %v10291_v37  ;;  %v2549_v34 = vcvt.s32.f32 %v1525_v55  ;;  %v10305_v32 = vmul.f32 %v9091_v21, %v2541_v1 }
 0x188   :  { %13534 = vst [vmem:[#allocation116_spill] sm:$0xff] %v10295_v54  ;;  %13535 = vst [vmem:[#allocation117_spill] sm:$0xff] %v10298_v58  ;;  %v2556_v1 = vcvt.s32.f32 %v1532_v30  ;;  %v2564_v37 = vcvt.s32.f32 %v1540_v52 }
 0x189   :  { %13536 = vst [vmem:[#allocation118_spill] sm:$0xff] %v10305_v32  ;;  %v10317_v55 = vmul.f32 %v9091_v21, %v2549_v34  ;;  %v10337_v32 = vld [vmem:[#allocation9 + $0x410] sm:$0xff] }
 0x18a   :  { %v609_v15 = vpop.f32.mrb[0].mxu0  ;;  %v10324_v54 = vmul.f32 %v9040_v5, %v2556_v1  ;;  %v10331_v52 = vmul.f32 %v9040_v5, %v2564_v37 }
 0x18b   :  { %v610_v28 = vadd.f32 %v609_v15, %v9769_v24  ;;  %v611_v43 = vpop.f32.mrb[1].mxu0  ;;  %13537 = vst [vmem:[#allocation119_spill] sm:$0xff] %v10317_v55 }
 0x18c   :  { %v612_v11 = vadd.f32 %v611_v43, %v9775_v33  ;;  %v613_v22 = vpop.f32.mrb[2].mxu0  ;;  %v10313_v43 = vld [vmem:[#allocation9 + $0x400] sm:$0xff] }
 0x18d   :  { %v747_v15 = vmax.f32 %v610_v28, 0.0  ;;  %v614_v16 = vadd.f32 %v613_v22, %v9769_v24  ;;  %v615_v0 = vpop.f32.mrb[3].mxu0  ;;  %v1534_v28 = vunpack.c.0.s8 %v10307_v3  ;;  %v1542_v24 = vunpack.c.1.s8 %v10307_v3 }
 0x18e   :  { %v748_v47 = vmax.f32 %v612_v11, 0.0  ;;  %v616_v6 = vadd.f32 %v615_v0, %v9775_v33  ;;  %v1531_v33 = vunpack.c.0.s8 %v10313_v43  ;;  %v1539_v1 = vunpack.c.1.s8 %v10313_v43 }
 0x18f   :  { %v755_v4 = vmax.f32 %v614_v16, 0.0  ;;  %v2558_v11 = vcvt.s32.f32 %v1534_v28  ;;  %v2566_v38 = vcvt.s32.f32 %v1542_v24 }
 0x190   :  { %v756_v22 = vmax.f32 %v616_v6, 0.0 }
 0x191   :  { %v10327_v0 = vpack.c.bf16 %v755_v4, %v747_v15  ;;  %v10343_v37 = vmul.f32 %v9048_v13, %v2558_v11  ;;  %v10349_v24 = vmul.f32 %v9048_v13, %v2566_v38  ;;  %v13540_v11 = vpack.c.bf16 %v9809_v31, %v9806_v36 }
 0x192   :  { %v652_v49 = vpop.f32.mrb[0].mxu1  ;;  %v10333_v16 = vpack.c.bf16 %v756_v22, %v748_v47  ;;  %v2555_v22 = vcvt.s32.f32 %v1531_v33  ;;  %v13543_v36 = vpack.c.bf16 %v9831_v8, %v9828_v19  ;;  %v1558_v8 = vunpack.c.3.s8 %v10307_v3  ;;  %v13594_v33 = vld [vmem:[#allocation49_spill] sm:$0xff] }
 0x193   :  { %13538 = vst [vmem:[#allocation120_spill] sm:$0xff] %v10327_v0  ;;  %v653_v34 = vadd.f32 %v652_v49, %v10192_v41  ;;  %v654_v30 = vpop.f32.mrb[1].mxu1 }
 0x194   :  { %13539 = vst [vmem:[#allocation121_spill] sm:$0xff] %v10333_v16  ;;  %v655_v6 = vadd.f32 %v654_v30, %v10201_v61  ;;  %v656_v58 = vpop.f32.mrb[2].mxu1  ;;  %4727 = vmatprep.mubr.bf16.mxu0 %v10333_v16  ;;  %4899 = vmatprep.mubr.bf16.mxu1 %v10333_v16  ;;  %v1541_v30 = vunpack.c.1.s8 %v10337_v32  ;;  %v13604_v16 = vld [vmem:[#allocation56_spill] sm:$0xff] }
 0x195   :  { %v749_v55 = vmax.f32 %v653_v34, 0.0  ;;  %v657_v4 = vadd.f32 %v656_v58, %v10192_v41  ;;  %v658_v15 = vpop.f32.mrb[3].mxu1  ;;  %4728 = vmatmul.mubr.bf16.vlgmr.msra.gmra.mrb[8].mxu0 %v10327_v0  ;;  %4900 = vmatmul.mubr.bf16.vlgmr.msra.gmra.mrb[8].mxu1 %v10327_v0  ;;  %v2563_v58 = vcvt.s32.f32 %v1539_v1  ;;  %v1533_v34 = vunpack.c.0.s8 %v10337_v32  ;;  %v13602_v0 = vld [vmem:[#allocation53_spill] sm:$0xff] }
 0x196   :  { %v750_v47 = vmax.f32 %v655_v6, 0.0  ;;  %v659_v28 = vadd.f32 %v658_v15, %v10201_v61  ;;  %4739 = vmatpush1.bf16.msra.mxu0 %v13540_v11  ;;  %v13541_v61 = vpack.c.bf16 %v9817_v40, %v9812_v17  ;;  %v10364_v6 = vmul.f32 %v9054_v27, %v2555_v22 }
 0x197   :  { %v757_v41 = vmax.f32 %v657_v4, 0.0  ;;  %v1548_v1 = vunpack.c.2.s8 %v10281_v2  ;;  %v13542_v4 = vpack.c.bf16 %v9825_v46, %v9820_v44  ;;  %v10376_v17 = vmul.f32 %v9054_v27, %v2563_v58  ;;  %v909_v44 = vld [vmem:[#allocation9 + $0x490] sm:$0xff] }
 0x198   :  { %4911 = vmatpush1.bf16.msra.mxu1 %v13541_v61  ;;  %v758_v38 = vmax.f32 %v659_v28, 0.0  ;;  %v2557_v40 = vcvt.s32.f32 %v1533_v34  ;;  %v2565_v15 = vcvt.s32.f32 %v1541_v30  ;;  %v1556_v22 = vunpack.c.3.s8 %v10281_v2  ;;  %v10401_v30 = vld [vmem:[#allocation9 + $0x448] sm:$0xff] }
 0x199   :  { %4740 = vmatprep.subr.bf16.mxu0 %v13542_v4  ;;  %4912 = vmatprep.subr.bf16.mxu1 %v13543_v36  ;;  %v10373_v31 = vpack.c.bf16 %v757_v41, %v749_v55  ;;  %v2572_v11 = vcvt.s32.f32 %v1548_v1  ;;  %v1550_v61 = vunpack.c.2.s8 %v10307_v3  ;;  %v13546_v55 = vpack.c.bf16 %v9841_v42, %v9836_v56 }
 0x19a   :  { %v10378_v28 = vpack.c.bf16 %v758_v38, %v750_v47  ;;  %v10385_v46 = vmul.f32 %v9091_v21, %v2557_v40  ;;  %v10388_v19 = vmul.f32 %v9091_v21, %v2565_v15  ;;  %v13547_v2 = vpack.c.bf16 %v9849_v9, %v9844_v60  ;;  %v902_v40 = vld [vmem:[#allocation9 + $0x458] sm:$0xff] }
 0x19b   :  { %13544 = vst [vmem:[#allocation122_spill] sm:$0xff] %v10373_v31  ;;  %4741 = vmatpush1.bf16.msra.mxu0 %v13546_v55  ;;  %v2580_v47 = vcvt.s32.f32 %v1556_v22  ;;  %v10398_v41 = vmul.f32 %v9040_v5, %v2572_v11  ;;  %v2574_v58 = vcvt.s32.f32 %v1550_v61  ;;  %v1547_v34 = vunpack.c.2.s8 %v10313_v43  ;;  %v10438_v55 = vld [vmem:[#allocation9 + $0x440] sm:$0xff] }
 0x19c   :  { %13545 = vst [vmem:[#allocation123_spill] sm:$0xff] %v10378_v28  ;;  %4913 = vmatpush1.bf16.msra.mxu1 %v13547_v2  ;;  %v13548_v3 = vpack.c.bf16 %v9857_v35, %v9852_v20  ;;  %v13549_v56 = vpack.c.bf16 %v9863_v18, %v9860_v7  ;;  %v2582_v60 = vcvt.s32.f32 %v1558_v8  ;;  %v1555_v9 = vunpack.c.3.s8 %v10313_v43  ;;  %4770 = vmatprep.mubr.bf16.mxu0 %v10378_v28 }
 0x19d   :  { %v1549_v38 = vunpack.c.2.s8 %v10337_v32  ;;  %4942 = vmatprep.mubr.bf16.mxu1 %v10378_v28  ;;  %v10416_v1 = vmul.f32 %v9040_v5, %v2580_v47  ;;  %v10419_v20 = vmul.f32 %v9048_v13, %v2574_v58  ;;  %v2571_v35 = vcvt.s32.f32 %v1547_v34  ;;  %v13596_v28 = vld [vmem:[#allocation52_spill] sm:$0xff] }
 0x19e   :  { %4742 = vmatprep.subr.bf16.mxu0 %v13548_v3  ;;  %4914 = vmatprep.subr.bf16.mxu1 %v13549_v56  ;;  %v1557_v7 = vunpack.c.3.s8 %v10337_v32  ;;  %v10423_v18 = vmul.f32 %v9048_v13, %v2582_v60  ;;  %v2579_v4 = vcvt.s32.f32 %v1555_v9  ;;  %v1564_v36 = vunpack.c.0.s8 %v10401_v30  ;;  %v10457_v3 = vld [vmem:[#allocation9 + $0x450] sm:$0xff] }
 0x19f   :  { %v2573_v43 = vcvt.s32.f32 %v1549_v38  ;;  %v13550_v15 = vpack.c.bf16 %v9873_v62, %v9868_v12  ;;  %v13551_v22 = vpack.c.bf16 %v9881_v59, %v9876_v48  ;;  %v10435_v32 = vmul.f32 %v9054_v27, %v2571_v35  ;;  %v13591_v62 = vld [vmem:[#allocation47_spill] sm:$0xff] }
 0x1a0   :  { %v2581_v61 = vcvt.s32.f32 %v1557_v7  ;;  %v1572_v8 = vunpack.c.1.s8 %v10401_v30  ;;  %v13552_v2 = vpack.c.bf16 %v9889_v45, %v9884_v10  ;;  %v13553_v12 = vpack.c.bf16 %v9895_v53, %v9892_v63  ;;  %v13590_v63 = vld [vmem:[#allocation48_spill] sm:$0xff] }
 0x1a1   :  { %4743 = vmatpush1.bf16.msra.mxu0 %v13550_v15  ;;  %4915 = vmatpush1.bf16.msra.mxu1 %v13551_v22  ;;  %v10449_v48 = vmul.f32 %v9054_v27, %v2579_v4  ;;  %v10452_v59 = vmul.f32 %v9091_v21, %v2573_v43  ;;  %v2588_v47 = vcvt.s32.f32 %v1564_v36  ;;  %v1566_v10 = vunpack.c.0.s8 %v902_v40 }
 0x1a2   :  { %4744 = vmatprep.subr.bf16.mxu0 %v13552_v2  ;;  %4916 = vmatprep.subr.bf16.mxu1 %v13553_v12  ;;  %v10455_v58 = vmul.f32 %v9091_v21, %v2581_v61  ;;  %v2596_v34 = vcvt.s32.f32 %v1572_v8  ;;  %v1574_v45 = vunpack.c.1.s8 %v902_v40  ;;  %v1563_v56 = vunpack.c.0.s8 %v10438_v55  ;;  %v13558_v12 = vld [vmem:[#allocation35_spill] sm:$0xff] }
 0x1a3   :  { %v10462_v53 = vmul.f32 %v9040_v5, %v2588_v47  ;;  %v1571_v60 = vunpack.c.1.s8 %v10438_v55  ;;  %v13554_v9 = vpack.c.bf16 %v9905_v51, %v9900_v23  ;;  %v13555_v38 = vpack.c.bf16 %v9913_v50, %v9908_v26  ;;  %v13559_v47 = vld [vmem:[#allocation34_spill] sm:$0xff] }
 0x1a4   :  { %v10475_v7 = vmul.f32 %v9040_v5, %v2596_v34  ;;  %v2590_v4 = vcvt.s32.f32 %v1566_v10  ;;  %v2598_v43 = vcvt.s32.f32 %v1574_v45  ;;  %v13556_v36 = vpack.c.bf16 %v9921_v57, %v9916_v29  ;;  %v13561_v10 = vld [vmem:[#allocation36_spill] sm:$0xff]  ;;  %v13562_v45 = vld [vmem:[#allocation37_spill] sm:$0xff] }
 0x1a5   :  { %4745 = vmatpush1.bf16.msra.mxu0 %v13554_v9  ;;  %4917 = vmatpush1.bf16.msra.mxu1 %v13555_v38  ;;  %v13557_v23 = vpack.c.bf16 %v9927_v14, %v9924_v25  ;;  %v2587_v51 = vcvt.s32.f32 %v1563_v56  ;;  %v2595_v15 = vcvt.s32.f32 %v1571_v60  ;;  %v1565_v26 = vunpack.c.0.s8 %v10457_v3  ;;  %v13578_v60 = vld [vmem:[#allocation41_spill] sm:$0xff] }
 0x1a6   :  { %4746 = vmatprep.subr.bf16.mxu0 %v13556_v36  ;;  %v1573_v50 = vunpack.c.1.s8 %v10457_v3  ;;  %v10488_v61 = vmul.f32 %v9048_v13, %v2590_v4  ;;  %v10491_v8 = vmul.f32 %v9048_v13, %v2598_v43  ;;  %v1580_v29 = vunpack.c.2.s8 %v10401_v30  ;;  %v13564_v43 = vld [vmem:[#allocation33_spill] sm:$0xff]  ;;  %v13565_v36 = vld [vmem:[#allocation38_spill] sm:$0xff] }
 0x1a7   :  { %4918 = vmatprep.subr.bf16.mxu1 %v13557_v23  ;;  %v10495_v25 = vmul.f32 %v9054_v27, %v2587_v51  ;;  %v10498_v57 = vmul.f32 %v9054_v27, %v2595_v15  ;;  %v2589_v14 = vcvt.s32.f32 %v1565_v26  ;;  %v13560_v34 = vpack.c.bf16 %v13558_v12, %v13559_v47  ;;  %v13567_v51 = vld [vmem:[#allocation31_spill] sm:$0xff]  ;;  %v13568_v15 = vld [vmem:[#allocation32_spill] sm:$0xff] }
 0x1a8   :  { %v2597_v2 = vcvt.s32.f32 %v1573_v50  ;;  %v13563_v56 = vpack.c.bf16 %v13561_v10, %v13562_v45  ;;  %v1588_v9 = vunpack.c.3.s8 %v10401_v30  ;;  %v2604_v38 = vcvt.s32.f32 %v1580_v29  ;;  %v13577_v50 = vld [vmem:[#allocation42_spill] sm:$0xff] }
 0x1a9   :  { %4747 = vmatpush1.bf16.msra.mxu0 %v13560_v34  ;;  %v1582_v4 = vunpack.c.2.s8 %v902_v40  ;;  %v13566_v23 = vpack.c.bf16 %v13564_v43, %v13565_v36  ;;  %v13569_v26 = vpack.c.bf16 %v13567_v51, %v13568_v15  ;;  %v10518_v12 = vmul.f32 %v9091_v21, %v2589_v14  ;;  %v13571_v51 = vld [vmem:[#allocation39_spill] sm:$0xff] }
 0x1aa   :  { %4919 = vmatpush1.bf16.msra.mxu1 %v13563_v56  ;;  %v10521_v47 = vmul.f32 %v9091_v21, %v2597_v2  ;;  %v1590_v30 = vunpack.c.3.s8 %v902_v40  ;;  %v2612_v29 = vcvt.s32.f32 %v1588_v9  ;;  %v10524_v34 = vmul.f32 %v9040_v5, %v2604_v38  ;;  %v10527_v56 = vld [vmem:[#allocation9 + $0x488] sm:$0xff]  ;;  %v13570_v2 = vld [vmem:[#allocation30_spill] sm:$0xff]  ;;  %v13573_v9 = vld [vmem:[#allocation40_spill] sm:$0xff] }
 0x1ab   :  { %4748 = vmatprep.subr.bf16.mxu0 %v13566_v23  ;;  %4920 = vmatprep.subr.bf16.mxu1 %v13569_v26  ;;  %v2606_v10 = vcvt.s32.f32 %v1582_v4  ;;  %v1579_v45 = vunpack.c.2.s8 %v10438_v55  ;;  %v1587_v14 = vunpack.c.3.s8 %v10438_v55  ;;  %v1581_v23 = vunpack.c.2.s8 %v10457_v3  ;;  %v13574_v38 = vld [vmem:[#allocation29_spill] sm:$0xff] }
 0x1ac   :  { %v2614_v36 = vcvt.s32.f32 %v1590_v30  ;;  %v13572_v40 = vpack.c.bf16 %v13570_v2, %v13571_v51  ;;  %v13575_v15 = vpack.c.bf16 %v13573_v9, %v13574_v38  ;;  %v10540_v4 = vmul.f32 %v9040_v5, %v2612_v29  ;;  %v13580_v2 = vld [vmem:[#allocation44_spill] sm:$0xff]  ;;  %v13581_v51 = vld [vmem:[#allocation43_spill] sm:$0xff] }
 0x1ad   :  { %v10543_v26 = vmul.f32 %v9048_v13, %v2606_v10  ;;  %v2603_v43 = vcvt.s32.f32 %v1579_v45  ;;  %v1589_v30 = vunpack.c.3.s8 %v10457_v3  ;;  %v13579_v22 = vpack.c.bf16 %v13577_v50, %v13578_v60  ;;  %v10558_v45 = vld [vmem:[#allocation9 + $0x498] sm:$0xff] }
 0x1ae   :  { %4749 = vmatpush1.bf16.msra.mxu0 %v13572_v40  ;;  %4921 = vmatpush1.bf16.msra.mxu1 %v13575_v15  ;;  %v13582_v40 = vpack.c.bf16 %v13580_v2, %v13581_v51  ;;  %v10555_v9 = vmul.f32 %v9048_v13, %v2614_v36  ;;  %v2611_v29 = vcvt.s32.f32 %v1587_v14  ;;  %v2605_v38 = vcvt.s32.f32 %v1581_v23  ;;  %v10568_v2 = vld [vmem:[#allocation9 + $0x480] sm:$0xff] }
 0x1af   :  { %v10546_v55 = vpop.f32.mrb[4].mxu0  ;;  %4750 = vmatprep.subr.bf16.mxu0 %v13579_v22  ;;  %v1596_v10 = vunpack.c.0.s8 %v10527_v56  ;;  %v10565_v22 = vmul.f32 %v9054_v27, %v2603_v43  ;;  %v2613_v60 = vcvt.s32.f32 %v1589_v30  ;;  %v1604_v50 = vunpack.c.1.s8 %v10527_v56  ;;  %v13587_v43 = vld [vmem:[#allocation46_spill] sm:$0xff]  ;;  %v13588_v30 = vld [vmem:[#allocation45_spill] sm:$0xff] }
 0x1b0   :  { %13576 = vst [vmem:[#allocation35_spill] sm:$0xff] %v10546_v55  ;;  %4922 = vmatprep.subr.bf16.mxu1 %v13582_v40  ;;  %v10560_v3 = vpop.f32.mrb[5].mxu0  ;;  %v10575_v23 = vmul.f32 %v9054_v27, %v2611_v29  ;;  %v10578_v51 = vmul.f32 %v9091_v21, %v2605_v38  ;;  %v13589_v35 = vpack.c.bf16 %v13587_v43, %v13588_v30  ;;  %v1598_v29 = vunpack.c.0.s8 %v10558_v45  ;;  %v13597_v43 = vld [vmem:[#allocation51_spill] sm:$0xff] }
 0x1b1   :  { %13583 = vst [vmem:[#allocation34_spill] sm:$0xff] %v10560_v3  ;;  %v10570_v36 = vpop.f32.mrb[6].mxu0  ;;  %v2620_v40 = vcvt.s32.f32 %v1596_v10  ;;  %v13592_v11 = vpack.c.bf16 %v13590_v63, %v13591_v62  ;;  %v10589_v42 = vmul.f32 %v9091_v21, %v2613_v60  ;;  %v2628_v14 = vcvt.s32.f32 %v1604_v50  ;;  %v13593_v10 = vld [vmem:[#allocation50_spill] sm:$0xff] }
 0x1b2   :  { %13584 = vst [vmem:[#allocation36_spill] sm:$0xff] %v10570_v36  ;;  %13585 = vst [vmem:[#allocation37_spill] sm:$0xff] %v10578_v51  ;;  %v10580_v15 = vpop.f32.mrb[7].mxu0  ;;  %4751 = vmatpush1.bf16.msra.mxu0 %v13589_v35  ;;  %v1606_v38 = vunpack.c.1.s8 %v10558_v45  ;;  %v13595_v49 = vpack.c.bf16 %v13593_v10, %v13594_v33  ;;  %v13598_v35 = vpack.c.bf16 %v13596_v28, %v13597_v43  ;;  %v1595_v63 = vunpack.c.0.s8 %v10568_v2  ;;  %v13663_v51 = vld [vmem:[#allocation83_spill] sm:$0xff] }
 0x1b3   :  { %13586 = vst [vmem:[#allocation33_spill] sm:$0xff] %v10580_v15  ;;  %4923 = vmatpush1.bf16.msra.mxu1 %v13592_v11  ;;  %v10602_v62 = vmul.f32 %v9040_v5, %v2620_v40  ;;  %v1603_v60 = vunpack.c.1.s8 %v10568_v2  ;;  %v10609_v33 = vmul.f32 %v9040_v5, %v2628_v14  ;;  %v1597_v43 = vunpack.c.0.s8 %v909_v44  ;;  %v13601_v11 = vld [vmem:[#allocation54_spill] sm:$0xff]  ;;  %v13605_v15 = vld [vmem:[#allocation55_spill] sm:$0xff] }
 0x1b4   :  { %4752 = vmatprep.subr.bf16.mxu0 %v13595_v49  ;;  %4924 = vmatprep.subr.bf16.mxu1 %v13598_v35  ;;  %v2622_v49 = vcvt.s32.f32 %v1598_v29  ;;  %v2630_v30 = vcvt.s32.f32 %v1606_v38  ;;  %v2619_v28 = vcvt.s32.f32 %v1595_v63  ;;  %v1605_v35 = vunpack.c.1.s8 %v909_v44  ;;  %v13609_v63 = vld [vmem:[#allocation58_spill] sm:$0xff] }
 0x1b5   :  { %13599 = vst [vmem:[#allocation38_spill] sm:$0xff] %v10602_v62  ;;  %13600 = vst [vmem:[#allocation31_spill] sm:$0xff] %v10609_v33  ;;  %v2627_v10 = vcvt.s32.f32 %v1603_v60  ;;  %v13603_v40 = vpack.c.bf16 %v13601_v11, %v13602_v0  ;;  %v13606_v36 = vpack.c.bf16 %v13604_v16, %v13605_v15  ;;  %v1612_v38 = vunpack.c.2.s8 %v10527_v56  ;;  %v13610_v60 = vld [vmem:[#allocation57_spill] sm:$0xff]  ;;  %v13612_v0 = vld [vmem:[#allocation60_spill] sm:$0xff] }
 0x1b6   :  { %v10620_v14 = vmul.f32 %v9048_v13, %v2622_v49  ;;  %v10623_v29 = vmul.f32 %v9048_v13, %v2630_v30  ;;  %v13611_v3 = vpack.c.bf16 %v13609_v63, %v13610_v60  ;;  %v13613_v11 = vld [vmem:[#allocation59_spill] sm:$0xff]  ;;  %v10633_v16 = vmul.f32 %v9054_v27, %v2619_v28  ;;  %v13662_v33 = vld [vmem:[#allocation84_spill] sm:$0xff] }
 0x1b7   :  { %4753 = vmatpush1.bf16.msra.mxu0 %v13603_v40  ;;  %4925 = vmatpush1.bf16.msra.mxu1 %v13606_v36  ;;  %v13614_v40 = vpack.c.bf16 %v13612_v0, %v13613_v11  ;;  %v10636_v15 = vmul.f32 %v9054_v27, %v2627_v10  ;;  %v2621_v36 = vcvt.s32.f32 %v1597_v43  ;;  %v2629_v49 = vcvt.s32.f32 %v1605_v35  ;;  %v13619_v43 = vld [vmem:[#allocation62_spill] sm:$0xff]  ;;  %v13620_v35 = vld [vmem:[#allocation61_spill] sm:$0xff]  ;;  %v13622_v11 = vld [vmem:[#allocation64_spill] sm:$0xff] }
 0x1b8   :  { %13607 = vst [vmem:[#allocation32_spill] sm:$0xff] %v10620_v14  ;;  %13608 = vst [vmem:[#allocation30_spill] sm:$0xff] %v10623_v29  ;;  %4754 = vmatprep.subr.bf16.mxu0 %v13611_v3  ;;  %v1620_v50 = vunpack.c.3.s8 %v10527_v56  ;;  %v2636_v55 = vcvt.s32.f32 %v1612_v38  ;;  %v1614_v3 = vunpack.c.2.s8 %v10558_v45  ;;  %v1622_v10 = vunpack.c.3.s8 %v10558_v45  ;;  %v13623_v56 = vld [vmem:[#allocation63_spill] sm:$0xff]  ;;  %v13629_v14 = vld [vmem:[#allocation68_spill] sm:$0xff] }
 0x1b9   :  { %4926 = vmatprep.subr.bf16.mxu1 %v13614_v40  ;;  %13615 = vst [vmem:[#allocation39_spill] sm:$0xff] %v10633_v16  ;;  %13616 = vst [vmem:[#allocation40_spill] sm:$0xff] %v10636_v15  ;;  %v10645_v60 = vmul.f32 %v9091_v21, %v2621_v36  ;;  %v10648_v28 = vmul.f32 %v9091_v21, %v2629_v49  ;;  %v13621_v0 = vpack.c.bf16 %v13619_v43, %v13620_v35  ;;  %v10661_v16 = vld [vmem:[#allocation9 + $0x4c8] sm:$0xff]  ;;  %v13626_v49 = vld [vmem:[#allocation66_spill] sm:$0xff] }
 0x1ba   :  { %v13624_v38 = vpack.c.bf16 %v13622_v11, %v13623_v56  ;;  %v2644_v40 = vcvt.s32.f32 %v1620_v50  ;;  %v10658_v30 = vmul.f32 %v9040_v5, %v2636_v55  ;;  %v2638_v63 = vcvt.s32.f32 %v1614_v3  ;;  %v13627_v15 = vld [vmem:[#allocation65_spill] sm:$0xff]  ;;  %v13630_v43 = vld [vmem:[#allocation67_spill] sm:$0xff] }
 0x1bb   :  { %13617 = vst [vmem:[#allocation29_spill] sm:$0xff] %v10645_v60  ;;  %13618 = vst [vmem:[#allocation42_spill] sm:$0xff] %v10648_v28  ;;  %4755 = vmatpush1.bf16.msra.mxu0 %v13621_v0  ;;  %v1611_v36 = vunpack.c.2.s8 %v10568_v2  ;;  %v13628_v45 = vpack.c.bf16 %v13626_v49, %v13627_v15  ;;  %v13631_v35 = vpack.c.bf16 %v13629_v14, %v13630_v43  ;;  %v2646_v50 = vcvt.s32.f32 %v1622_v10  ;;  %v13635_v10 = vld [vmem:[#allocation70_spill] sm:$0xff]  ;;  %v13636_v0 = vld [vmem:[#allocation69_spill] sm:$0xff] }
 0x1bc   :  { %4927 = vmatpush1.bf16.msra.mxu1 %v13624_v38  ;;  %13625 = vst [vmem:[#allocation41_spill] sm:$0xff] %v10658_v30  ;;  %v1619_v55 = vunpack.c.3.s8 %v10568_v2  ;;  %v1613_v11 = vunpack.c.2.s8 %v909_v44  ;;  %v10673_v3 = vmul.f32 %v9040_v5, %v2644_v40  ;;  %v10676_v56 = vmul.f32 %v9048_v13, %v2638_v63  ;;  %v13638_v60 = vld [vmem:[#allocation72_spill] sm:$0xff]  ;;  %v13639_v40 = vld [vmem:[#allocation71_spill] sm:$0xff]  ;;  %v13643_v29 = vld [vmem:[#allocation73_spill] sm:$0xff] }
 0x1bd   :  { %4756 = vmatprep.subr.bf16.mxu0 %v13628_v45  ;;  %4928 = vmatprep.subr.bf16.mxu1 %v13631_v35  ;;  %v2635_v38 = vcvt.s32.f32 %v1611_v36  ;;  %v1621_v15 = vunpack.c.3.s8 %v909_v44  ;;  %v10679_v49 = vmul.f32 %v9048_v13, %v2646_v50  ;;  %v1628_v43 = vunpack.c.0.s8 %v10661_v16  ;;  %v918_v35 = vld [vmem:[#allocation9 + $0x4d8] sm:$0xff] }
 0x1be   :  { %13632 = vst [vmem:[#allocation44_spill] sm:$0xff] %v10673_v3  ;;  %13633 = vst [vmem:[#allocation43_spill] sm:$0xff] %v10676_v56  ;;  %v2643_v14 = vcvt.s32.f32 %v1619_v55  ;;  %v2637_v45 = vcvt.s32.f32 %v1613_v11  ;;  %v13637_v2 = vpack.c.bf16 %v13635_v10, %v13636_v0  ;;  %v13640_v28 = vpack.c.bf16 %v13638_v60, %v13639_v40  ;;  %v10694_v55 = vld [vmem:[#allocation9 + $0x4c0] sm:$0xff]  ;;  %v13645_v0 = vld [vmem:[#allocation76_spill] sm:$0xff] }
 0x1bf   :  { %13634 = vst [vmem:[#allocation46_spill] sm:$0xff] %v10679_v49  ;;  %v10691_v44 = vmul.f32 %v9054_v27, %v2635_v38  ;;  %v2645_v36 = vcvt.s32.f32 %v1621_v15  ;;  %v1636_v50 = vunpack.c.1.s8 %v10661_v16  ;;  %v13642_v11 = vld [vmem:[#allocation74_spill] sm:$0xff]  ;;  %v13646_v10 = vld [vmem:[#allocation75_spill] sm:$0xff]  ;;  %v2652_v15 = vcvt.s32.f32 %v1628_v43  ;;  %v13653_v60 = vld [vmem:[#allocation77_spill] sm:$0xff] }
 0x1c0   :  { %4757 = vmatpush1.bf16.msra.mxu0 %v13637_v2  ;;  %4929 = vmatpush1.bf16.msra.mxu1 %v13640_v28  ;;  %v13644_v62 = vpack.c.bf16 %v13642_v11, %v13643_v29  ;;  %v13647_v2 = vpack.c.bf16 %v13645_v0, %v13646_v10  ;;  %v10705_v28 = vmul.f32 %v9054_v27, %v2643_v14  ;;  %v1630_v29 = vunpack.c.0.s8 %v918_v35  ;;  %v917_v11 = vld [vmem:[#allocation9 + $0x4d0] sm:$0xff]  ;;  %v13656_v56 = vld [vmem:[#allocation79_spill] sm:$0xff]  ;;  %v13660_v30 = vld [vmem:[#allocation81_spill] sm:$0xff] }
 0x1c1   :  { %13641 = vst [vmem:[#allocation45_spill] sm:$0xff] %v10691_v44  ;;  %v10708_v38 = vmul.f32 %v9091_v21, %v2637_v45  ;;  %v10711_v40 = vmul.f32 %v9091_v21, %v2645_v36  ;;  %v2660_v63 = vcvt.s32.f32 %v1636_v50  ;;  %v10716_v10 = vmul.f32 %v9040_v5, %v2652_v15  ;;  %v13652_v45 = vld [vmem:[#allocation78_spill] sm:$0xff]  ;;  %v13655_v36 = vld [vmem:[#allocation80_spill] sm:$0xff] }
 0x1c2   :  { %4758 = vmatprep.subr.bf16.mxu0 %v13644_v62  ;;  %4930 = vmatprep.subr.bf16.mxu1 %v13647_v2  ;;  %13648 = vst [vmem:[#allocation48_spill] sm:$0xff] %v10705_v28  ;;  %v1638_v62 = vunpack.c.1.s8 %v918_v35  ;;  %v1627_v14 = vunpack.c.0.s8 %v10694_v55  ;;  %v1635_v2 = vunpack.c.1.s8 %v10694_v55  ;;  %v13654_v43 = vpack.c.bf16 %v13652_v45, %v13653_v60  ;;  %v13659_v28 = vld [vmem:[#allocation82_spill] sm:$0xff] }
 0x1c3   :  { %13649 = vst [vmem:[#allocation47_spill] sm:$0xff] %v10708_v38  ;;  %13650 = vst [vmem:[#allocation50_spill] sm:$0xff] %v10711_v40  ;;  %v13657_v50 = vpack.c.bf16 %v13655_v36, %v13656_v56  ;;  %v10729_v0 = vmul.f32 %v9040_v5, %v2660_v63  ;;  %v2654_v15 = vcvt.s32.f32 %v1630_v29  ;;  %v13661_v3 = vpack.c.bf16 %v13659_v28, %v13660_v30 }
 0x1c4   :  { %13651 = vst [vmem:[#allocation49_spill] sm:$0xff] %v10716_v10  ;;  %4759 = vmatpush1.bf16.msra.mxu0 %v13654_v43  ;;  %v2662_v44 = vcvt.s32.f32 %v1638_v62  ;;  %v13664_v60 = vpack.c.bf16 %v13662_v33, %v13663_v51  ;;  %v2651_v45 = vcvt.s32.f32 %v1627_v14  ;;  %v2659_v43 = vcvt.s32.f32 %v1635_v2  ;;  %v13667_v62 = vld [vmem:[#allocation86_spill] sm:$0xff]  ;;  %v13668_v14 = vld [vmem:[#allocation85_spill] sm:$0xff] }
 0x1c5   :  { %4931 = vmatpush1.bf16.msra.mxu1 %v13657_v50  ;;  %13658 = vst [vmem:[#allocation52_spill] sm:$0xff] %v10729_v0  ;;  %4760 = vmatprep.subr.bf16.mxu0 %v13661_v3  ;;  %v1629_v56 = vunpack.c.0.s8 %v917_v11  ;;  %v1637_v36 = vunpack.c.1.s8 %v917_v11  ;;  %v10740_v63 = vmul.f32 %v9048_v13, %v2654_v15  ;;  %v1644_v30 = vunpack.c.2.s8 %v10661_v16  ;;  %v13671_v15 = vld [vmem:[#allocation87_spill] sm:$0xff]  ;;  %v13673_v0 = vld [vmem:[#allocation90_spill] sm:$0xff] }
 0x1c6   :  { %4932 = vmatprep.subr.bf16.mxu1 %v13664_v60  ;;  %v10743_v29 = vmul.f32 %v9048_v13, %v2662_v44  ;;  %v10747_v3 = vmul.f32 %v9054_v27, %v2651_v45  ;;  %v10750_v51 = vmul.f32 %v9054_v27, %v2659_v43  ;;  %v13669_v2 = vpack.c.bf16 %v13667_v62, %v13668_v14  ;;  %v13670_v60 = vld [vmem:[#allocation88_spill] sm:$0xff]  ;;  %v13674_v43 = vld [vmem:[#allocation89_spill] sm:$0xff] }
 0x1c7   :  { %v2653_v33 = vcvt.s32.f32 %v1629_v56  ;;  %v2661_v28 = vcvt.s32.f32 %v1637_v36  ;;  %v13672_v50 = vpack.c.bf16 %v13670_v60, %v13671_v15  ;;  %v1652_v49 = vunpack.c.3.s8 %v10661_v16  ;;  %v13676_v56 = vld [vmem:[#allocation92_spill] sm:$0xff]  ;;  %v13677_v36 = vld [vmem:[#allocation91_spill] sm:$0xff] }
 0x1c8   :  { %13665 = vst [vmem:[#allocation51_spill] sm:$0xff] %v10747_v3  ;;  %13666 = vst [vmem:[#allocation54_spill] sm:$0xff] %v10750_v51  ;;  %4761 = vmatpush1.bf16.msra.mxu0 %v13669_v2  ;;  %v2668_v45 = vcvt.s32.f32 %v1644_v30  ;;  %v1646_v10 = vunpack.c.2.s8 %v918_v35  ;;  %v13675_v38 = vpack.c.bf16 %v13673_v0, %v13674_v43  ;;  %v13678_v40 = vpack.c.bf16 %v13676_v56, %v13677_v36  ;;  %v10779_v60 = vld [vmem:[#allocation9 + $0x508] sm:$0xff]  ;;  %v13682_v56 = vld [vmem:[#allocation94_spill] sm:$0xff] }
 0x1c9   :  { %4933 = vmatpush1.bf16.msra.mxu1 %v13672_v50  ;;  %v10770_v50 = vmul.f32 %v9091_v21, %v2653_v33  ;;  %v10773_v14 = vmul.f32 %v9091_v21, %v2661_v28  ;;  %v1654_v16 = vunpack.c.3.s8 %v918_v35  ;;  %v2676_v30 = vcvt.s32.f32 %v1652_v49  ;;  %v13683_v28 = vld [vmem:[#allocation93_spill] sm:$0xff]  ;;  %v13685_v49 = vld [vmem:[#allocation96_spill] sm:$0xff]  ;;  %v13686_v35 = vld [vmem:[#allocation95_spill] sm:$0xff] }
 0x1ca   :  { %4762 = vmatprep.subr.bf16.mxu0 %v13675_v38  ;;  %4934 = vmatprep.subr.bf16.mxu1 %v13678_v40  ;;  %v10776_v2 = vmul.f32 %v9040_v5, %v2668_v45  ;;  %v2670_v0 = vcvt.s32.f32 %v1646_v10  ;;  %v1643_v38 = vunpack.c.2.s8 %v10694_v55  ;;  %v1651_v33 = vunpack.c.3.s8 %v10694_v55  ;;  %v13694_v3 = vld [vmem:[#allocation99_spill] sm:$0xff] }
 0x1cb   :  { %13679 = vst [vmem:[#allocation53_spill] sm:$0xff] %v10770_v50  ;;  %13680 = vst [vmem:[#allocation56_spill] sm:$0xff] %v10773_v14  ;;  %v2678_v15 = vcvt.s32.f32 %v1654_v16  ;;  %v1645_v43 = vunpack.c.2.s8 %v917_v11  ;;  %v13684_v36 = vpack.c.bf16 %v13682_v56, %v13683_v28  ;;  %v13687_v45 = vpack.c.bf16 %v13685_v49, %v13686_v35  ;;  %v13690_v16 = vld [vmem:[#allocation98_spill] sm:$0xff]  ;;  %v13691_v50 = vld [vmem:[#allocation97_spill] sm:$0xff] }
 0x1cc   :  { %13681 = vst [vmem:[#allocation55_spill] sm:$0xff] %v10776_v2  ;;  %v10791_v10 = vmul.f32 %v9040_v5, %v2676_v30  ;;  %v10794_v62 = vmul.f32 %v9048_v13, %v2670_v0  ;;  %v2667_v44 = vcvt.s32.f32 %v1643_v38  ;;  %v1653_v40 = vunpack.c.3.s8 %v917_v11  ;;  %v13693_v14 = vld [vmem:[#allocation100_spill] sm:$0xff]  ;;  %v926_v35 = vld [vmem:[#allocation9 + $0x518] sm:$0xff] }
 0x1cd   :  { %4763 = vmatpush1.bf16.msra.mxu0 %v13684_v36  ;;  %4935 = vmatpush1.bf16.msra.mxu1 %v13687_v45  ;;  %v13692_v55 = vpack.c.bf16 %v13690_v16, %v13691_v50  ;;  %v13695_v56 = vpack.c.bf16 %v13693_v14, %v13694_v3  ;;  %v10803_v28 = vmul.f32 %v9048_v13, %v2678_v15  ;;  %v2675_v36 = vcvt.s32.f32 %v1651_v33  ;;  %v10812_v45 = vld [vmem:[#allocation9 + $0x500] sm:$0xff]  ;;  %v13701_v16 = vld [vmem:[#allocation101_spill] sm:$0xff] }
 0x1ce   :  { %13688 = vst [vmem:[#allocation58_spill] sm:$0xff] %v10791_v10  ;;  %13689 = vst [vmem:[#allocation57_spill] sm:$0xff] %v10794_v62  ;;  %v2669_v49 = vcvt.s32.f32 %v1645_v43  ;;  %v1660_v30 = vunpack.c.0.s8 %v10779_v60  ;;  %v10809_v11 = vmul.f32 %v9054_v27, %v2667_v44  ;;  %v2677_v50 = vcvt.s32.f32 %v1653_v40  ;;  %v13700_v43 = vld [vmem:[#allocation102_spill] sm:$0xff]  ;;  %v13703_v44 = vld [vmem:[#allocation104_spill] sm:$0xff] }
 0x1cf   :  { %4764 = vmatprep.subr.bf16.mxu0 %v13692_v55  ;;  %4936 = vmatprep.subr.bf16.mxu1 %v13695_v56  ;;  %13696 = vst [vmem:[#allocation60_spill] sm:$0xff] %v10803_v28  ;;  %v1668_v38 = vunpack.c.1.s8 %v10779_v60  ;;  %v10817_v14 = vmul.f32 %v9054_v27, %v2675_v36  ;;  %v13702_v55 = vpack.c.bf16 %v13700_v43, %v13701_v16  ;;  %v13704_v40 = vld [vmem:[#allocation103_spill] sm:$0xff]  ;;  %v1662_v3 = vunpack.c.0.s8 %v926_v35  ;;  %v10831_v36 = vld [vmem:[#allocation9 + $0x510] sm:$0xff]  ;;  %v13706_v28 = vld [vmem:[#allocation106_spill] sm:$0xff] }
 0x1d0   :  { %13697 = vst [vmem:[#allocation59_spill] sm:$0xff] %v10809_v11  ;;  %v10820_v15 = vmul.f32 %v9091_v21, %v2669_v49  ;;  %v2684_v33 = vcvt.s32.f32 %v1660_v30  ;;  %v13705_v56 = vpack.c.bf16 %v13703_v44, %v13704_v40  ;;  %v10829_v0 = vmul.f32 %v9091_v21, %v2677_v50  ;;  %v13707_v49 = vld [vmem:[#allocation105_spill] sm:$0xff]  ;;  %v13709_v30 = vld [vmem:[#allocation107_spill] sm:$0xff]  ;;  %v13719_v44 = vld [vmem:[#allocation112_spill] sm:$0xff] }
 0x1d1   :  { %13698 = vst [vmem:[#allocation62_spill] sm:$0xff] %v10817_v14  ;;  %4765 = vmatpush1.bf16.msra.mxu0 %v13702_v55  ;;  %v2692_v2 = vcvt.s32.f32 %v1668_v38  ;;  %v1670_v62 = vunpack.c.1.s8 %v926_v35  ;;  %v13708_v10 = vpack.c.bf16 %v13706_v28, %v13707_v49  ;;  %v13710_v43 = vpack.c.bf16 %v10257_v39, %v13709_v30  ;;  %v13715_v11 = vld [vmem:[#allocation111_spill] sm:$0xff]  ;;  %v13716_v14 = vld [vmem:[#allocation110_spill] sm:$0xff] }
 0x1d2   :  { %13699 = vst [vmem:[#allocation61_spill] sm:$0xff] %v10820_v15  ;;  %4937 = vmatpush1.bf16.msra.mxu1 %v13705_v56  ;;  %v10842_v55 = vmul.f32 %v9040_v5, %v2684_v33  ;;  %v1659_v50 = vunpack.c.0.s8 %v10812_v45  ;;  %v1667_v38 = vunpack.c.1.s8 %v10812_v45  ;;  %v1661_v49 = vunpack.c.0.s8 %v10831_v36  ;;  %v13712_v33 = vld [vmem:[#allocation109_spill] sm:$0xff] }
 0x1d3   :  { %4766 = vmatprep.subr.bf16.mxu0 %v13708_v10  ;;  %4938 = vmatprep.subr.bf16.mxu1 %v13710_v43  ;;  %v10849_v28 = vmul.f32 %v9040_v5, %v2692_v2  ;;  %v2686_v10 = vcvt.s32.f32 %v1662_v3  ;;  %v2694_v40 = vcvt.s32.f32 %v1670_v62  ;;  %v1669_v30 = vunpack.c.1.s8 %v10831_v36  ;;  %v13713_v43 = vld [vmem:[#allocation108_spill] sm:$0xff] }
 0x1d4   :  { %13711 = vst [vmem:[#allocation64_spill] sm:$0xff] %v10842_v55  ;;  %v2683_v39 = vcvt.s32.f32 %v1659_v50  ;;  %v2691_v56 = vcvt.s32.f32 %v1667_v38  ;;  %v13714_v16 = vpack.c.bf16 %v13712_v33, %v13713_v43  ;;  %v13717_v51 = vpack.c.bf16 %v13715_v11, %v13716_v14  ;;  %v13718_v38 = vld [vmem:[#allocation113_spill] sm:$0xff]  ;;  %v13722_v33 = vld [vmem:[#allocation114_spill] sm:$0xff] }
 0x1d5   :  { %v10862_v3 = vmul.f32 %v9048_v13, %v2686_v10  ;;  %v10865_v62 = vmul.f32 %v9048_v13, %v2694_v40  ;;  %v1676_v50 = vunpack.c.2.s8 %v10779_v60  ;;  %v13720_v15 = vpack.c.bf16 %v13718_v38, %v13719_v44 }
 0x1d6   :  { %4767 = vmatpush1.bf16.msra.mxu0 %v13714_v16  ;;  %4939 = vmatpush1.bf16.msra.mxu1 %v13717_v51  ;;  %v13721_v16 = vld [vmem:[#allocation115_spill] sm:$0xff]  ;;  %v10875_v51 = vmul.f32 %v9054_v27, %v2683_v39  ;;  %v10878_v11 = vmul.f32 %v9054_v27, %v2691_v56  ;;  %v2685_v14 = vcvt.s32.f32 %v1661_v49  ;;  %v2693_v10 = vcvt.s32.f32 %v1669_v30  ;;  %v13726_v49 = vld [vmem:[#allocation116_spill] sm:$0xff] }
 0x1d7   :  { %4768 = vmatprep.subr.bf16.mxu0 %v13720_v15  ;;  %v13723_v43 = vpack.c.bf16 %v13721_v16, %v13722_v33  ;;  %v1684_v2 = vunpack.c.3.s8 %v10779_v60  ;;  %v2700_v55 = vcvt.s32.f32 %v1676_v50  ;;  %v1678_v44 = vunpack.c.2.s8 %v926_v35  ;;  %v13725_v16 = vld [vmem:[#allocation117_spill] sm:$0xff]  ;;  %v13728_v33 = vld [vmem:[#allocation119_spill] sm:$0xff] }
 0x1d8   :  { %13724 = vst [vmem:[#allocation63_spill] sm:$0xff] %v10875_v51  ;;  %v10886_v38 = vmul.f32 %v9091_v21, %v2685_v14  ;;  %v10889_v39 = vmul.f32 %v9091_v21, %v2693_v10  ;;  %v1686_v56 = vunpack.c.3.s8 %v926_v35  ;;  %v13727_v30 = vpack.c.bf16 %v13725_v16, %v13726_v49  ;;  %v10901_v51 = vld [vmem:[#allocation9 + $0x548] sm:$0xff] }
 0x1d9   :  { %4940 = vmatprep.subr.bf16.mxu1 %v13723_v43  ;;  %v13729_v43 = vld [vmem:[#allocation118_spill] sm:$0xff]  ;;  %v2708_v60 = vcvt.s32.f32 %v1684_v2  ;;  %v10898_v50 = vmul.f32 %v9040_v5, %v2700_v55  ;;  %v2702_v15 = vcvt.s32.f32 %v1678_v44  ;;  %v1675_v14 = vunpack.c.2.s8 %v10812_v45 }
 0x1da   :  { %4769 = vmatpush1.bf16.msra.mxu0 %v13727_v30  ;;  %v13730_v40 = vpack.c.bf16 %v13728_v33, %v13729_v43  ;;  %v13731_v35 = vpack.c.bf16 %v10331_v52, %v10324_v54  ;;  %v13732_v10 = vpack.c.bf16 %v10349_v24, %v10343_v37  ;;  %v2710_v2 = vcvt.s32.f32 %v1686_v56  ;;  %v934_v30 = vld [vmem:[#allocation9 + $0x558] sm:$0xff] }
 0x1db   :  { %v1683_v55 = vunpack.c.3.s8 %v10812_v45  ;;  %v1677_v44 = vunpack.c.2.s8 %v10831_v36  ;;  %v10914_v16 = vmul.f32 %v9040_v5, %v2708_v60  ;;  %v10917_v49 = vmul.f32 %v9048_v13, %v2702_v15 }
 0x1dc   :  { %4941 = vmatpush1.bf16.msra.mxu1 %v13730_v40  ;;  %4781 = vmatprep.subr.bf16.mxu0 %v13731_v35  ;;  %v2699_v54 = vcvt.s32.f32 %v1675_v14  ;;  %v1685_v52 = vunpack.c.3.s8 %v10831_v36  ;;  %v10923_v37 = vmul.f32 %v9048_v13, %v2710_v2  ;;  %v1692_v56 = vunpack.c.0.s8 %v10901_v51  ;;  %v10938_v35 = vld [vmem:[#allocation9 + $0x540] sm:$0xff]  ;;  %v13774_v40 = vld [vmem:[#allocation47_spill] sm:$0xff] }
 0x1dd   :  { %4953 = vmatprep.subr.bf16.mxu1 %v13732_v10  ;;  %4771 = vmatmul.mubr.bf16.vlgmr.msra.gmra.mrb[8].mxu0 %v10373_v31  ;;  %v2707_v24 = vcvt.s32.f32 %v1683_v55  ;;  %v2701_v45 = vcvt.s32.f32 %v1677_v44  ;;  %v13733_v33 = vpack.c.bf16 %v10376_v17, %v10364_v6  ;;  %v13734_v15 = vpack.c.bf16 %v10388_v19, %v10385_v46  ;;  %v13771_v17 = vld [vmem:[#allocation45_spill] sm:$0xff] }
 0x1de   :  { %v10935_v43 = vmul.f32 %v9054_v27, %v2699_v54  ;;  %v2709_v60 = vcvt.s32.f32 %v1685_v52  ;;  %v1700_v14 = vunpack.c.1.s8 %v10901_v51  ;;  %v13735_v10 = vpack.c.bf16 %v10416_v1, %v10398_v41  ;;  %v10957_v54 = vld [vmem:[#allocation9 + $0x550] sm:$0xff] }
 0x1df   :  { %4943 = vmatmul.mubr.bf16.vlgmr.msra.gmra.mrb[8].mxu1 %v10373_v31  ;;  %4782 = vmatpush1.bf16.msra.mxu0 %v13733_v33  ;;  %v13736_v6 = vpack.c.bf16 %v10423_v18, %v10419_v20  ;;  %v10949_v46 = vmul.f32 %v9054_v27, %v2707_v24  ;;  %v10952_v19 = vmul.f32 %v9091_v21, %v2701_v45  ;;  %v2716_v2 = vcvt.s32.f32 %v1692_v56  ;;  %v13770_v20 = vld [vmem:[#allocation48_spill] sm:$0xff] }
 0x1e0   :  { %4954 = vmatpush1.bf16.msra.mxu1 %v13734_v15  ;;  %4783 = vmatprep.subr.bf16.mxu0 %v13735_v10  ;;  %v10955_v55 = vmul.f32 %v9091_v21, %v2709_v60  ;;  %v2724_v44 = vcvt.s32.f32 %v1700_v14  ;;  %v1694_v41 = vunpack.c.0.s8 %v934_v30  ;;  %v1702_v1 = vunpack.c.1.s8 %v934_v30 }
 0x1e1   :  { %4955 = vmatprep.subr.bf16.mxu1 %v13736_v6  ;;  %v10962_v18 = vmul.f32 %v9040_v5, %v2716_v2  ;;  %v1691_v52 = vunpack.c.0.s8 %v10938_v35  ;;  %v1699_v24 = vunpack.c.1.s8 %v10938_v35  ;;  %v13737_v45 = vpack.c.bf16 %v10449_v48, %v10435_v32 }
 0x1e2   :  { %v13738_v56 = vpack.c.bf16 %v10455_v58, %v10452_v59  ;;  %v10975_v15 = vmul.f32 %v9040_v5, %v2724_v44  ;;  %v2718_v60 = vcvt.s32.f32 %v1694_v41  ;;  %v2726_v14 = vcvt.s32.f32 %v1702_v1 }
 0x1e3   :  { %4784 = vmatpush1.bf16.msra.mxu0 %v13737_v45  ;;  %v13739_v10 = vpack.c.bf16 %v10475_v7, %v10462_v53  ;;  %v13740_v32 = vpack.c.bf16 %v10491_v8, %v10488_v61  ;;  %v2715_v48 = vcvt.s32.f32 %v1691_v52  ;;  %v2723_v6 = vcvt.s32.f32 %v1699_v24  ;;  %v11089_v45 = vld [vmem:[#allocation9 + $0x590] sm:$0xff] }
 0x1e4   :  { %4956 = vmatpush1.bf16.msra.mxu1 %v13738_v56  ;;  %v1693_v59 = vunpack.c.0.s8 %v10957_v54  ;;  %v1701_v58 = vunpack.c.1.s8 %v10957_v54  ;;  %v10988_v44 = vmul.f32 %v9048_v13, %v2718_v60  ;;  %v10991_v41 = vmul.f32 %v9048_v13, %v2726_v14 }
 0x1e5   :  { %4785 = vmatprep.subr.bf16.mxu0 %v13739_v10  ;;  %4957 = vmatprep.subr.bf16.mxu1 %v13740_v32  ;;  %v1708_v53 = vunpack.c.2.s8 %v10901_v51  ;;  %v10995_v7 = vmul.f32 %v9054_v27, %v2715_v48  ;;  %v10998_v61 = vmul.f32 %v9054_v27, %v2723_v6  ;;  %v13741_v52 = vpack.c.bf16 %v10498_v57, %v10495_v25  ;;  %v11009_v10 = vpop.f32.mrb[4].mxu1 }
 0x1e6   :  { %v2717_v8 = vcvt.s32.f32 %v1693_v59  ;;  %v2725_v1 = vcvt.s32.f32 %v1701_v58  ;;  %v13742_v24 = vpack.c.bf16 %v10521_v47, %v10518_v12  ;;  %v1716_v56 = vunpack.c.3.s8 %v10901_v51  ;;  %13743 = vst [vmem:[#allocation66_spill] sm:$0xff] %v11009_v10  ;;  %v11029_v59 = vld [vmem:[#allocation9 + $0x588] sm:$0xff] }
 0x1e7   :  { %4786 = vmatpush1.bf16.msra.mxu0 %v13741_v52  ;;  %v2732_v60 = vcvt.s32.f32 %v1708_v53  ;;  %v1710_v14 = vunpack.c.2.s8 %v934_v30  ;;  %v13744_v32 = vpack.c.bf16 %v10540_v4, %v10524_v34  ;;  %v13745_v25 = vpack.c.bf16 %v10555_v9, %v10543_v26 }
 0x1e8   :  { %4958 = vmatpush1.bf16.msra.mxu1 %v13742_v24  ;;  %v11020_v12 = vmul.f32 %v9091_v21, %v2717_v8  ;;  %v11023_v47 = vmul.f32 %v9091_v21, %v2725_v1  ;;  %v1718_v51 = vunpack.c.3.s8 %v934_v30  ;;  %v2740_v48 = vcvt.s32.f32 %v1716_v56  ;;  %v13747_v8 = vld [vmem:[#allocation37_spill] sm:$0xff] }
 0x1e9   :  { %4787 = vmatprep.subr.bf16.mxu0 %v13744_v32  ;;  %4959 = vmatprep.subr.bf16.mxu1 %v13745_v25  ;;  %v11026_v6 = vmul.f32 %v9040_v5, %v2732_v60  ;;  %v2734_v34 = vcvt.s32.f32 %v1710_v14  ;;  %v1707_v4 = vunpack.c.2.s8 %v10938_v35  ;;  %v1715_v58 = vunpack.c.3.s8 %v10938_v35  ;;  %v13749_v35 = vld [vmem:[#allocation31_spill] sm:$0xff]  ;;  %v13750_v14 = vld [vmem:[#allocation38_spill] sm:$0xff] }
 0x1ea   :  { %v2742_v9 = vcvt.s32.f32 %v1718_v51  ;;  %v1709_v53 = vunpack.c.2.s8 %v10957_v54  ;;  %v13746_v30 = vpack.c.bf16 %v10575_v23, %v10565_v22  ;;  %v13748_v1 = vpack.c.bf16 %v10589_v42, %v13747_v8  ;;  %v13752_v25 = vld [vmem:[#allocation30_spill] sm:$0xff]  ;;  %v13753_v22 = vld [vmem:[#allocation32_spill] sm:$0xff] }
 0x1eb   :  { %v11042_v52 = vmul.f32 %v9040_v5, %v2740_v48  ;;  %v11045_v24 = vmul.f32 %v9048_v13, %v2734_v34  ;;  %v2731_v56 = vcvt.s32.f32 %v1707_v4  ;;  %v1717_v60 = vunpack.c.3.s8 %v10957_v54  ;;  %v11058_v34 = vld [vmem:[#allocation9 + $0x598] sm:$0xff]  ;;  %v11060_v4 = vpop.f32.mrb[5].mxu1 }
 0x1ec   :  { %4788 = vmatpush1.bf16.msra.mxu0 %v13746_v30  ;;  %4960 = vmatpush1.bf16.msra.mxu1 %v13748_v1  ;;  %v13751_v32 = vpack.c.bf16 %v13749_v35, %v13750_v14  ;;  %v13754_v23 = vpack.c.bf16 %v13752_v25, %v13753_v22  ;;  %v11055_v42 = vmul.f32 %v9048_v13, %v2742_v9  ;;  %v2739_v51 = vcvt.s32.f32 %v1715_v58  ;;  %v11068_v14 = vld [vmem:[#allocation9 + $0x580] sm:$0xff]  ;;  %v13756_v25 = vld [vmem:[#allocation40_spill] sm:$0xff]  ;;  %v13757_v22 = vld [vmem:[#allocation39_spill] sm:$0xff] }
 0x1ed   :  { %v2733_v48 = vcvt.s32.f32 %v1709_v53  ;;  %v1724_v30 = vunpack.c.0.s8 %v11029_v59  ;;  %13755 = vst [vmem:[#allocation65_spill] sm:$0xff] %v11060_v4  ;;  %v11065_v8 = vmul.f32 %v9054_v27, %v2731_v56  ;;  %v2741_v1 = vcvt.s32.f32 %v1717_v60  ;;  %v13759_v56 = vld [vmem:[#allocation42_spill] sm:$0xff]  ;;  %v13760_v60 = vld [vmem:[#allocation29_spill] sm:$0xff]  ;;  %v13793_v4 = vld [vmem:[#allocation35_spill] sm:$0xff] }
 0x1ee   :  { %4789 = vmatprep.subr.bf16.mxu0 %v13751_v32  ;;  %4961 = vmatprep.subr.bf16.mxu1 %v13754_v23  ;;  %v1732_v35 = vunpack.c.1.s8 %v11029_v59  ;;  %v11073_v58 = vmul.f32 %v9054_v27, %v2739_v51  ;;  %v13758_v23 = vpack.c.bf16 %v13756_v25, %v13757_v22  ;;  %v13761_v54 = vpack.c.bf16 %v13759_v56, %v13760_v60  ;;  %v13765_v25 = vld [vmem:[#allocation46_spill] sm:$0xff]  ;;  %v13766_v22 = vld [vmem:[#allocation43_spill] sm:$0xff] }
 0x1ef   :  { %v11076_v53 = vmul.f32 %v9091_v21, %v2733_v48  ;;  %v2748_v32 = vcvt.s32.f32 %v1724_v30  ;;  %v11085_v26 = vmul.f32 %v9091_v21, %v2741_v1  ;;  %v1726_v9 = vunpack.c.0.s8 %v11058_v34  ;;  %v13762_v48 = vld [vmem:[#allocation44_spill] sm:$0xff]  ;;  %v13763_v30 = vld [vmem:[#allocation41_spill] sm:$0xff]  ;;  %v13773_v60 = vld [vmem:[#allocation50_spill] sm:$0xff] }
 0x1f0   :  { %4790 = vmatpush1.bf16.msra.mxu0 %v13758_v23  ;;  %4962 = vmatpush1.bf16.msra.mxu1 %v13761_v54  ;;  %v2756_v57 = vcvt.s32.f32 %v1732_v35  ;;  %v1734_v51 = vunpack.c.1.s8 %v11058_v34  ;;  %v13764_v2 = vpack.c.bf16 %v13762_v48, %v13763_v30  ;;  %v13767_v23 = vpack.c.bf16 %v13765_v25, %v13766_v22  ;;  %v11109_v25 = vpop.f32.mrb[6].mxu1 }
 0x1f1   :  { %v11100_v1 = vmul.f32 %v9040_v5, %v2748_v32  ;;  %v1723_v35 = vunpack.c.0.s8 %v11068_v14  ;;  %v1731_v56 = vunpack.c.1.s8 %v11068_v14  ;;  %13768 = vst [vmem:[#allocation68_spill] sm:$0xff] %v11109_v25  ;;  %v1725_v54 = vunpack.c.0.s8 %v11089_v45  ;;  %v11113_v33 = vpop.f32.mrb[7].mxu1  ;;  %v13780_v25 = vld [vmem:[#allocation49_spill] sm:$0xff] }
 0x1f2   :  { %4791 = vmatprep.subr.bf16.mxu0 %v13764_v2  ;;  %4963 = vmatprep.subr.bf16.mxu1 %v13767_v23  ;;  %v11107_v48 = vmul.f32 %v9040_v5, %v2756_v57  ;;  %v2750_v2 = vcvt.s32.f32 %v1726_v9  ;;  %v2758_v30 = vcvt.s32.f32 %v1734_v51  ;;  %v1733_v32 = vunpack.c.1.s8 %v11089_v45  ;;  %13769 = vst [vmem:[#allocation67_spill] sm:$0xff] %v11113_v33  ;;  %v13779_v33 = vld [vmem:[#allocation52_spill] sm:$0xff] }
 0x1f3   :  { %v2747_v22 = vcvt.s32.f32 %v1723_v35  ;;  %v2755_v23 = vcvt.s32.f32 %v1731_v56  ;;  %v13772_v36 = vpack.c.bf16 %v13770_v20, %v13771_v17  ;;  %v13775_v57 = vpack.c.bf16 %v13773_v60, %v13774_v40  ;;  %v13777_v56 = vld [vmem:[#allocation24_spill] sm:$0xff] }
 0x1f4   :  { %v11124_v51 = vmul.f32 %v9048_v13, %v2750_v2  ;;  %v11127_v35 = vmul.f32 %v9048_v13, %v2758_v30  ;;  %v11130_v31 = vsub.s32 4, %v13777_v56  ;;  %v13781_v17 = vpack.c.bf16 %v13779_v33, %v13780_v25  ;;  %v8377_v33 = vld [vmem:[%s13157_s4] sm:$0xff]  ;;  %v13790_v30 = vld [vmem:[#allocation56_spill] sm:$0xff] }
 0x1f5   :  { %4792 = vmatpush1.bf16.msra.mxu0 %v13772_v36  ;;  %4964 = vmatpush1.bf16.msra.mxu1 %v13775_v57  ;;  %v13782_v40 = vpack.c.bf16 %v10743_v29, %v10740_v63  ;;  %v11139_v36 = vmul.f32 %v9054_v27, %v2747_v22  ;;  %v11142_v20 = vmul.f32 %v9054_v27, %v2755_v23  ;;  %v2749_v60 = vcvt.s32.f32 %v1725_v54  ;;  %v8376_v57 = vld [vmem:[#allocation8] sm:$0xff] }
 0x1f6   :  { %13776 = vst [vmem:[#allocation70_spill] sm:$0xff] %v11124_v51  ;;  %13778 = vst [vmem:[#allocation69_spill] sm:$0xff] %v11130_v31  ;;  %4793 = vmatprep.subr.bf16.mxu0 %v13781_v17  ;;  %v2757_v2 = vcvt.s32.f32 %v1733_v32  ;;  %v234_v9 = vrot.slane %v8376_v57, %v11130_v31  ;;  %v11151_v63 = vrot.slane %v8377_v33, %v11130_v31  ;;  %v11154_v29 = vsub.s32 5, %v13777_v56  ;;  %v13787_v32 = vld [vmem:[#allocation54_spill] sm:$0xff]  ;;  %v13788_v17 = vld [vmem:[#allocation51_spill] sm:$0xff] }
 0x1f7   :  { %4965 = vmatprep.subr.bf16.mxu1 %v13782_v40  ;;  %13783 = vst [vmem:[#allocation72_spill] sm:$0xff] %v11139_v36  ;;  %13784 = vst [vmem:[#allocation71_spill] sm:$0xff] %v11142_v20  ;;  %v11159_v25 = vmul.f32 %v9091_v21, %v2749_v60  ;;  %v1740_v23 = vunpack.c.2.s8 %v11029_v59  ;;  %v13789_v40 = vpack.c.bf16 %v13787_v32, %v13788_v17  ;;  %v13791_v31 = vld [vmem:[#allocation53_spill] sm:$0xff]  ;;  %v13795_v56 = vld [vmem:[#allocation58_spill] sm:$0xff] }
 0x1f8   :  { %13785 = vst [vmem:[#allocation74_spill] sm:$0xff] %v11151_v63  ;;  %13786 = vst [vmem:[#allocation73_spill] sm:$0xff] %v11154_v29  ;;  %v11162_v22 = vmul.f32 %v9091_v21, %v2757_v2  ;;  %v13792_v63 = vpack.c.bf16 %v13790_v30, %v13791_v31  ;;  %v696_v10 = vadd.f32 %v13793_v4, %v234_v9  ;;  %v1748_v2 = vunpack.c.3.s8 %v11029_v59  ;;  %v13796_v36 = vld [vmem:[#allocation55_spill] sm:$0xff]  ;;  %v13798_v51 = vld [vmem:[#allocation60_spill] sm:$0xff] }
 0x1f9   :  { %4794 = vmatpush1.bf16.msra.mxu0 %v13789_v40  ;;  %v238_v54 = vrot.slane %v8376_v57, %v11154_v29  ;;  %v11174_v60 = vrot.slane %v8377_v33, %v11154_v29  ;;  %v13797_v20 = vpack.c.bf16 %v13795_v56, %v13796_v36  ;;  %v13799_v32 = vld [vmem:[#allocation57_spill] sm:$0xff]  ;;  %v2764_v30 = vcvt.s32.f32 %v1740_v23  ;;  %v13802_v29 = vld [vmem:[#allocation36_spill] sm:$0xff] }
 0x1fa   :  { %4966 = vmatpush1.bf16.msra.mxu1 %v13792_v63  ;;  %v13800_v17 = vpack.c.bf16 %v13798_v51, %v13799_v32  ;;  %v1742_v4 = vunpack.c.2.s8 %v11058_v34  ;;  %v1750_v57 = vunpack.c.3.s8 %v11058_v34  ;;  %v751_v33 = vmax.f32 %v696_v10, 0.0  ;;  %v13801_v63 = vld [vmem:[#allocation34_spill] sm:$0xff]  ;;  %v13806_v31 = vld [vmem:[#allocation61_spill] sm:$0xff] }
 0x1fb   :  { %13794 = vst [vmem:[#allocation76_spill] sm:$0xff] %v11174_v60  ;;  %4795 = vmatprep.subr.bf16.mxu0 %v13797_v20  ;;  %v698_v40 = vadd.f32 %v13801_v63, %v238_v54  ;;  %v2772_v59 = vcvt.s32.f32 %v1748_v2  ;;  %v700_v60 = vadd.f32 %v13802_v29, %v234_v9  ;;  %v11190_v56 = vmul.f32 %v9040_v5, %v2764_v30  ;;  %v13803_v32 = vld [vmem:[#allocation62_spill] sm:$0xff]  ;;  %v13808_v30 = vld [vmem:[#allocation64_spill] sm:$0xff] }
 0x1fc   :  { %4967 = vmatprep.subr.bf16.mxu1 %v13800_v17  ;;  %v2766_v36 = vcvt.s32.f32 %v1742_v4  ;;  %v2774_v51 = vcvt.s32.f32 %v1750_v57  ;;  %v1739_v20 = vunpack.c.2.s8 %v11068_v14  ;;  %v13804_v17 = vld [vmem:[#allocation59_spill] sm:$0xff]  ;;  %v13807_v34 = vpack.c.bf16 %v10829_v0, %v13806_v31 }
 0x1fd   :  { %v13805_v23 = vpack.c.bf16 %v13803_v32, %v13804_v17  ;;  %v752_v10 = vmax.f32 %v698_v40, 0.0  ;;  %v11200_v2 = vmul.f32 %v9040_v5, %v2772_v59  ;;  %v759_v9 = vmax.f32 %v700_v60, 0.0  ;;  %v11216_v60 = vld [vmem:[#allocation9 + $0x5c8] sm:$0xff]  ;;  %v13811_v32 = vld [vmem:[#allocation33_spill] sm:$0xff] }
 0x1fe   :  { %4968 = vmatpush1.bf16.msra.mxu1 %v13807_v34  ;;  %v1747_v29 = vunpack.c.3.s8 %v11068_v14  ;;  %v13809_v4 = vpack.c.bf16 %v10849_v28, %v13808_v30  ;;  %v13810_v57 = vpack.c.bf16 %v10865_v62, %v10862_v3  ;;  %v11210_v63 = vmul.f32 %v9048_v13, %v2766_v36  ;;  %v11223_v62 = vld [vmem:[#allocation9 + $0x5d8] sm:$0xff] }
 0x1ff   :  { %4796 = vmatpush1.bf16.msra.mxu0 %v13805_v23  ;;  %v11213_v0 = vmul.f32 %v9048_v13, %v2774_v51  ;;  %v2763_v31 = vcvt.s32.f32 %v1739_v20  ;;  %v1741_v40 = vunpack.c.2.s8 %v11089_v45  ;;  %v4494_v14 = vpack.c.bf16 %v11200_v2, %v11190_v56  ;;  %v13812_v23 = vld [vmem:[#allocation63_spill] sm:$0xff] }
 0x200   :  { %4797 = vmatprep.subr.bf16.mxu0 %v13809_v4  ;;  %4969 = vmatprep.subr.bf16.mxu1 %v13810_v57  ;;  %v11220_v28 = vpack.c.bf16 %v759_v9, %v751_v33  ;;  %v2771_v59 = vcvt.s32.f32 %v1747_v29  ;;  %v1749_v3 = vunpack.c.3.s8 %v11089_v45  ;;  %v702_v17 = vadd.f32 %v13811_v32, %v238_v54  ;;  %v11242_v4 = vld [vmem:[#allocation9 + $0x5c0] sm:$0xff] }
 0x201   :  { %v4496_v36 = vpack.c.bf16 %v11213_v0, %v11210_v63  ;;  %v11228_v51 = vmul.f32 %v9054_v27, %v2763_v31  ;;  %v2765_v20 = vcvt.s32.f32 %v1741_v40  ;;  %v13813_v34 = vpack.c.bf16 %v10878_v11, %v13812_v23 }
 0x202   :  { %v13814_v33 = vpack.c.bf16 %v10889_v39, %v10886_v38  ;;  %v11238_v45 = vmul.f32 %v9054_v27, %v2771_v59  ;;  %v2773_v9 = vcvt.s32.f32 %v1749_v3  ;;  %v1756_v29 = vunpack.c.0.s8 %v11216_v60  ;;  %v949_v3 = vld [vmem:[#allocation9 + $0x5d0] sm:$0xff] }
 0x203   :  { %4798 = vmatpush1.bf16.msra.mxu0 %v13813_v34  ;;  %v1764_v30 = vunpack.c.1.s8 %v11216_v60  ;;  %v13815_v54 = vpack.c.bf16 %v10914_v16, %v10898_v50  ;;  %v13816_v11 = vpack.c.bf16 %v10923_v37, %v10917_v49  ;;  %v11251_v38 = vmul.f32 %v9091_v21, %v2765_v20 }
 0x204   :  { %4970 = vmatpush1.bf16.msra.mxu1 %v13814_v33  ;;  %v760_v39 = vmax.f32 %v702_v17, 0.0  ;;  %v1758_v57 = vunpack.c.0.s8 %v11223_v62  ;;  %v1766_v31 = vunpack.c.1.s8 %v11223_v62  ;;  %v4493_v40 = vpack.c.bf16 %v11238_v45, %v11228_v51 }
 0x205   :  { %4799 = vmatprep.subr.bf16.mxu0 %v13815_v54  ;;  %4971 = vmatprep.subr.bf16.mxu1 %v13816_v11  ;;  %v11258_v59 = vmul.f32 %v9091_v21, %v2773_v9  ;;  %v2780_v50 = vcvt.s32.f32 %v1756_v29  ;;  %v2788_v16 = vcvt.s32.f32 %v1764_v30  ;;  %v1755_v20 = vunpack.c.0.s8 %v11242_v4 }
 0x206   :  { %v11260_v32 = vpack.c.bf16 %v760_v39, %v752_v10  ;;  %v2782_v49 = vcvt.s32.f32 %v1758_v57  ;;  %v2790_v37 = vcvt.s32.f32 %v1766_v31  ;;  %v13817_v17 = vpack.c.bf16 %v10949_v46, %v10935_v43 }
 0x207   :  { %v13818_v23 = vpack.c.bf16 %v10955_v55, %v10952_v19  ;;  %v4495_v34 = vpack.c.bf16 %v11258_v59, %v11251_v38  ;;  %v11272_v33 = vmul.f32 %v9040_v5, %v2780_v50  ;;  %v11275_v10 = vmul.f32 %v9040_v5, %v2788_v16 }
 0x208   :  { %4800 = vmatpush1.bf16.msra.mxu0 %v13817_v17  ;;  %v1763_v9 = vunpack.c.1.s8 %v11242_v4  ;;  %v13819_v29 = vpack.c.bf16 %v10975_v15, %v10962_v18  ;;  %v13820_v43 = vpack.c.bf16 %v10991_v41, %v10988_v44  ;;  %v11285_v46 = vmul.f32 %v9048_v13, %v2782_v49  ;;  %4813 = vmatprep.mubr.bf16.mxu0 %v11260_v32 }
 0x209   :  { %4972 = vmatpush1.bf16.msra.mxu1 %v13818_v23  ;;  %v11288_v19 = vmul.f32 %v9048_v13, %v2790_v37  ;;  %v2779_v55 = vcvt.s32.f32 %v1755_v20  ;;  %v1757_v30 = vunpack.c.0.s8 %v949_v3  ;;  %v4502_v54 = vpack.c.bf16 %v11275_v10, %v11272_v33  ;;  %4985 = vmatprep.mubr.bf16.mxu1 %v11260_v32 }
 0x20a   :  { %4801 = vmatprep.subr.bf16.mxu0 %v13819_v29  ;;  %4973 = vmatprep.subr.bf16.mxu1 %v13820_v43  ;;  %v2787_v11 = vcvt.s32.f32 %v1763_v9  ;;  %v1765_v39 = vunpack.c.1.s8 %v949_v3  ;;  %v1772_v18 = vunpack.c.2.s8 %v11216_v60  ;;  %v1780_v57 = vunpack.c.3.s8 %v11216_v60 }
 0x20b   :  { %v4504_v15 = vpack.c.bf16 %v11288_v19, %v11285_v46  ;;  %v11298_v44 = vmul.f32 %v9054_v27, %v2779_v55  ;;  %v2781_v41 = vcvt.s32.f32 %v1757_v30  ;;  %v13821_v31 = vpack.c.bf16 %v10998_v61, %v10995_v7 }
 0x20c   :  { %v13822_v50 = vpack.c.bf16 %v11023_v47, %v11020_v12  ;;  %v11308_v16 = vmul.f32 %v9054_v27, %v2787_v11  ;;  %v2789_v49 = vcvt.s32.f32 %v1765_v39  ;;  %v2796_v37 = vcvt.s32.f32 %v1772_v18 }
 0x20d   :  { %4802 = vmatpush1.bf16.msra.mxu0 %v13821_v31  ;;  %v1774_v20 = vunpack.c.2.s8 %v11223_v62  ;;  %v13823_v17 = vpack.c.bf16 %v11042_v52, %v11026_v6  ;;  %v13824_v60 = vpack.c.bf16 %v11055_v42, %v11045_v24  ;;  %v11318_v7 = vmul.f32 %v9091_v21, %v2781_v41 }
 0x20e   :  { %4974 = vmatpush1.bf16.msra.mxu1 %v13822_v50  ;;  %v2804_v61 = vcvt.s32.f32 %v1780_v57  ;;  %v1782_v12 = vunpack.c.3.s8 %v11223_v62  ;;  %v1771_v47 = vunpack.c.2.s8 %v11242_v4  ;;  %v4501_v23 = vpack.c.bf16 %v11308_v16, %v11298_v44  ;;  %v956_v62 = vld [vmem:[#allocation9 + $0x608] sm:$0xff]  ;;  %v11345_v57 = vld [vmem:[#allocation9 + $0x618] sm:$0xff] }
 0x20f   :  { %4803 = vmatprep.subr.bf16.mxu0 %v13823_v17  ;;  %4975 = vmatprep.subr.bf16.mxu1 %v13824_v60  ;;  %v11325_v9 = vmul.f32 %v9091_v21, %v2789_v49  ;;  %v11328_v6 = vmul.f32 %v9040_v5, %v2796_v37  ;;  %v2798_v52 = vcvt.s32.f32 %v1774_v20  ;;  %v1779_v29 = vunpack.c.3.s8 %v11242_v4  ;;  %v11359_v17 = vld [vmem:[#allocation9 + $0x600] sm:$0xff] }
 0x210   :  { %v11331_v24 = vmul.f32 %v9040_v5, %v2804_v61  ;;  %v2806_v42 = vcvt.s32.f32 %v1782_v12  ;;  %v2795_v43 = vcvt.s32.f32 %v1771_v47  ;;  %v13825_v55 = vpack.c.bf16 %v11073_v58, %v11065_v8  ;;  %v13828_v8 = vld [vmem:[#allocation70_spill] sm:$0xff]  ;;  %v13831_v61 = vld [vmem:[#allocation72_spill] sm:$0xff] }
 0x211   :  { %v13826_v30 = vpack.c.bf16 %v11085_v26, %v11076_v53  ;;  %v4503_v11 = vpack.c.bf16 %v11325_v9, %v11318_v7  ;;  %v11343_v39 = vmul.f32 %v9048_v13, %v2798_v52  ;;  %v1773_v18 = vunpack.c.2.s8 %v949_v3  ;;  %v13830_v7 = vld [vmem:[#allocation71_spill] sm:$0xff] }
 0x212   :  { %4804 = vmatpush1.bf16.msra.mxu0 %v13825_v55  ;;  %v1781_v41 = vunpack.c.3.s8 %v949_v3  ;;  %v13827_v4 = vpack.c.bf16 %v11107_v48, %v11100_v1  ;;  %v13829_v58 = vpack.c.bf16 %v11127_v35, %v13828_v8  ;;  %v4510_v26 = vpack.c.bf16 %v11331_v24, %v11328_v6 }
 0x213   :  { %4976 = vmatpush1.bf16.msra.mxu1 %v13826_v30  ;;  %v3872_v53 = vmul.f32 %v9048_v13, %v2806_v42  ;;  %v2803_v31 = vcvt.s32.f32 %v1779_v29  ;;  %v11357_v50 = vmul.f32 %v9054_v27, %v2795_v43  ;;  %v2797_v3 = vcvt.s32.f32 %v1773_v18  ;;  %v957_v42 = vld [vmem:[#allocation9 + $0x610] sm:$0xff] }
 0x214   :  { %4805 = vmatprep.subr.bf16.mxu0 %v13827_v4  ;;  %4977 = vmatprep.subr.bf16.mxu1 %v13829_v58  ;;  %v2805_v49 = vcvt.s32.f32 %v1781_v41  ;;  %v1788_v37 = vunpack.c.0.s8 %v956_v62  ;;  %v1796_v20 = vunpack.c.1.s8 %v956_v62  ;;  %v1790_v35 = vunpack.c.0.s8 %v11345_v57 }
 0x215   :  { %v4512_v1 = vpack.c.bf16 %v3872_v53, %v11343_v39  ;;  %v11363_v48 = vmul.f32 %v9054_v27, %v2803_v31  ;;  %v1798_v60 = vunpack.c.1.s8 %v11345_v57  ;;  %v13832_v12 = vpack.c.bf16 %v13830_v7, %v13831_v61  ;;  %v11423_v61 = vld [vmem:[#allocation9 + $0x640] sm:$0xff] }
 0x216   :  { %v13833_v47 = vpack.c.bf16 %v11162_v22, %v11159_v25  ;;  %v3863_v9 = vmul.f32 %v9091_v21, %v2797_v3  ;;  %v3871_v6 = vmul.f32 %v9091_v21, %v2805_v49  ;;  %v2812_v52 = vcvt.s32.f32 %v1788_v37  ;;  %v11414_v49 = vld [vmem:[#allocation9 + $0x648] sm:$0xff] }
 0x217   :  { %4806 = vmatpush1.bf16.msra.mxu0 %v13832_v12  ;;  %v2820_v24 = vcvt.s32.f32 %v1796_v20  ;;  %v4509_v29 = vpack.c.bf16 %v11363_v48, %v11357_v50  ;;  %v2814_v25 = vcvt.s32.f32 %v1790_v35  ;;  %v2822_v22 = vcvt.s32.f32 %v1798_v60 }
 0x218   :  { %4978 = vmatpush1.bf16.msra.mxu1 %v13833_v47  ;;  %4807 = vmatprep.subr.bf16.mxu0 %v4494_v14  ;;  %v1787_v43 = vunpack.c.0.s8 %v11359_v17  ;;  %v4511_v55 = vpack.c.bf16 %v3871_v6, %v3863_v9  ;;  %v3878_v30 = vmul.f32 %v9040_v5, %v2812_v52  ;;  %v1795_v18 = vunpack.c.1.s8 %v11359_v17 }
 0x219   :  { %4979 = vmatprep.subr.bf16.mxu1 %v4496_v36  ;;  %v3886_v39 = vmul.f32 %v9040_v5, %v2820_v24  ;;  %v3880_v56 = vmul.f32 %v9048_v13, %v2814_v25  ;;  %v3888_v2 = vmul.f32 %v9048_v13, %v2822_v22  ;;  %v1789_v0 = vunpack.c.0.s8 %v957_v42  ;;  %v965_v25 = vld [vmem:[#allocation9 + $0x650] sm:$0xff] }
 0x21a   :  { %v2811_v63 = vcvt.s32.f32 %v1787_v43  ;;  %v2819_v36 = vcvt.s32.f32 %v1795_v18  ;;  %v1797_v41 = vunpack.c.1.s8 %v957_v42  ;;  %v1804_v4 = vunpack.c.2.s8 %v956_v62 }
 0x21b   :  { %4808 = vmatpush1.bf16.msra.mxu0 %v4493_v40  ;;  %v4518_v14 = vpack.c.bf16 %v3886_v39, %v3878_v30  ;;  %v4520_v8 = vpack.c.bf16 %v3888_v2, %v3880_v56  ;;  %v2813_v45 = vcvt.s32.f32 %v1789_v0  ;;  %v1812_v40 = vunpack.c.3.s8 %v956_v62 }
 0x21c   :  { %4980 = vmatpush1.bf16.msra.mxu1 %v4495_v34  ;;  %4809 = vmatprep.subr.bf16.mxu0 %v4502_v54  ;;  %v3877_v51 = vmul.f32 %v9054_v27, %v2811_v63  ;;  %v3885_v38 = vmul.f32 %v9054_v27, %v2819_v36  ;;  %v2821_v59 = vcvt.s32.f32 %v1797_v41  ;;  %v2828_v34 = vcvt.s32.f32 %v1804_v4 }
 0x21d   :  { %4981 = vmatprep.subr.bf16.mxu1 %v4504_v15  ;;  %v1806_v58 = vunpack.c.2.s8 %v11345_v57  ;;  %v3879_v53 = vmul.f32 %v9091_v21, %v2813_v45  ;;  %v2836_v31 = vcvt.s32.f32 %v1812_v40  ;;  %v1814_v33 = vunpack.c.3.s8 %v11345_v57 }
 0x21e   :  { %v1803_v10 = vunpack.c.2.s8 %v11359_v17  ;;  %v4517_v46 = vpack.c.bf16 %v3885_v38, %v3877_v51  ;;  %v3887_v19 = vmul.f32 %v9091_v21, %v2821_v59  ;;  %v3894_v54 = vmul.f32 %v9040_v5, %v2828_v34 }
 0x21f   :  { %4810 = vmatpush1.bf16.msra.mxu0 %v4501_v23  ;;  %v2830_v15 = vcvt.s32.f32 %v1806_v58  ;;  %v3902_v62 = vmul.f32 %v9040_v5, %v2836_v31  ;;  %v2838_v50 = vcvt.s32.f32 %v1814_v33  ;;  %v1811_v57 = vunpack.c.3.s8 %v11359_v17 }
 0x220   :  { %4982 = vmatpush1.bf16.msra.mxu1 %v4503_v11  ;;  %4811 = vmatprep.subr.bf16.mxu0 %v4510_v26  ;;  %v2827_v3 = vcvt.s32.f32 %v1803_v10  ;;  %v4519_v37 = vpack.c.bf16 %v3887_v19, %v3879_v53  ;;  %v1805_v16 = vunpack.c.2.s8 %v957_v42  ;;  %v1813_v23 = vunpack.c.3.s8 %v957_v42  ;;  %v11417_v11 = vld [vmem:[#allocation9 + $0x658] sm:$0xff] }
 0x221   :  { %4983 = vmatprep.subr.bf16.mxu1 %v4512_v1  ;;  %v3896_v44 = vmul.f32 %v9048_v13, %v2830_v15  ;;  %v4526_v20 = vpack.c.bf16 %v3902_v62, %v3894_v54  ;;  %v3904_v48 = vmul.f32 %v9048_v13, %v2838_v50  ;;  %v2835_v26 = vcvt.s32.f32 %v1811_v57 }
 0x222   :  { %v3893_v1 = vmul.f32 %v9054_v27, %v2827_v3  ;;  %v2829_v35 = vcvt.s32.f32 %v1805_v16  ;;  %v2837_v17 = vcvt.s32.f32 %v1813_v23  ;;  %v1820_v60 = vunpack.c.0.s8 %v11414_v49 }
 0x223   :  { %4812 = vmatpush1.bf16.msra.mxu0 %v4509_v29  ;;  %v1828_v7 = vunpack.c.1.s8 %v11414_v49  ;;  %v4528_v12 = vpack.c.bf16 %v3904_v48, %v3896_v44  ;;  %v3901_v47 = vmul.f32 %v9054_v27, %v2835_v26  ;;  %v1822_v9 = vunpack.c.0.s8 %v11417_v11  ;;  %v972_v44 = vld [vmem:[#allocation9 + $0x688] sm:$0xff]  ;;  %v974_v48 = vld [vmem:[#allocation9 + $0x698] sm:$0xff] }
 0x224   :  { %4984 = vmatpush1.bf16.msra.mxu1 %v4511_v55  ;;  %4824 = vmatprep.subr.bf16.mxu0 %v4518_v14  ;;  %v1830_v6 = vunpack.c.1.s8 %v11417_v11  ;;  %v3895_v52 = vmul.f32 %v9091_v21, %v2829_v35  ;;  %v3903_v24 = vmul.f32 %v9091_v21, %v2837_v17  ;;  %v2844_v42 = vcvt.s32.f32 %v1820_v60 }
 0x225   :  { %4996 = vmatprep.subr.bf16.mxu1 %v4520_v8  ;;  %v2852_v29 = vcvt.s32.f32 %v1828_v7  ;;  %v4525_v22 = vpack.c.bf16 %v3901_v47, %v3893_v1  ;;  %v2846_v43 = vcvt.s32.f32 %v1822_v9  ;;  %v1819_v30 = vunpack.c.0.s8 %v11423_v61  ;;  %v971_v47 = vld [vmem:[#allocation9 + $0x680] sm:$0xff] }
 0x226   :  { %4814 = vmatmul.mubr.bf16.vlgmr.msra.gmra.mrb[8].mxu0 %v11220_v28  ;;  %v2854_v55 = vcvt.s32.f32 %v1830_v6  ;;  %v4527_v39 = vpack.c.bf16 %v3903_v24, %v3895_v52  ;;  %v3910_v18 = vmul.f32 %v9040_v5, %v2844_v42  ;;  %v1827_v2 = vunpack.c.1.s8 %v11423_v61 }
 0x227   :  { %4986 = vmatmul.mubr.bf16.vlgmr.msra.gmra.mrb[8].mxu1 %v11220_v28  ;;  %4825 = vmatpush1.bf16.msra.mxu0 %v4517_v46  ;;  %v3918_v56 = vmul.f32 %v9040_v5, %v2852_v29  ;;  %v3912_v63 = vmul.f32 %v9048_v13, %v2846_v43  ;;  %v2843_v14 = vcvt.s32.f32 %v1819_v30  ;;  %v1821_v36 = vunpack.c.0.s8 %v965_v25  ;;  %v973_v43 = vld [vmem:[#allocation9 + $0x690] sm:$0xff] }
 0x228   :  { %4997 = vmatpush1.bf16.msra.mxu1 %v4519_v37  ;;  %4826 = vmatprep.subr.bf16.mxu0 %v4526_v20  ;;  %v3920_v0 = vmul.f32 %v9048_v13, %v2854_v55  ;;  %v2851_v4 = vcvt.s32.f32 %v1827_v2  ;;  %v1829_v8 = vunpack.c.1.s8 %v965_v25  ;;  %v1836_v51 = vunpack.c.2.s8 %v11414_v49 }
 0x229   :  { %4998 = vmatprep.subr.bf16.mxu1 %v4528_v12  ;;  %v4534_v41 = vpack.c.bf16 %v3918_v56, %v3910_v18  ;;  %v3909_v40 = vmul.f32 %v9054_v27, %v2843_v14  ;;  %v2845_v38 = vcvt.s32.f32 %v1821_v36  ;;  %v1844_v59 = vunpack.c.3.s8 %v11414_v49 }
 0x22a   :  { %v4536_v45 = vpack.c.bf16 %v3920_v0, %v3912_v63  ;;  %v3917_v34 = vmul.f32 %v9054_v27, %v2851_v4  ;;  %v2853_v58 = vcvt.s32.f32 %v1829_v8  ;;  %v2860_v53 = vcvt.s32.f32 %v1836_v51 }
 0x22b   :  { %4827 = vmatpush1.bf16.msra.mxu0 %v4525_v22  ;;  %v1838_v31 = vunpack.c.2.s8 %v11417_v11  ;;  %v3911_v33 = vmul.f32 %v9091_v21, %v2845_v38  ;;  %v2868_v10 = vcvt.s32.f32 %v1844_v59  ;;  %v1846_v46 = vunpack.c.3.s8 %v11417_v11 }
 0x22c   :  { %4999 = vmatpush1.bf16.msra.mxu1 %v4527_v39  ;;  %4828 = vmatprep.subr.bf16.mxu0 %v4534_v41  ;;  %v1835_v19 = vunpack.c.2.s8 %v11423_v61  ;;  %v4533_v54 = vpack.c.bf16 %v3917_v34, %v3909_v40  ;;  %v3919_v15 = vmul.f32 %v9091_v21, %v2853_v58  ;;  %v3926_v62 = vmul.f32 %v9040_v5, %v2860_v53 }
 0x22d   :  { %5000 = vmatprep.subr.bf16.mxu1 %v4536_v45  ;;  %v2862_v50 = vcvt.s32.f32 %v1838_v31  ;;  %v3934_v57 = vmul.f32 %v9040_v5, %v2868_v10  ;;  %v2870_v3 = vcvt.s32.f32 %v1846_v46  ;;  %v1843_v49 = vunpack.c.3.s8 %v11423_v61 }
 0x22e   :  { %v2859_v37 = vcvt.s32.f32 %v1835_v19  ;;  %v4535_v16 = vpack.c.bf16 %v3919_v15, %v3911_v33  ;;  %v1837_v11 = vunpack.c.2.s8 %v965_v25  ;;  %v1845_v20 = vunpack.c.3.s8 %v965_v25 }
 0x22f   :  { %4829 = vmatpush1.bf16.msra.mxu0 %v4533_v54  ;;  %v3928_v23 = vmul.f32 %v9048_v13, %v2862_v50  ;;  %v4542_v26 = vpack.c.bf16 %v3934_v57, %v3926_v62  ;;  %v3936_v1 = vmul.f32 %v9048_v13, %v2870_v3  ;;  %v2867_v35 = vcvt.s32.f32 %v1843_v49 }
 0x230   :  { %v3925_v17 = vmul.f32 %v9054_v27, %v2859_v37  ;;  %5001 = vmatpush1.bf16.msra.mxu1 %v4535_v16  ;;  %v2861_v60 = vcvt.s32.f32 %v1837_v11  ;;  %v2869_v7 = vcvt.s32.f32 %v1845_v20  ;;  %v1852_v12 = vunpack.c.0.s8 %v972_v44 }
 0x231   :  { %v1860_v61 = vunpack.c.1.s8 %v972_v44  ;;  %4830 = vmatprep.subr.bf16.mxu0 %v4542_v26  ;;  %v4544_v9 = vpack.c.bf16 %v3936_v1, %v3928_v23  ;;  %v3933_v6 = vmul.f32 %v9054_v27, %v2867_v35  ;;  %v1854_v52 = vunpack.c.0.s8 %v974_v48  ;;  %v980_v23 = vld [vmem:[#allocation9 + $0x6c8] sm:$0xff] }
 0x232   :  { %v1862_v24 = vunpack.c.1.s8 %v974_v48  ;;  %v3927_v42 = vmul.f32 %v9091_v21, %v2861_v60  ;;  %v3935_v29 = vmul.f32 %v9091_v21, %v2869_v7  ;;  %v2876_v25 = vcvt.s32.f32 %v1852_v12 }
 0x233   :  { %v2884_v22 = vcvt.s32.f32 %v1860_v61  ;;  %5002 = vmatprep.subr.bf16.mxu1 %v4544_v9  ;;  %v4541_v55 = vpack.c.bf16 %v3933_v6, %v3925_v17  ;;  %v2878_v30 = vcvt.s32.f32 %v1854_v52  ;;  %v1851_v18 = vunpack.c.0.s8 %v971_v47  ;;  %v979_v6 = vld [vmem:[#allocation9 + $0x6c0] sm:$0xff] }
 0x234   :  { %v2886_v39 = vcvt.s32.f32 %v1862_v24  ;;  %v4543_v56 = vpack.c.bf16 %v3935_v29, %v3927_v42  ;;  %v3942_v2 = vmul.f32 %v9040_v5, %v2876_v25  ;;  %v1859_v0 = vunpack.c.1.s8 %v971_v47 }
 0x235   :  { %v3950_v63 = vmul.f32 %v9040_v5, %v2884_v22  ;;  %4831 = vmatpush1.bf16.msra.mxu0 %v4541_v55  ;;  %v3944_v14 = vmul.f32 %v9048_v13, %v2878_v30  ;;  %v2875_v41 = vcvt.s32.f32 %v1851_v18  ;;  %v1853_v4 = vunpack.c.0.s8 %v973_v43  ;;  %v981_v30 = vld [vmem:[#allocation9 + $0x6d0] sm:$0xff] }
 0x236   :  { %v3952_v36 = vmul.f32 %v9048_v13, %v2886_v39  ;;  %5003 = vmatpush1.bf16.msra.mxu1 %v4543_v56  ;;  %v2883_v51 = vcvt.s32.f32 %v1859_v0  ;;  %v1861_v45 = vunpack.c.1.s8 %v973_v43  ;;  %v1868_v40 = vunpack.c.2.s8 %v972_v44 }
 0x237   :  { %v4550_v8 = vpack.c.bf16 %v3950_v63, %v3942_v2  ;;  %v3941_v59 = vmul.f32 %v9054_v27, %v2875_v41  ;;  %v2877_v34 = vcvt.s32.f32 %v1853_v4  ;;  %v1876_v58 = vunpack.c.3.s8 %v972_v44 }
 0x238   :  { %v4552_v38 = vpack.c.bf16 %v3952_v36, %v3944_v14  ;;  %v3949_v53 = vmul.f32 %v9054_v27, %v2883_v51  ;;  %v2885_v31 = vcvt.s32.f32 %v1861_v45  ;;  %v2892_v33 = vcvt.s32.f32 %v1868_v40 }
 0x239   :  { %4832 = vmatprep.subr.bf16.mxu0 %v4550_v8  ;;  %v1870_v10 = vunpack.c.2.s8 %v974_v48  ;;  %v3943_v46 = vmul.f32 %v9091_v21, %v2877_v34  ;;  %v2900_v19 = vcvt.s32.f32 %v1876_v58  ;;  %v1878_v54 = vunpack.c.3.s8 %v974_v48  ;;  %v982_v48 = vld [vmem:[#allocation9 + $0x6d8] sm:$0xff] }
 0x23a   :  { %5004 = vmatprep.subr.bf16.mxu1 %v4552_v38  ;;  %v1867_v15 = vunpack.c.2.s8 %v971_v47  ;;  %v4549_v62 = vpack.c.bf16 %v3949_v53, %v3941_v59  ;;  %v3951_v50 = vmul.f32 %v9091_v21, %v2885_v31  ;;  %v3958_v57 = vmul.f32 %v9040_v5, %v2892_v33 }
 0x23b   :  { %v2894_v3 = vcvt.s32.f32 %v1870_v10  ;;  %v3966_v49 = vmul.f32 %v9040_v5, %v2900_v19  ;;  %v2902_v37 = vcvt.s32.f32 %v1878_v54  ;;  %v1875_v44 = vunpack.c.3.s8 %v971_v47 }
 0x23c   :  { %v2891_v16 = vcvt.s32.f32 %v1867_v15  ;;  %4833 = vmatpush1.bf16.msra.mxu0 %v4549_v62  ;;  %v4551_v11 = vpack.c.bf16 %v3951_v50, %v3943_v46  ;;  %v1869_v26 = vunpack.c.2.s8 %v973_v43  ;;  %v1877_v1 = vunpack.c.3.s8 %v973_v43 }
 0x23d   :  { %v3960_v20 = vmul.f32 %v9048_v13, %v2894_v3  ;;  %v4558_v35 = vpack.c.bf16 %v3966_v49, %v3958_v57  ;;  %v3968_v17 = vmul.f32 %v9048_v13, %v2902_v37  ;;  %v2899_v60 = vcvt.s32.f32 %v1875_v44 }
 0x23e   :  { %v3957_v7 = vmul.f32 %v9054_v27, %v2891_v16  ;;  %5005 = vmatpush1.bf16.msra.mxu1 %v4551_v11  ;;  %v2893_v12 = vcvt.s32.f32 %v1869_v26  ;;  %v2901_v61 = vcvt.s32.f32 %v1877_v1  ;;  %v1884_v9 = vunpack.c.0.s8 %v980_v23 }
 0x23f   :  { %v1892_v47 = vunpack.c.1.s8 %v980_v23  ;;  %4834 = vmatprep.subr.bf16.mxu0 %v4558_v35  ;;  %v4560_v52 = vpack.c.bf16 %v3968_v17, %v3960_v20  ;;  %v3965_v24 = vmul.f32 %v9054_v27, %v2899_v60  ;;  %v1886_v42 = vunpack.c.0.s8 %v982_v48  ;;  %v988_v20 = vld [vmem:[#allocation9 + $0x708] sm:$0xff] }
 0x240   :  { %v1894_v29 = vunpack.c.1.s8 %v982_v48  ;;  %v3959_v25 = vmul.f32 %v9091_v21, %v2893_v12  ;;  %v3967_v22 = vmul.f32 %v9091_v21, %v2901_v61  ;;  %v2908_v43 = vcvt.s32.f32 %v1884_v9 }
 0x241   :  { %v2916_v55 = vcvt.s32.f32 %v1892_v47  ;;  %5006 = vmatprep.subr.bf16.mxu1 %v4560_v52  ;;  %v4557_v39 = vpack.c.bf16 %v3965_v24, %v3957_v7  ;;  %v2910_v18 = vcvt.s32.f32 %v1886_v42  ;;  %v1883_v2 = vunpack.c.0.s8 %v979_v6  ;;  %v987_v24 = vld [vmem:[#allocation9 + $0x700] sm:$0xff] }
 0x242   :  { %v2918_v56 = vcvt.s32.f32 %v1894_v29  ;;  %v4559_v63 = vpack.c.bf16 %v3967_v22, %v3959_v25  ;;  %v3974_v0 = vmul.f32 %v9040_v5, %v2908_v43  ;;  %v1891_v36 = vunpack.c.1.s8 %v979_v6 }
 0x243   :  { %v3982_v14 = vmul.f32 %v9040_v5, %v2916_v55  ;;  %4835 = vmatpush1.bf16.msra.mxu0 %v4557_v39  ;;  %v3976_v41 = vmul.f32 %v9048_v13, %v2910_v18  ;;  %v2907_v8 = vcvt.s32.f32 %v1883_v2  ;;  %v1885_v51 = vunpack.c.0.s8 %v981_v30  ;;  %v989_v18 = vld [vmem:[#allocation9 + $0x710] sm:$0xff] }
 0x244   :  { %v3984_v4 = vmul.f32 %v9048_v13, %v2918_v56  ;;  %5007 = vmatpush1.bf16.msra.mxu1 %v4559_v63  ;;  %v2915_v40 = vcvt.s32.f32 %v1891_v36  ;;  %v1893_v38 = vunpack.c.1.s8 %v981_v30  ;;  %v1900_v59 = vunpack.c.2.s8 %v980_v23 }
 0x245   :  { %v4566_v45 = vpack.c.bf16 %v3982_v14, %v3974_v0  ;;  %v3973_v58 = vmul.f32 %v9054_v27, %v2907_v8  ;;  %v2909_v53 = vcvt.s32.f32 %v1885_v51  ;;  %v1908_v31 = vunpack.c.3.s8 %v980_v23 }
 0x246   :  { %v4568_v34 = vpack.c.bf16 %v3984_v4, %v3976_v41  ;;  %v3981_v33 = vmul.f32 %v9054_v27, %v2915_v40  ;;  %v2917_v10 = vcvt.s32.f32 %v1893_v38  ;;  %v2924_v46 = vcvt.s32.f32 %v1900_v59 }
 0x247   :  { %4836 = vmatprep.subr.bf16.mxu0 %v4566_v45  ;;  %v1902_v19 = vunpack.c.2.s8 %v982_v48  ;;  %v3975_v54 = vmul.f32 %v9091_v21, %v2909_v53  ;;  %v2932_v15 = vcvt.s32.f32 %v1908_v31  ;;  %v1910_v62 = vunpack.c.3.s8 %v982_v48  ;;  %v990_v48 = vld [vmem:[#allocation9 + $0x718] sm:$0xff] }
 0x248   :  { %5008 = vmatprep.subr.bf16.mxu1 %v4568_v34  ;;  %v1899_v50 = vunpack.c.2.s8 %v979_v6  ;;  %v4565_v57 = vpack.c.bf16 %v3981_v33, %v3973_v58  ;;  %v3983_v3 = vmul.f32 %v9091_v21, %v2917_v10  ;;  %v3990_v49 = vmul.f32 %v9040_v5, %v2924_v46 }
 0x249   :  { %v2926_v37 = vcvt.s32.f32 %v1902_v19  ;;  %v3998_v44 = vmul.f32 %v9040_v5, %v2932_v15  ;;  %v2934_v16 = vcvt.s32.f32 %v1910_v62  ;;  %v1907_v23 = vunpack.c.3.s8 %v979_v6 }
 0x24a   :  { %v2923_v11 = vcvt.s32.f32 %v1899_v50  ;;  %4837 = vmatpush1.bf16.msra.mxu0 %v4565_v57  ;;  %v4567_v26 = vpack.c.bf16 %v3983_v3, %v3975_v54  ;;  %v1901_v35 = vunpack.c.2.s8 %v981_v30  ;;  %v1909_v17 = vunpack.c.3.s8 %v981_v30 }
 0x24b   :  { %v3992_v1 = vmul.f32 %v9048_v13, %v2926_v37  ;;  %v4574_v60 = vpack.c.bf16 %v3998_v44, %v3990_v49  ;;  %v4000_v7 = vmul.f32 %v9048_v13, %v2934_v16  ;;  %v2931_v12 = vcvt.s32.f32 %v1907_v23 }
 0x24c   :  { %v3989_v61 = vmul.f32 %v9054_v27, %v2923_v11  ;;  %5009 = vmatpush1.bf16.msra.mxu1 %v4567_v26  ;;  %v2925_v9 = vcvt.s32.f32 %v1901_v35  ;;  %v2933_v47 = vcvt.s32.f32 %v1909_v17  ;;  %v1916_v52 = vunpack.c.0.s8 %v988_v20 }
 0x24d   :  { %v1924_v6 = vunpack.c.1.s8 %v988_v20  ;;  %4838 = vmatprep.subr.bf16.mxu0 %v4574_v60  ;;  %v4576_v42 = vpack.c.bf16 %v4000_v7, %v3992_v1  ;;  %v3997_v29 = vmul.f32 %v9054_v27, %v2931_v12  ;;  %v1918_v25 = vunpack.c.0.s8 %v990_v48  ;;  %v996_v1 = vld [vmem:[#allocation9 + $0x748] sm:$0xff] }
 0x24e   :  { %v1926_v22 = vunpack.c.1.s8 %v990_v48  ;;  %v3991_v43 = vmul.f32 %v9091_v21, %v2925_v9  ;;  %v3999_v55 = vmul.f32 %v9091_v21, %v2933_v47  ;;  %v2940_v30 = vcvt.s32.f32 %v1916_v52 }
 0x24f   :  { %v2948_v39 = vcvt.s32.f32 %v1924_v6  ;;  %5010 = vmatprep.subr.bf16.mxu1 %v4576_v42  ;;  %v4573_v56 = vpack.c.bf16 %v3997_v29, %v3989_v61  ;;  %v2942_v2 = vcvt.s32.f32 %v1918_v25  ;;  %v1915_v0 = vunpack.c.0.s8 %v987_v24  ;;  %v995_v29 = vld [vmem:[#allocation9 + $0x740] sm:$0xff] }
 0x250   :  { %v2950_v63 = vcvt.s32.f32 %v1926_v22  ;;  %v4575_v14 = vpack.c.bf16 %v3999_v55, %v3991_v43  ;;  %v4006_v36 = vmul.f32 %v9040_v5, %v2940_v30  ;;  %v1923_v4 = vunpack.c.1.s8 %v987_v24 }
 0x251   :  { %v4014_v41 = vmul.f32 %v9040_v5, %v2948_v39  ;;  %4839 = vmatpush1.bf16.msra.mxu0 %v4573_v56  ;;  %v4008_v8 = vmul.f32 %v9048_v13, %v2942_v2  ;;  %v2939_v45 = vcvt.s32.f32 %v1915_v0  ;;  %v1917_v40 = vunpack.c.0.s8 %v989_v18  ;;  %v997_v2 = vld [vmem:[#allocation9 + $0x750] sm:$0xff] }
 0x252   :  { %v4016_v51 = vmul.f32 %v9048_v13, %v2950_v63  ;;  %5011 = vmatpush1.bf16.msra.mxu1 %v4575_v14  ;;  %v2947_v59 = vcvt.s32.f32 %v1923_v4  ;;  %v1925_v34 = vunpack.c.1.s8 %v989_v18  ;;  %v1932_v58 = vunpack.c.2.s8 %v988_v20 }
 0x253   :  { %v4582_v38 = vpack.c.bf16 %v4014_v41, %v4006_v36  ;;  %v4005_v31 = vmul.f32 %v9054_v27, %v2939_v45  ;;  %v2941_v33 = vcvt.s32.f32 %v1917_v40  ;;  %v1940_v10 = vunpack.c.3.s8 %v988_v20 }
 0x254   :  { %v4584_v53 = vpack.c.bf16 %v4016_v51, %v4008_v8  ;;  %v4013_v46 = vmul.f32 %v9054_v27, %v2947_v59  ;;  %v2949_v19 = vcvt.s32.f32 %v1925_v34  ;;  %v2956_v54 = vcvt.s32.f32 %v1932_v58 }
 0x255   :  { %4840 = vmatprep.subr.bf16.mxu0 %v4582_v38  ;;  %v1934_v15 = vunpack.c.2.s8 %v990_v48  ;;  %v4007_v62 = vmul.f32 %v9091_v21, %v2941_v33  ;;  %v2964_v50 = vcvt.s32.f32 %v1940_v10  ;;  %v1942_v57 = vunpack.c.3.s8 %v990_v48  ;;  %v998_v48 = vld [vmem:[#allocation9 + $0x758] sm:$0xff] }
 0x256   :  { %5012 = vmatprep.subr.bf16.mxu1 %v4584_v53  ;;  %v1931_v3 = vunpack.c.2.s8 %v987_v24  ;;  %v4581_v49 = vpack.c.bf16 %v4013_v46, %v4005_v31  ;;  %v4015_v37 = vmul.f32 %v9091_v21, %v2949_v19  ;;  %v4022_v44 = vmul.f32 %v9040_v5, %v2956_v54 }
 0x257   :  { %v2958_v16 = vcvt.s32.f32 %v1934_v15  ;;  %v4030_v23 = vmul.f32 %v9040_v5, %v2964_v50  ;;  %v2966_v11 = vcvt.s32.f32 %v1942_v57  ;;  %v1939_v20 = vunpack.c.3.s8 %v987_v24 }
 0x258   :  { %v2955_v26 = vcvt.s32.f32 %v1931_v3  ;;  %4841 = vmatpush1.bf16.msra.mxu0 %v4581_v49  ;;  %v4583_v35 = vpack.c.bf16 %v4015_v37, %v4007_v62  ;;  %v1933_v60 = vunpack.c.2.s8 %v989_v18  ;;  %v1941_v7 = vunpack.c.3.s8 %v989_v18 }
 0x259   :  { %v4024_v17 = vmul.f32 %v9048_v13, %v2958_v16  ;;  %v4590_v12 = vpack.c.bf16 %v4030_v23, %v4022_v44  ;;  %v4032_v61 = vmul.f32 %v9048_v13, %v2966_v11  ;;  %v2963_v9 = vcvt.s32.f32 %v1939_v20 }
 0x25a   :  { %v4021_v47 = vmul.f32 %v9054_v27, %v2955_v26  ;;  %5013 = vmatpush1.bf16.msra.mxu1 %v4583_v35  ;;  %v2957_v52 = vcvt.s32.f32 %v1933_v60  ;;  %v2965_v6 = vcvt.s32.f32 %v1941_v7  ;;  %v1948_v42 = vunpack.c.0.s8 %v996_v1 }
 0x25b   :  { %v1956_v24 = vunpack.c.1.s8 %v996_v1  ;;  %4842 = vmatprep.subr.bf16.mxu0 %v4590_v12  ;;  %v4592_v25 = vpack.c.bf16 %v4032_v61, %v4024_v17  ;;  %v4029_v22 = vmul.f32 %v9054_v27, %v2963_v9  ;;  %v1950_v43 = vunpack.c.0.s8 %v998_v48  ;;  %v11514_v17 = vld [vmem:[#allocation9 + $0x788] sm:$0xff]  ;;  %v11517_v61 = vld [vmem:[#allocation9 + $0x798] sm:$0xff] }
 0x25c   :  { %v1958_v55 = vunpack.c.1.s8 %v998_v48  ;;  %v4023_v30 = vmul.f32 %v9091_v21, %v2957_v52  ;;  %v4031_v39 = vmul.f32 %v9091_v21, %v2965_v6  ;;  %v2972_v18 = vcvt.s32.f32 %v1948_v42 }
 0x25d   :  { %v2980_v56 = vcvt.s32.f32 %v1956_v24  ;;  %5014 = vmatprep.subr.bf16.mxu1 %v4592_v25  ;;  %v4589_v63 = vpack.c.bf16 %v4029_v22, %v4021_v47  ;;  %v2974_v0 = vcvt.s32.f32 %v1950_v43  ;;  %v1947_v36 = vunpack.c.0.s8 %v995_v29 }
 0x25e   :  { %v2982_v14 = vcvt.s32.f32 %v1958_v55  ;;  %v4591_v41 = vpack.c.bf16 %v4031_v39, %v4023_v30  ;;  %v4038_v4 = vmul.f32 %v9040_v5, %v2972_v18  ;;  %v1955_v51 = vunpack.c.1.s8 %v995_v29 }
 0x25f   :  { %v4046_v8 = vmul.f32 %v9040_v5, %v2980_v56  ;;  %4843 = vmatpush1.bf16.msra.mxu0 %v4589_v63  ;;  %v4040_v45 = vmul.f32 %v9048_v13, %v2974_v0  ;;  %v2971_v38 = vcvt.s32.f32 %v1947_v36  ;;  %v1949_v59 = vunpack.c.0.s8 %v997_v2  ;;  %v8379_v0 = vld [vmem:[%s13157_s4] sm:$0xff] }
 0x260   :  { %v4048_v40 = vmul.f32 %v9048_v13, %v2982_v14  ;;  %5015 = vmatpush1.bf16.msra.mxu1 %v4591_v41  ;;  %v2979_v58 = vcvt.s32.f32 %v1955_v51  ;;  %v1957_v53 = vunpack.c.1.s8 %v997_v2  ;;  %v1964_v31 = vunpack.c.2.s8 %v996_v1  ;;  %v11537_v36 = vld [vmem:[#allocation9 + $0x780] sm:$0xff] }
 0x261   :  { %v4598_v34 = vpack.c.bf16 %v4046_v8, %v4038_v4  ;;  %v4037_v10 = vmul.f32 %v9054_v27, %v2971_v38  ;;  %v2973_v46 = vcvt.s32.f32 %v1949_v59  ;;  %v1972_v19 = vunpack.c.3.s8 %v996_v1 }
 0x262   :  { %v4600_v33 = vpack.c.bf16 %v4048_v40, %v4040_v45  ;;  %v4045_v54 = vmul.f32 %v9054_v27, %v2979_v58  ;;  %v2981_v15 = vcvt.s32.f32 %v1957_v53  ;;  %v2988_v62 = vcvt.s32.f32 %v1964_v31  ;;  %v13835_v40 = vld [vmem:[#allocation66_spill] sm:$0xff] }
 0x263   :  { %4844 = vmatprep.subr.bf16.mxu0 %v4598_v34  ;;  %v1966_v50 = vunpack.c.2.s8 %v998_v48  ;;  %v4039_v57 = vmul.f32 %v9091_v21, %v2973_v46  ;;  %v2996_v3 = vcvt.s32.f32 %v1972_v19  ;;  %v1974_v49 = vunpack.c.3.s8 %v998_v48 }
 0x264   :  { %5016 = vmatprep.subr.bf16.mxu1 %v4600_v33  ;;  %v1963_v37 = vunpack.c.2.s8 %v995_v29  ;;  %v4597_v44 = vpack.c.bf16 %v4045_v54, %v4037_v10  ;;  %v4047_v16 = vmul.f32 %v9091_v21, %v2981_v15  ;;  %v4054_v23 = vmul.f32 %v9040_v5, %v2988_v62  ;;  %v1005_v10 = vld [vmem:[#allocation9 + $0x790] sm:$0xff] }
 0x265   :  { %v2990_v11 = vcvt.s32.f32 %v1966_v50  ;;  %v4062_v20 = vmul.f32 %v9040_v5, %v2996_v3  ;;  %v2998_v26 = vcvt.s32.f32 %v1974_v49  ;;  %v1971_v1 = vunpack.c.3.s8 %v995_v29  ;;  %v13834_v29 = vld [vmem:[#allocation24_spill] sm:$0xff]  ;;  %v13836_v49 = vld [vmem:[#allocation65_spill] sm:$0xff] }
 0x266   :  { %v2987_v35 = vcvt.s32.f32 %v1963_v37  ;;  %4845 = vmatpush1.bf16.msra.mxu0 %v4597_v44  ;;  %v4599_v60 = vpack.c.bf16 %v4047_v16, %v4039_v57  ;;  %v1965_v12 = vunpack.c.2.s8 %v997_v2  ;;  %v1973_v48 = vunpack.c.3.s8 %v997_v2  ;;  %v8378_v2 = vld [vmem:[#allocation8] sm:$0xff] }
 0x267   :  { %v4056_v7 = vmul.f32 %v9048_v13, %v2990_v11  ;;  %v4606_v9 = vpack.c.bf16 %v4062_v20, %v4054_v23  ;;  %v4064_v47 = vmul.f32 %v9048_v13, %v2998_v26  ;;  %v2995_v52 = vcvt.s32.f32 %v1971_v1  ;;  %v13837_v23 = vld [vmem:[#allocation68_spill] sm:$0xff] }
 0x268   :  { %v4053_v6 = vmul.f32 %v9054_v27, %v2987_v35  ;;  %5017 = vmatpush1.bf16.msra.mxu1 %v4599_v60  ;;  %v2989_v42 = vcvt.s32.f32 %v1965_v12  ;;  %v2997_v24 = vcvt.s32.f32 %v1973_v48  ;;  %v11522_v25 = vsub.s32 6, %v13834_v29  ;;  %v13838_v35 = vld [vmem:[#allocation67_spill] sm:$0xff] }
 0x269   :  { %v1980_v22 = vunpack.c.0.s8 %v11514_v17  ;;  %4846 = vmatprep.subr.bf16.mxu0 %v4606_v9  ;;  %v4608_v43 = vpack.c.bf16 %v4064_v47, %v4056_v7  ;;  %v4061_v55 = vmul.f32 %v9054_v27, %v2995_v52  ;;  %v1988_v30 = vunpack.c.1.s8 %v11514_v17 }
 0x26a   :  { %v1982_v39 = vunpack.c.0.s8 %v11517_v61  ;;  %v4055_v18 = vmul.f32 %v9091_v21, %v2989_v42  ;;  %v4063_v56 = vmul.f32 %v9091_v21, %v2997_v24  ;;  %v242_v63 = vrot.slane %v8378_v2, %v11522_v25 }
 0x26b   :  { %v11535_v14 = vrot.slane %v8379_v0, %v11522_v25  ;;  %5018 = vmatprep.subr.bf16.mxu1 %v4608_v43  ;;  %v4605_v41 = vpack.c.bf16 %v4061_v55, %v4053_v6  ;;  %v3004_v4 = vcvt.s32.f32 %v1980_v22  ;;  %v3012_v8 = vcvt.s32.f32 %v1988_v30 }
 0x26c   :  { %v1990_v51 = vunpack.c.1.s8 %v11517_v61  ;;  %v4607_v45 = vpack.c.bf16 %v4063_v56, %v4055_v18  ;;  %v739_v38 = vadd.f32 %v13835_v40, %v242_v63  ;;  %v3006_v59 = vcvt.s32.f32 %v1982_v39 }
 0x26d   :  { %v11542_v34 = vsub.s32 7, %v13834_v29  ;;  %4847 = vmatpush1.bf16.msra.mxu0 %v4605_v41  ;;  %v4070_v58 = vmul.f32 %v9040_v5, %v3004_v4  ;;  %v4078_v53 = vmul.f32 %v9040_v5, %v3012_v8  ;;  %v1979_v33 = vunpack.c.0.s8 %v11537_v36 }
 0x26e   :  { %v3014_v31 = vcvt.s32.f32 %v1990_v51  ;;  %5019 = vmatpush1.bf16.msra.mxu1 %v4607_v45  ;;  %v753_v46 = vmax.f32 %v739_v38, 0.0  ;;  %v4072_v19 = vmul.f32 %v9048_v13, %v3006_v59  ;;  %v1987_v57 = vunpack.c.1.s8 %v11537_v36  ;;  %v1014_v59 = vld [vmem:[#allocation9 + $0x7d8] sm:$0xff] }
 0x26f   :  { %v246_v54 = vrot.slane %v8378_v2, %v11542_v34  ;;  %v11550_v15 = vrot.slane %v8379_v0, %v11542_v34  ;;  %v4614_v62 = vpack.c.bf16 %v4078_v53, %v4070_v58  ;;  %v3003_v3 = vcvt.s32.f32 %v1979_v33 }
 0x270   :  { %v4080_v50 = vmul.f32 %v9048_v13, %v3014_v31  ;;  %v1981_v44 = vunpack.c.0.s8 %v1005_v10  ;;  %v1989_v16 = vunpack.c.1.s8 %v1005_v10  ;;  %v743_v11 = vadd.f32 %v13837_v23, %v242_v63  ;;  %v1013_v23 = vld [vmem:[#allocation9 + $0x7d0] sm:$0xff] }
 0x271   :  { %v741_v37 = vadd.f32 %v13836_v49, %v246_v54  ;;  %4848 = vmatprep.subr.bf16.mxu0 %v4614_v62  ;;  %v3011_v26 = vcvt.s32.f32 %v1987_v57  ;;  %v4069_v1 = vmul.f32 %v9054_v27, %v3003_v3  ;;  %v745_v60 = vadd.f32 %v13838_v35, %v246_v54  ;;  %v1011_v62 = vld [vmem:[#allocation9 + $0x7c0] sm:$0xff] }
 0x272   :  { %v4616_v20 = vpack.c.bf16 %v4080_v50, %v4072_v19  ;;  %v3005_v12 = vcvt.s32.f32 %v1981_v44  ;;  %v3013_v48 = vcvt.s32.f32 %v1989_v16  ;;  %v761_v9 = vmax.f32 %v743_v11, 0.0 }
 0x273   :  { %v754_v7 = vmax.f32 %v741_v37, 0.0  ;;  %v4077_v47 = vmul.f32 %v9054_v27, %v3011_v26  ;;  %v762_v52 = vmax.f32 %v745_v60, 0.0  ;;  %v1996_v6 = vunpack.c.2.s8 %v11514_v17 }
 0x274   :  { %5020 = vmatprep.subr.bf16.mxu1 %v4616_v20  ;;  %v2004_v42 = vunpack.c.3.s8 %v11514_v17  ;;  %v4071_v24 = vmul.f32 %v9091_v21, %v3005_v12  ;;  %v4079_v29 = vmul.f32 %v9091_v21, %v3013_v48  ;;  %v11563_v22 = vpack.c.bf16 %v761_v9, %v753_v46  ;;  %v11570_v17 = vld [vmem:[#allocation9 + $0x7c8] sm:$0xff] }
 0x275   :  { %v1998_v43 = vunpack.c.2.s8 %v11517_v61  ;;  %v4613_v55 = vpack.c.bf16 %v4077_v47, %v4069_v1  ;;  %v11566_v30 = vpack.c.bf16 %v762_v52, %v754_v7  ;;  %v3020_v39 = vcvt.s32.f32 %v1996_v6 }
 0x276   :  { %v3028_v18 = vcvt.s32.f32 %v2004_v42  ;;  %v4615_v56 = vpack.c.bf16 %v4079_v29, %v4071_v24  ;;  %v2006_v2 = vunpack.c.3.s8 %v11517_v61  ;;  %v1995_v0 = vunpack.c.2.s8 %v11537_v36 }
 0x277   :  { %v3022_v63 = vcvt.s32.f32 %v1998_v43  ;;  %4849 = vmatpush1.bf16.msra.mxu0 %v4613_v55  ;;  %v4086_v41 = vmul.f32 %v9040_v5, %v3020_v39  ;;  %v2003_v8 = vunpack.c.3.s8 %v11537_v36  ;;  %v1997_v51 = vunpack.c.2.s8 %v1005_v10  ;;  %4856 = vmatprep.mubr.bf16.mxu0 %v11566_v30 }
 0x278   :  { %v4094_v4 = vmul.f32 %v9040_v5, %v3028_v18  ;;  %5021 = vmatpush1.bf16.msra.mxu1 %v4615_v56  ;;  %v3030_v45 = vcvt.s32.f32 %v2006_v2  ;;  %v3019_v61 = vcvt.s32.f32 %v1995_v0  ;;  %v2005_v38 = vunpack.c.3.s8 %v1005_v10  ;;  %5028 = vmatprep.mubr.bf16.mxu1 %v11566_v30 }
 0x279   :  { %v4088_v40 = vmul.f32 %v9048_v13, %v3022_v63  ;;  %v3027_v53 = vcvt.s32.f32 %v2003_v8  ;;  %v3021_v31 = vcvt.s32.f32 %v1997_v51  ;;  %v2012_v33 = vunpack.c.0.s8 %v11570_v17 }
 0x27a   :  { %v4622_v58 = vpack.c.bf16 %v4094_v4, %v4086_v41  ;;  %v4096_v46 = vmul.f32 %v9048_v13, %v3030_v45  ;;  %v4085_v36 = vmul.f32 %v9054_v27, %v3019_v61  ;;  %v3029_v19 = vcvt.s32.f32 %v2005_v38 }
 0x27b   :  { %v2020_v54 = vunpack.c.1.s8 %v11570_v17  ;;  %v4093_v50 = vmul.f32 %v9054_v27, %v3027_v53  ;;  %v4087_v10 = vmul.f32 %v9091_v21, %v3021_v31  ;;  %v3036_v57 = vcvt.s32.f32 %v2012_v33 }
 0x27c   :  { %4850 = vmatprep.subr.bf16.mxu0 %v4622_v58  ;;  %v2014_v3 = vunpack.c.0.s8 %v1014_v59  ;;  %v4624_v49 = vpack.c.bf16 %v4096_v46, %v4088_v40  ;;  %v4095_v37 = vmul.f32 %v9091_v21, %v3029_v19  ;;  %v2022_v16 = vunpack.c.1.s8 %v1014_v59  ;;  %v11596_v58 = vld [vmem:[#allocation9 + $0x28] sm:$0xff] }
 0x27d   :  { %v3044_v44 = vcvt.s32.f32 %v2020_v54  ;;  %v4621_v11 = vpack.c.bf16 %v4093_v50, %v4085_v36  ;;  %v4102_v20 = vmul.f32 %v9040_v5, %v3036_v57  ;;  %v2011_v1 = vunpack.c.0.s8 %v1011_v62 }
 0x27e   :  { %v3038_v26 = vcvt.s32.f32 %v2014_v3  ;;  %5022 = vmatprep.subr.bf16.mxu1 %v4624_v49  ;;  %v4623_v35 = vpack.c.bf16 %v4095_v37, %v4087_v10  ;;  %v3046_v7 = vcvt.s32.f32 %v2022_v16  ;;  %v2019_v12 = vunpack.c.1.s8 %v1011_v62 }
 0x27f   :  { %v4110_v60 = vmul.f32 %v9040_v5, %v3044_v44  ;;  %4851 = vmatpush1.bf16.msra.mxu0 %v4621_v11  ;;  %v3035_v9 = vcvt.s32.f32 %v2011_v1  ;;  %v2013_v47 = vunpack.c.0.s8 %v1013_v23  ;;  %v2021_v52 = vunpack.c.1.s8 %v1013_v23  ;;  %v11606_v44 = vld [vmem:[#allocation9 + $0x20] sm:$0xff] }
 0x280   :  { %v4104_v48 = vmul.f32 %v9048_v13, %v3038_v26  ;;  %5023 = vmatpush1.bf16.msra.mxu1 %v4623_v35  ;;  %v4112_v42 = vmul.f32 %v9048_v13, %v3046_v7  ;;  %v3043_v24 = vcvt.s32.f32 %v2019_v12  ;;  %v2028_v29 = vunpack.c.2.s8 %v11570_v17  ;;  %v13839_v12 = vld [vmem:[#allocation76_spill] sm:$0xff] }
 0x281   :  { %v4630_v6 = vpack.c.bf16 %v4110_v60, %v4102_v20  ;;  %v4101_v43 = vmul.f32 %v9054_v27, %v3035_v9  ;;  %v3037_v55 = vcvt.s32.f32 %v2013_v47  ;;  %v3045_v39 = vcvt.s32.f32 %v2021_v52  ;;  %v769_v60 = vld [vmem:[#allocation9 + $0x30] sm:$0xff] }
 0x282   :  { %v2036_v18 = vunpack.c.3.s8 %v11570_v17  ;;  %v4632_v56 = vpack.c.bf16 %v4112_v42, %v4104_v48  ;;  %v4109_v2 = vmul.f32 %v9054_v27, %v3043_v24  ;;  %v3052_v63 = vcvt.s32.f32 %v2028_v29 }
 0x283   :  { %4852 = vmatprep.subr.bf16.mxu0 %v4630_v6  ;;  %v2030_v0 = vunpack.c.2.s8 %v1014_v59  ;;  %v4103_v41 = vmul.f32 %v9091_v21, %v3037_v55  ;;  %v4111_v4 = vmul.f32 %v9091_v21, %v3045_v39  ;;  %v2038_v51 = vunpack.c.3.s8 %v1014_v59  ;;  %v11600_v59 = vld [vmem:[#allocation9 + $0x38] sm:$0xff] }
 0x284   :  { %v3060_v8 = vcvt.s32.f32 %v2036_v18  ;;  %5024 = vmatprep.subr.bf16.mxu1 %v4632_v56  ;;  %v4629_v45 = vpack.c.bf16 %v4109_v2, %v4101_v43  ;;  %v4118_v40 = vmul.f32 %v9040_v5, %v3052_v63  ;;  %v2027_v38 = vunpack.c.2.s8 %v1011_v62  ;;  %v13840_v2 = vld [vmem:[#allocation74_spill] sm:$0xff] }
 0x285   :  { %v3054_v61 = vcvt.s32.f32 %v2030_v0  ;;  %v4631_v17 = vpack.c.bf16 %v4111_v4, %v4103_v41  ;;  %v3062_v31 = vcvt.s32.f32 %v2038_v51  ;;  %v2035_v33 = vunpack.c.3.s8 %v1011_v62 }
 0x286   :  { %v4126_v53 = vmul.f32 %v9040_v5, %v3060_v8  ;;  %4853 = vmatpush1.bf16.msra.mxu0 %v4629_v45  ;;  %v3051_v36 = vcvt.s32.f32 %v2027_v38  ;;  %v2029_v19 = vunpack.c.2.s8 %v1013_v23  ;;  %v2037_v54 = vunpack.c.3.s8 %v1013_v23 }
 0x287   :  { %v4120_v46 = vmul.f32 %v9048_v13, %v3054_v61  ;;  %5025 = vmatpush1.bf16.msra.mxu1 %v4631_v17  ;;  %v4128_v10 = vmul.f32 %v9048_v13, %v3062_v31  ;;  %v3059_v57 = vcvt.s32.f32 %v2035_v33  ;;  %v1024_v3 = vunpack.c.0.s8 %v11596_v58  ;;  %v13841_v61 = vld [vmem:[#allocation121_spill] sm:$0xff] }
 0x288   :  { %v4638_v50 = vpack.c.bf16 %v4126_v53, %v4118_v40  ;;  %v4117_v49 = vmul.f32 %v9054_v27, %v3051_v36  ;;  %v3053_v5 = vcvt.s32.f32 %v2029_v19  ;;  %v3061_v37 = vcvt.s32.f32 %v2037_v54  ;;  %v776_v19 = vld [vmem:[#allocation9 + $0x68] sm:$0xff] }
 0x289   :  { %v1032_v62 = vunpack.c.1.s8 %v11596_v58  ;;  %v4640_v16 = vpack.c.bf16 %v4128_v10, %v4120_v46  ;;  %v4125_v23 = vmul.f32 %v9054_v27, %v3059_v57  ;;  %v2048_v11 = vcvt.s32.f32 %v1024_v3 }
 0x28a   :  { %4854 = vmatprep.subr.bf16.mxu0 %v4638_v50  ;;  %v1026_v20 = vunpack.c.0.s8 %v11600_v59  ;;  %v4119_v13 = vmul.f32 %v9091_v21, %v3053_v5  ;;  %v4127_v26 = vmul.f32 %v9091_v21, %v3061_v37  ;;  %v1034_v35 = vunpack.c.1.s8 %v11600_v59  ;;  %v778_v37 = vld [vmem:[#allocation9 + $0x78] sm:$0xff] }
 0x28b   :  { %v2056_v1 = vcvt.s32.f32 %v1032_v62  ;;  %5026 = vmatprep.subr.bf16.mxu1 %v4640_v16  ;;  %v4637_v7 = vpack.c.bf16 %v4125_v23, %v4117_v49  ;;  %v3114_v48 = vmul.f32 %v13839_v12, %v2048_v11  ;;  %v1023_v47 = vunpack.c.0.s8 %v11606_v44 }
 0x28c   :  { %v2050_v9 = vcvt.s32.f32 %v1026_v20  ;;  %v4639_v52 = vpack.c.bf16 %v4127_v26, %v4119_v13  ;;  %v2058_v6 = vcvt.s32.f32 %v1034_v35  ;;  %v1031_v42 = vunpack.c.1.s8 %v11606_v44  ;;  %v775_v35 = vld [vmem:[#allocation9 + $0x60] sm:$0xff] }
 0x28d   :  { %v3122_v27 = vmul.f32 %v13839_v12, %v2056_v1  ;;  %4855 = vmatpush1.bf16.msra.mxu0 %v4637_v7  ;;  %v2047_v24 = vcvt.s32.f32 %v1023_v47  ;;  %v1025_v29 = vunpack.c.0.s8 %v769_v60  ;;  %v1033_v43 = vunpack.c.1.s8 %v769_v60 }
 0x28e   :  { %v3116_v21 = vmul.f32 %v11550_v15, %v2050_v9  ;;  %5027 = vmatpush1.bf16.msra.mxu1 %v4639_v52  ;;  %v3124_v39 = vmul.f32 %v11550_v15, %v2058_v6  ;;  %v2055_v18 = vcvt.s32.f32 %v1031_v42  ;;  %v1040_v56 = vunpack.c.2.s8 %v11596_v58  ;;  %v777_v6 = vld [vmem:[#allocation9 + $0x70] sm:$0xff] }
 0x28f   :  { %v4138_v55 = vpack.c.bf16 %v3122_v27, %v3114_v48  ;;  %v3113_v63 = vmul.f32 %v13840_v2, %v2047_v24  ;;  %v2049_v0 = vcvt.s32.f32 %v1025_v29  ;;  %v2057_v41 = vcvt.s32.f32 %v1033_v43 }
 0x290   :  { %v1048_v4 = vunpack.c.3.s8 %v11596_v58  ;;  %4857 = vmatmul.mubr.bf16.vlgmr.msra.gmra.mrb[8].mxu0 %v11563_v22  ;;  %v4140_v8 = vpack.c.bf16 %v3124_v39, %v3116_v21  ;;  %v3121_v51 = vmul.f32 %v13840_v2, %v2055_v18  ;;  %v2064_v45 = vcvt.s32.f32 %v1040_v56 }
 0x291   :  { %5039 = vmatprep.subr.bf16.mxu0 %v4138_v55  ;;  %v1042_v40 = vunpack.c.2.s8 %v11600_v59  ;;  %5029 = vmatmul.mubr.bf16.vlgmr.msra.gmra.mrb[8].mxu1 %v11563_v22  ;;  %v3115_v38 = vmul.f32 %v11535_v14, %v2049_v0  ;;  %v3123_v17 = vmul.f32 %v11535_v14, %v2057_v41  ;;  %v1050_v58 = vunpack.c.3.s8 %v11600_v59 }
 0x292   :  { %5071 = vmatprep.mubr.bf16.mxu0 %v13841_v61  ;;  %v2072_v53 = vcvt.s32.f32 %v1048_v4  ;;  %5211 = vmatprep.subr.bf16.mxu1 %v4140_v8  ;;  %v4137_v31 = vpack.c.bf16 %v3121_v51, %v3113_v63  ;;  %v3130_v33 = vmul.f32 %v13839_v12, %v2064_v45  ;;  %v1039_v36 = vunpack.c.2.s8 %v11606_v44 }
 0x293   :  { %5243 = vmatprep.mubr.bf16.mxu1 %v13841_v61  ;;  %v2066_v46 = vcvt.s32.f32 %v1042_v40  ;;  %v4139_v54 = vpack.c.bf16 %v3123_v17, %v3115_v38  ;;  %v2074_v10 = vcvt.s32.f32 %v1050_v58  ;;  %v1047_v57 = vunpack.c.3.s8 %v11606_v44 }
 0x294   :  { %v3138_v50 = vmul.f32 %v13839_v12, %v2072_v53  ;;  %5040 = vmatpush1.bf16.msra.mxu0 %v4137_v31  ;;  %v2063_v59 = vcvt.s32.f32 %v1039_v36  ;;  %v1041_v49 = vunpack.c.2.s8 %v769_v60  ;;  %v1049_v5 = vunpack.c.3.s8 %v769_v60 }
 0x295   :  { %v3132_v3 = vmul.f32 %v11550_v15, %v2066_v46  ;;  %5212 = vmatpush1.bf16.msra.mxu1 %v4139_v54  ;;  %v3140_v16 = vmul.f32 %v11550_v15, %v2074_v10  ;;  %v2071_v23 = vcvt.s32.f32 %v1047_v57  ;;  %v1056_v11 = vunpack.c.0.s8 %v776_v19 }
 0x296   :  { %v4146_v62 = vpack.c.bf16 %v3138_v50, %v3130_v33  ;;  %v3129_v20 = vmul.f32 %v13840_v2, %v2063_v59  ;;  %v2065_v13 = vcvt.s32.f32 %v1041_v49  ;;  %v2073_v26 = vcvt.s32.f32 %v1049_v5  ;;  %v784_v49 = vld [vmem:[#allocation9 + $0xa8] sm:$0xff] }
 0x297   :  { %v1064_v1 = vunpack.c.1.s8 %v776_v19  ;;  %v4148_v44 = vpack.c.bf16 %v3140_v16, %v3132_v3  ;;  %v3137_v7 = vmul.f32 %v13840_v2, %v2071_v23  ;;  %v2080_v48 = vcvt.s32.f32 %v1056_v11 }
 0x298   :  { %5041 = vmatprep.subr.bf16.mxu0 %v4146_v62  ;;  %v1058_v9 = vunpack.c.0.s8 %v778_v37  ;;  %v3131_v60 = vmul.f32 %v11535_v14, %v2065_v13  ;;  %v3139_v47 = vmul.f32 %v11535_v14, %v2073_v26  ;;  %v1066_v27 = vunpack.c.1.s8 %v778_v37  ;;  %v786_v26 = vld [vmem:[#allocation9 + $0xb8] sm:$0xff] }
 0x299   :  { %v2088_v52 = vcvt.s32.f32 %v1064_v1  ;;  %5213 = vmatprep.subr.bf16.mxu1 %v4148_v44  ;;  %v4145_v42 = vpack.c.bf16 %v3137_v7, %v3129_v20  ;;  %v3146_v21 = vmul.f32 %v13839_v12, %v2080_v48  ;;  %v1055_v29 = vunpack.c.0.s8 %v775_v35 }
 0x29a   :  { %v2082_v24 = vcvt.s32.f32 %v1058_v9  ;;  %v4147_v43 = vpack.c.bf16 %v3139_v47, %v3131_v60  ;;  %v2090_v39 = vcvt.s32.f32 %v1066_v27  ;;  %v1063_v18 = vunpack.c.1.s8 %v775_v35 }
 0x29b   :  { %v3154_v55 = vmul.f32 %v13839_v12, %v2088_v52  ;;  %5042 = vmatpush1.bf16.msra.mxu0 %v4145_v42  ;;  %v2079_v63 = vcvt.s32.f32 %v1055_v29  ;;  %v1057_v0 = vunpack.c.0.s8 %v777_v6  ;;  %v1065_v41 = vunpack.c.1.s8 %v777_v6  ;;  %v783_v52 = vld [vmem:[#allocation9 + $0xa0] sm:$0xff] }
 0x29c   :  { %v3148_v56 = vmul.f32 %v11550_v15, %v2082_v24  ;;  %5214 = vmatpush1.bf16.msra.mxu1 %v4147_v43  ;;  %v3156_v8 = vmul.f32 %v11550_v15, %v2090_v39  ;;  %v2087_v51 = vcvt.s32.f32 %v1063_v18  ;;  %v1072_v45 = vunpack.c.2.s8 %v776_v19 }
 0x29d   :  { %v4154_v4 = vpack.c.bf16 %v3154_v55, %v3146_v21  ;;  %v3145_v40 = vmul.f32 %v13840_v2, %v2079_v63  ;;  %v2081_v61 = vcvt.s32.f32 %v1057_v0  ;;  %v2089_v38 = vcvt.s32.f32 %v1065_v41  ;;  %v785_v55 = vld [vmem:[#allocation9 + $0xb0] sm:$0xff] }
 0x29e   :  { %v1080_v17 = vunpack.c.3.s8 %v776_v19  ;;  %v4156_v53 = vpack.c.bf16 %v3156_v8, %v3148_v56  ;;  %v3153_v58 = vmul.f32 %v13840_v2, %v2087_v51  ;;  %v2096_v31 = vcvt.s32.f32 %v1072_v45 }
 0x29f   :  { %5043 = vmatprep.subr.bf16.mxu0 %v4154_v4  ;;  %v1074_v33 = vunpack.c.2.s8 %v778_v37  ;;  %v3147_v46 = vmul.f32 %v11535_v14, %v2081_v61  ;;  %v3155_v36 = vmul.f32 %v11535_v14, %v2089_v38  ;;  %v1082_v50 = vunpack.c.3.s8 %v778_v37 }
 0x2a0   :  { %v2104_v54 = vcvt.s32.f32 %v1080_v17  ;;  %5215 = vmatprep.subr.bf16.mxu1 %v4156_v53  ;;  %v4153_v10 = vpack.c.bf16 %v3153_v58, %v3145_v40  ;;  %v3162_v57 = vmul.f32 %v13839_v12, %v2096_v31  ;;  %v1071_v59 = vunpack.c.2.s8 %v775_v35 }
 0x2a1   :  { %v2098_v3 = vcvt.s32.f32 %v1074_v33  ;;  %v4155_v19 = vpack.c.bf16 %v3155_v36, %v3147_v46  ;;  %v2106_v62 = vcvt.s32.f32 %v1082_v50  ;;  %v1079_v16 = vunpack.c.3.s8 %v775_v35 }
 0x2a2   :  { %v3170_v5 = vmul.f32 %v13839_v12, %v2104_v54  ;;  %5044 = vmatpush1.bf16.msra.mxu0 %v4153_v10  ;;  %v2095_v11 = vcvt.s32.f32 %v1071_v59  ;;  %v1073_v20 = vunpack.c.2.s8 %v777_v6  ;;  %v1081_v13 = vunpack.c.3.s8 %v777_v6 }
 0x2a3   :  { %v3164_v23 = vmul.f32 %v11550_v15, %v2098_v3  ;;  %5216 = vmatpush1.bf16.msra.mxu1 %v4155_v19  ;;  %v3172_v1 = vmul.f32 %v11550_v15, %v2106_v62  ;;  %v2103_v44 = vcvt.s32.f32 %v1079_v16  ;;  %v1088_v7 = vunpack.c.0.s8 %v784_v49 }
 0x2a4   :  { %v4162_v37 = vpack.c.bf16 %v3170_v5, %v3162_v57  ;;  %v3161_v48 = vmul.f32 %v13840_v2, %v2095_v11  ;;  %v2097_v9 = vcvt.s32.f32 %v1073_v20  ;;  %v2105_v60 = vcvt.s32.f32 %v1081_v13  ;;  %v792_v20 = vld [vmem:[#allocation9 + $0xe8] sm:$0xff] }
 0x2a5   :  { %v1096_v47 = vunpack.c.1.s8 %v784_v49  ;;  %v4164_v35 = vpack.c.bf16 %v3172_v1, %v3164_v23  ;;  %v3169_v27 = vmul.f32 %v13840_v2, %v2103_v44  ;;  %v2112_v42 = vcvt.s32.f32 %v1088_v7 }
 0x2a6   :  { %5045 = vmatprep.subr.bf16.mxu0 %v4162_v37  ;;  %v1090_v21 = vunpack.c.0.s8 %v786_v26  ;;  %v3163_v6 = vmul.f32 %v11535_v14, %v2097_v9  ;;  %v3171_v24 = vmul.f32 %v11535_v14, %v2105_v60  ;;  %v1098_v43 = vunpack.c.1.s8 %v786_v26  ;;  %v794_v60 = vld [vmem:[#allocation9 + $0xf8] sm:$0xff] }
 0x2a7   :  { %v2120_v29 = vcvt.s32.f32 %v1096_v47  ;;  %5217 = vmatprep.subr.bf16.mxu1 %v4164_v35  ;;  %v4161_v39 = vpack.c.bf16 %v3169_v27, %v3161_v48  ;;  %v3178_v18 = vmul.f32 %v13839_v12, %v2112_v42  ;;  %v1087_v63 = vunpack.c.0.s8 %v783_v52 }
 0x2a8   :  { %v2114_v56 = vcvt.s32.f32 %v1090_v21  ;;  %v4163_v0 = vpack.c.bf16 %v3171_v24, %v3163_v6  ;;  %v2122_v4 = vcvt.s32.f32 %v1098_v43  ;;  %v1095_v8 = vunpack.c.1.s8 %v783_v52 }
 0x2a9   :  { %v3186_v41 = vmul.f32 %v13839_v12, %v2120_v29  ;;  %5046 = vmatpush1.bf16.msra.mxu0 %v4161_v39  ;;  %v2111_v45 = vcvt.s32.f32 %v1087_v63  ;;  %v1089_v40 = vunpack.c.0.s8 %v785_v55  ;;  %v1097_v61 = vunpack.c.1.s8 %v785_v55  ;;  %v791_v29 = vld [vmem:[#allocation9 + $0xe0] sm:$0xff] }
 0x2aa   :  { %v3180_v51 = vmul.f32 %v11550_v15, %v2114_v56  ;;  %5218 = vmatpush1.bf16.msra.mxu1 %v4163_v0  ;;  %v3188_v17 = vmul.f32 %v11550_v15, %v2122_v4  ;;  %v2119_v53 = vcvt.s32.f32 %v1095_v8  ;;  %v1104_v58 = vunpack.c.2.s8 %v784_v49 }
 0x2ab   :  { %v4170_v38 = vpack.c.bf16 %v3186_v41, %v3178_v18  ;;  %v3177_v31 = vmul.f32 %v13840_v2, %v2111_v45  ;;  %v2113_v33 = vcvt.s32.f32 %v1089_v40  ;;  %v2121_v46 = vcvt.s32.f32 %v1097_v61  ;;  %v793_v41 = vld [vmem:[#allocation9 + $0xf0] sm:$0xff] }
 0x2ac   :  { %v1112_v36 = vunpack.c.3.s8 %v784_v49  ;;  %v4172_v54 = vpack.c.bf16 %v3188_v17, %v3180_v51  ;;  %v3185_v50 = vmul.f32 %v13840_v2, %v2119_v53  ;;  %v2128_v10 = vcvt.s32.f32 %v1104_v58 }
 0x2ad   :  { %5047 = vmatprep.subr.bf16.mxu0 %v4170_v38  ;;  %v1106_v57 = vunpack.c.2.s8 %v786_v26  ;;  %v3179_v3 = vmul.f32 %v11535_v14, %v2113_v33  ;;  %v3187_v59 = vmul.f32 %v11535_v14, %v2121_v46  ;;  %v1114_v5 = vunpack.c.3.s8 %v786_v26 }
 0x2ae   :  { %v2136_v19 = vcvt.s32.f32 %v1112_v36  ;;  %5219 = vmatprep.subr.bf16.mxu1 %v4172_v54  ;;  %v4169_v62 = vpack.c.bf16 %v3185_v50, %v3177_v31  ;;  %v3194_v16 = vmul.f32 %v13839_v12, %v2128_v10  ;;  %v1103_v11 = vunpack.c.2.s8 %v783_v52 }
 0x2af   :  { %v2130_v23 = vcvt.s32.f32 %v1106_v57  ;;  %v4171_v49 = vpack.c.bf16 %v3187_v59, %v3179_v3  ;;  %v2138_v37 = vcvt.s32.f32 %v1114_v5  ;;  %v1111_v1 = vunpack.c.3.s8 %v783_v52 }
 0x2b0   :  { %v3202_v13 = vmul.f32 %v13839_v12, %v2136_v19  ;;  %5048 = vmatpush1.bf16.msra.mxu0 %v4169_v62  ;;  %v2127_v7 = vcvt.s32.f32 %v1103_v11  ;;  %v1105_v48 = vunpack.c.2.s8 %v785_v55  ;;  %v1113_v9 = vunpack.c.3.s8 %v785_v55 }
 0x2b1   :  { %v3196_v44 = vmul.f32 %v11550_v15, %v2130_v23  ;;  %5220 = vmatpush1.bf16.msra.mxu1 %v4171_v49  ;;  %v3204_v47 = vmul.f32 %v11550_v15, %v2138_v37  ;;  %v2135_v35 = vcvt.s32.f32 %v1111_v1  ;;  %v1120_v27 = vunpack.c.0.s8 %v792_v20 }
 0x2b2   :  { %v4178_v26 = vpack.c.bf16 %v3202_v13, %v3194_v16  ;;  %v3193_v42 = vmul.f32 %v13840_v2, %v2127_v7  ;;  %v2129_v21 = vcvt.s32.f32 %v1105_v48  ;;  %v2137_v6 = vcvt.s32.f32 %v1113_v9  ;;  %v800_v48 = vld [vmem:[#allocation9 + $0x128] sm:$0xff] }
 0x2b3   :  { %v1128_v24 = vunpack.c.1.s8 %v792_v20  ;;  %v4180_v52 = vpack.c.bf16 %v3204_v47, %v3196_v44  ;;  %v3201_v43 = vmul.f32 %v13840_v2, %v2135_v35  ;;  %v2144_v39 = vcvt.s32.f32 %v1120_v27 }
 0x2b4   :  { %5049 = vmatprep.subr.bf16.mxu0 %v4178_v26  ;;  %v1122_v18 = vunpack.c.0.s8 %v794_v60  ;;  %v3195_v55 = vmul.f32 %v11535_v14, %v2129_v21  ;;  %v3203_v56 = vmul.f32 %v11535_v14, %v2137_v6  ;;  %v1130_v0 = vunpack.c.1.s8 %v794_v60  ;;  %v802_v6 = vld [vmem:[#allocation9 + $0x138] sm:$0xff] }
 0x2b5   :  { %v2152_v63 = vcvt.s32.f32 %v1128_v24  ;;  %5221 = vmatprep.subr.bf16.mxu1 %v4180_v52  ;;  %v4177_v4 = vpack.c.bf16 %v3201_v43, %v3193_v42  ;;  %v3210_v8 = vmul.f32 %v13839_v12, %v2144_v39  ;;  %v1119_v45 = vunpack.c.0.s8 %v791_v29 }
 0x2b6   :  { %v2146_v51 = vcvt.s32.f32 %v1122_v18  ;;  %v4179_v40 = vpack.c.bf16 %v3203_v56, %v3195_v55  ;;  %v2154_v38 = vcvt.s32.f32 %v1130_v0  ;;  %v1127_v17 = vunpack.c.1.s8 %v791_v29 }
 0x2b7   :  { %v3218_v61 = vmul.f32 %v13839_v12, %v2152_v63  ;;  %5050 = vmatpush1.bf16.msra.mxu0 %v4177_v4  ;;  %v2143_v58 = vcvt.s32.f32 %v1119_v45  ;;  %v1121_v31 = vunpack.c.0.s8 %v793_v41  ;;  %v1129_v33 = vunpack.c.1.s8 %v793_v41  ;;  %v799_v63 = vld [vmem:[#allocation9 + $0x120] sm:$0xff] }
 0x2b8   :  { %v3212_v53 = vmul.f32 %v11550_v15, %v2146_v51  ;;  %5222 = vmatpush1.bf16.msra.mxu1 %v4179_v40  ;;  %v3220_v36 = vmul.f32 %v11550_v15, %v2154_v38  ;;  %v2151_v54 = vcvt.s32.f32 %v1127_v17  ;;  %v1136_v50 = vunpack.c.2.s8 %v792_v20 }
 0x2b9   :  { %v4186_v46 = vpack.c.bf16 %v3218_v61, %v3210_v8  ;;  %v3209_v10 = vmul.f32 %v13840_v2, %v2143_v58  ;;  %v2145_v57 = vcvt.s32.f32 %v1121_v31  ;;  %v2153_v3 = vcvt.s32.f32 %v1129_v33  ;;  %v801_v61 = vld [vmem:[#allocation9 + $0x130] sm:$0xff] }
 0x2ba   :  { %v1144_v59 = vunpack.c.3.s8 %v792_v20  ;;  %v4188_v19 = vpack.c.bf16 %v3220_v36, %v3212_v53  ;;  %v3217_v5 = vmul.f32 %v13840_v2, %v2151_v54  ;;  %v2160_v62 = vcvt.s32.f32 %v1136_v50 }
 0x2bb   :  { %5051 = vmatprep.subr.bf16.mxu0 %v4186_v46  ;;  %v1138_v16 = vunpack.c.2.s8 %v794_v60  ;;  %v3211_v23 = vmul.f32 %v11535_v14, %v2145_v57  ;;  %v3219_v11 = vmul.f32 %v11535_v14, %v2153_v3  ;;  %v1146_v13 = vunpack.c.3.s8 %v794_v60 }
 0x2bc   :  { %v2168_v49 = vcvt.s32.f32 %v1144_v59  ;;  %5223 = vmatprep.subr.bf16.mxu1 %v4188_v19  ;;  %v4185_v37 = vpack.c.bf16 %v3217_v5, %v3209_v10  ;;  %v3226_v1 = vmul.f32 %v13839_v12, %v2160_v62  ;;  %v1135_v7 = vunpack.c.2.s8 %v791_v29 }
 0x2bd   :  { %v2162_v44 = vcvt.s32.f32 %v1138_v16  ;;  %v4187_v20 = vpack.c.bf16 %v3219_v11, %v3211_v23  ;;  %v2170_v26 = vcvt.s32.f32 %v1146_v13  ;;  %v1143_v47 = vunpack.c.3.s8 %v791_v29 }
 0x2be   :  { %v3234_v9 = vmul.f32 %v13839_v12, %v2168_v49  ;;  %5052 = vmatpush1.bf16.msra.mxu0 %v4185_v37  ;;  %v2159_v27 = vcvt.s32.f32 %v1135_v7  ;;  %v1137_v42 = vunpack.c.2.s8 %v793_v41  ;;  %v1145_v21 = vunpack.c.3.s8 %v793_v41 }
 0x2bf   :  { %v3228_v35 = vmul.f32 %v11550_v15, %v2162_v44  ;;  %5224 = vmatpush1.bf16.msra.mxu1 %v4187_v20  ;;  %v3236_v24 = vmul.f32 %v11550_v15, %v2170_v26  ;;  %v2167_v52 = vcvt.s32.f32 %v1143_v47  ;;  %v1152_v43 = vunpack.c.0.s8 %v800_v48 }
 0x2c0   :  { %v4194_v60 = vpack.c.bf16 %v3234_v9, %v3226_v1  ;;  %v3225_v39 = vmul.f32 %v13840_v2, %v2159_v27  ;;  %v2161_v18 = vcvt.s32.f32 %v1137_v42  ;;  %v2169_v55 = vcvt.s32.f32 %v1145_v21  ;;  %v808_v42 = vld [vmem:[#allocation9 + $0x168] sm:$0xff] }
 0x2c1   :  { %v1160_v56 = vunpack.c.1.s8 %v800_v48  ;;  %v4196_v29 = vpack.c.bf16 %v3236_v24, %v3228_v35  ;;  %v3233_v0 = vmul.f32 %v13840_v2, %v2167_v52  ;;  %v2176_v4 = vcvt.s32.f32 %v1152_v43 }
 0x2c2   :  { %5053 = vmatprep.subr.bf16.mxu0 %v4194_v60  ;;  %v1154_v8 = vunpack.c.0.s8 %v802_v6  ;;  %v3227_v41 = vmul.f32 %v11535_v14, %v2161_v18  ;;  %v3235_v51 = vmul.f32 %v11535_v14, %v2169_v55  ;;  %v1162_v40 = vunpack.c.1.s8 %v802_v6  ;;  %v810_v55 = vld [vmem:[#allocation9 + $0x178] sm:$0xff] }
 0x2c3   :  { %v2184_v45 = vcvt.s32.f32 %v1160_v56  ;;  %5225 = vmatprep.subr.bf16.mxu1 %v4196_v29  ;;  %v4193_v38 = vpack.c.bf16 %v3233_v0, %v3225_v39  ;;  %v3242_v17 = vmul.f32 %v13839_v12, %v2176_v4  ;;  %v1151_v58 = vunpack.c.0.s8 %v799_v63 }
 0x2c4   :  { %v2178_v53 = vcvt.s32.f32 %v1154_v8  ;;  %v4195_v31 = vpack.c.bf16 %v3235_v51, %v3227_v41  ;;  %v2186_v46 = vcvt.s32.f32 %v1162_v40  ;;  %v1159_v36 = vunpack.c.1.s8 %v799_v63 }
 0x2c5   :  { %v3250_v33 = vmul.f32 %v13839_v12, %v2184_v45  ;;  %5054 = vmatpush1.bf16.msra.mxu0 %v4193_v38  ;;  %v2175_v50 = vcvt.s32.f32 %v1151_v58  ;;  %v1153_v10 = vunpack.c.0.s8 %v801_v61  ;;  %v1161_v57 = vunpack.c.1.s8 %v801_v61  ;;  %v807_v45 = vld [vmem:[#allocation9 + $0x160] sm:$0xff] }
 0x2c6   :  { %v3244_v54 = vmul.f32 %v11550_v15, %v2178_v53  ;;  %5226 = vmatpush1.bf16.msra.mxu1 %v4195_v31  ;;  %v3252_v59 = vmul.f32 %v11550_v15, %v2186_v46  ;;  %v2183_v19 = vcvt.s32.f32 %v1159_v36  ;;  %v1168_v5 = vunpack.c.2.s8 %v800_v48 }
 0x2c7   :  { %v4202_v3 = vpack.c.bf16 %v3250_v33, %v3242_v17  ;;  %v3241_v62 = vmul.f32 %v13840_v2, %v2175_v50  ;;  %v2177_v16 = vcvt.s32.f32 %v1153_v10  ;;  %v2185_v23 = vcvt.s32.f32 %v1161_v57  ;;  %v809_v33 = vld [vmem:[#allocation9 + $0x170] sm:$0xff] }
 0x2c8   :  { %v1176_v11 = vunpack.c.3.s8 %v800_v48  ;;  %v4204_v49 = vpack.c.bf16 %v3252_v59, %v3244_v54  ;;  %v3249_v13 = vmul.f32 %v13840_v2, %v2183_v19  ;;  %v2192_v37 = vcvt.s32.f32 %v1168_v5 }
 0x2c9   :  { %5055 = vmatprep.subr.bf16.mxu0 %v4202_v3  ;;  %v1170_v1 = vunpack.c.2.s8 %v802_v6  ;;  %v3243_v44 = vmul.f32 %v11535_v14, %v2177_v16  ;;  %v3251_v7 = vmul.f32 %v11535_v14, %v2185_v23  ;;  %v1178_v9 = vunpack.c.3.s8 %v802_v6 }
 0x2ca   :  { %v2200_v20 = vcvt.s32.f32 %v1176_v11  ;;  %5227 = vmatprep.subr.bf16.mxu1 %v4204_v49  ;;  %v4201_v26 = vpack.c.bf16 %v3249_v13, %v3241_v62  ;;  %v3258_v47 = vmul.f32 %v13839_v12, %v2192_v37  ;;  %v1167_v27 = vunpack.c.2.s8 %v799_v63 }
 0x2cb   :  { %v2194_v35 = vcvt.s32.f32 %v1170_v1  ;;  %v4203_v48 = vpack.c.bf16 %v3251_v7, %v3243_v44  ;;  %v2202_v60 = vcvt.s32.f32 %v1178_v9  ;;  %v1175_v24 = vunpack.c.3.s8 %v799_v63 }
 0x2cc   :  { %v3266_v21 = vmul.f32 %v13839_v12, %v2200_v20  ;;  %5056 = vmatpush1.bf16.msra.mxu0 %v4201_v26  ;;  %v2191_v43 = vcvt.s32.f32 %v1167_v27  ;;  %v1169_v39 = vunpack.c.2.s8 %v801_v61  ;;  %v1177_v18 = vunpack.c.3.s8 %v801_v61 }
 0x2cd   :  { %v3260_v52 = vmul.f32 %v11550_v15, %v2194_v35  ;;  %5228 = vmatpush1.bf16.msra.mxu1 %v4203_v48  ;;  %v3268_v56 = vmul.f32 %v11550_v15, %v2202_v60  ;;  %v2199_v29 = vcvt.s32.f32 %v1175_v24  ;;  %v1184_v0 = vunpack.c.0.s8 %v808_v42 }
 0x2ce   :  { %v4210_v6 = vpack.c.bf16 %v3266_v21, %v3258_v47  ;;  %v3257_v4 = vmul.f32 %v13840_v2, %v2191_v43  ;;  %v2193_v8 = vcvt.s32.f32 %v1169_v39  ;;  %v2201_v41 = vcvt.s32.f32 %v1177_v18  ;;  %v816_v39 = vld [vmem:[#allocation9 + $0x1a8] sm:$0xff] }
 0x2cf   :  { %v1192_v51 = vunpack.c.1.s8 %v808_v42  ;;  %v4212_v63 = vpack.c.bf16 %v3268_v56, %v3260_v52  ;;  %v3265_v40 = vmul.f32 %v13840_v2, %v2199_v29  ;;  %v2208_v38 = vcvt.s32.f32 %v1184_v0 }
 0x2d0   :  { %5057 = vmatprep.subr.bf16.mxu0 %v4210_v6  ;;  %v1186_v17 = vunpack.c.0.s8 %v810_v55  ;;  %v3259_v61 = vmul.f32 %v11535_v14, %v2193_v8  ;;  %v3267_v53 = vmul.f32 %v11535_v14, %v2201_v41  ;;  %v1194_v31 = vunpack.c.1.s8 %v810_v55  ;;  %v818_v41 = vld [vmem:[#allocation9 + $0x1b8] sm:$0xff] }
 0x2d1   :  { %v2216_v58 = vcvt.s32.f32 %v1192_v51  ;;  %5229 = vmatprep.subr.bf16.mxu1 %v4212_v63  ;;  %v4209_v46 = vpack.c.bf16 %v3265_v40, %v3257_v4  ;;  %v3274_v36 = vmul.f32 %v13839_v12, %v2208_v38  ;;  %v1183_v50 = vunpack.c.0.s8 %v807_v45 }
 0x2d2   :  { %v2210_v54 = vcvt.s32.f32 %v1186_v17  ;;  %v4211_v10 = vpack.c.bf16 %v3267_v53, %v3259_v61  ;;  %v2218_v3 = vcvt.s32.f32 %v1194_v31  ;;  %v1191_v59 = vunpack.c.1.s8 %v807_v45 }
 0x2d3   :  { %v3282_v57 = vmul.f32 %v13839_v12, %v2216_v58  ;;  %5058 = vmatpush1.bf16.msra.mxu0 %v4209_v46  ;;  %v2207_v5 = vcvt.s32.f32 %v1183_v50  ;;  %v1185_v62 = vunpack.c.0.s8 %v809_v33  ;;  %v1193_v16 = vunpack.c.1.s8 %v809_v33  ;;  %v815_v58 = vld [vmem:[#allocation9 + $0x1a0] sm:$0xff] }
 0x2d4   :  { %v3276_v19 = vmul.f32 %v11550_v15, %v2210_v54  ;;  %5230 = vmatpush1.bf16.msra.mxu1 %v4211_v10  ;;  %v3284_v11 = vmul.f32 %v11550_v15, %v2218_v3  ;;  %v2215_v49 = vcvt.s32.f32 %v1191_v59  ;;  %v1200_v13 = vunpack.c.2.s8 %v808_v42 }
 0x2d5   :  { %v4218_v23 = vpack.c.bf16 %v3282_v57, %v3274_v36  ;;  %v3273_v37 = vmul.f32 %v13840_v2, %v2207_v5  ;;  %v2209_v1 = vcvt.s32.f32 %v1185_v62  ;;  %v2217_v44 = vcvt.s32.f32 %v1193_v16  ;;  %v817_v57 = vld [vmem:[#allocation9 + $0x1b0] sm:$0xff] }
 0x2d6   :  { %v1208_v7 = vunpack.c.3.s8 %v808_v42  ;;  %v4220_v20 = vpack.c.bf16 %v3284_v11, %v3276_v19  ;;  %v3281_v9 = vmul.f32 %v13840_v2, %v2215_v49  ;;  %v2224_v26 = vcvt.s32.f32 %v1200_v13 }
 0x2d7   :  { %5059 = vmatprep.subr.bf16.mxu0 %v4218_v23  ;;  %v1202_v47 = vunpack.c.2.s8 %v810_v55  ;;  %v3275_v35 = vmul.f32 %v11535_v14, %v2209_v1  ;;  %v3283_v27 = vmul.f32 %v11535_v14, %v2217_v44  ;;  %v1210_v21 = vunpack.c.3.s8 %v810_v55 }
 0x2d8   :  { %v2232_v48 = vcvt.s32.f32 %v1208_v7  ;;  %5231 = vmatprep.subr.bf16.mxu1 %v4220_v20  ;;  %v4217_v60 = vpack.c.bf16 %v3281_v9, %v3273_v37  ;;  %v3290_v24 = vmul.f32 %v13839_v12, %v2224_v26  ;;  %v1199_v43 = vunpack.c.2.s8 %v807_v45 }
 0x2d9   :  { %v2226_v52 = vcvt.s32.f32 %v1202_v47  ;;  %v4219_v42 = vpack.c.bf16 %v3283_v27, %v3275_v35  ;;  %v2234_v6 = vcvt.s32.f32 %v1210_v21  ;;  %v1207_v56 = vunpack.c.3.s8 %v807_v45 }
 0x2da   :  { %v3298_v18 = vmul.f32 %v13839_v12, %v2232_v48  ;;  %5060 = vmatpush1.bf16.msra.mxu0 %v4217_v60  ;;  %v2223_v0 = vcvt.s32.f32 %v1199_v43  ;;  %v1201_v4 = vunpack.c.2.s8 %v809_v33  ;;  %v1209_v8 = vunpack.c.3.s8 %v809_v33 }
 0x2db   :  { %v3292_v29 = vmul.f32 %v11550_v15, %v2226_v52  ;;  %5232 = vmatpush1.bf16.msra.mxu1 %v4219_v42  ;;  %v3300_v51 = vmul.f32 %v11550_v15, %v2234_v6  ;;  %v2231_v63 = vcvt.s32.f32 %v1207_v56  ;;  %v1216_v40 = vunpack.c.0.s8 %v816_v39 }
 0x2dc   :  { %v4226_v55 = vpack.c.bf16 %v3298_v18, %v3290_v24  ;;  %v3289_v38 = vmul.f32 %v13840_v2, %v2223_v0  ;;  %v2225_v17 = vcvt.s32.f32 %v1201_v4  ;;  %v2233_v61 = vcvt.s32.f32 %v1209_v8  ;;  %v824_v4 = vld [vmem:[#allocation9 + $0x1e8] sm:$0xff] }
 0x2dd   :  { %v1224_v53 = vunpack.c.1.s8 %v816_v39  ;;  %v4228_v45 = vpack.c.bf16 %v3300_v51, %v3292_v29  ;;  %v3297_v31 = vmul.f32 %v13840_v2, %v2231_v63  ;;  %v2240_v46 = vcvt.s32.f32 %v1216_v40 }
 0x2de   :  { %5061 = vmatprep.subr.bf16.mxu0 %v4226_v55  ;;  %v1218_v36 = vunpack.c.0.s8 %v818_v41  ;;  %v3291_v33 = vmul.f32 %v11535_v14, %v2225_v17  ;;  %v3299_v54 = vmul.f32 %v11535_v14, %v2233_v61  ;;  %v1226_v10 = vunpack.c.1.s8 %v818_v41  ;;  %v826_v61 = vld [vmem:[#allocation9 + $0x1f8] sm:$0xff] }
 0x2df   :  { %v2248_v50 = vcvt.s32.f32 %v1224_v53  ;;  %5233 = vmatprep.subr.bf16.mxu1 %v4228_v45  ;;  %v4225_v3 = vpack.c.bf16 %v3297_v31, %v3289_v38  ;;  %v3306_v59 = vmul.f32 %v13839_v12, %v2240_v46  ;;  %v1215_v5 = vunpack.c.0.s8 %v815_v58 }
 0x2e0   :  { %v2242_v19 = vcvt.s32.f32 %v1218_v36  ;;  %v4227_v62 = vpack.c.bf16 %v3299_v54, %v3291_v33  ;;  %v2250_v23 = vcvt.s32.f32 %v1226_v10  ;;  %v1223_v11 = vunpack.c.1.s8 %v815_v58 }
 0x2e1   :  { %v3314_v16 = vmul.f32 %v13839_v12, %v2248_v50  ;;  %5062 = vmatpush1.bf16.msra.mxu0 %v4225_v3  ;;  %v2239_v13 = vcvt.s32.f32 %v1215_v5  ;;  %v1217_v37 = vunpack.c.0.s8 %v817_v57  ;;  %v1225_v1 = vunpack.c.1.s8 %v817_v57  ;;  %v823_v50 = vld [vmem:[#allocation9 + $0x1e0] sm:$0xff] }
 0x2e2   :  { %v3308_v49 = vmul.f32 %v11550_v15, %v2242_v19  ;;  %5234 = vmatpush1.bf16.msra.mxu1 %v4227_v62  ;;  %v3316_v7 = vmul.f32 %v11550_v15, %v2250_v23  ;;  %v2247_v20 = vcvt.s32.f32 %v1223_v11  ;;  %v1232_v9 = vunpack.c.2.s8 %v816_v39 }
 0x2e3   :  { %v4234_v44 = vpack.c.bf16 %v3314_v16, %v3306_v59  ;;  %v3305_v26 = vmul.f32 %v13840_v2, %v2239_v13  ;;  %v2241_v47 = vcvt.s32.f32 %v1217_v37  ;;  %v2249_v35 = vcvt.s32.f32 %v1225_v1  ;;  %v825_v16 = vld [vmem:[#allocation9 + $0x1f0] sm:$0xff] }
 0x2e4   :  { %v1240_v27 = vunpack.c.3.s8 %v816_v39  ;;  %v4236_v48 = vpack.c.bf16 %v3316_v7, %v3308_v49  ;;  %v3313_v21 = vmul.f32 %v13840_v2, %v2247_v20  ;;  %v2256_v60 = vcvt.s32.f32 %v1232_v9 }
 0x2e5   :  { %5063 = vmatprep.subr.bf16.mxu0 %v4234_v44  ;;  %v1234_v24 = vunpack.c.2.s8 %v818_v41  ;;  %v3307_v52 = vmul.f32 %v11535_v14, %v2241_v47  ;;  %v3315_v43 = vmul.f32 %v11535_v14, %v2249_v35  ;;  %v1242_v18 = vunpack.c.3.s8 %v818_v41 }
 0x2e6   :  { %v2264_v42 = vcvt.s32.f32 %v1240_v27  ;;  %5235 = vmatprep.subr.bf16.mxu1 %v4236_v48  ;;  %v4233_v6 = vpack.c.bf16 %v3313_v21, %v3305_v26  ;;  %v3322_v56 = vmul.f32 %v13839_v12, %v2256_v60  ;;  %v1231_v0 = vunpack.c.2.s8 %v815_v58 }
 0x2e7   :  { %v2258_v29 = vcvt.s32.f32 %v1234_v24  ;;  %v4235_v39 = vpack.c.bf16 %v3315_v43, %v3307_v52  ;;  %v2266_v55 = vcvt.s32.f32 %v1242_v18  ;;  %v1239_v51 = vunpack.c.3.s8 %v815_v58 }
 0x2e8   :  { %v3330_v8 = vmul.f32 %v13839_v12, %v2264_v42  ;;  %5064 = vmatpush1.bf16.msra.mxu0 %v4233_v6  ;;  %v2255_v40 = vcvt.s32.f32 %v1231_v0  ;;  %v1233_v38 = vunpack.c.2.s8 %v817_v57  ;;  %v1241_v17 = vunpack.c.3.s8 %v817_v57 }
 0x2e9   :  { %v3324_v63 = vmul.f32 %v11550_v15, %v2258_v29  ;;  %5236 = vmatpush1.bf16.msra.mxu1 %v4235_v39  ;;  %v3332_v53 = vmul.f32 %v11550_v15, %v2266_v55  ;;  %v2263_v45 = vcvt.s32.f32 %v1239_v51  ;;  %v1248_v31 = vunpack.c.0.s8 %v824_v4 }
 0x2ea   :  { %v4242_v41 = vpack.c.bf16 %v3330_v8, %v3322_v56  ;;  %v3321_v46 = vmul.f32 %v13840_v2, %v2255_v40  ;;  %v2257_v36 = vcvt.s32.f32 %v1233_v38  ;;  %v2265_v33 = vcvt.s32.f32 %v1241_v17  ;;  %v11746_v38 = vld [vmem:[#allocation9 + $0x228] sm:$0xff] }
 0x2eb   :  { %v1256_v54 = vunpack.c.1.s8 %v824_v4  ;;  %v4244_v58 = vpack.c.bf16 %v3332_v53, %v3324_v63  ;;  %v3329_v10 = vmul.f32 %v13840_v2, %v2263_v45  ;;  %v2272_v3 = vcvt.s32.f32 %v1248_v31 }
 0x2ec   :  { %5065 = vmatprep.subr.bf16.mxu0 %v4242_v41  ;;  %v1250_v59 = vunpack.c.0.s8 %v826_v61  ;;  %v3323_v57 = vmul.f32 %v11535_v14, %v2257_v36  ;;  %v3331_v19 = vmul.f32 %v11535_v14, %v2265_v33  ;;  %v1258_v62 = vunpack.c.1.s8 %v826_v61 }
 0x2ed   :  { %v2280_v5 = vcvt.s32.f32 %v1256_v54  ;;  %5237 = vmatprep.subr.bf16.mxu1 %v4244_v58  ;;  %v4241_v23 = vpack.c.bf16 %v3329_v10, %v3321_v46  ;;  %v3338_v11 = vmul.f32 %v13839_v12, %v2272_v3  ;;  %v1247_v13 = vunpack.c.0.s8 %v823_v50 }
 0x2ee   :  { %v2274_v49 = vcvt.s32.f32 %v1250_v59  ;;  %v4243_v37 = vpack.c.bf16 %v3331_v19, %v3323_v57  ;;  %v2282_v44 = vcvt.s32.f32 %v1258_v62  ;;  %v1255_v7 = vunpack.c.1.s8 %v823_v50  ;;  %v11756_v19 = vld [vmem:[#allocation9 + $0x220] sm:$0xff] }
 0x2ef   :  { %v3346_v1 = vmul.f32 %v13839_v12, %v2280_v5  ;;  %5066 = vmatpush1.bf16.msra.mxu0 %v4241_v23  ;;  %v2271_v9 = vcvt.s32.f32 %v1247_v13  ;;  %v1249_v26 = vunpack.c.0.s8 %v825_v16  ;;  %v1257_v47 = vunpack.c.1.s8 %v825_v16 }
 0x2f0   :  { %v3340_v20 = vmul.f32 %v11550_v15, %v2274_v49  ;;  %5238 = vmatpush1.bf16.msra.mxu1 %v4243_v37  ;;  %v3348_v27 = vmul.f32 %v11550_v15, %v2282_v44  ;;  %v2279_v48 = vcvt.s32.f32 %v1255_v7  ;;  %v1264_v21 = vunpack.c.2.s8 %v824_v4 }
 0x2f1   :  { %v4250_v35 = vpack.c.bf16 %v3346_v1, %v3338_v11  ;;  %v3337_v60 = vmul.f32 %v13840_v2, %v2271_v9  ;;  %v2273_v24 = vcvt.s32.f32 %v1249_v26  ;;  %v2281_v52 = vcvt.s32.f32 %v1257_v47  ;;  %v833_v1 = vld [vmem:[#allocation9 + $0x230] sm:$0xff] }
 0x2f2   :  { %v1272_v43 = vunpack.c.3.s8 %v824_v4  ;;  %v4252_v42 = vpack.c.bf16 %v3348_v27, %v3340_v20  ;;  %v3345_v18 = vmul.f32 %v13840_v2, %v2279_v48  ;;  %v2288_v6 = vcvt.s32.f32 %v1264_v21 }
 0x2f3   :  { %5067 = vmatprep.subr.bf16.mxu0 %v4250_v35  ;;  %v1266_v56 = vunpack.c.2.s8 %v826_v61  ;;  %v3339_v29 = vmul.f32 %v11535_v14, %v2273_v24  ;;  %v3347_v0 = vmul.f32 %v11535_v14, %v2281_v52  ;;  %v1274_v8 = vunpack.c.3.s8 %v826_v61  ;;  %v11750_v61 = vld [vmem:[#allocation9 + $0x238] sm:$0xff] }
 0x2f4   :  { %v2296_v39 = vcvt.s32.f32 %v1272_v43  ;;  %5239 = vmatprep.subr.bf16.mxu1 %v4252_v42  ;;  %v4249_v55 = vpack.c.bf16 %v3345_v18, %v3337_v60  ;;  %v3354_v51 = vmul.f32 %v13839_v12, %v2288_v6  ;;  %v1263_v40 = vunpack.c.2.s8 %v823_v50 }
 0x2f5   :  { %v2290_v63 = vcvt.s32.f32 %v1266_v56  ;;  %v4251_v4 = vpack.c.bf16 %v3347_v0, %v3339_v29  ;;  %v2298_v41 = vcvt.s32.f32 %v1274_v8  ;;  %v1271_v53 = vunpack.c.3.s8 %v823_v50 }
 0x2f6   :  { %v3362_v17 = vmul.f32 %v13839_v12, %v2296_v39  ;;  %5068 = vmatpush1.bf16.msra.mxu0 %v4249_v55  ;;  %v2287_v31 = vcvt.s32.f32 %v1263_v40  ;;  %v1265_v46 = vunpack.c.2.s8 %v825_v16  ;;  %v1273_v36 = vunpack.c.3.s8 %v825_v16  ;;  %v13842_v39 = vld [vmem:[#allocation120_spill] sm:$0xff]  ;;  %v13843_v40 = vld [vmem:[#allocation123_spill] sm:$0xff] }
 0x2f7   :  { %v3356_v45 = vmul.f32 %v11550_v15, %v2290_v63  ;;  %5240 = vmatpush1.bf16.msra.mxu1 %v4251_v4  ;;  %v3364_v54 = vmul.f32 %v11550_v15, %v2298_v41  ;;  %v2295_v58 = vcvt.s32.f32 %v1271_v53  ;;  %v1280_v10 = vunpack.c.0.s8 %v11746_v38 }
 0x2f8   :  { %v4258_v33 = vpack.c.bf16 %v3362_v17, %v3354_v51  ;;  %v3353_v3 = vmul.f32 %v13840_v2, %v2287_v31  ;;  %v2289_v59 = vcvt.s32.f32 %v1265_v46  ;;  %v2297_v57 = vcvt.s32.f32 %v1273_v36  ;;  %v840_v36 = vld [vmem:[#allocation9 + $0x268] sm:$0xff] }
 0x2f9   :  { %v1288_v50 = vunpack.c.1.s8 %v11746_v38  ;;  %v4260_v5 = vpack.c.bf16 %v3364_v54, %v3356_v45  ;;  %v3361_v62 = vmul.f32 %v13840_v2, %v2295_v58  ;;  %v2304_v16 = vcvt.s32.f32 %v1280_v10 }
 0x2fa   :  { %5069 = vmatprep.subr.bf16.mxu0 %v4258_v33  ;;  %v1282_v23 = vunpack.c.0.s8 %v11750_v61  ;;  %v3355_v11 = vmul.f32 %v11535_v14, %v2289_v59  ;;  %v3363_v49 = vmul.f32 %v11535_v14, %v2297_v57  ;;  %v1290_v37 = vunpack.c.1.s8 %v11750_v61 }
 0x2fb   :  { %v2312_v13 = vcvt.s32.f32 %v1288_v50  ;;  %5241 = vmatprep.subr.bf16.mxu1 %v4260_v5  ;;  %v4257_v44 = vpack.c.bf16 %v3361_v62, %v3353_v3  ;;  %v3370_v7 = vmul.f32 %v13839_v12, %v2304_v16  ;;  %v1279_v9 = vunpack.c.0.s8 %v11756_v19  ;;  %v842_v50 = vld [vmem:[#allocation9 + $0x278] sm:$0xff] }
 0x2fc   :  { %v2306_v20 = vcvt.s32.f32 %v1282_v23  ;;  %v4259_v26 = vpack.c.bf16 %v3363_v49, %v3355_v11  ;;  %v2314_v35 = vcvt.s32.f32 %v1290_v37  ;;  %v1287_v27 = vunpack.c.1.s8 %v11756_v19 }
 0x2fd   :  { %v3378_v47 = vmul.f32 %v13839_v12, %v2312_v13  ;;  %5070 = vmatpush1.bf16.msra.mxu0 %v4257_v44  ;;  %v2303_v21 = vcvt.s32.f32 %v1279_v9  ;;  %v1281_v60 = vunpack.c.0.s8 %v833_v1  ;;  %v1289_v24 = vunpack.c.1.s8 %v833_v1  ;;  %v839_v44 = vld [vmem:[#allocation9 + $0x260] sm:$0xff] }
 0x2fe   :  { %v3372_v48 = vmul.f32 %v11550_v15, %v2306_v20  ;;  %5242 = vmatpush1.bf16.msra.mxu1 %v4259_v26  ;;  %v3380_v43 = vmul.f32 %v11550_v15, %v2314_v35  ;;  %v2311_v42 = vcvt.s32.f32 %v1287_v27  ;;  %v1296_v18 = vunpack.c.2.s8 %v11746_v38  ;;  %v841_v27 = vld [vmem:[#allocation9 + $0x270] sm:$0xff] }
 0x2ff   :  { %v4266_v52 = vpack.c.bf16 %v3378_v47, %v3370_v7  ;;  %v3369_v6 = vmul.f32 %v13840_v2, %v2303_v21  ;;  %v2305_v56 = vcvt.s32.f32 %v1281_v60  ;;  %v2313_v29 = vcvt.s32.f32 %v1289_v24 }
 0x300   :  { %v1304_v0 = vunpack.c.3.s8 %v11746_v38  ;;  %5072 = vmatmul.mubr.bf16.vlgmr.msra.gmra.mrb[12].mxu0 %v13842_v39  ;;  %v4268_v8 = vpack.c.bf16 %v3380_v43, %v3372_v48  ;;  %v3377_v55 = vmul.f32 %v13840_v2, %v2311_v42  ;;  %v2320_v51 = vcvt.s32.f32 %v1296_v18 }
 0x301   :  { %5082 = vmatprep.subr.bf16.mxu0 %v4266_v52  ;;  %v1298_v63 = vunpack.c.2.s8 %v11750_v61  ;;  %5244 = vmatmul.mubr.bf16.vlgmr.msra.gmra.mrb[12].mxu1 %v13842_v39  ;;  %v3371_v4 = vmul.f32 %v11535_v14, %v2305_v56  ;;  %v3379_v17 = vmul.f32 %v11535_v14, %v2313_v29  ;;  %v1306_v38 = vunpack.c.3.s8 %v11750_v61 }
 0x302   :  { %5114 = vmatprep.mubr.bf16.mxu0 %v13843_v40  ;;  %v2328_v41 = vcvt.s32.f32 %v1304_v0  ;;  %5254 = vmatprep.subr.bf16.mxu1 %v4268_v8  ;;  %v4265_v53 = vpack.c.bf16 %v3377_v55, %v3369_v6  ;;  %v3386_v45 = vmul.f32 %v13839_v12, %v2320_v51  ;;  %v1295_v46 = vunpack.c.2.s8 %v11756_v19 }
 0x303   :  { %5286 = vmatprep.mubr.bf16.mxu1 %v13843_v40  ;;  %v2322_v31 = vcvt.s32.f32 %v1298_v63  ;;  %v4267_v33 = vpack.c.bf16 %v3379_v17, %v3371_v4  ;;  %v2330_v58 = vcvt.s32.f32 %v1306_v38  ;;  %v1303_v10 = vunpack.c.3.s8 %v11756_v19 }
 0x304   :  { %v3394_v54 = vmul.f32 %v13839_v12, %v2328_v41  ;;  %5083 = vmatpush1.bf16.msra.mxu0 %v4265_v53  ;;  %v2319_v61 = vcvt.s32.f32 %v1295_v46  ;;  %v1297_v59 = vunpack.c.2.s8 %v833_v1  ;;  %v1305_v57 = vunpack.c.3.s8 %v833_v1 }
 0x305   :  { %v3388_v3 = vmul.f32 %v11550_v15, %v2322_v31  ;;  %5255 = vmatpush1.bf16.msra.mxu1 %v4267_v33  ;;  %v3396_v62 = vmul.f32 %v11550_v15, %v2330_v58  ;;  %v2327_v16 = vcvt.s32.f32 %v1303_v10  ;;  %v1312_v23 = vunpack.c.0.s8 %v840_v36 }
 0x306   :  { %v4274_v5 = vpack.c.bf16 %v3394_v54, %v3386_v45  ;;  %v3385_v11 = vmul.f32 %v13840_v2, %v2319_v61  ;;  %v2321_v49 = vcvt.s32.f32 %v1297_v59  ;;  %v2329_v13 = vcvt.s32.f32 %v1305_v57  ;;  %v848_v59 = vld [vmem:[#allocation9 + $0x2a8] sm:$0xff] }
 0x307   :  { %v1320_v37 = vunpack.c.1.s8 %v840_v36  ;;  %v4276_v19 = vpack.c.bf16 %v3396_v62, %v3388_v3  ;;  %v3393_v7 = vmul.f32 %v13840_v2, %v2327_v16  ;;  %v2336_v20 = vcvt.s32.f32 %v1312_v23 }
 0x308   :  { %5084 = vmatprep.subr.bf16.mxu0 %v4274_v5  ;;  %v1314_v9 = vunpack.c.0.s8 %v842_v50  ;;  %v3387_v1 = vmul.f32 %v11535_v14, %v2321_v49  ;;  %v3395_v26 = vmul.f32 %v11535_v14, %v2329_v13  ;;  %v1322_v35 = vunpack.c.1.s8 %v842_v50  ;;  %v850_v13 = vld [vmem:[#allocation9 + $0x2b8] sm:$0xff] }
 0x309   :  { %v2344_v47 = vcvt.s32.f32 %v1320_v37  ;;  %5256 = vmatprep.subr.bf16.mxu1 %v4276_v19  ;;  %v4273_v48 = vpack.c.bf16 %v3393_v7, %v3385_v11  ;;  %v3402_v21 = vmul.f32 %v13839_v12, %v2336_v20  ;;  %v1311_v24 = vunpack.c.0.s8 %v839_v44 }
 0x30a   :  { %v2338_v60 = vcvt.s32.f32 %v1314_v9  ;;  %v4275_v52 = vpack.c.bf16 %v3395_v26, %v3387_v1  ;;  %v2346_v42 = vcvt.s32.f32 %v1322_v35  ;;  %v1319_v18 = vunpack.c.1.s8 %v839_v44 }
 0x30b   :  { %v3410_v43 = vmul.f32 %v13839_v12, %v2344_v47  ;;  %5085 = vmatpush1.bf16.msra.mxu0 %v4273_v48  ;;  %v2335_v56 = vcvt.s32.f32 %v1311_v24  ;;  %v1313_v29 = vunpack.c.0.s8 %v841_v27  ;;  %v1321_v0 = vunpack.c.1.s8 %v841_v27  ;;  %v847_v47 = vld [vmem:[#allocation9 + $0x2a0] sm:$0xff] }
 0x30c   :  { %v3404_v6 = vmul.f32 %v11550_v15, %v2338_v60  ;;  %5257 = vmatpush1.bf16.msra.mxu1 %v4275_v52  ;;  %v3412_v8 = vmul.f32 %v11550_v15, %v2346_v42  ;;  %v2343_v55 = vcvt.s32.f32 %v1319_v18  ;;  %v1328_v51 = vunpack.c.2.s8 %v840_v36 }
 0x30d   :  { %v4282_v39 = vpack.c.bf16 %v3410_v43, %v3402_v21  ;;  %v3401_v63 = vmul.f32 %v13840_v2, %v2335_v56  ;;  %v2337_v40 = vcvt.s32.f32 %v1313_v29  ;;  %v2345_v4 = vcvt.s32.f32 %v1321_v0  ;;  %v849_v43 = vld [vmem:[#allocation9 + $0x2b0] sm:$0xff] }
 0x30e   :  { %v1336_v17 = vunpack.c.3.s8 %v840_v36  ;;  %v4284_v41 = vpack.c.bf16 %v3412_v8, %v3404_v6  ;;  %v3409_v38 = vmul.f32 %v13840_v2, %v2343_v55  ;;  %v2352_v53 = vcvt.s32.f32 %v1328_v51 }
 0x30f   :  { %5086 = vmatprep.subr.bf16.mxu0 %v4282_v39  ;;  %v1330_v45 = vunpack.c.2.s8 %v842_v50  ;;  %v3403_v31 = vmul.f32 %v11535_v14, %v2337_v40  ;;  %v3411_v46 = vmul.f32 %v11535_v14, %v2345_v4  ;;  %v1338_v54 = vunpack.c.3.s8 %v842_v50 }
 0x310   :  { %v2360_v33 = vcvt.s32.f32 %v1336_v17  ;;  %5258 = vmatprep.subr.bf16.mxu1 %v4284_v41  ;;  %v4281_v58 = vpack.c.bf16 %v3409_v38, %v3401_v63  ;;  %v3418_v10 = vmul.f32 %v13839_v12, %v2352_v53  ;;  %v1327_v61 = vunpack.c.2.s8 %v839_v44 }
 0x311   :  { %v2354_v3 = vcvt.s32.f32 %v1330_v45  ;;  %v4283_v36 = vpack.c.bf16 %v3411_v46, %v3403_v31  ;;  %v2362_v5 = vcvt.s32.f32 %v1338_v54  ;;  %v1335_v62 = vunpack.c.3.s8 %v839_v44 }
 0x312   :  { %v3426_v57 = vmul.f32 %v13839_v12, %v2360_v33  ;;  %5087 = vmatpush1.bf16.msra.mxu0 %v4281_v58  ;;  %v2351_v23 = vcvt.s32.f32 %v1327_v61  ;;  %v1329_v11 = vunpack.c.2.s8 %v841_v27  ;;  %v1337_v49 = vunpack.c.3.s8 %v841_v27 }
 0x313   :  { %v3420_v16 = vmul.f32 %v11550_v15, %v2354_v3  ;;  %5259 = vmatpush1.bf16.msra.mxu1 %v4283_v36  ;;  %v3428_v37 = vmul.f32 %v11550_v15, %v2362_v5  ;;  %v2359_v19 = vcvt.s32.f32 %v1335_v62  ;;  %v1344_v7 = vunpack.c.0.s8 %v848_v59 }
 0x314   :  { %v4290_v50 = vpack.c.bf16 %v3426_v57, %v3418_v10  ;;  %v3417_v20 = vmul.f32 %v13840_v2, %v2351_v23  ;;  %v2353_v9 = vcvt.s32.f32 %v1329_v11  ;;  %v2361_v1 = vcvt.s32.f32 %v1337_v49  ;;  %v856_v11 = vld [vmem:[#allocation9 + $0x2e8] sm:$0xff] }
 0x315   :  { %v1352_v26 = vunpack.c.1.s8 %v848_v59  ;;  %v4292_v44 = vpack.c.bf16 %v3428_v37, %v3420_v16  ;;  %v3425_v35 = vmul.f32 %v13840_v2, %v2359_v19  ;;  %v2368_v48 = vcvt.s32.f32 %v1344_v7 }
 0x316   :  { %5088 = vmatprep.subr.bf16.mxu0 %v4290_v50  ;;  %v1346_v21 = vunpack.c.0.s8 %v850_v13  ;;  %v3419_v27 = vmul.f32 %v11535_v14, %v2353_v9  ;;  %v3427_v60 = vmul.f32 %v11535_v14, %v2361_v1  ;;  %v1354_v52 = vunpack.c.1.s8 %v850_v13  ;;  %v858_v1 = vld [vmem:[#allocation9 + $0x2f8] sm:$0xff] }
 0x317   :  { %v2376_v24 = vcvt.s32.f32 %v1352_v26  ;;  %5260 = vmatprep.subr.bf16.mxu1 %v4292_v44  ;;  %v4289_v42 = vpack.c.bf16 %v3425_v35, %v3417_v20  ;;  %v3434_v18 = vmul.f32 %v13839_v12, %v2368_v48  ;;  %v1343_v56 = vunpack.c.0.s8 %v847_v47 }
 0x318   :  { %v2370_v6 = vcvt.s32.f32 %v1346_v21  ;;  %v4291_v29 = vpack.c.bf16 %v3427_v60, %v3419_v27  ;;  %v2378_v39 = vcvt.s32.f32 %v1354_v52  ;;  %v1351_v8 = vunpack.c.1.s8 %v847_v47 }
 0x319   :  { %v3442_v0 = vmul.f32 %v13839_v12, %v2376_v24  ;;  %5089 = vmatpush1.bf16.msra.mxu0 %v4289_v42  ;;  %v2367_v51 = vcvt.s32.f32 %v1343_v56  ;;  %v1345_v63 = vunpack.c.0.s8 %v849_v43  ;;  %v1353_v40 = vunpack.c.1.s8 %v849_v43  ;;  %v855_v24 = vld [vmem:[#allocation9 + $0x2e0] sm:$0xff] }
 0x31a   :  { %v3436_v55 = vmul.f32 %v11550_v15, %v2370_v6  ;;  %5261 = vmatpush1.bf16.msra.mxu1 %v4291_v29  ;;  %v3444_v17 = vmul.f32 %v11550_v15, %v2378_v39  ;;  %v2375_v41 = vcvt.s32.f32 %v1351_v8  ;;  %v1360_v38 = vunpack.c.2.s8 %v848_v59 }
 0x31b   :  { %v4298_v4 = vpack.c.bf16 %v3442_v0, %v3434_v18  ;;  %v3433_v53 = vmul.f32 %v13840_v2, %v2367_v51  ;;  %v2369_v45 = vcvt.s32.f32 %v1345_v63  ;;  %v2377_v31 = vcvt.s32.f32 %v1353_v40  ;;  %v857_v0 = vld [vmem:[#allocation9 + $0x2f0] sm:$0xff] }
 0x31c   :  { %v1368_v46 = vunpack.c.3.s8 %v848_v59  ;;  %v4300_v33 = vpack.c.bf16 %v3444_v17, %v3436_v55  ;;  %v3441_v54 = vmul.f32 %v13840_v2, %v2375_v41  ;;  %v2384_v58 = vcvt.s32.f32 %v1360_v38 }
 0x31d   :  { %5090 = vmatprep.subr.bf16.mxu0 %v4298_v4  ;;  %v1362_v10 = vunpack.c.2.s8 %v850_v13  ;;  %v3435_v3 = vmul.f32 %v11535_v14, %v2369_v45  ;;  %v3443_v61 = vmul.f32 %v11535_v14, %v2377_v31  ;;  %v1370_v57 = vunpack.c.3.s8 %v850_v13 }
 0x31e   :  { %v2392_v36 = vcvt.s32.f32 %v1368_v46  ;;  %5262 = vmatprep.subr.bf16.mxu1 %v4300_v33  ;;  %v4297_v5 = vpack.c.bf16 %v3441_v54, %v3433_v53  ;;  %v3450_v62 = vmul.f32 %v13839_v12, %v2384_v58  ;;  %v1359_v23 = vunpack.c.2.s8 %v847_v47 }
 0x31f   :  { %v2386_v16 = vcvt.s32.f32 %v1362_v10  ;;  %v4299_v59 = vpack.c.bf16 %v3443_v61, %v3435_v3  ;;  %v2394_v50 = vcvt.s32.f32 %v1370_v57  ;;  %v1367_v37 = vunpack.c.3.s8 %v847_v47 }
 0x320   :  { %v3458_v49 = vmul.f32 %v13839_v12, %v2392_v36  ;;  %5091 = vmatpush1.bf16.msra.mxu0 %v4297_v5  ;;  %v2383_v7 = vcvt.s32.f32 %v1359_v23  ;;  %v1361_v20 = vunpack.c.2.s8 %v849_v43  ;;  %v1369_v9 = vunpack.c.3.s8 %v849_v43 }
 0x321   :  { %v3452_v19 = vmul.f32 %v11550_v15, %v2386_v16  ;;  %5263 = vmatpush1.bf16.msra.mxu1 %v4299_v59  ;;  %v3460_v26 = vmul.f32 %v11550_v15, %v2394_v50  ;;  %v2391_v44 = vcvt.s32.f32 %v1367_v37  ;;  %v1376_v35 = vunpack.c.0.s8 %v856_v11 }
 0x322   :  { %v4306_v13 = vpack.c.bf16 %v3458_v49, %v3450_v62  ;;  %v3449_v48 = vmul.f32 %v13840_v2, %v2383_v7  ;;  %v2385_v21 = vcvt.s32.f32 %v1361_v20  ;;  %v2393_v27 = vcvt.s32.f32 %v1369_v9  ;;  %v864_v20 = vld [vmem:[#allocation9 + $0x328] sm:$0xff] }
 0x323   :  { %v1384_v60 = vunpack.c.1.s8 %v856_v11  ;;  %v4308_v47 = vpack.c.bf16 %v3460_v26, %v3452_v19  ;;  %v3457_v52 = vmul.f32 %v13840_v2, %v2391_v44  ;;  %v2400_v42 = vcvt.s32.f32 %v1376_v35 }
 0x324   :  { %5092 = vmatprep.subr.bf16.mxu0 %v4306_v13  ;;  %v1378_v18 = vunpack.c.0.s8 %v858_v1  ;;  %v3451_v43 = vmul.f32 %v11535_v14, %v2385_v21  ;;  %v3459_v6 = vmul.f32 %v11535_v14, %v2393_v27  ;;  %v1386_v29 = vunpack.c.1.s8 %v858_v1  ;;  %v866_v27 = vld [vmem:[#allocation9 + $0x338] sm:$0xff] }
 0x325   :  { %v2408_v56 = vcvt.s32.f32 %v1384_v60  ;;  %5264 = vmatprep.subr.bf16.mxu1 %v4308_v47  ;;  %v4305_v39 = vpack.c.bf16 %v3457_v52, %v3449_v48  ;;  %v3466_v8 = vmul.f32 %v13839_v12, %v2400_v42  ;;  %v1375_v51 = vunpack.c.0.s8 %v855_v24 }
 0x326   :  { %v2402_v55 = vcvt.s32.f32 %v1378_v18  ;;  %v4307_v63 = vpack.c.bf16 %v3459_v6, %v3451_v43  ;;  %v2410_v4 = vcvt.s32.f32 %v1386_v29  ;;  %v1383_v17 = vunpack.c.1.s8 %v855_v24 }
 0x327   :  { %v3474_v40 = vmul.f32 %v13839_v12, %v2408_v56  ;;  %5093 = vmatpush1.bf16.msra.mxu0 %v4305_v39  ;;  %v2399_v38 = vcvt.s32.f32 %v1375_v51  ;;  %v1377_v53 = vunpack.c.0.s8 %v857_v0  ;;  %v1385_v45 = vunpack.c.1.s8 %v857_v0  ;;  %v863_v56 = vld [vmem:[#allocation9 + $0x320] sm:$0xff] }
 0x328   :  { %v3468_v41 = vmul.f32 %v11550_v15, %v2402_v55  ;;  %5265 = vmatpush1.bf16.msra.mxu1 %v4307_v63  ;;  %v3476_v46 = vmul.f32 %v11550_v15, %v2410_v4  ;;  %v2407_v33 = vcvt.s32.f32 %v1383_v17  ;;  %v1392_v54 = vunpack.c.2.s8 %v856_v11 }
 0x329   :  { %v4314_v31 = vpack.c.bf16 %v3474_v40, %v3466_v8  ;;  %v3465_v58 = vmul.f32 %v13840_v2, %v2399_v38  ;;  %v2401_v10 = vcvt.s32.f32 %v1377_v53  ;;  %v2409_v3 = vcvt.s32.f32 %v1385_v45  ;;  %v865_v40 = vld [vmem:[#allocation9 + $0x330] sm:$0xff] }
 0x32a   :  { %v1400_v61 = vunpack.c.3.s8 %v856_v11  ;;  %v4316_v36 = vpack.c.bf16 %v3476_v46, %v3468_v41  ;;  %v3473_v57 = vmul.f32 %v13840_v2, %v2407_v33  ;;  %v2416_v5 = vcvt.s32.f32 %v1392_v54 }
 0x32b   :  { %5094 = vmatprep.subr.bf16.mxu0 %v4314_v31  ;;  %v1394_v62 = vunpack.c.2.s8 %v858_v1  ;;  %v3467_v16 = vmul.f32 %v11535_v14, %v2401_v10  ;;  %v3475_v23 = vmul.f32 %v11535_v14, %v2409_v3  ;;  %v1402_v49 = vunpack.c.3.s8 %v858_v1 }
 0x32c   :  { %v2424_v59 = vcvt.s32.f32 %v1400_v61  ;;  %5266 = vmatprep.subr.bf16.mxu1 %v4316_v36  ;;  %v4313_v50 = vpack.c.bf16 %v3473_v57, %v3465_v58  ;;  %v3482_v37 = vmul.f32 %v13839_v12, %v2416_v5  ;;  %v1391_v7 = vunpack.c.2.s8 %v855_v24 }
 0x32d   :  { %v2418_v19 = vcvt.s32.f32 %v1394_v62  ;;  %v4315_v11 = vpack.c.bf16 %v3475_v23, %v3467_v16  ;;  %v2426_v13 = vcvt.s32.f32 %v1402_v49  ;;  %v1399_v26 = vunpack.c.3.s8 %v855_v24 }
 0x32e   :  { %v3490_v9 = vmul.f32 %v13839_v12, %v2424_v59  ;;  %5095 = vmatpush1.bf16.msra.mxu0 %v4313_v50  ;;  %v2415_v35 = vcvt.s32.f32 %v1391_v7  ;;  %v1393_v48 = vunpack.c.2.s8 %v857_v0  ;;  %v1401_v21 = vunpack.c.3.s8 %v857_v0 }
 0x32f   :  { %v3484_v44 = vmul.f32 %v11550_v15, %v2418_v19  ;;  %5267 = vmatpush1.bf16.msra.mxu1 %v4315_v11  ;;  %v3492_v60 = vmul.f32 %v11550_v15, %v2426_v13  ;;  %v2423_v47 = vcvt.s32.f32 %v1399_v26  ;;  %v1408_v52 = vunpack.c.0.s8 %v864_v20 }
 0x330   :  { %v4322_v1 = vpack.c.bf16 %v3490_v9, %v3482_v37  ;;  %v3481_v42 = vmul.f32 %v13840_v2, %v2415_v35  ;;  %v2417_v18 = vcvt.s32.f32 %v1393_v48  ;;  %v2425_v43 = vcvt.s32.f32 %v1401_v21  ;;  %v872_v48 = vld [vmem:[#allocation9 + $0x368] sm:$0xff] }
 0x331   :  { %v1416_v6 = vunpack.c.1.s8 %v864_v20  ;;  %v4324_v24 = vpack.c.bf16 %v3492_v60, %v3484_v44  ;;  %v3489_v29 = vmul.f32 %v13840_v2, %v2423_v47  ;;  %v2432_v39 = vcvt.s32.f32 %v1408_v52 }
 0x332   :  { %5096 = vmatprep.subr.bf16.mxu0 %v4322_v1  ;;  %v1410_v8 = vunpack.c.0.s8 %v866_v27  ;;  %v3483_v0 = vmul.f32 %v11535_v14, %v2417_v18  ;;  %v3491_v55 = vmul.f32 %v11535_v14, %v2425_v43  ;;  %v1418_v63 = vunpack.c.1.s8 %v866_v27  ;;  %v874_v43 = vld [vmem:[#allocation9 + $0x378] sm:$0xff] }
 0x333   :  { %v2440_v51 = vcvt.s32.f32 %v1416_v6  ;;  %5268 = vmatprep.subr.bf16.mxu1 %v4324_v24  ;;  %v4321_v4 = vpack.c.bf16 %v3489_v29, %v3481_v42  ;;  %v3498_v17 = vmul.f32 %v13839_v12, %v2432_v39  ;;  %v1407_v38 = vunpack.c.0.s8 %v863_v56 }
 0x334   :  { %v2434_v41 = vcvt.s32.f32 %v1410_v8  ;;  %v4323_v53 = vpack.c.bf16 %v3491_v55, %v3483_v0  ;;  %v2442_v31 = vcvt.s32.f32 %v1418_v63  ;;  %v1415_v46 = vunpack.c.1.s8 %v863_v56 }
 0x335   :  { %v3506_v45 = vmul.f32 %v13839_v12, %v2440_v51  ;;  %5097 = vmatpush1.bf16.msra.mxu0 %v4321_v4  ;;  %v2431_v54 = vcvt.s32.f32 %v1407_v38  ;;  %v1409_v58 = vunpack.c.0.s8 %v865_v40  ;;  %v1417_v10 = vunpack.c.1.s8 %v865_v40  ;;  %v871_v51 = vld [vmem:[#allocation9 + $0x360] sm:$0xff] }
 0x336   :  { %v3500_v33 = vmul.f32 %v11550_v15, %v2434_v41  ;;  %5269 = vmatpush1.bf16.msra.mxu1 %v4323_v53  ;;  %v3508_v61 = vmul.f32 %v11550_v15, %v2442_v31  ;;  %v2439_v36 = vcvt.s32.f32 %v1415_v46  ;;  %v1424_v57 = vunpack.c.2.s8 %v864_v20 }
 0x337   :  { %v4330_v3 = vpack.c.bf16 %v3506_v45, %v3498_v17  ;;  %v3497_v5 = vmul.f32 %v13840_v2, %v2431_v54  ;;  %v2433_v62 = vcvt.s32.f32 %v1409_v58  ;;  %v2441_v16 = vcvt.s32.f32 %v1417_v10  ;;  %v873_v45 = vld [vmem:[#allocation9 + $0x370] sm:$0xff] }
 0x338   :  { %v1432_v23 = vunpack.c.3.s8 %v864_v20  ;;  %v4332_v59 = vpack.c.bf16 %v3508_v61, %v3500_v33  ;;  %v3505_v49 = vmul.f32 %v13840_v2, %v2439_v36  ;;  %v2448_v50 = vcvt.s32.f32 %v1424_v57 }
 0x339   :  { %5098 = vmatprep.subr.bf16.mxu0 %v4330_v3  ;;  %v1426_v37 = vunpack.c.2.s8 %v866_v27  ;;  %v3499_v19 = vmul.f32 %v11535_v14, %v2433_v62  ;;  %v3507_v7 = vmul.f32 %v11535_v14, %v2441_v16  ;;  %v1434_v9 = vunpack.c.3.s8 %v866_v27 }
 0x33a   :  { %v2456_v11 = vcvt.s32.f32 %v1432_v23  ;;  %5270 = vmatprep.subr.bf16.mxu1 %v4332_v59  ;;  %v4329_v13 = vpack.c.bf16 %v3505_v49, %v3497_v5  ;;  %v3514_v26 = vmul.f32 %v13839_v12, %v2448_v50  ;;  %v1423_v35 = vunpack.c.2.s8 %v863_v56 }
 0x33b   :  { %v2450_v44 = vcvt.s32.f32 %v1426_v37  ;;  %v4331_v20 = vpack.c.bf16 %v3507_v7, %v3499_v19  ;;  %v2458_v1 = vcvt.s32.f32 %v1434_v9  ;;  %v1431_v60 = vunpack.c.3.s8 %v863_v56 }
 0x33c   :  { %v3522_v21 = vmul.f32 %v13839_v12, %v2456_v11  ;;  %5099 = vmatpush1.bf16.msra.mxu0 %v4329_v13  ;;  %v2447_v52 = vcvt.s32.f32 %v1423_v35  ;;  %v1425_v42 = vunpack.c.2.s8 %v865_v40  ;;  %v1433_v18 = vunpack.c.3.s8 %v865_v40 }
 0x33d   :  { %v3516_v47 = vmul.f32 %v11550_v15, %v2450_v44  ;;  %5271 = vmatpush1.bf16.msra.mxu1 %v4331_v20  ;;  %v3524_v6 = vmul.f32 %v11550_v15, %v2458_v1  ;;  %v2455_v24 = vcvt.s32.f32 %v1431_v60  ;;  %v1440_v29 = vunpack.c.0.s8 %v872_v48 }
 0x33e   :  { %v4338_v27 = vpack.c.bf16 %v3522_v21, %v3514_v26  ;;  %v3513_v39 = vmul.f32 %v13840_v2, %v2447_v52  ;;  %v2449_v8 = vcvt.s32.f32 %v1425_v42  ;;  %v2457_v0 = vcvt.s32.f32 %v1433_v18  ;;  %v880_v42 = vld [vmem:[#allocation9 + $0x3a8] sm:$0xff] }
 0x33f   :  { %v1448_v55 = vunpack.c.1.s8 %v872_v48  ;;  %v4340_v56 = vpack.c.bf16 %v3524_v6, %v3516_v47  ;;  %v3521_v63 = vmul.f32 %v13840_v2, %v2455_v24  ;;  %v2464_v4 = vcvt.s32.f32 %v1440_v29 }
 0x340   :  { %5100 = vmatprep.subr.bf16.mxu0 %v4338_v27  ;;  %v1442_v17 = vunpack.c.0.s8 %v874_v43  ;;  %v3515_v40 = vmul.f32 %v11535_v14, %v2449_v8  ;;  %v3523_v41 = vmul.f32 %v11535_v14, %v2457_v0  ;;  %v1450_v53 = vunpack.c.1.s8 %v874_v43  ;;  %v882_v0 = vld [vmem:[#allocation9 + $0x3b8] sm:$0xff] }
 0x341   :  { %v2472_v38 = vcvt.s32.f32 %v1448_v55  ;;  %5272 = vmatprep.subr.bf16.mxu1 %v4340_v56  ;;  %v4337_v31 = vpack.c.bf16 %v3521_v63, %v3513_v39  ;;  %v3530_v46 = vmul.f32 %v13839_v12, %v2464_v4  ;;  %v1439_v54 = vunpack.c.0.s8 %v871_v51 }
 0x342   :  { %v2466_v33 = vcvt.s32.f32 %v1442_v17  ;;  %v4339_v58 = vpack.c.bf16 %v3523_v41, %v3515_v40  ;;  %v2474_v3 = vcvt.s32.f32 %v1450_v53  ;;  %v1447_v61 = vunpack.c.1.s8 %v871_v51 }
 0x343   :  { %v3538_v10 = vmul.f32 %v13839_v12, %v2472_v38  ;;  %5101 = vmatpush1.bf16.msra.mxu0 %v4337_v31  ;;  %v2463_v57 = vcvt.s32.f32 %v1439_v54  ;;  %v1441_v5 = vunpack.c.0.s8 %v873_v45  ;;  %v1449_v62 = vunpack.c.1.s8 %v873_v45  ;;  %v879_v38 = vld [vmem:[#allocation9 + $0x3a0] sm:$0xff] }
 0x344   :  { %v3532_v36 = vmul.f32 %v11550_v15, %v2466_v33  ;;  %5273 = vmatpush1.bf16.msra.mxu1 %v4339_v58  ;;  %v3540_v23 = vmul.f32 %v11550_v15, %v2474_v3  ;;  %v2471_v59 = vcvt.s32.f32 %v1447_v61  ;;  %v1456_v49 = vunpack.c.2.s8 %v872_v48 }
 0x345   :  { %v4346_v16 = vpack.c.bf16 %v3538_v10, %v3530_v46  ;;  %v3529_v50 = vmul.f32 %v13840_v2, %v2463_v57  ;;  %v2465_v37 = vcvt.s32.f32 %v1441_v5  ;;  %v2473_v19 = vcvt.s32.f32 %v1449_v62  ;;  %v881_v10 = vld [vmem:[#allocation9 + $0x3b0] sm:$0xff] }
 0x346   :  { %v1464_v7 = vunpack.c.3.s8 %v872_v48  ;;  %v4348_v11 = vpack.c.bf16 %v3540_v23, %v3532_v36  ;;  %v3537_v9 = vmul.f32 %v13840_v2, %v2471_v59  ;;  %v2480_v13 = vcvt.s32.f32 %v1456_v49 }
 0x347   :  { %5102 = vmatprep.subr.bf16.mxu0 %v4346_v16  ;;  %v1458_v26 = vunpack.c.2.s8 %v874_v43  ;;  %v3531_v44 = vmul.f32 %v11535_v14, %v2465_v37  ;;  %v3539_v35 = vmul.f32 %v11535_v14, %v2473_v19  ;;  %v1466_v21 = vunpack.c.3.s8 %v874_v43 }
 0x348   :  { %v2488_v20 = vcvt.s32.f32 %v1464_v7  ;;  %5274 = vmatprep.subr.bf16.mxu1 %v4348_v11  ;;  %v4345_v1 = vpack.c.bf16 %v3537_v9, %v3529_v50  ;;  %v3546_v60 = vmul.f32 %v13839_v12, %v2480_v13  ;;  %v1455_v52 = vunpack.c.2.s8 %v871_v51 }
 0x349   :  { %v2482_v47 = vcvt.s32.f32 %v1458_v26  ;;  %v4347_v48 = vpack.c.bf16 %v3539_v35, %v3531_v44  ;;  %v2490_v27 = vcvt.s32.f32 %v1466_v21  ;;  %v1463_v6 = vunpack.c.3.s8 %v871_v51 }
 0x34a   :  { %v3554_v18 = vmul.f32 %v13839_v12, %v2488_v20  ;;  %5103 = vmatpush1.bf16.msra.mxu0 %v4345_v1  ;;  %v2479_v29 = vcvt.s32.f32 %v1455_v52  ;;  %v1457_v39 = vunpack.c.2.s8 %v873_v45  ;;  %v1465_v8 = vunpack.c.3.s8 %v873_v45 }
 0x34b   :  { %v3548_v24 = vmul.f32 %v11550_v15, %v2482_v47  ;;  %5275 = vmatpush1.bf16.msra.mxu1 %v4347_v48  ;;  %v3556_v55 = vmul.f32 %v11550_v15, %v2490_v27  ;;  %v2487_v56 = vcvt.s32.f32 %v1463_v6  ;;  %v1472_v63 = vunpack.c.0.s8 %v880_v42 }
 0x34c   :  { %v4354_v43 = vpack.c.bf16 %v3554_v18, %v3546_v60  ;;  %v3545_v4 = vmul.f32 %v13840_v2, %v2479_v29  ;;  %v2481_v17 = vcvt.s32.f32 %v1457_v39  ;;  %v2489_v40 = vcvt.s32.f32 %v1465_v8  ;;  %v888_v39 = vld [vmem:[#allocation9 + $0x3e8] sm:$0xff] }
 0x34d   :  { %v1480_v41 = vunpack.c.1.s8 %v880_v42  ;;  %v4356_v51 = vpack.c.bf16 %v3556_v55, %v3548_v24  ;;  %v3553_v53 = vmul.f32 %v13840_v2, %v2487_v56  ;;  %v2496_v31 = vcvt.s32.f32 %v1472_v63 }
 0x34e   :  { %5104 = vmatprep.subr.bf16.mxu0 %v4354_v43  ;;  %v1474_v46 = vunpack.c.0.s8 %v882_v0  ;;  %v3547_v45 = vmul.f32 %v11535_v14, %v2481_v17  ;;  %v3555_v33 = vmul.f32 %v11535_v14, %v2489_v40  ;;  %v1482_v58 = vunpack.c.1.s8 %v882_v0  ;;  %v890_v40 = vld [vmem:[#allocation9 + $0x3f8] sm:$0xff] }
 0x34f   :  { %v2504_v54 = vcvt.s32.f32 %v1480_v41  ;;  %5276 = vmatprep.subr.bf16.mxu1 %v4356_v51  ;;  %v4353_v3 = vpack.c.bf16 %v3553_v53, %v3545_v4  ;;  %v3562_v61 = vmul.f32 %v13839_v12, %v2496_v31  ;;  %v1471_v57 = vunpack.c.0.s8 %v879_v38 }
 0x350   :  { %v2498_v36 = vcvt.s32.f32 %v1474_v46  ;;  %v4355_v5 = vpack.c.bf16 %v3555_v33, %v3547_v45  ;;  %v2506_v16 = vcvt.s32.f32 %v1482_v58  ;;  %v1479_v23 = vunpack.c.1.s8 %v879_v38 }
 0x351   :  { %v3570_v62 = vmul.f32 %v13839_v12, %v2504_v54  ;;  %5105 = vmatpush1.bf16.msra.mxu0 %v4353_v3  ;;  %v2495_v49 = vcvt.s32.f32 %v1471_v57  ;;  %v1473_v50 = vunpack.c.0.s8 %v881_v10  ;;  %v1481_v37 = vunpack.c.1.s8 %v881_v10  ;;  %v887_v54 = vld [vmem:[#allocation9 + $0x3e0] sm:$0xff] }
 0x352   :  { %v3564_v59 = vmul.f32 %v11550_v15, %v2498_v36  ;;  %5277 = vmatpush1.bf16.msra.mxu1 %v4355_v5  ;;  %v3572_v7 = vmul.f32 %v11550_v15, %v2506_v16  ;;  %v2503_v11 = vcvt.s32.f32 %v1479_v23  ;;  %v1488_v9 = vunpack.c.2.s8 %v880_v42 }
 0x353   :  { %v4362_v19 = vpack.c.bf16 %v3570_v62, %v3562_v61  ;;  %v3561_v13 = vmul.f32 %v13840_v2, %v2495_v49  ;;  %v2497_v26 = vcvt.s32.f32 %v1473_v50  ;;  %v2505_v44 = vcvt.s32.f32 %v1481_v37  ;;  %v889_v62 = vld [vmem:[#allocation9 + $0x3f0] sm:$0xff] }
 0x354   :  { %v1496_v35 = vunpack.c.3.s8 %v880_v42  ;;  %v4364_v20 = vpack.c.bf16 %v3572_v7, %v3564_v59  ;;  %v3569_v21 = vmul.f32 %v13840_v2, %v2503_v11  ;;  %v2512_v1 = vcvt.s32.f32 %v1488_v9 }
 0x355   :  { %5106 = vmatprep.subr.bf16.mxu0 %v4362_v19  ;;  %v1490_v60 = vunpack.c.2.s8 %v882_v0  ;;  %v3563_v47 = vmul.f32 %v11535_v14, %v2497_v26  ;;  %v3571_v52 = vmul.f32 %v11535_v14, %v2505_v44  ;;  %v1498_v18 = vunpack.c.3.s8 %v882_v0 }
 0x356   :  { %v2520_v48 = vcvt.s32.f32 %v1496_v35  ;;  %5278 = vmatprep.subr.bf16.mxu1 %v4364_v20  ;;  %v4361_v27 = vpack.c.bf16 %v3569_v21, %v3561_v13  ;;  %v3578_v6 = vmul.f32 %v13839_v12, %v2512_v1  ;;  %v1487_v29 = vunpack.c.2.s8 %v879_v38 }
 0x357   :  { %v2514_v24 = vcvt.s32.f32 %v1490_v60  ;;  %v4363_v42 = vpack.c.bf16 %v3571_v52, %v3563_v47  ;;  %v2522_v43 = vcvt.s32.f32 %v1498_v18  ;;  %v1495_v55 = vunpack.c.3.s8 %v879_v38 }
 0x358   :  { %v3586_v8 = vmul.f32 %v13839_v12, %v2520_v48  ;;  %5107 = vmatpush1.bf16.msra.mxu0 %v4361_v27  ;;  %v2511_v63 = vcvt.s32.f32 %v1487_v29  ;;  %v1489_v4 = vunpack.c.2.s8 %v881_v10  ;;  %v1497_v17 = vunpack.c.3.s8 %v881_v10 }
 0x359   :  { %v3580_v56 = vmul.f32 %v11550_v15, %v2514_v24  ;;  %5279 = vmatpush1.bf16.msra.mxu1 %v4363_v42  ;;  %v3588_v41 = vmul.f32 %v11550_v15, %v2522_v43  ;;  %v2519_v51 = vcvt.s32.f32 %v1495_v55  ;;  %v1504_v53 = vunpack.c.0.s8 %v888_v39 }
 0x35a   :  { %v4370_v0 = vpack.c.bf16 %v3586_v8, %v3578_v6  ;;  %v3577_v31 = vmul.f32 %v13840_v2, %v2511_v63  ;;  %v2513_v46 = vcvt.s32.f32 %v1489_v4  ;;  %v2521_v45 = vcvt.s32.f32 %v1497_v17  ;;  %v11896_v4 = vld [vmem:[#allocation9 + $0x428] sm:$0xff] }
 0x35b   :  { %v1512_v33 = vunpack.c.1.s8 %v888_v39  ;;  %v4372_v38 = vpack.c.bf16 %v3588_v41, %v3580_v56  ;;  %v3585_v58 = vmul.f32 %v13840_v2, %v2519_v51  ;;  %v2528_v3 = vcvt.s32.f32 %v1504_v53 }
 0x35c   :  { %5108 = vmatprep.subr.bf16.mxu0 %v4370_v0  ;;  %v1506_v61 = vunpack.c.0.s8 %v890_v40  ;;  %v3579_v10 = vmul.f32 %v11535_v14, %v2513_v46  ;;  %v3587_v36 = vmul.f32 %v11535_v14, %v2521_v45  ;;  %v1514_v5 = vunpack.c.1.s8 %v890_v40 }
 0x35d   :  { %v2536_v57 = vcvt.s32.f32 %v1512_v33  ;;  %5280 = vmatprep.subr.bf16.mxu1 %v4372_v38  ;;  %v4369_v16 = vpack.c.bf16 %v3585_v58, %v3577_v31  ;;  %v3594_v23 = vmul.f32 %v13839_v12, %v2528_v3  ;;  %v1503_v49 = vunpack.c.0.s8 %v887_v54 }
 0x35e   :  { %v2530_v59 = vcvt.s32.f32 %v1506_v61  ;;  %v4371_v50 = vpack.c.bf16 %v3587_v36, %v3579_v10  ;;  %v2538_v19 = vcvt.s32.f32 %v1514_v5  ;;  %v1511_v7 = vunpack.c.1.s8 %v887_v54  ;;  %v11906_v36 = vld [vmem:[#allocation9 + $0x420] sm:$0xff] }
 0x35f   :  { %v3602_v37 = vmul.f32 %v13839_v12, %v2536_v57  ;;  %5109 = vmatpush1.bf16.msra.mxu0 %v4369_v16  ;;  %v2527_v9 = vcvt.s32.f32 %v1503_v49  ;;  %v1505_v13 = vunpack.c.0.s8 %v889_v62  ;;  %v1513_v26 = vunpack.c.1.s8 %v889_v62 }
 0x360   :  { %v3596_v11 = vmul.f32 %v11550_v15, %v2530_v59  ;;  %5281 = vmatpush1.bf16.msra.mxu1 %v4371_v50  ;;  %v3604_v35 = vmul.f32 %v11550_v15, %v2538_v19  ;;  %v2535_v20 = vcvt.s32.f32 %v1511_v7  ;;  %v1520_v21 = vunpack.c.2.s8 %v888_v39 }
 0x361   :  { %v4378_v44 = vpack.c.bf16 %v3602_v37, %v3594_v23  ;;  %v3593_v1 = vmul.f32 %v13840_v2, %v2527_v9  ;;  %v2529_v60 = vcvt.s32.f32 %v1505_v13  ;;  %v2537_v47 = vcvt.s32.f32 %v1513_v26  ;;  %v897_v37 = vld [vmem:[#allocation9 + $0x430] sm:$0xff] }
 0x362   :  { %v1528_v52 = vunpack.c.3.s8 %v888_v39  ;;  %v4380_v48 = vpack.c.bf16 %v3604_v35, %v3596_v11  ;;  %v3601_v18 = vmul.f32 %v13840_v2, %v2535_v20  ;;  %v2544_v27 = vcvt.s32.f32 %v1520_v21 }
 0x363   :  { %5110 = vmatprep.subr.bf16.mxu0 %v4378_v44  ;;  %v1522_v6 = vunpack.c.2.s8 %v890_v40  ;;  %v3595_v24 = vmul.f32 %v11535_v14, %v2529_v60  ;;  %v3603_v29 = vmul.f32 %v11535_v14, %v2537_v47  ;;  %v1530_v8 = vunpack.c.3.s8 %v890_v40  ;;  %v11900_v40 = vld [vmem:[#allocation9 + $0x438] sm:$0xff] }
 0x364   :  { %v2552_v42 = vcvt.s32.f32 %v1528_v52  ;;  %5282 = vmatprep.subr.bf16.mxu1 %v4380_v48  ;;  %v4377_v43 = vpack.c.bf16 %v3601_v18, %v3593_v1  ;;  %v3610_v55 = vmul.f32 %v13839_v12, %v2544_v27  ;;  %v1519_v63 = vunpack.c.2.s8 %v887_v54 }
 0x365   :  { %v2546_v56 = vcvt.s32.f32 %v1522_v6  ;;  %v4379_v39 = vpack.c.bf16 %v3603_v29, %v3595_v24  ;;  %v2554_v0 = vcvt.s32.f32 %v1530_v8  ;;  %v1527_v41 = vunpack.c.3.s8 %v887_v54 }
 0x366   :  { %v3618_v17 = vmul.f32 %v13839_v12, %v2552_v42  ;;  %5111 = vmatpush1.bf16.msra.mxu0 %v4377_v43  ;;  %v2543_v53 = vcvt.s32.f32 %v1519_v63  ;;  %v1521_v31 = vunpack.c.2.s8 %v889_v62  ;;  %v1529_v46 = vunpack.c.3.s8 %v889_v62  ;;  %v13844_v42 = vld [vmem:[#allocation122_spill] sm:$0xff] }
 0x367   :  { %v3612_v51 = vmul.f32 %v11550_v15, %v2546_v56  ;;  %5283 = vmatpush1.bf16.msra.mxu1 %v4379_v39  ;;  %v3620_v33 = vmul.f32 %v11550_v15, %v2554_v0  ;;  %v2551_v38 = vcvt.s32.f32 %v1527_v41  ;;  %v1536_v58 = vunpack.c.0.s8 %v11896_v4 }
 0x368   :  { %v4386_v45 = vpack.c.bf16 %v3618_v17, %v3610_v55  ;;  %v3609_v3 = vmul.f32 %v13840_v2, %v2543_v53  ;;  %v2545_v61 = vcvt.s32.f32 %v1521_v31  ;;  %v2553_v10 = vcvt.s32.f32 %v1529_v46  ;;  %v904_v31 = vld [vmem:[#allocation9 + $0x468] sm:$0xff] }
 0x369   :  { %v1544_v54 = vunpack.c.1.s8 %v11896_v4  ;;  %v4388_v57 = vpack.c.bf16 %v3620_v33, %v3612_v51  ;;  %v3617_v5 = vmul.f32 %v13840_v2, %v2551_v38  ;;  %v2560_v62 = vcvt.s32.f32 %v1536_v58 }
 0x36a   :  { %5112 = vmatprep.subr.bf16.mxu0 %v4386_v45  ;;  %v1538_v16 = vunpack.c.0.s8 %v11900_v40  ;;  %v3611_v23 = vmul.f32 %v11535_v14, %v2545_v61  ;;  %v3619_v59 = vmul.f32 %v11535_v14, %v2553_v10  ;;  %v1546_v50 = vunpack.c.1.s8 %v11900_v40  ;;  %v906_v10 = vld [vmem:[#allocation9 + $0x478] sm:$0xff] }
 0x36b   :  { %v2568_v49 = vcvt.s32.f32 %v1544_v54  ;;  %5284 = vmatprep.subr.bf16.mxu1 %v4388_v57  ;;  %v4385_v19 = vpack.c.bf16 %v3617_v5, %v3609_v3  ;;  %v3626_v7 = vmul.f32 %v13839_v12, %v2560_v62  ;;  %v1535_v9 = vunpack.c.0.s8 %v11906_v36 }
 0x36c   :  { %v2562_v11 = vcvt.s32.f32 %v1538_v16  ;;  %v4387_v13 = vpack.c.bf16 %v3619_v59, %v3611_v23  ;;  %v2570_v44 = vcvt.s32.f32 %v1546_v50  ;;  %v1543_v35 = vunpack.c.1.s8 %v11906_v36 }
 0x36d   :  { %v3634_v26 = vmul.f32 %v13839_v12, %v2568_v49  ;;  %5113 = vmatpush1.bf16.msra.mxu0 %v4385_v19  ;;  %v2559_v21 = vcvt.s32.f32 %v1535_v9  ;;  %v1537_v1 = vunpack.c.0.s8 %v897_v37  ;;  %v1545_v60 = vunpack.c.1.s8 %v897_v37  ;;  %v11938_v49 = vld [vmem:[#allocation9 + $0x460] sm:$0xff] }
 0x36e   :  { %v3628_v20 = vmul.f32 %v11550_v15, %v2562_v11  ;;  %5285 = vmatpush1.bf16.msra.mxu1 %v4387_v13  ;;  %v3636_v52 = vmul.f32 %v11550_v15, %v2570_v44  ;;  %v2567_v48 = vcvt.s32.f32 %v1543_v35  ;;  %v1552_v18 = vunpack.c.2.s8 %v11896_v4 }
 0x36f   :  { %v4394_v47 = vpack.c.bf16 %v3634_v26, %v3626_v7  ;;  %v3625_v27 = vmul.f32 %v13840_v2, %v2559_v21  ;;  %v2561_v6 = vcvt.s32.f32 %v1537_v1  ;;  %v2569_v24 = vcvt.s32.f32 %v1545_v60  ;;  %v905_v26 = vld [vmem:[#allocation9 + $0x470] sm:$0xff] }
 0x370   :  { %v1560_v29 = vunpack.c.3.s8 %v11896_v4  ;;  %5115 = vmatmul.mubr.bf16.vlgmr.msra.gmra.mrb[12].mxu0 %v13844_v42  ;;  %v4396_v8 = vpack.c.bf16 %v3636_v52, %v3628_v20  ;;  %v3633_v43 = vmul.f32 %v13840_v2, %v2567_v48  ;;  %v2576_v55 = vcvt.s32.f32 %v1552_v18 }
 0x371   :  { %5125 = vmatprep.subr.bf16.mxu0 %v4394_v47  ;;  %v1554_v56 = vunpack.c.2.s8 %v11900_v40  ;;  %5287 = vmatmul.mubr.bf16.vlgmr.msra.gmra.mrb[12].mxu1 %v13844_v42  ;;  %v3627_v63 = vmul.f32 %v11535_v14, %v2561_v6  ;;  %v3635_v39 = vmul.f32 %v11535_v14, %v2569_v24  ;;  %v1562_v4 = vunpack.c.3.s8 %v11900_v40 }
 0x372   :  { %5157 = vmatprep.mubr.bf16.mxu0 %v11260_v32  ;;  %v2584_v17 = vcvt.s32.f32 %v1560_v29  ;;  %5297 = vmatprep.subr.bf16.mxu1 %v4396_v8  ;;  %v4393_v0 = vpack.c.bf16 %v3633_v43, %v3625_v27  ;;  %v3642_v41 = vmul.f32 %v13839_v12, %v2576_v55  ;;  %v1551_v53 = vunpack.c.2.s8 %v11906_v36 }
 0x373   :  { %5329 = vmatprep.mubr.bf16.mxu1 %v11260_v32  ;;  %v2578_v51 = vcvt.s32.f32 %v1554_v56  ;;  %v4395_v46 = vpack.c.bf16 %v3635_v39, %v3627_v63  ;;  %v2586_v33 = vcvt.s32.f32 %v1562_v4  ;;  %v1559_v38 = vunpack.c.3.s8 %v11906_v36 }
 0x374   :  { %v3650_v45 = vmul.f32 %v13839_v12, %v2584_v17  ;;  %5126 = vmatpush1.bf16.msra.mxu0 %v4393_v0  ;;  %v2575_v40 = vcvt.s32.f32 %v1551_v53  ;;  %v1553_v3 = vunpack.c.2.s8 %v897_v37  ;;  %v1561_v61 = vunpack.c.3.s8 %v897_v37 }
 0x375   :  { %v3644_v58 = vmul.f32 %v11550_v15, %v2578_v51  ;;  %5298 = vmatpush1.bf16.msra.mxu1 %v4395_v46  ;;  %v3652_v54 = vmul.f32 %v11550_v15, %v2586_v33  ;;  %v2583_v57 = vcvt.s32.f32 %v1559_v38  ;;  %v1568_v5 = vunpack.c.0.s8 %v904_v31 }
 0x376   :  { %v4402_v32 = vpack.c.bf16 %v3650_v45, %v3642_v41  ;;  %v3641_v62 = vmul.f32 %v13840_v2, %v2575_v40  ;;  %v2577_v16 = vcvt.s32.f32 %v1553_v3  ;;  %v2585_v23 = vcvt.s32.f32 %v1561_v61 }
 0x377   :  { %v1576_v59 = vunpack.c.1.s8 %v904_v31  ;;  %v4404_v36 = vpack.c.bf16 %v3652_v54, %v3644_v58  ;;  %v3649_v50 = vmul.f32 %v13840_v2, %v2583_v57  ;;  %v2592_v19 = vcvt.s32.f32 %v1568_v5  ;;  %v11959_v54 = vpop.f32.mrb[8].mxu0  ;;  %v11961_v57 = vpop.f32.mrb[8].mxu1 }
 0x378   :  { %5127 = vmatprep.subr.bf16.mxu0 %v4402_v32  ;;  %v1570_v37 = vunpack.c.0.s8 %v906_v10  ;;  %v3643_v7 = vmul.f32 %v11535_v14, %v2577_v16  ;;  %v3651_v11 = vmul.f32 %v11535_v14, %v2585_v23  ;;  %v1578_v13 = vunpack.c.1.s8 %v906_v10  ;;  %v11964_v23 = vld [vmem:[#allocation9 + $0x4b8] sm:$0xff] }
 0x379   :  { %v2600_v9 = vcvt.s32.f32 %v1576_v59  ;;  %5299 = vmatprep.subr.bf16.mxu1 %v4404_v36  ;;  %v4401_v44 = vpack.c.bf16 %v3649_v50, %v3641_v62  ;;  %v3658_v35 = vmul.f32 %v13839_v12, %v2592_v19  ;;  %v1567_v21 = vunpack.c.0.s8 %v11938_v49  ;;  %v11966_v59 = vpop.f32.mrb[9].mxu0  ;;  %v11968_v36 = vpop.f32.mrb[9].mxu1 }
 0x37a   :  { %v2594_v20 = vcvt.s32.f32 %v1570_v37  ;;  %v4403_v1 = vpack.c.bf16 %v3651_v11, %v3643_v7  ;;  %v2602_v47 = vcvt.s32.f32 %v1578_v13  ;;  %v1575_v52 = vunpack.c.1.s8 %v11938_v49 }
 0x37b   :  { %v3666_v60 = vmul.f32 %v13839_v12, %v2600_v9  ;;  %5128 = vmatpush1.bf16.msra.mxu0 %v4401_v44  ;;  %v2591_v18 = vcvt.s32.f32 %v1567_v21  ;;  %v1569_v27 = vunpack.c.0.s8 %v905_v26  ;;  %v1577_v6 = vunpack.c.1.s8 %v905_v26 }
 0x37c   :  { %v3660_v48 = vmul.f32 %v11550_v15, %v2594_v20  ;;  %5300 = vmatpush1.bf16.msra.mxu1 %v4403_v1  ;;  %v3668_v29 = vmul.f32 %v11550_v15, %v2602_v47  ;;  %v2599_v42 = vcvt.s32.f32 %v1575_v52  ;;  %v1584_v8 = vunpack.c.2.s8 %v904_v31 }
 0x37d   :  { %v4410_v24 = vpack.c.bf16 %v3666_v60, %v3658_v35  ;;  %v3657_v43 = vmul.f32 %v13840_v2, %v2591_v18  ;;  %v2593_v55 = vcvt.s32.f32 %v1569_v27  ;;  %v2601_v56 = vcvt.s32.f32 %v1577_v6 }
 0x37e   :  { %v1592_v63 = vunpack.c.3.s8 %v904_v31  ;;  %v4412_v39 = vpack.c.bf16 %v3668_v29, %v3660_v48  ;;  %v3665_v17 = vmul.f32 %v13840_v2, %v2599_v42  ;;  %v2608_v4 = vcvt.s32.f32 %v1584_v8  ;;  %v11955_v31 = vld [vmem:[#allocation9 + $0x4a8] sm:$0xff]  ;;  %v913_v48 = vld [vmem:[#allocation9 + $0x4b0] sm:$0xff] }
 0x37f   :  { %5129 = vmatprep.subr.bf16.mxu0 %v4410_v24  ;;  %v1586_v0 = vunpack.c.2.s8 %v906_v10  ;;  %v3659_v41 = vmul.f32 %v11535_v14, %v2593_v55  ;;  %v3667_v51 = vmul.f32 %v11535_v14, %v2601_v56  ;;  %v1594_v46 = vunpack.c.3.s8 %v906_v10  ;;  %v11985_v55 = vpop.f32.mrb[10].mxu0  ;;  %v11987_v56 = vpop.f32.mrb[10].mxu1 }
 0x380   :  { %v2616_v53 = vcvt.s32.f32 %v1592_v63  ;;  %5301 = vmatprep.subr.bf16.mxu1 %v4412_v39  ;;  %v4409_v45 = vpack.c.bf16 %v3665_v17, %v3657_v43  ;;  %v3674_v33 = vmul.f32 %v13839_v12, %v2608_v4  ;;  %v1583_v58 = vunpack.c.2.s8 %v11938_v49 }
 0x381   :  { %v2610_v38 = vcvt.s32.f32 %v1586_v0  ;;  %v4411_v40 = vpack.c.bf16 %v3667_v51, %v3659_v41  ;;  %v2618_v61 = vcvt.s32.f32 %v1594_v46  ;;  %v1591_v32 = vunpack.c.3.s8 %v11938_v49 }
 0x382   :  { %v3682_v3 = vmul.f32 %v13839_v12, %v2616_v53  ;;  %5130 = vmatpush1.bf16.msra.mxu0 %v4409_v45  ;;  %v2607_v5 = vcvt.s32.f32 %v1583_v58  ;;  %v1585_v62 = vunpack.c.2.s8 %v905_v26  ;;  %v1593_v16 = vunpack.c.3.s8 %v905_v26  ;;  %v11974_v26 = vld [vmem:[#allocation9 + $0x4a0] sm:$0xff] }
 0x383   :  { %v3676_v10 = vmul.f32 %v11550_v15, %v2610_v38  ;;  %5302 = vmatpush1.bf16.msra.mxu1 %v4411_v40  ;;  %v3684_v49 = vmul.f32 %v11550_v15, %v2618_v61  ;;  %v2615_v19 = vcvt.s32.f32 %v1591_v32  ;;  %v1600_v37 = vunpack.c.0.s8 %v11955_v31 }
 0x384   :  { %v4418_v50 = vpack.c.bf16 %v3682_v3, %v3674_v33  ;;  %v3673_v7 = vmul.f32 %v13840_v2, %v2607_v5  ;;  %v2609_v11 = vcvt.s32.f32 %v1585_v62  ;;  %v2617_v9 = vcvt.s32.f32 %v1593_v16 }
 0x385   :  { %v1608_v13 = vunpack.c.1.s8 %v11955_v31  ;;  %v4420_v44 = vpack.c.bf16 %v3684_v49, %v3676_v10  ;;  %v3681_v35 = vmul.f32 %v13840_v2, %v2615_v19  ;;  %v2624_v20 = vcvt.s32.f32 %v1600_v37  ;;  %v12001_v19 = vld [vmem:[#allocation9 + $0x4e8] sm:$0xff]  ;;  %v12003_v37 = vpop.f32.mrb[11].mxu0 }
 0x386   :  { %5131 = vmatprep.subr.bf16.mxu0 %v4418_v50  ;;  %v1602_v21 = vunpack.c.0.s8 %v11964_v23  ;;  %v3675_v1 = vmul.f32 %v11535_v14, %v2609_v11  ;;  %v3683_v60 = vmul.f32 %v11535_v14, %v2617_v9  ;;  %v1610_v52 = vunpack.c.1.s8 %v11964_v23 }
 0x387   :  { %v2632_v47 = vcvt.s32.f32 %v1608_v13  ;;  %5303 = vmatprep.subr.bf16.mxu1 %v4420_v44  ;;  %v4417_v18 = vpack.c.bf16 %v3681_v35, %v3673_v7  ;;  %v3690_v27 = vmul.f32 %v13839_v12, %v2624_v20  ;;  %v1599_v24 = vunpack.c.0.s8 %v11974_v26  ;;  %v12005_v7 = vpop.f32.mrb[11].mxu1 }
 0x388   :  { %v2626_v6 = vcvt.s32.f32 %v1602_v21  ;;  %v4419_v29 = vpack.c.bf16 %v3683_v60, %v3675_v1  ;;  %v2634_v8 = vcvt.s32.f32 %v1610_v52  ;;  %v1607_v43 = vunpack.c.1.s8 %v11974_v26  ;;  %v922_v1 = vld [vmem:[#allocation9 + $0x4f8] sm:$0xff] }
 0x389   :  { %v3698_v42 = vmul.f32 %v13839_v12, %v2632_v47  ;;  %5132 = vmatpush1.bf16.msra.mxu0 %v4417_v18  ;;  %v2623_v39 = vcvt.s32.f32 %v1599_v24  ;;  %v1601_v17 = vunpack.c.0.s8 %v913_v48  ;;  %v1609_v4 = vunpack.c.1.s8 %v913_v48 }
 0x38a   :  { %v3692_v63 = vmul.f32 %v11550_v15, %v2626_v6  ;;  %5304 = vmatpush1.bf16.msra.mxu1 %v4419_v29  ;;  %v3700_v41 = vmul.f32 %v11550_v15, %v2634_v8  ;;  %v2631_v51 = vcvt.s32.f32 %v1607_v43  ;;  %v1616_v53 = vunpack.c.2.s8 %v11955_v31  ;;  %v919_v29 = vld [vmem:[#allocation9 + $0x4e0] sm:$0xff] }
 0x38b   :  { %v4426_v0 = vpack.c.bf16 %v3698_v42, %v3690_v27  ;;  %v3689_v46 = vmul.f32 %v13840_v2, %v2623_v39  ;;  %v2625_v45 = vcvt.s32.f32 %v1601_v17  ;;  %v2633_v33 = vcvt.s32.f32 %v1609_v4 }
 0x38c   :  { %v1624_v38 = vunpack.c.3.s8 %v11955_v31  ;;  %v4428_v58 = vpack.c.bf16 %v3700_v41, %v3692_v63  ;;  %v3697_v40 = vmul.f32 %v13840_v2, %v2631_v51  ;;  %v2640_v3 = vcvt.s32.f32 %v1616_v53 }
 0x38d   :  { %5133 = vmatprep.subr.bf16.mxu0 %v4426_v0  ;;  %v1618_v61 = vunpack.c.2.s8 %v11964_v23  ;;  %v3691_v32 = vmul.f32 %v11535_v14, %v2625_v45  ;;  %v3699_v10 = vmul.f32 %v11535_v14, %v2633_v33  ;;  %v1626_v62 = vunpack.c.3.s8 %v11964_v23  ;;  %v921_v0 = vld [vmem:[#allocation9 + $0x4f0] sm:$0xff] }
 0x38e   :  { %v2648_v5 = vcvt.s32.f32 %v1624_v38  ;;  %5305 = vmatprep.subr.bf16.mxu1 %v4428_v58  ;;  %v4425_v16 = vpack.c.bf16 %v3697_v40, %v3689_v46  ;;  %v3706_v50 = vmul.f32 %v13839_v12, %v2640_v3  ;;  %v1615_v31 = vunpack.c.2.s8 %v11974_v26 }
 0x38f   :  { %v2642_v49 = vcvt.s32.f32 %v1618_v61  ;;  %v4427_v11 = vpack.c.bf16 %v3699_v10, %v3691_v32  ;;  %v2650_v13 = vcvt.s32.f32 %v1626_v62  ;;  %v1623_v44 = vunpack.c.3.s8 %v11974_v26 }
 0x390   :  { %v3714_v9 = vmul.f32 %v13839_v12, %v2648_v5  ;;  %5134 = vmatpush1.bf16.msra.mxu0 %v4425_v16  ;;  %v2639_v35 = vcvt.s32.f32 %v1615_v31  ;;  %v1617_v20 = vunpack.c.2.s8 %v913_v48  ;;  %v1625_v21 = vunpack.c.3.s8 %v913_v48 }
 0x391   :  { %v3708_v23 = vmul.f32 %v11550_v15, %v2642_v49  ;;  %5306 = vmatpush1.bf16.msra.mxu1 %v4427_v11  ;;  %v3716_v47 = vmul.f32 %v11550_v15, %v2650_v13  ;;  %v2647_v52 = vcvt.s32.f32 %v1623_v44  ;;  %v1632_v18 = vunpack.c.0.s8 %v12001_v19 }
 0x392   :  { %v4434_v60 = vpack.c.bf16 %v3714_v9, %v3706_v50  ;;  %v3705_v27 = vmul.f32 %v13840_v2, %v2639_v35  ;;  %v2641_v6 = vcvt.s32.f32 %v1617_v20  ;;  %v2649_v24 = vcvt.s32.f32 %v1625_v21 }
 0x393   :  { %v1640_v26 = vunpack.c.1.s8 %v12001_v19  ;;  %v4436_v42 = vpack.c.bf16 %v3716_v47, %v3708_v23  ;;  %v3713_v8 = vmul.f32 %v13840_v2, %v2647_v52  ;;  %v2656_v48 = vcvt.s32.f32 %v1632_v18 }
 0x394   :  { %5135 = vmatprep.subr.bf16.mxu0 %v4434_v60  ;;  %v1634_v43 = vunpack.c.0.s8 %v922_v1  ;;  %v3707_v63 = vmul.f32 %v11535_v14, %v2641_v6  ;;  %v3715_v39 = vmul.f32 %v11535_v14, %v2649_v24  ;;  %v1642_v4 = vunpack.c.1.s8 %v922_v1  ;;  %v928_v6 = vld [vmem:[#allocation9 + $0x528] sm:$0xff] }
 0x395   :  { %v2664_v17 = vcvt.s32.f32 %v1640_v26  ;;  %5307 = vmatprep.subr.bf16.mxu1 %v4436_v42  ;;  %v4433_v41 = vpack.c.bf16 %v3713_v8, %v3705_v27  ;;  %v3722_v51 = vmul.f32 %v13839_v12, %v2656_v48  ;;  %v1631_v46 = vunpack.c.0.s8 %v919_v29 }
 0x396   :  { %v2658_v53 = vcvt.s32.f32 %v1634_v43  ;;  %v4435_v45 = vpack.c.bf16 %v3715_v39, %v3707_v63  ;;  %v2666_v38 = vcvt.s32.f32 %v1642_v4  ;;  %v1639_v58 = vunpack.c.1.s8 %v919_v29  ;;  %v930_v39 = vld [vmem:[#allocation9 + $0x538] sm:$0xff] }
 0x397   :  { %v3730_v33 = vmul.f32 %v13839_v12, %v2664_v17  ;;  %5136 = vmatpush1.bf16.msra.mxu0 %v4433_v41  ;;  %v2655_v3 = vcvt.s32.f32 %v1631_v46  ;;  %v1633_v61 = vunpack.c.0.s8 %v921_v0  ;;  %v1641_v32 = vunpack.c.1.s8 %v921_v0 }
 0x398   :  { %v3724_v40 = vmul.f32 %v11550_v15, %v2658_v53  ;;  %5308 = vmatpush1.bf16.msra.mxu1 %v4435_v45  ;;  %v3732_v5 = vmul.f32 %v11550_v15, %v2666_v38  ;;  %v2663_v62 = vcvt.s32.f32 %v1639_v58  ;;  %v1648_v16 = vunpack.c.2.s8 %v12001_v19 }
 0x399   :  { %v4442_v10 = vpack.c.bf16 %v3730_v33, %v3722_v51  ;;  %v3721_v50 = vmul.f32 %v13840_v2, %v2655_v3  ;;  %v2657_v49 = vcvt.s32.f32 %v1633_v61  ;;  %v2665_v31 = vcvt.s32.f32 %v1641_v32  ;;  %v927_v33 = vld [vmem:[#allocation9 + $0x520] sm:$0xff] }
 0x39a   :  { %v1656_v11 = vunpack.c.3.s8 %v12001_v19  ;;  %v4444_v9 = vpack.c.bf16 %v3732_v5, %v3724_v40  ;;  %v3729_v13 = vmul.f32 %v13840_v2, %v2663_v62  ;;  %v2672_v44 = vcvt.s32.f32 %v1648_v16 }
 0x39b   :  { %5137 = vmatprep.subr.bf16.mxu0 %v4442_v10  ;;  %v1650_v23 = vunpack.c.2.s8 %v922_v1  ;;  %v3723_v35 = vmul.f32 %v11535_v14, %v2657_v49  ;;  %v3731_v20 = vmul.f32 %v11535_v14, %v2665_v31  ;;  %v1658_v60 = vunpack.c.3.s8 %v922_v1  ;;  %v929_v10 = vld [vmem:[#allocation9 + $0x530] sm:$0xff] }
 0x39c   :  { %v2680_v21 = vcvt.s32.f32 %v1656_v11  ;;  %5309 = vmatprep.subr.bf16.mxu1 %v4444_v9  ;;  %v4441_v47 = vpack.c.bf16 %v3729_v13, %v3721_v50  ;;  %v3738_v52 = vmul.f32 %v13839_v12, %v2672_v44  ;;  %v1647_v27 = vunpack.c.2.s8 %v919_v29 }
 0x39d   :  { %v2674_v18 = vcvt.s32.f32 %v1650_v23  ;;  %v4443_v19 = vpack.c.bf16 %v3731_v20, %v3723_v35  ;;  %v2682_v26 = vcvt.s32.f32 %v1658_v60  ;;  %v1655_v42 = vunpack.c.3.s8 %v919_v29 }
 0x39e   :  { %v3746_v24 = vmul.f32 %v13839_v12, %v2680_v21  ;;  %5138 = vmatpush1.bf16.msra.mxu0 %v4441_v47  ;;  %v2671_v48 = vcvt.s32.f32 %v1647_v27  ;;  %v1649_v43 = vunpack.c.2.s8 %v921_v0  ;;  %v1657_v63 = vunpack.c.3.s8 %v921_v0 }
 0x39f   :  { %v3740_v8 = vmul.f32 %v11550_v15, %v2674_v18  ;;  %5310 = vmatpush1.bf16.msra.mxu1 %v4443_v19  ;;  %v3748_v17 = vmul.f32 %v11550_v15, %v2682_v26  ;;  %v2679_v4 = vcvt.s32.f32 %v1655_v42  ;;  %v1664_v41 = vunpack.c.0.s8 %v928_v6 }
 0x3a0   :  { %v4450_v1 = vpack.c.bf16 %v3746_v24, %v3738_v52  ;;  %v3737_v51 = vmul.f32 %v13840_v2, %v2671_v48  ;;  %v2673_v53 = vcvt.s32.f32 %v1649_v43  ;;  %v2681_v46 = vcvt.s32.f32 %v1657_v63 }
 0x3a1   :  { %v1672_v45 = vunpack.c.1.s8 %v928_v6  ;;  %v4452_v29 = vpack.c.bf16 %v3748_v17, %v3740_v8  ;;  %v3745_v38 = vmul.f32 %v13840_v2, %v2679_v4  ;;  %v2688_v58 = vcvt.s32.f32 %v1664_v41 }
 0x3a2   :  { %5139 = vmatprep.subr.bf16.mxu0 %v4450_v1  ;;  %v1666_v40 = vunpack.c.0.s8 %v930_v39  ;;  %v3739_v0 = vmul.f32 %v11535_v14, %v2673_v53  ;;  %v3747_v3 = vmul.f32 %v11535_v14, %v2681_v46  ;;  %v1674_v32 = vunpack.c.1.s8 %v930_v39  ;;  %v936_v53 = vld [vmem:[#allocation9 + $0x568] sm:$0xff] }
 0x3a3   :  { %v2696_v61 = vcvt.s32.f32 %v1672_v45  ;;  %5311 = vmatprep.subr.bf16.mxu1 %v4452_v29  ;;  %v4449_v5 = vpack.c.bf16 %v3745_v38, %v3737_v51  ;;  %v3754_v62 = vmul.f32 %v13839_v12, %v2688_v58  ;;  %v1663_v50 = vunpack.c.0.s8 %v927_v33 }
 0x3a4   :  { %v2690_v16 = vcvt.s32.f32 %v1666_v40  ;;  %v4451_v49 = vpack.c.bf16 %v3747_v3, %v3739_v0  ;;  %v2698_v11 = vcvt.s32.f32 %v1674_v32  ;;  %v1671_v9 = vunpack.c.1.s8 %v927_v33  ;;  %v938_v3 = vld [vmem:[#allocation9 + $0x578] sm:$0xff] }
 0x3a5   :  { %v3762_v31 = vmul.f32 %v13839_v12, %v2696_v61  ;;  %5140 = vmatpush1.bf16.msra.mxu0 %v4449_v5  ;;  %v2687_v44 = vcvt.s32.f32 %v1663_v50  ;;  %v1665_v23 = vunpack.c.0.s8 %v929_v10  ;;  %v1673_v35 = vunpack.c.1.s8 %v929_v10 }
 0x3a6   :  { %v3756_v13 = vmul.f32 %v11550_v15, %v2690_v16  ;;  %5312 = vmatpush1.bf16.msra.mxu1 %v4451_v49  ;;  %v3764_v21 = vmul.f32 %v11550_v15, %v2698_v11  ;;  %v2695_v60 = vcvt.s32.f32 %v1671_v9  ;;  %v1680_v47 = vunpack.c.2.s8 %v928_v6 }
 0x3a7   :  { %v4458_v20 = vpack.c.bf16 %v3762_v31, %v3754_v62  ;;  %v3753_v52 = vmul.f32 %v13840_v2, %v2687_v44  ;;  %v2689_v18 = vcvt.s32.f32 %v1665_v23  ;;  %v2697_v27 = vcvt.s32.f32 %v1673_v35  ;;  %v935_v31 = vld [vmem:[#allocation9 + $0x560] sm:$0xff] }
 0x3a8   :  { %v1688_v19 = vunpack.c.3.s8 %v928_v6  ;;  %v4460_v24 = vpack.c.bf16 %v3764_v21, %v3756_v13  ;;  %v3761_v26 = vmul.f32 %v13840_v2, %v2695_v60  ;;  %v2704_v42 = vcvt.s32.f32 %v1680_v47 }
 0x3a9   :  { %5141 = vmatprep.subr.bf16.mxu0 %v4458_v20  ;;  %v1682_v8 = vunpack.c.2.s8 %v930_v39  ;;  %v3755_v48 = vmul.f32 %v11535_v14, %v2689_v18  ;;  %v3763_v43 = vmul.f32 %v11535_v14, %v2697_v27  ;;  %v1690_v1 = vunpack.c.3.s8 %v930_v39  ;;  %v937_v20 = vld [vmem:[#allocation9 + $0x570] sm:$0xff] }
 0x3aa   :  { %v2712_v63 = vcvt.s32.f32 %v1688_v19  ;;  %5313 = vmatprep.subr.bf16.mxu1 %v4460_v24  ;;  %v4457_v17 = vpack.c.bf16 %v3761_v26, %v3753_v52  ;;  %v3770_v4 = vmul.f32 %v13839_v12, %v2704_v42  ;;  %v1679_v51 = vunpack.c.2.s8 %v927_v33 }
 0x3ab   :  { %v2706_v41 = vcvt.s32.f32 %v1682_v8  ;;  %v4459_v6 = vpack.c.bf16 %v3763_v43, %v3755_v48  ;;  %v2714_v45 = vcvt.s32.f32 %v1690_v1  ;;  %v1687_v29 = vunpack.c.3.s8 %v927_v33 }
 0x3ac   :  { %v3778_v46 = vmul.f32 %v13839_v12, %v2712_v63  ;;  %5142 = vmatpush1.bf16.msra.mxu0 %v4457_v17  ;;  %v2703_v58 = vcvt.s32.f32 %v1679_v51  ;;  %v1681_v40 = vunpack.c.2.s8 %v929_v10  ;;  %v1689_v0 = vunpack.c.3.s8 %v929_v10 }
 0x3ad   :  { %v3772_v38 = vmul.f32 %v11550_v15, %v2706_v41  ;;  %5314 = vmatpush1.bf16.msra.mxu1 %v4459_v6  ;;  %v3780_v61 = vmul.f32 %v11550_v15, %v2714_v45  ;;  %v2711_v32 = vcvt.s32.f32 %v1687_v29  ;;  %v1696_v5 = vunpack.c.0.s8 %v936_v53 }
 0x3ae   :  { %v4466_v39 = vpack.c.bf16 %v3778_v46, %v3770_v4  ;;  %v3769_v62 = vmul.f32 %v13840_v2, %v2703_v58  ;;  %v2705_v16 = vcvt.s32.f32 %v1681_v40  ;;  %v2713_v50 = vcvt.s32.f32 %v1689_v0 }
 0x3af   :  { %v1704_v49 = vunpack.c.1.s8 %v936_v53  ;;  %v4468_v33 = vpack.c.bf16 %v3780_v61, %v3772_v38  ;;  %v3777_v11 = vmul.f32 %v13840_v2, %v2711_v32  ;;  %v2720_v9 = vcvt.s32.f32 %v1696_v5 }
 0x3b0   :  { %5143 = vmatprep.subr.bf16.mxu0 %v4466_v39  ;;  %v1698_v13 = vunpack.c.0.s8 %v938_v3  ;;  %v3771_v10 = vmul.f32 %v11535_v14, %v2705_v16  ;;  %v3779_v44 = vmul.f32 %v11535_v14, %v2713_v50  ;;  %v1706_v35 = vunpack.c.1.s8 %v938_v3  ;;  %v944_v16 = vld [vmem:[#allocation9 + $0x5a8] sm:$0xff] }
 0x3b1   :  { %v2728_v23 = vcvt.s32.f32 %v1704_v49  ;;  %5315 = vmatprep.subr.bf16.mxu1 %v4468_v33  ;;  %v4465_v21 = vpack.c.bf16 %v3777_v11, %v3769_v62  ;;  %v3786_v60 = vmul.f32 %v13839_v12, %v2720_v9  ;;  %v1695_v52 = vunpack.c.0.s8 %v935_v31 }
 0x3b2   :  { %v2722_v47 = vcvt.s32.f32 %v1698_v13  ;;  %v4467_v18 = vpack.c.bf16 %v3779_v44, %v3771_v10  ;;  %v2730_v19 = vcvt.s32.f32 %v1706_v35  ;;  %v1703_v24 = vunpack.c.1.s8 %v935_v31  ;;  %v946_v44 = vld [vmem:[#allocation9 + $0x5b8] sm:$0xff] }
 0x3b3   :  { %v3794_v27 = vmul.f32 %v13839_v12, %v2728_v23  ;;  %5144 = vmatpush1.bf16.msra.mxu0 %v4465_v21  ;;  %v2719_v42 = vcvt.s32.f32 %v1695_v52  ;;  %v1697_v8 = vunpack.c.0.s8 %v937_v20  ;;  %v1705_v48 = vunpack.c.1.s8 %v937_v20 }
 0x3b4   :  { %v3788_v26 = vmul.f32 %v11550_v15, %v2722_v47  ;;  %5316 = vmatpush1.bf16.msra.mxu1 %v4467_v18  ;;  %v3796_v63 = vmul.f32 %v11550_v15, %v2730_v19  ;;  %v2727_v1 = vcvt.s32.f32 %v1703_v24  ;;  %v1712_v17 = vunpack.c.2.s8 %v936_v53 }
 0x3b5   :  { %v4474_v43 = vpack.c.bf16 %v3794_v27, %v3786_v60  ;;  %v3785_v4 = vmul.f32 %v13840_v2, %v2719_v42  ;;  %v2721_v41 = vcvt.s32.f32 %v1697_v8  ;;  %v2729_v51 = vcvt.s32.f32 %v1705_v48  ;;  %v943_v27 = vld [vmem:[#allocation9 + $0x5a0] sm:$0xff] }
 0x3b6   :  { %v1720_v6 = vunpack.c.3.s8 %v936_v53  ;;  %v4476_v46 = vpack.c.bf16 %v3796_v63, %v3788_v26  ;;  %v3793_v45 = vmul.f32 %v13840_v2, %v2727_v1  ;;  %v2736_v29 = vcvt.s32.f32 %v1712_v17 }
 0x3b7   :  { %5145 = vmatprep.subr.bf16.mxu0 %v4474_v43  ;;  %v1714_v38 = vunpack.c.2.s8 %v938_v3  ;;  %v3787_v58 = vmul.f32 %v11535_v14, %v2721_v41  ;;  %v3795_v40 = vmul.f32 %v11535_v14, %v2729_v51  ;;  %v1722_v39 = vunpack.c.3.s8 %v938_v3  ;;  %v945_v43 = vld [vmem:[#allocation9 + $0x5b0] sm:$0xff] }
 0x3b8   :  { %v2744_v0 = vcvt.s32.f32 %v1720_v6  ;;  %5317 = vmatprep.subr.bf16.mxu1 %v4476_v46  ;;  %v4473_v61 = vpack.c.bf16 %v3793_v45, %v3785_v4  ;;  %v3802_v32 = vmul.f32 %v13839_v12, %v2736_v29  ;;  %v1711_v62 = vunpack.c.2.s8 %v935_v31 }
 0x3b9   :  { %v2738_v5 = vcvt.s32.f32 %v1714_v38  ;;  %v4475_v53 = vpack.c.bf16 %v3795_v40, %v3787_v58  ;;  %v2746_v49 = vcvt.s32.f32 %v1722_v39  ;;  %v1719_v33 = vunpack.c.3.s8 %v935_v31 }
 0x3ba   :  { %v3810_v50 = vmul.f32 %v13839_v12, %v2744_v0  ;;  %5146 = vmatpush1.bf16.msra.mxu0 %v4473_v61  ;;  %v2735_v9 = vcvt.s32.f32 %v1711_v62  ;;  %v1713_v13 = vunpack.c.2.s8 %v937_v20  ;;  %v1721_v10 = vunpack.c.3.s8 %v937_v20 }
 0x3bb   :  { %v3804_v11 = vmul.f32 %v11550_v15, %v2738_v5  ;;  %5318 = vmatpush1.bf16.msra.mxu1 %v4475_v53  ;;  %v3812_v23 = vmul.f32 %v11550_v15, %v2746_v49  ;;  %v2743_v35 = vcvt.s32.f32 %v1719_v33  ;;  %v1728_v21 = vunpack.c.0.s8 %v944_v16 }
 0x3bc   :  { %v4482_v3 = vpack.c.bf16 %v3810_v50, %v3802_v32  ;;  %v3801_v60 = vmul.f32 %v13840_v2, %v2735_v9  ;;  %v2737_v47 = vcvt.s32.f32 %v1713_v13  ;;  %v2745_v52 = vcvt.s32.f32 %v1721_v10 }
 0x3bd   :  { %v1736_v18 = vunpack.c.1.s8 %v944_v16  ;;  %v4484_v31 = vpack.c.bf16 %v3812_v23, %v3804_v11  ;;  %v3809_v19 = vmul.f32 %v13840_v2, %v2743_v35  ;;  %v2752_v24 = vcvt.s32.f32 %v1728_v21 }
 0x3be   :  { %5147 = vmatprep.subr.bf16.mxu0 %v4482_v3  ;;  %v1730_v26 = vunpack.c.0.s8 %v946_v44  ;;  %v3803_v20 = vmul.f32 %v11535_v14, %v2737_v47  ;;  %v3811_v42 = vmul.f32 %v11535_v14, %v2745_v52  ;;  %v1738_v48 = vunpack.c.1.s8 %v946_v44  ;;  %v952_v47 = vld [vmem:[#allocation9 + $0x5e8] sm:$0xff] }
 0x3bf   :  { %v2760_v8 = vcvt.s32.f32 %v1736_v18  ;;  %5319 = vmatprep.subr.bf16.mxu1 %v4484_v31  ;;  %v4481_v63 = vpack.c.bf16 %v3809_v19, %v3801_v60  ;;  %v3818_v1 = vmul.f32 %v13839_v12, %v2752_v24  ;;  %v1727_v4 = vunpack.c.0.s8 %v943_v27 }
 0x3c0   :  { %v2754_v17 = vcvt.s32.f32 %v1730_v26  ;;  %v4483_v41 = vpack.c.bf16 %v3811_v42, %v3803_v20  ;;  %v2762_v6 = vcvt.s32.f32 %v1738_v48  ;;  %v1735_v46 = vunpack.c.1.s8 %v943_v27  ;;  %v954_v42 = vld [vmem:[#allocation9 + $0x5f8] sm:$0xff] }
 0x3c1   :  { %v3826_v51 = vmul.f32 %v13839_v12, %v2760_v8  ;;  %5148 = vmatpush1.bf16.msra.mxu0 %v4481_v63  ;;  %v2751_v29 = vcvt.s32.f32 %v1727_v4  ;;  %v1729_v38 = vunpack.c.0.s8 %v945_v43  ;;  %v1737_v58 = vunpack.c.1.s8 %v945_v43 }
 0x3c2   :  { %v3820_v45 = vmul.f32 %v11550_v15, %v2754_v17  ;;  %5320 = vmatpush1.bf16.msra.mxu1 %v4483_v41  ;;  %v3828_v0 = vmul.f32 %v11550_v15, %v2762_v6  ;;  %v2759_v39 = vcvt.s32.f32 %v1735_v46  ;;  %v1744_v61 = vunpack.c.2.s8 %v944_v16 }
 0x3c3   :  { %v4490_v40 = vpack.c.bf16 %v3826_v51, %v3818_v1  ;;  %v3817_v32 = vmul.f32 %v13840_v2, %v2751_v29  ;;  %v2753_v5 = vcvt.s32.f32 %v1729_v38  ;;  %v2761_v62 = vcvt.s32.f32 %v1737_v58  ;;  %v951_v51 = vld [vmem:[#allocation9 + $0x5e0] sm:$0xff] }
 0x3c4   :  { %v1752_v53 = vunpack.c.3.s8 %v944_v16  ;;  %v4492_v50 = vpack.c.bf16 %v3828_v0, %v3820_v45  ;;  %v3825_v49 = vmul.f32 %v13840_v2, %v2759_v39  ;;  %v2768_v33 = vcvt.s32.f32 %v1744_v61 }
 0x3c5   :  { %5149 = vmatprep.subr.bf16.mxu0 %v4490_v40  ;;  %v1746_v11 = vunpack.c.2.s8 %v946_v44  ;;  %v3819_v9 = vmul.f32 %v11535_v14, %v2753_v5  ;;  %v3827_v13 = vmul.f32 %v11535_v14, %v2761_v62  ;;  %v1754_v3 = vunpack.c.3.s8 %v946_v44  ;;  %v953_v40 = vld [vmem:[#allocation9 + $0x5f0] sm:$0xff] }
 0x3c6   :  { %v2776_v10 = vcvt.s32.f32 %v1752_v53  ;;  %5321 = vmatprep.subr.bf16.mxu1 %v4492_v50  ;;  %v4489_v23 = vpack.c.bf16 %v3825_v49, %v3817_v32  ;;  %v3834_v35 = vmul.f32 %v13839_v12, %v2768_v33  ;;  %v1743_v60 = vunpack.c.2.s8 %v943_v27 }
 0x3c7   :  { %v2770_v21 = vcvt.s32.f32 %v1746_v11  ;;  %v4491_v16 = vpack.c.bf16 %v3827_v13, %v3819_v9  ;;  %v2778_v18 = vcvt.s32.f32 %v1754_v3  ;;  %v1751_v31 = vunpack.c.3.s8 %v943_v27 }
 0x3c8   :  { %v3842_v52 = vmul.f32 %v13839_v12, %v2776_v10  ;;  %5150 = vmatpush1.bf16.msra.mxu0 %v4489_v23  ;;  %v2767_v24 = vcvt.s32.f32 %v1743_v60  ;;  %v1745_v26 = vunpack.c.2.s8 %v945_v43  ;;  %v1753_v20 = vunpack.c.3.s8 %v945_v43 }
 0x3c9   :  { %v3836_v19 = vmul.f32 %v11550_v15, %v2770_v21  ;;  %5322 = vmatpush1.bf16.msra.mxu1 %v4491_v16  ;;  %v3844_v8 = vmul.f32 %v11550_v15, %v2778_v18  ;;  %v2775_v48 = vcvt.s32.f32 %v1751_v31  ;;  %v1760_v63 = vunpack.c.0.s8 %v952_v47 }
 0x3ca   :  { %v4498_v44 = vpack.c.bf16 %v3842_v52, %v3834_v35  ;;  %v3833_v1 = vmul.f32 %v13840_v2, %v2767_v24  ;;  %v2769_v17 = vcvt.s32.f32 %v1745_v26  ;;  %v2777_v4 = vcvt.s32.f32 %v1753_v20 }
 0x3cb   :  { %v1768_v41 = vunpack.c.1.s8 %v952_v47  ;;  %v4500_v27 = vpack.c.bf16 %v3844_v8, %v3836_v19  ;;  %v3841_v6 = vmul.f32 %v13840_v2, %v2775_v48  ;;  %v2784_v46 = vcvt.s32.f32 %v1760_v63 }
 0x3cc   :  { %5151 = vmatprep.subr.bf16.mxu0 %v4498_v44  ;;  %v1762_v45 = vunpack.c.0.s8 %v954_v42  ;;  %v3835_v43 = vmul.f32 %v11535_v14, %v2769_v17  ;;  %v3843_v29 = vmul.f32 %v11535_v14, %v2777_v4  ;;  %v1770_v58 = vunpack.c.1.s8 %v954_v42  ;;  %v12092_v17 = vld [vmem:[#allocation9 + $0x628] sm:$0xff] }
 0x3cd   :  { %v2792_v38 = vcvt.s32.f32 %v1768_v41  ;;  %5323 = vmatprep.subr.bf16.mxu1 %v4500_v27  ;;  %v4497_v0 = vpack.c.bf16 %v3841_v6, %v3833_v1  ;;  %v3850_v39 = vmul.f32 %v13839_v12, %v2784_v46  ;;  %v1759_v32 = vunpack.c.0.s8 %v951_v51 }
 0x3ce   :  { %v2786_v61 = vcvt.s32.f32 %v1762_v45  ;;  %v4499_v5 = vpack.c.bf16 %v3843_v29, %v3835_v43  ;;  %v2794_v53 = vcvt.s32.f32 %v1770_v58  ;;  %v1767_v50 = vunpack.c.1.s8 %v951_v51 }
 0x3cf   :  { %v3858_v62 = vmul.f32 %v13839_v12, %v2792_v38  ;;  %5152 = vmatpush1.bf16.msra.mxu0 %v4497_v0  ;;  %v2783_v33 = vcvt.s32.f32 %v1759_v32  ;;  %v1761_v11 = vunpack.c.0.s8 %v953_v40  ;;  %v1769_v9 = vunpack.c.1.s8 %v953_v40 }
 0x3d0   :  { %v3852_v49 = vmul.f32 %v11550_v15, %v2786_v61  ;;  %5324 = vmatpush1.bf16.msra.mxu1 %v4499_v5  ;;  %v3860_v10 = vmul.f32 %v11550_v15, %v2794_v53  ;;  %v2791_v3 = vcvt.s32.f32 %v1767_v50  ;;  %v1776_v23 = vunpack.c.2.s8 %v952_v47  ;;  %v12102_v5 = vld [vmem:[#allocation9 + $0x620] sm:$0xff] }
 0x3d1   :  { %v4506_v13 = vpack.c.bf16 %v3858_v62, %v3850_v39  ;;  %v3849_v35 = vmul.f32 %v13840_v2, %v2783_v33  ;;  %v2785_v21 = vcvt.s32.f32 %v1761_v11  ;;  %v2793_v60 = vcvt.s32.f32 %v1769_v9 }
 0x3d2   :  { %v1784_v16 = vunpack.c.3.s8 %v952_v47  ;;  %v4508_v52 = vpack.c.bf16 %v3860_v10, %v3852_v49  ;;  %v3857_v18 = vmul.f32 %v13840_v2, %v2791_v3  ;;  %v2800_v31 = vcvt.s32.f32 %v1776_v23 }
 0x3d3   :  { %5153 = vmatprep.subr.bf16.mxu0 %v4506_v13  ;;  %v1778_v19 = vunpack.c.2.s8 %v954_v42  ;;  %v3851_v24 = vmul.f32 %v11535_v14, %v2785_v21  ;;  %v3859_v26 = vmul.f32 %v11535_v14, %v2793_v60  ;;  %v1786_v44 = vunpack.c.3.s8 %v954_v42  ;;  %v12096_v42 = vld [vmem:[#allocation9 + $0x638] sm:$0xff]  ;;  %v961_v13 = vld [vmem:[#allocation9 + $0x630] sm:$0xff] }
 0x3d4   :  { %v2808_v20 = vcvt.s32.f32 %v1784_v16  ;;  %5325 = vmatprep.subr.bf16.mxu1 %v4508_v52  ;;  %v4505_v8 = vpack.c.bf16 %v3857_v18, %v3849_v35  ;;  %v3866_v48 = vmul.f32 %v13839_v12, %v2800_v31  ;;  %v1775_v1 = vunpack.c.2.s8 %v951_v51 }
 0x3d5   :  { %v2802_v63 = vcvt.s32.f32 %v1778_v19  ;;  %v4507_v47 = vpack.c.bf16 %v3859_v26, %v3851_v24  ;;  %v2810_v41 = vcvt.s32.f32 %v1786_v44  ;;  %v1783_v27 = vunpack.c.3.s8 %v951_v51 }
 0x3d6   :  { %v3874_v4 = vmul.f32 %v13839_v12, %v2808_v20  ;;  %5154 = vmatpush1.bf16.msra.mxu0 %v4505_v8  ;;  %v2799_v46 = vcvt.s32.f32 %v1775_v1  ;;  %v1777_v45 = vunpack.c.2.s8 %v953_v40  ;;  %v1785_v43 = vunpack.c.3.s8 %v953_v40 }
 0x3d7   :  { %v3868_v6 = vmul.f32 %v11550_v15, %v2802_v63  ;;  %5326 = vmatpush1.bf16.msra.mxu1 %v4507_v47  ;;  %v3876_v38 = vmul.f32 %v11550_v15, %v2810_v41  ;;  %v2807_v58 = vcvt.s32.f32 %v1783_v27  ;;  %v1792_v0 = vunpack.c.0.s8 %v12092_v17 }
 0x3d8   :  { %v4514_v29 = vpack.c.bf16 %v3874_v4, %v3866_v48  ;;  %v3865_v39 = vmul.f32 %v13840_v2, %v2799_v46  ;;  %v2801_v61 = vcvt.s32.f32 %v1777_v45  ;;  %v2809_v32 = vcvt.s32.f32 %v1785_v43 }
 0x3d9   :  { %v1800_v51 = vunpack.c.1.s8 %v12092_v17  ;;  %v4516_v62 = vpack.c.bf16 %v3876_v38, %v3868_v6  ;;  %v3873_v40 = vmul.f32 %v13840_v2, %v2807_v58  ;;  %v2816_v53 = vcvt.s32.f32 %v1792_v0 }
 0x3da   :  { %5155 = vmatprep.subr.bf16.mxu0 %v4514_v29  ;;  %v1794_v50 = vunpack.c.0.s8 %v12096_v42  ;;  %v3867_v49 = vmul.f32 %v11535_v14, %v2801_v61  ;;  %v3875_v33 = vmul.f32 %v11535_v14, %v2809_v32  ;;  %v1802_v9 = vunpack.c.1.s8 %v12096_v42 }
 0x3db   :  { %v2824_v11 = vcvt.s32.f32 %v1800_v51  ;;  %5327 = vmatprep.subr.bf16.mxu1 %v4516_v62  ;;  %v4513_v10 = vpack.c.bf16 %v3873_v40, %v3865_v39  ;;  %v3882_v3 = vmul.f32 %v13839_v12, %v2816_v53  ;;  %v1791_v35 = vunpack.c.0.s8 %v12102_v5  ;;  %v968_v39 = vld [vmem:[#allocation9 + $0x668] sm:$0xff] }
 0x3dc   :  { %v2818_v23 = vcvt.s32.f32 %v1794_v50  ;;  %v4515_v21 = vpack.c.bf16 %v3875_v33, %v3867_v49  ;;  %v2826_v16 = vcvt.s32.f32 %v1802_v9  ;;  %v1799_v52 = vunpack.c.1.s8 %v12102_v5  ;;  %v970_v50 = vld [vmem:[#allocation9 + $0x678] sm:$0xff] }
 0x3dd   :  { %v3890_v60 = vmul.f32 %v13839_v12, %v2824_v11  ;;  %5156 = vmatpush1.bf16.msra.mxu0 %v4513_v10  ;;  %v2815_v31 = vcvt.s32.f32 %v1791_v35  ;;  %v1793_v19 = vunpack.c.0.s8 %v961_v13  ;;  %v1801_v24 = vunpack.c.1.s8 %v961_v13  ;;  %v967_v35 = vld [vmem:[#allocation9 + $0x660] sm:$0xff] }
 0x3de   :  { %v3884_v18 = vmul.f32 %v11550_v15, %v2818_v23  ;;  %5328 = vmatpush1.bf16.msra.mxu1 %v4515_v21  ;;  %v3892_v20 = vmul.f32 %v11550_v15, %v2826_v16  ;;  %v2823_v44 = vcvt.s32.f32 %v1799_v52  ;;  %v1808_v8 = vunpack.c.2.s8 %v12092_v17 }
 0x3df   :  { %v4522_v26 = vpack.c.bf16 %v3890_v60, %v3882_v3  ;;  %v3881_v48 = vmul.f32 %v13840_v2, %v2815_v31  ;;  %v2817_v63 = vcvt.s32.f32 %v1793_v19  ;;  %v2825_v1 = vcvt.s32.f32 %v1801_v24  ;;  %v969_v19 = vld [vmem:[#allocation9 + $0x670] sm:$0xff] }
 0x3e0   :  { %v1816_v47 = vunpack.c.3.s8 %v12092_v17  ;;  %5158 = vmatmul.mubr.bf16.vlgmr.msra.gmra.mrb[12].mxu0 %v11220_v28  ;;  %v4524_v4 = vpack.c.bf16 %v3892_v20, %v3884_v18  ;;  %v3889_v41 = vmul.f32 %v13840_v2, %v2823_v44  ;;  %v2832_v27 = vcvt.s32.f32 %v1808_v8 }
 0x3e1   :  { %5168 = vmatprep.subr.bf16.mxu0 %v4522_v26  ;;  %v1810_v6 = vunpack.c.2.s8 %v12096_v42  ;;  %5330 = vmatmul.mubr.bf16.vlgmr.msra.gmra.mrb[12].mxu1 %v11220_v28  ;;  %v3883_v46 = vmul.f32 %v11535_v14, %v2817_v63  ;;  %v3891_v45 = vmul.f32 %v11535_v14, %v2825_v1  ;;  %v1818_v17 = vunpack.c.3.s8 %v12096_v42 }
 0x3e2   :  { %5200 = vmatprep.mubr.bf16.mxu0 %v11566_v30  ;;  %v2840_v43 = vcvt.s32.f32 %v1816_v47  ;;  %5340 = vmatprep.subr.bf16.mxu1 %v4524_v4  ;;  %v4521_v29 = vpack.c.bf16 %v3889_v41, %v3881_v48  ;;  %v3898_v38 = vmul.f32 %v13839_v12, %v2832_v27  ;;  %v1807_v0 = vunpack.c.2.s8 %v12102_v5 }
 0x3e3   :  { %5372 = vmatprep.mubr.bf16.mxu1 %v11566_v30  ;;  %v2834_v58 = vcvt.s32.f32 %v1810_v6  ;;  %v4523_v28 = vpack.c.bf16 %v3891_v45, %v3883_v46  ;;  %v2842_v32 = vcvt.s32.f32 %v1818_v17  ;;  %v1815_v51 = vunpack.c.3.s8 %v12102_v5 }
 0x3e4   :  { %v3906_v61 = vmul.f32 %v13839_v12, %v2840_v43  ;;  %5169 = vmatpush1.bf16.msra.mxu0 %v4521_v29  ;;  %v2831_v42 = vcvt.s32.f32 %v1807_v0  ;;  %v1809_v40 = vunpack.c.2.s8 %v961_v13  ;;  %v1817_v53 = vunpack.c.3.s8 %v961_v13 }
 0x3e5   :  { %v3900_v62 = vmul.f32 %v11550_v15, %v2834_v58  ;;  %5341 = vmatpush1.bf16.msra.mxu1 %v4523_v28  ;;  %v3908_v49 = vmul.f32 %v11550_v15, %v2842_v32  ;;  %v2839_v33 = vcvt.s32.f32 %v1815_v51  ;;  %v1824_v11 = vunpack.c.0.s8 %v968_v39 }
 0x3e6   :  { %v4530_v30 = vpack.c.bf16 %v3906_v61, %v3898_v38  ;;  %v3897_v9 = vmul.f32 %v13840_v2, %v2831_v42  ;;  %v2833_v10 = vcvt.s32.f32 %v1809_v40  ;;  %v2841_v3 = vcvt.s32.f32 %v1817_v53 }
 0x3e7   :  { %v1832_v23 = vunpack.c.1.s8 %v968_v39  ;;  %v4532_v5 = vpack.c.bf16 %v3908_v49, %v3900_v62  ;;  %v3905_v21 = vmul.f32 %v13840_v2, %v2839_v33  ;;  %v2848_v60 = vcvt.s32.f32 %v1824_v11  ;;  %v12146_v11 = vld [vmem:[#allocation9 + $0x6a8] sm:$0xff] }
 0x3e8   :  { %5170 = vmatprep.subr.bf16.mxu0 %v4530_v30  ;;  %v1826_v16 = vunpack.c.0.s8 %v970_v50  ;;  %v3899_v13 = vmul.f32 %v11535_v14, %v2833_v10  ;;  %v3907_v52 = vmul.f32 %v11535_v14, %v2841_v3  ;;  %v1834_v31 = vunpack.c.1.s8 %v970_v50 }
 0x3e9   :  { %v2856_v18 = vcvt.s32.f32 %v1832_v23  ;;  %5342 = vmatprep.subr.bf16.mxu1 %v4532_v5  ;;  %v4529_v24 = vpack.c.bf16 %v3905_v21, %v3897_v9  ;;  %v3914_v26 = vmul.f32 %v13839_v12, %v2848_v60  ;;  %v1823_v44 = vunpack.c.0.s8 %v967_v35 }
 0x3ea   :  { %v2850_v20 = vcvt.s32.f32 %v1826_v16  ;;  %v4531_v8 = vpack.c.bf16 %v3907_v52, %v3899_v13  ;;  %v2858_v63 = vcvt.s32.f32 %v1834_v31  ;;  %v1831_v1 = vunpack.c.1.s8 %v967_v35 }
 0x3eb   :  { %v3922_v48 = vmul.f32 %v13839_v12, %v2856_v18  ;;  %5171 = vmatpush1.bf16.msra.mxu0 %v4529_v24  ;;  %v2847_v4 = vcvt.s32.f32 %v1823_v44  ;;  %v1825_v41 = vunpack.c.0.s8 %v969_v19  ;;  %v1833_v27 = vunpack.c.1.s8 %v969_v19 }
 0x3ec   :  { %v3916_v47 = vmul.f32 %v11550_v15, %v2850_v20  ;;  %5343 = vmatpush1.bf16.msra.mxu1 %v4531_v8  ;;  %v3924_v46 = vmul.f32 %v11550_v15, %v2858_v63  ;;  %v2855_v45 = vcvt.s32.f32 %v1831_v1  ;;  %v1840_v43 = vunpack.c.2.s8 %v968_v39  ;;  %v12156_v20 = vld [vmem:[#allocation9 + $0x6a0] sm:$0xff] }
 0x3ed   :  { %v4538_v6 = vpack.c.bf16 %v3922_v48, %v3914_v26  ;;  %v3913_v17 = vmul.f32 %v13840_v2, %v2847_v4  ;;  %v2849_v29 = vcvt.s32.f32 %v1825_v41  ;;  %v2857_v38 = vcvt.s32.f32 %v1833_v27  ;;  %v12163_v41 = vld [vmem:[#allocation9 + $0x6b0] sm:$0xff] }
 0x3ee   :  { %v1848_v58 = vunpack.c.3.s8 %v968_v39  ;;  %v4540_v0 = vpack.c.bf16 %v3924_v46, %v3916_v47  ;;  %v3921_v28 = vmul.f32 %v13840_v2, %v2855_v45  ;;  %v2864_v61 = vcvt.s32.f32 %v1840_v43  ;;  %v4653_v43 = vld [vmem:[#allocation11] sm:$0xff] }
 0x3ef   :  { %5172 = vmatprep.subr.bf16.mxu0 %v4538_v6  ;;  %v1842_v32 = vunpack.c.2.s8 %v970_v50  ;;  %v3915_v51 = vmul.f32 %v11535_v14, %v2849_v29  ;;  %v3923_v62 = vmul.f32 %v11535_v14, %v2857_v38  ;;  %v1850_v40 = vunpack.c.3.s8 %v970_v50  ;;  %v12150_v50 = vld [vmem:[#allocation9 + $0x6b8] sm:$0xff] }
 0x3f0   :  { %v2872_v42 = vcvt.s32.f32 %v1848_v58  ;;  %5344 = vmatprep.subr.bf16.mxu1 %v4540_v0  ;;  %v4537_v53 = vpack.c.bf16 %v3921_v28, %v3913_v17  ;;  %v3930_v30 = vmul.f32 %v13839_v12, %v2864_v61  ;;  %v1839_v33 = vunpack.c.2.s8 %v967_v35 }
 0x3f1   :  { %v2866_v49 = vcvt.s32.f32 %v1842_v32  ;;  %v4539_v39 = vpack.c.bf16 %v3923_v62, %v3915_v51  ;;  %v2874_v10 = vcvt.s32.f32 %v1850_v40  ;;  %v1847_v3 = vunpack.c.3.s8 %v967_v35  ;;  %v13845_v40 = vld [vmem:[#allocation27_spill] sm:$0xff] }
 0x3f2   :  { %v3938_v9 = vmul.f32 %v13839_v12, %v2872_v42  ;;  %5173 = vmatpush1.bf16.msra.mxu0 %v4537_v53  ;;  %v2863_v5 = vcvt.s32.f32 %v1839_v33  ;;  %v1841_v21 = vunpack.c.2.s8 %v969_v19  ;;  %v1849_v60 = vunpack.c.3.s8 %v969_v19 }
 0x3f3   :  { %v3932_v23 = vmul.f32 %v11550_v15, %v2866_v49  ;;  %5345 = vmatpush1.bf16.msra.mxu1 %v4539_v39  ;;  %v3940_v13 = vmul.f32 %v11550_v15, %v2874_v10  ;;  %v2871_v52 = vcvt.s32.f32 %v1847_v3  ;;  %v1856_v18 = vunpack.c.0.s8 %v12146_v11  ;;  %v13846_v39 = vld [vmem:[#allocation28_spill] sm:$0xff] }
 0x3f4   :  { %v4546_v16 = vpack.c.bf16 %v3938_v9, %v3930_v30  ;;  %v3929_v31 = vmul.f32 %v13840_v2, %v2863_v5  ;;  %v2865_v24 = vcvt.s32.f32 %v1841_v21  ;;  %v2873_v26 = vcvt.s32.f32 %v1849_v60  ;;  %v13847_v5 = vld [vmem:[#allocation25_spill] sm:$0xff] }
 0x3f5   :  { %v1864_v35 = vunpack.c.1.s8 %v12146_v11  ;;  %v4548_v44 = vpack.c.bf16 %v3940_v13, %v3932_v23  ;;  %v3937_v19 = vmul.f32 %v13840_v2, %v2871_v52  ;;  %v2880_v8 = vcvt.s32.f32 %v1856_v18  ;;  %v13848_v52 = vld [vmem:[#allocation26_spill] sm:$0xff] }
 0x3f6   :  { %5174 = vmatprep.subr.bf16.mxu0 %v4546_v16  ;;  %v1858_v48 = vunpack.c.0.s8 %v12150_v50  ;;  %v3931_v63 = vmul.f32 %v11535_v14, %v2865_v24  ;;  %v3939_v1 = vmul.f32 %v11535_v14, %v2873_v26  ;;  %v1866_v4 = vunpack.c.1.s8 %v12150_v50 }
 0x3f7   :  { %v2888_v47 = vcvt.s32.f32 %v1864_v35  ;;  %5346 = vmatprep.subr.bf16.mxu1 %v4548_v44  ;;  %v4545_v27 = vpack.c.bf16 %v3937_v19, %v3929_v31  ;;  %v3946_v6 = vmul.f32 %v13839_v12, %v2880_v8  ;;  %v1855_v45 = vunpack.c.0.s8 %v12156_v20 }
 0x3f8   :  { %v2882_v46 = vcvt.s32.f32 %v1858_v48  ;;  %v4547_v17 = vpack.c.bf16 %v3939_v1, %v3931_v63  ;;  %v2890_v38 = vcvt.s32.f32 %v1866_v4  ;;  %v1863_v58 = vunpack.c.1.s8 %v12156_v20 }
 0x3f9   :  { %v3954_v29 = vmul.f32 %v13839_v12, %v2888_v47  ;;  %5175 = vmatpush1.bf16.msra.mxu0 %v4545_v27  ;;  %v2879_v28 = vcvt.s32.f32 %v1855_v45  ;;  %v1857_v61 = vunpack.c.0.s8 %v12163_v41  ;;  %v1865_v32 = vunpack.c.1.s8 %v12163_v41 }
 0x3fa   :  { %v3948_v0 = vmul.f32 %v11550_v15, %v2882_v46  ;;  %5347 = vmatpush1.bf16.msra.mxu1 %v4547_v17  ;;  %v3956_v62 = vmul.f32 %v11550_v15, %v2890_v38  ;;  %v2887_v42 = vcvt.s32.f32 %v1863_v58  ;;  %v4658_v53 = vrot.slane %v4653_v43, %v13845_v40 }
 0x3fb   :  { %v4554_v51 = vpack.c.bf16 %v3954_v29, %v3946_v6  ;;  %v3945_v30 = vmul.f32 %v13840_v2, %v2879_v28  ;;  %v2881_v49 = vcvt.s32.f32 %v1857_v61  ;;  %v2889_v33 = vcvt.s32.f32 %v1865_v32 }
 0x3fc   :  { %v4666_v9 = vrot.slane %v4653_v43, %v13846_v39  ;;  %v4556_v10 = vpack.c.bf16 %v3956_v62, %v3948_v0  ;;  %v3953_v3 = vmul.f32 %v13840_v2, %v2887_v42  ;;  %v8232_v23 = vadd.f32 %v11959_v54, %v4658_v53 }
 0x3fd   :  { %5176 = vmatprep.subr.bf16.mxu0 %v4554_v51  ;;  %v4662_v21 = vrot.slane %v4653_v43, %v13847_v5  ;;  %v3947_v60 = vmul.f32 %v11535_v14, %v2881_v49  ;;  %v3955_v16 = vmul.f32 %v11535_v14, %v2889_v33  ;;  %v4670_v18 = vrot.slane %v4653_v43, %v13848_v52  ;;  %v12202_v51 = vld [vmem:[#allocation9 + $0x6f8] sm:$0xff] }
 0x3fe   :  { %v8236_v13 = vadd.f32 %v11961_v57, %v4666_v9  ;;  %5348 = vmatprep.subr.bf16.mxu1 %v4556_v10  ;;  %v4553_v31 = vpack.c.bf16 %v3953_v3, %v3945_v30  ;;  %v5383_v24 = vmax.f32 %v8232_v23, 0.0  ;;  %v1872_v35 = vunpack.c.2.s8 %v12146_v11 }
 0x3ff   :  { %v8233_v26 = vadd.f32 %v11966_v59, %v4662_v21  ;;  %v4555_v44 = vpack.c.bf16 %v3955_v16, %v3947_v60  ;;  %v8237_v54 = vadd.f32 %v11968_v36, %v4670_v18  ;;  %v1880_v8 = vunpack.c.3.s8 %v12146_v11  ;;  %v983_v16 = vld [vmem:[#allocation9 + $0x6e0] sm:$0xff] }
 0x400   :  { %v5385_v19 = vmax.f32 %v8236_v13, 0.0  ;;  %5177 = vmatpush1.bf16.msra.mxu0 %v4553_v31  ;;  %v2896_v63 = vcvt.s32.f32 %v1872_v35  ;;  %v1874_v57 = vunpack.c.2.s8 %v12150_v50  ;;  %v1882_v1 = vunpack.c.3.s8 %v12150_v50 }
 0x401   :  { %v5384_v48 = vmax.f32 %v8233_v26, 0.0  ;;  %5349 = vmatpush1.bf16.msra.mxu1 %v4555_v44  ;;  %v5386_v47 = vmax.f32 %v8237_v54, 0.0  ;;  %v2904_v4 = vcvt.s32.f32 %v1880_v8  ;;  %v8234_v59 = vadd.f32 %v11985_v55, %v4658_v53 }
 0x402   :  { %v8238_v27 = vadd.f32 %v11987_v56, %v4666_v9  ;;  %v3962_v6 = vmul.f32 %v13839_v12, %v2896_v63  ;;  %v2898_v46 = vcvt.s32.f32 %v1874_v57  ;;  %v2906_v36 = vcvt.s32.f32 %v1882_v1  ;;  %v984_v56 = vld [vmem:[#allocation9 + $0x6e8] sm:$0xff] }
 0x403   :  { %v1871_v11 = vunpack.c.2.s8 %v12156_v20  ;;  %v3970_v45 = vmul.f32 %v13839_v12, %v2904_v4  ;;  %v5391_v43 = vmax.f32 %v8234_v59, 0.0  ;;  %v1879_v29 = vunpack.c.3.s8 %v12156_v20 }
 0x404   :  { %v5393_v17 = vmax.f32 %v8238_v27, 0.0  ;;  %v3964_v50 = vmul.f32 %v11550_v15, %v2898_v46  ;;  %v3972_v38 = vmul.f32 %v11550_v15, %v2906_v36  ;;  %v1873_v55 = vunpack.c.2.s8 %v12163_v41 }
 0x405   :  { %v2895_v58 = vcvt.s32.f32 %v1871_v11  ;;  %v4562_v0 = vpack.c.bf16 %v3970_v45, %v3962_v6  ;;  %v12198_v28 = vpack.c.bf16 %v5391_v43, %v5383_v24  ;;  %v2903_v32 = vcvt.s32.f32 %v1879_v29 }
 0x406   :  { %v12200_v61 = vpack.c.bf16 %v5393_v17, %v5385_v19  ;;  %v4564_v62 = vpack.c.bf16 %v3972_v38, %v3964_v50  ;;  %v1881_v20 = vunpack.c.3.s8 %v12163_v41  ;;  %v2897_v53 = vcvt.s32.f32 %v1873_v55 }
 0x407   :  { %v3961_v42 = vmul.f32 %v13840_v2, %v2895_v58  ;;  %5178 = vmatprep.subr.bf16.mxu0 %v4562_v0  ;;  %v3969_v30 = vmul.f32 %v13840_v2, %v2903_v32  ;;  %v8235_v49 = vadd.f32 %v12003_v37, %v4662_v21  ;;  %v8239_v33 = vadd.f32 %v12005_v7, %v4670_v18  ;;  %v985_v7 = vld [vmem:[#allocation9 + $0x6f0] sm:$0xff] }
 0x408   :  { %v1888_v9 = vunpack.c.0.s8 %v984_v56  ;;  %5350 = vmatprep.subr.bf16.mxu1 %v4564_v62  ;;  %v2905_v10 = vcvt.s32.f32 %v1881_v20  ;;  %v3963_v3 = vmul.f32 %v11535_v14, %v2897_v53  ;;  %v1896_v23 = vunpack.c.1.s8 %v984_v56 }
 0x409   :  { %v1890_v60 = vunpack.c.0.s8 %v12202_v51  ;;  %v4561_v13 = vpack.c.bf16 %v3969_v30, %v3961_v42  ;;  %v5392_v31 = vmax.f32 %v8235_v49, 0.0  ;;  %v5394_v41 = vmax.f32 %v8239_v33, 0.0  ;;  %v992_v30 = vld [vmem:[#allocation9 + $0x728] sm:$0xff] }
 0x40a   :  { %v2912_v24 = vcvt.s32.f32 %v1888_v9  ;;  %v3971_v26 = vmul.f32 %v11535_v14, %v2905_v10  ;;  %v2920_v35 = vcvt.s32.f32 %v1896_v23  ;;  %v1898_v37 = vunpack.c.1.s8 %v12202_v51 }
 0x40b   :  { %v2914_v21 = vcvt.s32.f32 %v1890_v60  ;;  %5179 = vmatpush1.bf16.msra.mxu0 %v4561_v13  ;;  %v12213_v18 = vpack.c.bf16 %v5392_v31, %v5384_v48  ;;  %v12215_v44 = vpack.c.bf16 %v5394_v41, %v5386_v47  ;;  %v1887_v54 = vunpack.c.0.s8 %v983_v16 }
 0x40c   :  { %v3978_v19 = vmul.f32 %v13839_v12, %v2912_v24  ;;  %v4563_v8 = vpack.c.bf16 %v3971_v26, %v3963_v3  ;;  %v3986_v63 = vmul.f32 %v13839_v12, %v2920_v35  ;;  %v2922_v57 = vcvt.s32.f32 %v1898_v37  ;;  %v12229_v3 = vld [vmem:[#allocation9 + $0x738] sm:$0xff] }
 0x40d   :  { %v3980_v1 = vmul.f32 %v11550_v15, %v2914_v21  ;;  %v1895_v4 = vunpack.c.1.s8 %v983_v16  ;;  %v2911_v59 = vcvt.s32.f32 %v1887_v54  ;;  %v1889_v27 = vunpack.c.0.s8 %v985_v7 }
 0x40e   :  { %v1897_v6 = vunpack.c.1.s8 %v985_v7  ;;  %5351 = vmatpush1.bf16.msra.mxu1 %v4563_v8  ;;  %v4570_v46 = vpack.c.bf16 %v3986_v63, %v3978_v19  ;;  %v3988_v48 = vmul.f32 %v11550_v15, %v2922_v57  ;;  %v1904_v36 = vunpack.c.2.s8 %v984_v56  ;;  %v991_v19 = vld [vmem:[#allocation9 + $0x720] sm:$0xff] }
 0x40f   :  { %v1912_v47 = vunpack.c.3.s8 %v984_v56  ;;  %v2919_v11 = vcvt.s32.f32 %v1895_v4  ;;  %v3977_v45 = vmul.f32 %v13840_v2, %v2911_v59  ;;  %v2913_v43 = vcvt.s32.f32 %v1889_v27  ;;  %v993_v27 = vld [vmem:[#allocation9 + $0x730] sm:$0xff] }
 0x410   :  { %v2921_v17 = vcvt.s32.f32 %v1897_v6  ;;  %5180 = vmatprep.subr.bf16.mxu0 %v4570_v46  ;;  %v4572_v29 = vpack.c.bf16 %v3988_v48, %v3980_v1  ;;  %v2928_v50 = vcvt.s32.f32 %v1904_v36  ;;  %v1906_v58 = vunpack.c.2.s8 %v12202_v51 }
 0x411   :  { %v2936_v38 = vcvt.s32.f32 %v1912_v47  ;;  %v3985_v55 = vmul.f32 %v13840_v2, %v2919_v11  ;;  %v3979_v0 = vmul.f32 %v11535_v14, %v2913_v43  ;;  %v1914_v62 = vunpack.c.3.s8 %v12202_v51 }
 0x412   :  { %v3987_v32 = vmul.f32 %v11535_v14, %v2921_v17  ;;  %5352 = vmatprep.subr.bf16.mxu1 %v4572_v29  ;;  %v3994_v56 = vmul.f32 %v13839_v12, %v2928_v50  ;;  %v2930_v20 = vcvt.s32.f32 %v1906_v58  ;;  %v1903_v53 = vunpack.c.2.s8 %v983_v16 }
 0x413   :  { %v4002_v42 = vmul.f32 %v13839_v12, %v2936_v38  ;;  %v4569_v49 = vpack.c.bf16 %v3985_v55, %v3977_v45  ;;  %v2938_v9 = vcvt.s32.f32 %v1914_v62  ;;  %v1911_v10 = vunpack.c.3.s8 %v983_v16 }
 0x414   :  { %v4571_v33 = vpack.c.bf16 %v3987_v32, %v3979_v0  ;;  %v3996_v60 = vmul.f32 %v11550_v15, %v2930_v20  ;;  %v2927_v13 = vcvt.s32.f32 %v1903_v53  ;;  %v1905_v31 = vunpack.c.2.s8 %v985_v7 }
 0x415   :  { %v4578_v23 = vpack.c.bf16 %v4002_v42, %v3994_v56  ;;  %5181 = vmatpush1.bf16.msra.mxu0 %v4569_v49  ;;  %v4004_v51 = vmul.f32 %v11550_v15, %v2938_v9  ;;  %v2935_v41 = vcvt.s32.f32 %v1911_v10  ;;  %v1913_v24 = vunpack.c.3.s8 %v985_v7 }
 0x416   :  { %5353 = vmatpush1.bf16.msra.mxu1 %v4571_v33  ;;  %v1920_v26 = vunpack.c.0.s8 %v992_v30  ;;  %v3993_v35 = vmul.f32 %v13840_v2, %v2927_v13  ;;  %v2929_v37 = vcvt.s32.f32 %v1905_v31  ;;  %v1928_v21 = vunpack.c.1.s8 %v992_v30 }
 0x417   :  { %5182 = vmatprep.subr.bf16.mxu0 %v4578_v23  ;;  %v1922_v16 = vunpack.c.0.s8 %v12229_v3  ;;  %v4580_v54 = vpack.c.bf16 %v4004_v51, %v3996_v60  ;;  %v4001_v8 = vmul.f32 %v13840_v2, %v2935_v41  ;;  %v2937_v63 = vcvt.s32.f32 %v1913_v24  ;;  %v1000_v24 = vld [vmem:[#allocation9 + $0x768] sm:$0xff] }
 0x418   :  { %v2944_v57 = vcvt.s32.f32 %v1920_v26  ;;  %v3995_v1 = vmul.f32 %v11535_v14, %v2929_v37  ;;  %v2952_v4 = vcvt.s32.f32 %v1928_v21  ;;  %v1930_v59 = vunpack.c.1.s8 %v12229_v3 }
 0x419   :  { %v2946_v7 = vcvt.s32.f32 %v1922_v16  ;;  %5354 = vmatprep.subr.bf16.mxu1 %v4580_v54  ;;  %v4577_v6 = vpack.c.bf16 %v4001_v8, %v3993_v35  ;;  %v4003_v46 = vmul.f32 %v11535_v14, %v2937_v63  ;;  %v1919_v36 = vunpack.c.0.s8 %v991_v19 }
 0x41a   :  { %v4010_v48 = vmul.f32 %v13839_v12, %v2944_v57  ;;  %v4018_v47 = vmul.f32 %v13839_v12, %v2952_v4  ;;  %v2954_v11 = vcvt.s32.f32 %v1930_v59  ;;  %v1927_v43 = vunpack.c.1.s8 %v991_v19  ;;  %v1002_v57 = vld [vmem:[#allocation9 + $0x778] sm:$0xff] }
 0x41b   :  { %v4012_v45 = vmul.f32 %v11550_v15, %v2946_v7  ;;  %5183 = vmatpush1.bf16.msra.mxu0 %v4577_v6  ;;  %v4579_v17 = vpack.c.bf16 %v4003_v46, %v3995_v1  ;;  %v2943_v29 = vcvt.s32.f32 %v1919_v36  ;;  %v1921_v50 = vunpack.c.0.s8 %v993_v27  ;;  %v999_v36 = vld [vmem:[#allocation9 + $0x760] sm:$0xff] }
 0x41c   :  { %v1929_v38 = vunpack.c.1.s8 %v993_v27  ;;  %v4586_v58 = vpack.c.bf16 %v4018_v47, %v4010_v48  ;;  %v4020_v55 = vmul.f32 %v11550_v15, %v2954_v11  ;;  %v2951_v0 = vcvt.s32.f32 %v1927_v43 }
 0x41d   :  { %v1936_v32 = vunpack.c.2.s8 %v992_v30  ;;  %5355 = vmatpush1.bf16.msra.mxu1 %v4579_v17  ;;  %v4009_v62 = vmul.f32 %v13840_v2, %v2943_v29  ;;  %v2945_v56 = vcvt.s32.f32 %v1921_v50  ;;  %v1944_v20 = vunpack.c.3.s8 %v992_v30  ;;  %v1001_v50 = vld [vmem:[#allocation9 + $0x770] sm:$0xff] }
 0x41e   :  { %v2953_v42 = vcvt.s32.f32 %v1929_v38  ;;  %5184 = vmatprep.subr.bf16.mxu0 %v4586_v58  ;;  %v4588_v53 = vpack.c.bf16 %v4020_v55, %v4012_v45  ;;  %v4017_v49 = vmul.f32 %v13840_v2, %v2951_v0  ;;  %v1938_v9 = vunpack.c.2.s8 %v12229_v3 }
 0x41f   :  { %v2960_v33 = vcvt.s32.f32 %v1936_v32  ;;  %v4011_v10 = vmul.f32 %v11535_v14, %v2945_v56  ;;  %v2968_v60 = vcvt.s32.f32 %v1944_v20  ;;  %v1946_v13 = vunpack.c.3.s8 %v12229_v3 }
 0x420   :  { %v4019_v23 = vmul.f32 %v11535_v14, %v2953_v42  ;;  %5356 = vmatprep.subr.bf16.mxu1 %v4588_v53  ;;  %v4585_v31 = vpack.c.bf16 %v4017_v49, %v4009_v62  ;;  %v2962_v41 = vcvt.s32.f32 %v1938_v9  ;;  %v1935_v30 = vunpack.c.2.s8 %v991_v19 }
 0x421   :  { %v4026_v51 = vmul.f32 %v13839_v12, %v2960_v33  ;;  %v4034_v35 = vmul.f32 %v13839_v12, %v2968_v60  ;;  %v2970_v37 = vcvt.s32.f32 %v1946_v13  ;;  %v1943_v21 = vunpack.c.3.s8 %v991_v19 }
 0x422   :  { %v4587_v26 = vpack.c.bf16 %v4019_v23, %v4011_v10  ;;  %5185 = vmatpush1.bf16.msra.mxu0 %v4585_v31  ;;  %v4028_v16 = vmul.f32 %v11550_v15, %v2962_v41  ;;  %v2959_v54 = vcvt.s32.f32 %v1935_v30  ;;  %v1937_v8 = vunpack.c.2.s8 %v993_v27 }
 0x423   :  { %v1945_v63 = vunpack.c.3.s8 %v993_v27  ;;  %v4594_v3 = vpack.c.bf16 %v4034_v35, %v4026_v51  ;;  %v4036_v1 = vmul.f32 %v11550_v15, %v2970_v37  ;;  %v2967_v4 = vcvt.s32.f32 %v1943_v21 }
 0x424   :  { %5357 = vmatpush1.bf16.msra.mxu1 %v4587_v26  ;;  %v1952_v59 = vunpack.c.0.s8 %v1000_v24  ;;  %v4025_v7 = vmul.f32 %v13840_v2, %v2959_v54  ;;  %v2961_v6 = vcvt.s32.f32 %v1937_v8  ;;  %v1960_v48 = vunpack.c.1.s8 %v1000_v24 }
 0x425   :  { %v2969_v46 = vcvt.s32.f32 %v1945_v63  ;;  %5186 = vmatprep.subr.bf16.mxu0 %v4594_v3  ;;  %v4596_v19 = vpack.c.bf16 %v4036_v1, %v4028_v16  ;;  %v4033_v47 = vmul.f32 %v13840_v2, %v2967_v4  ;;  %v1954_v45 = vunpack.c.0.s8 %v1002_v57 }
 0x426   :  { %v2976_v11 = vcvt.s32.f32 %v1952_v59  ;;  %v4027_v27 = vmul.f32 %v11535_v14, %v2961_v6  ;;  %v2984_v17 = vcvt.s32.f32 %v1960_v48  ;;  %v1962_v29 = vunpack.c.1.s8 %v1002_v57  ;;  %v1008_v59 = vld [vmem:[#allocation9 + $0x7a8] sm:$0xff] }
 0x427   :  { %v4035_v43 = vmul.f32 %v11535_v14, %v2969_v46  ;;  %5358 = vmatprep.subr.bf16.mxu1 %v4596_v19  ;;  %v4593_v38 = vpack.c.bf16 %v4033_v47, %v4025_v7  ;;  %v2978_v55 = vcvt.s32.f32 %v1954_v45  ;;  %v1951_v0 = vunpack.c.0.s8 %v999_v36  ;;  %v1010_v45 = vld [vmem:[#allocation9 + $0x7b8] sm:$0xff] }
 0x428   :  { %v4042_v58 = vmul.f32 %v13839_v12, %v2976_v11  ;;  %v4050_v62 = vmul.f32 %v13839_v12, %v2984_v17  ;;  %v2986_v56 = vcvt.s32.f32 %v1962_v29  ;;  %v1959_v42 = vunpack.c.1.s8 %v999_v36 }
 0x429   :  { %v4595_v32 = vpack.c.bf16 %v4035_v43, %v4027_v27  ;;  %5187 = vmatpush1.bf16.msra.mxu0 %v4593_v38  ;;  %v4044_v20 = vmul.f32 %v11550_v15, %v2978_v55  ;;  %v2975_v53 = vcvt.s32.f32 %v1951_v0  ;;  %v1953_v49 = vunpack.c.0.s8 %v1001_v50  ;;  %v1007_v0 = vld [vmem:[#allocation9 + $0x7a0] sm:$0xff] }
 0x42a   :  { %v1961_v33 = vunpack.c.1.s8 %v1001_v50  ;;  %v4602_v9 = vpack.c.bf16 %v4050_v62, %v4042_v58  ;;  %v4052_v10 = vmul.f32 %v11550_v15, %v2986_v56  ;;  %v2983_v23 = vcvt.s32.f32 %v1959_v42 }
 0x42b   :  { %5359 = vmatpush1.bf16.msra.mxu1 %v4595_v32  ;;  %v1968_v60 = vunpack.c.2.s8 %v1000_v24  ;;  %v4041_v13 = vmul.f32 %v13840_v2, %v2975_v53  ;;  %v2977_v31 = vcvt.s32.f32 %v1953_v49  ;;  %v1976_v41 = vunpack.c.3.s8 %v1000_v24  ;;  %v1009_v49 = vld [vmem:[#allocation9 + $0x7b0] sm:$0xff] }
 0x42c   :  { %v2985_v51 = vcvt.s32.f32 %v1961_v33  ;;  %5188 = vmatprep.subr.bf16.mxu0 %v4602_v9  ;;  %v4604_v30 = vpack.c.bf16 %v4052_v10, %v4044_v20  ;;  %v4049_v26 = vmul.f32 %v13840_v2, %v2983_v23  ;;  %v1970_v37 = vunpack.c.2.s8 %v1002_v57 }
 0x42d   :  { %v2992_v35 = vcvt.s32.f32 %v1968_v60  ;;  %v4043_v21 = vmul.f32 %v11535_v14, %v2977_v31  ;;  %v3000_v54 = vcvt.s32.f32 %v1976_v41  ;;  %v1978_v8 = vunpack.c.3.s8 %v1002_v57 }
 0x42e   :  { %v4051_v16 = vmul.f32 %v11535_v14, %v2985_v51  ;;  %5360 = vmatprep.subr.bf16.mxu1 %v4604_v30  ;;  %v4601_v63 = vpack.c.bf16 %v4049_v26, %v4041_v13  ;;  %v2994_v1 = vcvt.s32.f32 %v1970_v37  ;;  %v1967_v4 = vunpack.c.2.s8 %v999_v36 }
 0x42f   :  { %v4058_v3 = vmul.f32 %v13839_v12, %v2992_v35  ;;  %v4066_v7 = vmul.f32 %v13839_v12, %v3000_v54  ;;  %v3002_v6 = vcvt.s32.f32 %v1978_v8  ;;  %v1975_v46 = vunpack.c.3.s8 %v999_v36 }
 0x430   :  { %v4603_v24 = vpack.c.bf16 %v4051_v16, %v4043_v21  ;;  %5189 = vmatpush1.bf16.msra.mxu0 %v4601_v63  ;;  %v4060_v48 = vmul.f32 %v11550_v15, %v2994_v1  ;;  %v2991_v19 = vcvt.s32.f32 %v1967_v4  ;;  %v1969_v47 = vunpack.c.2.s8 %v1001_v50 }
 0x431   :  { %v1977_v11 = vunpack.c.3.s8 %v1001_v50  ;;  %v4610_v57 = vpack.c.bf16 %v4066_v7, %v4058_v3  ;;  %v4068_v27 = vmul.f32 %v11550_v15, %v3002_v6  ;;  %v2999_v43 = vcvt.s32.f32 %v1975_v46 }
 0x432   :  { %5361 = vmatpush1.bf16.msra.mxu1 %v4603_v24  ;;  %v1984_v17 = vunpack.c.0.s8 %v1008_v59  ;;  %v4057_v29 = vmul.f32 %v13840_v2, %v2991_v19  ;;  %v2993_v38 = vcvt.s32.f32 %v1969_v47  ;;  %v1992_v55 = vunpack.c.1.s8 %v1008_v59 }
 0x433   :  { %v3001_v58 = vcvt.s32.f32 %v1977_v11  ;;  %5190 = vmatprep.subr.bf16.mxu0 %v4610_v57  ;;  %v4612_v36 = vpack.c.bf16 %v4068_v27, %v4060_v48  ;;  %v4065_v32 = vmul.f32 %v13840_v2, %v2999_v43  ;;  %v1986_v56 = vunpack.c.0.s8 %v1010_v45 }
 0x434   :  { %v3008_v62 = vcvt.s32.f32 %v1984_v17  ;;  %v4059_v50 = vmul.f32 %v11535_v14, %v2993_v38  ;;  %v3016_v20 = vcvt.s32.f32 %v1992_v55  ;;  %v1994_v53 = vunpack.c.1.s8 %v1010_v45  ;;  %v1016_v17 = vld [vmem:[#allocation9 + $0x7e8] sm:$0xff] }
 0x435   :  { %v4067_v42 = vmul.f32 %v11535_v14, %v3001_v58  ;;  %5362 = vmatprep.subr.bf16.mxu1 %v4612_v36  ;;  %v4609_v33 = vpack.c.bf16 %v4065_v32, %v4057_v29  ;;  %v3010_v10 = vcvt.s32.f32 %v1986_v56  ;;  %v1983_v23 = vunpack.c.0.s8 %v1007_v0  ;;  %v1018_v56 = vld [vmem:[#allocation9 + $0x7f8] sm:$0xff] }
 0x436   :  { %v4074_v9 = vmul.f32 %v13839_v12, %v3008_v62  ;;  %v4082_v13 = vmul.f32 %v13839_v12, %v3016_v20  ;;  %v3018_v31 = vcvt.s32.f32 %v1994_v53  ;;  %v1991_v51 = vunpack.c.1.s8 %v1007_v0 }
 0x437   :  { %v4611_v60 = vpack.c.bf16 %v4067_v42, %v4059_v50  ;;  %5191 = vmatpush1.bf16.msra.mxu0 %v4609_v33  ;;  %v4076_v41 = vmul.f32 %v11550_v15, %v3010_v10  ;;  %v3007_v30 = vcvt.s32.f32 %v1983_v23  ;;  %v1985_v26 = vunpack.c.0.s8 %v1009_v49  ;;  %v1015_v23 = vld [vmem:[#allocation9 + $0x7e0] sm:$0xff] }
 0x438   :  { %v1993_v35 = vunpack.c.1.s8 %v1009_v49  ;;  %v4618_v37 = vpack.c.bf16 %v4082_v13, %v4074_v9  ;;  %v4084_v21 = vmul.f32 %v11550_v15, %v3018_v31  ;;  %v3015_v16 = vcvt.s32.f32 %v1991_v51 }
 0x439   :  { %5363 = vmatpush1.bf16.msra.mxu1 %v4611_v60  ;;  %v2000_v54 = vunpack.c.2.s8 %v1008_v59  ;;  %v4073_v8 = vmul.f32 %v13840_v2, %v3007_v30  ;;  %v3009_v63 = vcvt.s32.f32 %v1985_v26  ;;  %v2008_v1 = vunpack.c.3.s8 %v1008_v59  ;;  %v1017_v26 = vld [vmem:[#allocation9 + $0x7f0] sm:$0xff] }
 0x43a   :  { %v3017_v3 = vcvt.s32.f32 %v1993_v35  ;;  %5192 = vmatprep.subr.bf16.mxu0 %v4618_v37  ;;  %v4620_v4 = vpack.c.bf16 %v4084_v21, %v4076_v41  ;;  %v4081_v24 = vmul.f32 %v13840_v2, %v3015_v16  ;;  %v2002_v6 = vunpack.c.2.s8 %v1010_v45 }
 0x43b   :  { %v3024_v7 = vcvt.s32.f32 %v2000_v54  ;;  %v4075_v46 = vmul.f32 %v11535_v14, %v3009_v63  ;;  %v3032_v19 = vcvt.s32.f32 %v2008_v1  ;;  %v2010_v47 = vunpack.c.3.s8 %v1010_v45 }
 0x43c   :  { %v4083_v48 = vmul.f32 %v11535_v14, %v3017_v3  ;;  %5364 = vmatprep.subr.bf16.mxu1 %v4620_v4  ;;  %v4617_v11 = vpack.c.bf16 %v4081_v24, %v4073_v8  ;;  %v3026_v27 = vcvt.s32.f32 %v2002_v6  ;;  %v1999_v43 = vunpack.c.2.s8 %v1007_v0 }
 0x43d   :  { %v4090_v57 = vmul.f32 %v13839_v12, %v3024_v7  ;;  %v4098_v29 = vmul.f32 %v13839_v12, %v3032_v19  ;;  %v3034_v38 = vcvt.s32.f32 %v2010_v47  ;;  %v2007_v58 = vunpack.c.3.s8 %v1007_v0 }
 0x43e   :  { %v4619_v59 = vpack.c.bf16 %v4083_v48, %v4075_v46  ;;  %5193 = vmatpush1.bf16.msra.mxu0 %v4617_v11  ;;  %v4092_v55 = vmul.f32 %v11550_v15, %v3026_v27  ;;  %v3023_v36 = vcvt.s32.f32 %v1999_v43  ;;  %v2001_v32 = vunpack.c.2.s8 %v1009_v49 }
 0x43f   :  { %v2009_v62 = vunpack.c.3.s8 %v1009_v49  ;;  %v4626_v45 = vpack.c.bf16 %v4098_v29, %v4090_v57  ;;  %v4100_v50 = vmul.f32 %v11550_v15, %v3034_v38  ;;  %v3031_v42 = vcvt.s32.f32 %v2007_v58 }
 0x440   :  { %5365 = vmatpush1.bf16.msra.mxu1 %v4619_v59  ;;  %v2016_v20 = vunpack.c.0.s8 %v1016_v17  ;;  %v4089_v53 = vmul.f32 %v13840_v2, %v3023_v36  ;;  %v3025_v33 = vcvt.s32.f32 %v2001_v32  ;;  %v2024_v10 = vunpack.c.1.s8 %v1016_v17 }
 0x441   :  { %v3033_v9 = vcvt.s32.f32 %v2009_v62  ;;  %5194 = vmatprep.subr.bf16.mxu0 %v4626_v45  ;;  %v4628_v0 = vpack.c.bf16 %v4100_v50, %v4092_v55  ;;  %v4097_v60 = vmul.f32 %v13840_v2, %v3031_v42  ;;  %v2018_v31 = vunpack.c.0.s8 %v1018_v56 }
 0x442   :  { %v3040_v13 = vcvt.s32.f32 %v2016_v20  ;;  %v4091_v49 = vmul.f32 %v11535_v14, %v3025_v33  ;;  %v3048_v41 = vcvt.s32.f32 %v2024_v10  ;;  %v2026_v30 = vunpack.c.1.s8 %v1018_v56  ;;  %v12298_v20 = vld [vmem:[#allocation12 + $0x8] sm:$0xff] }
 0x443   :  { %v4099_v51 = vmul.f32 %v11535_v14, %v3033_v9  ;;  %5366 = vmatprep.subr.bf16.mxu1 %v4628_v0  ;;  %v4625_v35 = vpack.c.bf16 %v4097_v60, %v4089_v53  ;;  %v3042_v21 = vcvt.s32.f32 %v2018_v31  ;;  %v2015_v16 = vunpack.c.0.s8 %v1015_v23 }
 0x444   :  { %v4106_v37 = vmul.f32 %v13839_v12, %v3040_v13  ;;  %v4114_v8 = vmul.f32 %v13839_v12, %v3048_v41  ;;  %v3050_v63 = vcvt.s32.f32 %v2026_v30  ;;  %v2023_v3 = vunpack.c.1.s8 %v1015_v23 }
 0x445   :  { %v4627_v54 = vpack.c.bf16 %v4099_v51, %v4091_v49  ;;  %5195 = vmatpush1.bf16.msra.mxu0 %v4625_v35  ;;  %v4108_v1 = vmul.f32 %v11550_v15, %v3042_v21  ;;  %v3039_v4 = vcvt.s32.f32 %v2015_v16  ;;  %v2017_v24 = vunpack.c.0.s8 %v1017_v26 }
 0x446   :  { %v2025_v7 = vunpack.c.1.s8 %v1017_v26  ;;  %v4634_v6 = vpack.c.bf16 %v4114_v8, %v4106_v37  ;;  %v4116_v46 = vmul.f32 %v11550_v15, %v3050_v63  ;;  %v3047_v48 = vcvt.s32.f32 %v2023_v3 }
 0x447   :  { %5367 = vmatpush1.bf16.msra.mxu1 %v4627_v54  ;;  %v2032_v19 = vunpack.c.2.s8 %v1016_v17  ;;  %v4105_v47 = vmul.f32 %v13840_v2, %v3039_v4  ;;  %v3041_v11 = vcvt.s32.f32 %v2017_v24  ;;  %v2040_v27 = vunpack.c.3.s8 %v1016_v17  ;;  %v12318_v4 = vld [vmem:[#allocation12 + $0x10] sm:$0xff] }
 0x448   :  { %v3049_v57 = vcvt.s32.f32 %v2025_v7  ;;  %5196 = vmatprep.subr.bf16.mxu0 %v4634_v6  ;;  %v4636_v43 = vpack.c.bf16 %v4116_v46, %v4108_v1  ;;  %v4113_v59 = vmul.f32 %v13840_v2, %v3047_v48  ;;  %v2034_v38 = vunpack.c.2.s8 %v1018_v56 }
 0x449   :  { %v3056_v29 = vcvt.s32.f32 %v2032_v19  ;;  %v4107_v58 = vmul.f32 %v11535_v14, %v3041_v11  ;;  %v3064_v36 = vcvt.s32.f32 %v2040_v27  ;;  %v2042_v32 = vunpack.c.3.s8 %v1018_v56  ;;  %v6551_v56 = vld [vmem:[%s13160_s7] sm:$0xf] }
 0x44a   :  { %v4115_v55 = vmul.f32 %v11535_v14, %v3049_v57  ;;  %5368 = vmatprep.subr.bf16.mxu1 %v4636_v43  ;;  %v4633_v62 = vpack.c.bf16 %v4113_v59, %v4105_v47  ;;  %v3058_v50 = vcvt.s32.f32 %v2034_v38  ;;  %v2031_v42 = vunpack.c.2.s8 %v1015_v23 }
 0x44b   :  { %v4122_v45 = vmul.f32 %v13839_v12, %v3056_v29  ;;  %v4130_v53 = vmul.f32 %v13839_v12, %v3064_v36  ;;  %v3066_v33 = vcvt.s32.f32 %v2042_v32  ;;  %v2039_v9 = vunpack.c.3.s8 %v1015_v23  ;;  %v12307_v12 = vld [vmem:[#allocation12 + $0x18] sm:$0xff] }
 0x44c   :  { %v4635_v17 = vpack.c.bf16 %v4115_v55, %v4107_v58  ;;  %5197 = vmatpush1.bf16.msra.mxu0 %v4633_v62  ;;  %v4124_v10 = vmul.f32 %v11550_v15, %v3058_v50  ;;  %v3055_v0 = vcvt.s32.f32 %v2031_v42  ;;  %v2033_v60 = vunpack.c.2.s8 %v1017_v26 }
 0x44d   :  { %v2041_v13 = vunpack.c.3.s8 %v1017_v26  ;;  %v4642_v31 = vpack.c.bf16 %v4130_v53, %v4122_v45  ;;  %v4132_v49 = vmul.f32 %v11550_v15, %v3066_v33  ;;  %v3063_v51 = vcvt.s32.f32 %v2039_v9  ;;  %v5399_v15 = vld [vmem:[#allocation12] sm:$0xff] }
 0x44e   :  { %5369 = vmatpush1.bf16.msra.mxu1 %v4635_v17  ;;  %v5528_v41 = vunpack.c.0.s8 %v12298_v20  ;;  %v4121_v23 = vmul.f32 %v13840_v2, %v3055_v0  ;;  %v3057_v30 = vcvt.s32.f32 %v2033_v60  ;;  %v5532_v37 = vunpack.c.1.s8 %v12298_v20 }
 0x44f   :  { %v3065_v35 = vcvt.s32.f32 %v2041_v13  ;;  %5198 = vmatprep.subr.bf16.mxu0 %v4642_v31  ;;  %v4644_v26 = vpack.c.bf16 %v4132_v49, %v4124_v10  ;;  %v4129_v21 = vmul.f32 %v13840_v2, %v3063_v51  ;;  %v12313_v54 = vrot.slane %v6551_v56, %v13847_v5  ;;  %v5404_v49 = vld [vmem:[#allocation12 + $0x28] sm:$0xff] }
 0x450   :  { %v6040_v16 = vcvt.s32.f32 %v5528_v41  ;;  %v4123_v8 = vmul.f32 %v11535_v14, %v3057_v30  ;;  %v6044_v3 = vcvt.s32.f32 %v5532_v37  ;;  %v5530_v1 = vunpack.c.0.s8 %v12307_v12 }
 0x451   :  { %v4131_v63 = vmul.f32 %v11535_v14, %v3065_v35  ;;  %5370 = vmatprep.subr.bf16.mxu1 %v4644_v26  ;;  %v4641_v24 = vpack.c.bf16 %v4129_v21, %v4121_v23  ;;  %v5534_v2 = vunpack.c.1.s8 %v12307_v12  ;;  %v12323_v6 = vrot.slane %v6551_v56, %v13848_v52 }
 0x452   :  { %v6574_v7 = vmul.f32 %v12313_v54, %v6040_v16  ;;  %v6578_v48 = vmul.f32 %v12313_v54, %v6044_v3  ;;  %v6042_v19 = vcvt.s32.f32 %v5530_v1  ;;  %v5527_v47 = vunpack.c.0.s8 %v5399_v15 }
 0x453   :  { %v4643_v46 = vpack.c.bf16 %v4131_v63, %v4123_v8  ;;  %5199 = vmatpush1.bf16.msra.mxu0 %v4641_v24  ;;  %v6046_v14 = vcvt.s32.f32 %v5534_v2  ;;  %v5531_v11 = vunpack.c.1.s8 %v5399_v15  ;;  %v12327_v57 = vrot.slane %v6551_v56, %v13845_v40 }
 0x454   :  { %v5529_v27 = vunpack.c.0.s8 %v12318_v4  ;;  %v7086_v43 = vpack.c.bf16 %v6578_v48, %v6574_v7  ;;  %v6576_v59 = vmul.f32 %v12323_v6, %v6042_v19  ;;  %v6039_v29 = vcvt.s32.f32 %v5527_v47  ;;  %v5403_v7 = vld [vmem:[#allocation12 + $0x20] sm:$0xff]  ;;  %v12356_v47 = vld [vmem:[#allocation12 + $0x30] sm:$0xff] }
 0x455   :  { %5371 = vmatpush1.bf16.msra.mxu1 %v4643_v46  ;;  %v5533_v38 = vunpack.c.1.s8 %v12318_v4  ;;  %v6580_v58 = vmul.f32 %v12323_v6, %v6046_v14  ;;  %v6043_v55 = vcvt.s32.f32 %v5531_v11  ;;  %v12334_v32 = vrot.slane %v6551_v56, %v13846_v39 }
 0x456   :  { %v6041_v36 = vcvt.s32.f32 %v5529_v27  ;;  %5201 = vmatmul.mubr.bf16.vlgmr.msra.gmra.mrb[12].mxu0 %v11563_v22  ;;  %7371 = vmatprep.subr.bf16.mxu0 %v7086_v43  ;;  %v6573_v62 = vmul.f32 %v12327_v57, %v6039_v29  ;;  %v5536_v50 = vunpack.c.2.s8 %v12298_v20  ;;  %v5540_v42 = vunpack.c.3.s8 %v12298_v20 }
 0x457   :  { %v6045_v45 = vcvt.s32.f32 %v5533_v38  ;;  %v7088_v17 = vpack.c.bf16 %v6580_v58, %v6576_v59  ;;  %v6577_v53 = vmul.f32 %v12327_v57, %v6043_v55  ;;  %7403 = vmatprep.mubr.bf16.mxu0 %v12213_v18  ;;  %v5538_v9 = vunpack.c.2.s8 %v12307_v12 }
 0x458   :  { %5373 = vmatmul.mubr.bf16.vlgmr.msra.gmra.mrb[12].mxu1 %v11563_v22  ;;  %v6575_v33 = vmul.f32 %v12334_v32, %v6041_v36  ;;  %v6048_v0 = vcvt.s32.f32 %v5536_v50  ;;  %v6052_v60 = vcvt.s32.f32 %v5540_v42  ;;  %v5542_v13 = vunpack.c.3.s8 %v12307_v12  ;;  %v5406_v12 = vld [vmem:[#allocation12 + $0x38] sm:$0xff] }
 0x459   :  { %v6579_v10 = vmul.f32 %v12334_v32, %v6045_v45  ;;  %7575 = vmatprep.mubr.bf16.mxu1 %v12213_v18  ;;  %7543 = vmatprep.subr.bf16.mxu1 %v7088_v17  ;;  %v7085_v20 = vpack.c.bf16 %v6577_v53, %v6573_v62  ;;  %v6050_v22 = vcvt.s32.f32 %v5538_v9  ;;  %v5535_v56 = vunpack.c.2.s8 %v5399_v15 }
 0x45a   :  { %v5539_v31 = vunpack.c.3.s8 %v5399_v15  ;;  %v6582_v41 = vmul.f32 %v12313_v54, %v6048_v0  ;;  %v6586_v23 = vmul.f32 %v12313_v54, %v6052_v60  ;;  %v6054_v30 = vcvt.s32.f32 %v5542_v13 }
 0x45b   :  { %v7087_v51 = vpack.c.bf16 %v6579_v10, %v6575_v33  ;;  %7372 = vmatpush1.bf16.msra.mxu0 %v7085_v20  ;;  %v6584_v35 = vmul.f32 %v12323_v6, %v6050_v22  ;;  %v6047_v18 = vcvt.s32.f32 %v5535_v56  ;;  %v5537_v26 = vunpack.c.2.s8 %v12318_v4 }
 0x45c   :  { %v6051_v37 = vcvt.s32.f32 %v5539_v31  ;;  %v7090_v21 = vpack.c.bf16 %v6586_v23, %v6582_v41  ;;  %v6588_v16 = vmul.f32 %v12323_v6, %v6054_v30  ;;  %v5541_v15 = vunpack.c.3.s8 %v12318_v4 }
 0x45d   :  { %7544 = vmatpush1.bf16.msra.mxu1 %v7087_v51  ;;  %v5544_v8 = vunpack.c.0.s8 %v5404_v49  ;;  %v6581_v63 = vmul.f32 %v12327_v57, %v6047_v18  ;;  %v6049_v1 = vcvt.s32.f32 %v5537_v26  ;;  %v5548_v24 = vunpack.c.1.s8 %v5404_v49 }
 0x45e   :  { %v6585_v3 = vmul.f32 %v12327_v57, %v6051_v37  ;;  %7373 = vmatprep.subr.bf16.mxu0 %v7090_v21  ;;  %v7092_v2 = vpack.c.bf16 %v6588_v16, %v6584_v35  ;;  %v6053_v46 = vcvt.s32.f32 %v5541_v15  ;;  %v5546_v19 = vunpack.c.0.s8 %v5406_v12  ;;  %v5408_v16 = vld [vmem:[#allocation12 + $0x48] sm:$0xff] }
 0x45f   :  { %v6056_v48 = vcvt.s32.f32 %v5544_v8  ;;  %v6583_v11 = vmul.f32 %v12334_v32, %v6049_v1  ;;  %v6060_v27 = vcvt.s32.f32 %v5548_v24  ;;  %v5550_v4 = vunpack.c.1.s8 %v5406_v12 }
 0x460   :  { %v7089_v14 = vpack.c.bf16 %v6585_v3, %v6581_v63  ;;  %7545 = vmatprep.subr.bf16.mxu1 %v7092_v2  ;;  %v6587_v43 = vmul.f32 %v12334_v32, %v6053_v46  ;;  %v6058_v29 = vcvt.s32.f32 %v5546_v19  ;;  %v5543_v38 = vunpack.c.0.s8 %v5403_v7 }
 0x461   :  { %v6590_v59 = vmul.f32 %v12313_v54, %v6056_v48  ;;  %v6594_v58 = vmul.f32 %v12313_v54, %v6060_v27  ;;  %v6062_v55 = vcvt.s32.f32 %v5550_v4  ;;  %v5547_v36 = vunpack.c.1.s8 %v5403_v7 }
 0x462   :  { %7374 = vmatpush1.bf16.msra.mxu0 %v7089_v14  ;;  %v5545_v62 = vunpack.c.0.s8 %v12356_v47  ;;  %v7091_v45 = vpack.c.bf16 %v6587_v43, %v6583_v11  ;;  %v6592_v50 = vmul.f32 %v12323_v6, %v6058_v29  ;;  %v6055_v42 = vcvt.s32.f32 %v5543_v38  ;;  %v5407_v43 = vld [vmem:[#allocation12 + $0x40] sm:$0xff] }
 0x463   :  { %v5549_v17 = vunpack.c.1.s8 %v12356_v47  ;;  %v7094_v53 = vpack.c.bf16 %v6594_v58, %v6590_v59  ;;  %v6596_v33 = vmul.f32 %v12323_v6, %v6062_v55  ;;  %v6059_v9 = vcvt.s32.f32 %v5547_v36  ;;  %v12378_v55 = vld [vmem:[#allocation12 + $0x50] sm:$0xff] }
 0x464   :  { %v6057_v10 = vcvt.s32.f32 %v5545_v62  ;;  %7546 = vmatpush1.bf16.msra.mxu1 %v7091_v45  ;;  %v6589_v0 = vmul.f32 %v12327_v57, %v6055_v42  ;;  %v5552_v13 = vunpack.c.2.s8 %v5404_v49  ;;  %v5556_v20 = vunpack.c.3.s8 %v5404_v49 }
 0x465   :  { %v6061_v60 = vcvt.s32.f32 %v5549_v17  ;;  %7375 = vmatprep.subr.bf16.mxu0 %v7094_v53  ;;  %v7096_v22 = vpack.c.bf16 %v6596_v33, %v6592_v50  ;;  %v6593_v56 = vmul.f32 %v12327_v57, %v6059_v9  ;;  %v5554_v51 = vunpack.c.2.s8 %v5406_v12 }
 0x466   :  { %v6591_v31 = vmul.f32 %v12334_v32, %v6057_v10  ;;  %v6064_v23 = vcvt.s32.f32 %v5552_v13  ;;  %v6068_v30 = vcvt.s32.f32 %v5556_v20  ;;  %v5558_v35 = vunpack.c.3.s8 %v5406_v12  ;;  %v5410_v12 = vld [vmem:[#allocation12 + $0x58] sm:$0xff] }
 0x467   :  { %v6595_v41 = vmul.f32 %v12334_v32, %v6061_v60  ;;  %7547 = vmatprep.subr.bf16.mxu1 %v7096_v22  ;;  %v7093_v18 = vpack.c.bf16 %v6593_v56, %v6589_v0  ;;  %v6066_v37 = vcvt.s32.f32 %v5554_v51  ;;  %v5551_v26 = vunpack.c.2.s8 %v5403_v7 }
 0x468   :  { %v5555_v21 = vunpack.c.3.s8 %v5403_v7  ;;  %v6598_v49 = vmul.f32 %v12313_v54, %v6064_v23  ;;  %v6602_v8 = vmul.f32 %v12313_v54, %v6068_v30  ;;  %v6070_v63 = vcvt.s32.f32 %v5558_v35 }
 0x469   :  { %v7095_v15 = vpack.c.bf16 %v6595_v41, %v6591_v31  ;;  %7376 = vmatpush1.bf16.msra.mxu0 %v7093_v18  ;;  %v6600_v3 = vmul.f32 %v12323_v6, %v6066_v37  ;;  %v6063_v1 = vcvt.s32.f32 %v5551_v26  ;;  %v5553_v2 = vunpack.c.2.s8 %v12356_v47 }
 0x46a   :  { %v6067_v24 = vcvt.s32.f32 %v5555_v21  ;;  %v7098_v46 = vpack.c.bf16 %v6602_v8, %v6598_v49  ;;  %v6604_v48 = vmul.f32 %v12323_v6, %v6070_v63  ;;  %v5557_v7 = vunpack.c.3.s8 %v12356_v47 }
 0x46b   :  { %7548 = vmatpush1.bf16.msra.mxu1 %v7095_v15  ;;  %v5560_v19 = vunpack.c.0.s8 %v5408_v16  ;;  %v6597_v14 = vmul.f32 %v12327_v57, %v6063_v1  ;;  %v6065_v27 = vcvt.s32.f32 %v5553_v2  ;;  %v5564_v4 = vunpack.c.1.s8 %v5408_v16 }
 0x46c   :  { %v6601_v11 = vmul.f32 %v12327_v57, %v6067_v24  ;;  %7377 = vmatprep.subr.bf16.mxu0 %v7098_v46  ;;  %v7100_v59 = vpack.c.bf16 %v6604_v48, %v6600_v3  ;;  %v6069_v29 = vcvt.s32.f32 %v5557_v7  ;;  %v5562_v58 = vunpack.c.0.s8 %v5410_v12  ;;  %v5412_v48 = vld [vmem:[#allocation12 + $0x68] sm:$0xff] }
 0x46d   :  { %v6072_v38 = vcvt.s32.f32 %v5560_v19  ;;  %v6599_v62 = vmul.f32 %v12334_v32, %v6065_v27  ;;  %v6076_v45 = vcvt.s32.f32 %v5564_v4  ;;  %v5566_v47 = vunpack.c.1.s8 %v5410_v12 }
 0x46e   :  { %v7097_v36 = vpack.c.bf16 %v6601_v11, %v6597_v14  ;;  %7549 = vmatprep.subr.bf16.mxu1 %v7100_v59  ;;  %v6603_v50 = vmul.f32 %v12334_v32, %v6069_v29  ;;  %v6074_v17 = vcvt.s32.f32 %v5562_v58  ;;  %v5559_v53 = vunpack.c.0.s8 %v5407_v43 }
 0x46f   :  { %v6606_v42 = vmul.f32 %v12313_v54, %v6072_v38  ;;  %v6610_v33 = vmul.f32 %v12313_v54, %v6076_v45  ;;  %v6078_v9 = vcvt.s32.f32 %v5566_v47  ;;  %v5563_v10 = vunpack.c.1.s8 %v5407_v43 }
 0x470   :  { %7378 = vmatpush1.bf16.msra.mxu0 %v7097_v36  ;;  %v5561_v0 = vunpack.c.0.s8 %v12378_v55  ;;  %v7099_v60 = vpack.c.bf16 %v6603_v50, %v6599_v62  ;;  %v6608_v13 = vmul.f32 %v12323_v6, %v6074_v17  ;;  %v6071_v20 = vcvt.s32.f32 %v5559_v53  ;;  %v5411_v50 = vld [vmem:[#allocation12 + $0x60] sm:$0xff] }
 0x471   :  { %v5565_v22 = vunpack.c.1.s8 %v12378_v55  ;;  %v7102_v56 = vpack.c.bf16 %v6610_v33, %v6606_v42  ;;  %v6612_v31 = vmul.f32 %v12323_v6, %v6078_v9  ;;  %v6075_v51 = vcvt.s32.f32 %v5563_v10  ;;  %v12400_v9 = vld [vmem:[#allocation12 + $0x70] sm:$0xff] }
 0x472   :  { %v6073_v41 = vcvt.s32.f32 %v5561_v0  ;;  %7550 = vmatpush1.bf16.msra.mxu1 %v7099_v60  ;;  %v6605_v23 = vmul.f32 %v12327_v57, %v6071_v20  ;;  %v5568_v35 = vunpack.c.2.s8 %v5408_v16  ;;  %v5572_v18 = vunpack.c.3.s8 %v5408_v16 }
 0x473   :  { %v6077_v30 = vcvt.s32.f32 %v5565_v22  ;;  %7379 = vmatprep.subr.bf16.mxu0 %v7102_v56  ;;  %v7104_v37 = vpack.c.bf16 %v6612_v31, %v6608_v13  ;;  %v6609_v26 = vmul.f32 %v12327_v57, %v6075_v51  ;;  %v5570_v15 = vunpack.c.2.s8 %v5410_v12 }
 0x474   :  { %v6607_v21 = vmul.f32 %v12334_v32, %v6073_v41  ;;  %v6080_v8 = vcvt.s32.f32 %v5568_v35  ;;  %v6084_v63 = vcvt.s32.f32 %v5572_v18  ;;  %v5574_v3 = vunpack.c.3.s8 %v5410_v12  ;;  %v5414_v12 = vld [vmem:[#allocation12 + $0x78] sm:$0xff] }
 0x475   :  { %v6611_v49 = vmul.f32 %v12334_v32, %v6077_v30  ;;  %7551 = vmatprep.subr.bf16.mxu1 %v7104_v37  ;;  %v7101_v1 = vpack.c.bf16 %v6609_v26, %v6605_v23  ;;  %v6082_v24 = vcvt.s32.f32 %v5570_v15  ;;  %v5567_v2 = vunpack.c.2.s8 %v5407_v43 }
 0x476   :  { %v5571_v46 = vunpack.c.3.s8 %v5407_v43  ;;  %v6614_v16 = vmul.f32 %v12313_v54, %v6080_v8  ;;  %v6618_v19 = vmul.f32 %v12313_v54, %v6084_v63  ;;  %v6086_v14 = vcvt.s32.f32 %v5574_v3 }
 0x477   :  { %v7103_v7 = vpack.c.bf16 %v6611_v49, %v6607_v21  ;;  %7380 = vmatpush1.bf16.msra.mxu0 %v7101_v1  ;;  %v6616_v11 = vmul.f32 %v12323_v6, %v6082_v24  ;;  %v6079_v27 = vcvt.s32.f32 %v5567_v2  ;;  %v5569_v59 = vunpack.c.2.s8 %v12378_v55 }
 0x478   :  { %v6083_v4 = vcvt.s32.f32 %v5571_v46  ;;  %v7106_v29 = vpack.c.bf16 %v6618_v19, %v6614_v16  ;;  %v6620_v38 = vmul.f32 %v12323_v6, %v6086_v14  ;;  %v5573_v43 = vunpack.c.3.s8 %v12378_v55 }
 0x479   :  { %7552 = vmatpush1.bf16.msra.mxu1 %v7103_v7  ;;  %v5576_v58 = vunpack.c.0.s8 %v5412_v48  ;;  %v6613_v36 = vmul.f32 %v12327_v57, %v6079_v27  ;;  %v6081_v45 = vcvt.s32.f32 %v5569_v59  ;;  %v5580_v47 = vunpack.c.1.s8 %v5412_v48 }
 0x47a   :  { %v6617_v62 = vmul.f32 %v12327_v57, %v6083_v4  ;;  %7381 = vmatprep.subr.bf16.mxu0 %v7106_v29  ;;  %v7108_v42 = vpack.c.bf16 %v6620_v38, %v6616_v11  ;;  %v6085_v17 = vcvt.s32.f32 %v5573_v43  ;;  %v5578_v33 = vunpack.c.0.s8 %v5414_v12  ;;  %v5416_v38 = vld [vmem:[#allocation12 + $0x88] sm:$0xff] }
 0x47b   :  { %v6088_v53 = vcvt.s32.f32 %v5576_v58  ;;  %v6615_v0 = vmul.f32 %v12334_v32, %v6081_v45  ;;  %v6092_v60 = vcvt.s32.f32 %v5580_v47  ;;  %v5582_v55 = vunpack.c.1.s8 %v5414_v12 }
 0x47c   :  { %v7105_v10 = vpack.c.bf16 %v6617_v62, %v6613_v36  ;;  %7553 = vmatprep.subr.bf16.mxu1 %v7108_v42  ;;  %v6619_v13 = vmul.f32 %v12334_v32, %v6085_v17  ;;  %v6090_v22 = vcvt.s32.f32 %v5578_v33  ;;  %v5575_v56 = vunpack.c.0.s8 %v5411_v50 }
 0x47d   :  { %v6622_v20 = vmul.f32 %v12313_v54, %v6088_v53  ;;  %v6626_v31 = vmul.f32 %v12313_v54, %v6092_v60  ;;  %v6094_v51 = vcvt.s32.f32 %v5582_v55  ;;  %v5579_v41 = vunpack.c.1.s8 %v5411_v50 }
 0x47e   :  { %7382 = vmatpush1.bf16.msra.mxu0 %v7105_v10  ;;  %v5577_v23 = vunpack.c.0.s8 %v12400_v9  ;;  %v7107_v30 = vpack.c.bf16 %v6619_v13, %v6615_v0  ;;  %v6624_v35 = vmul.f32 %v12323_v6, %v6090_v22  ;;  %v6087_v18 = vcvt.s32.f32 %v5575_v56  ;;  %v5415_v13 = vld [vmem:[#allocation12 + $0x80] sm:$0xff] }
 0x47f   :  { %v5581_v37 = vunpack.c.1.s8 %v12400_v9  ;;  %v7110_v26 = vpack.c.bf16 %v6626_v31, %v6622_v20  ;;  %v6628_v21 = vmul.f32 %v12323_v6, %v6094_v51  ;;  %v6091_v15 = vcvt.s32.f32 %v5579_v41  ;;  %v12422_v51 = vld [vmem:[#allocation12 + $0x90] sm:$0xff] }
 0x480   :  { %v6089_v49 = vcvt.s32.f32 %v5577_v23  ;;  %7554 = vmatpush1.bf16.msra.mxu1 %v7107_v30  ;;  %v6621_v8 = vmul.f32 %v12327_v57, %v6087_v18  ;;  %v5584_v3 = vunpack.c.2.s8 %v5412_v48  ;;  %v5588_v1 = vunpack.c.3.s8 %v5412_v48 }
 0x481   :  { %v6093_v63 = vcvt.s32.f32 %v5581_v37  ;;  %7383 = vmatprep.subr.bf16.mxu0 %v7110_v26  ;;  %v7112_v24 = vpack.c.bf16 %v6628_v21, %v6624_v35  ;;  %v6625_v2 = vmul.f32 %v12327_v57, %v6091_v15  ;;  %v5586_v7 = vunpack.c.2.s8 %v5414_v12 }
 0x482   :  { %v6623_v46 = vmul.f32 %v12334_v32, %v6089_v49  ;;  %v6096_v19 = vcvt.s32.f32 %v5584_v3  ;;  %v6100_v14 = vcvt.s32.f32 %v5588_v1  ;;  %v5590_v11 = vunpack.c.3.s8 %v5414_v12  ;;  %v5418_v12 = vld [vmem:[#allocation12 + $0x98] sm:$0xff] }
 0x483   :  { %v6627_v16 = vmul.f32 %v12334_v32, %v6093_v63  ;;  %7555 = vmatprep.subr.bf16.mxu1 %v7112_v24  ;;  %v7109_v27 = vpack.c.bf16 %v6625_v2, %v6621_v8  ;;  %v6098_v4 = vcvt.s32.f32 %v5586_v7  ;;  %v5583_v59 = vunpack.c.2.s8 %v5411_v50 }
 0x484   :  { %v5587_v29 = vunpack.c.3.s8 %v5411_v50  ;;  %v6630_v48 = vmul.f32 %v12313_v54, %v6096_v19  ;;  %v6634_v58 = vmul.f32 %v12313_v54, %v6100_v14  ;;  %v6102_v36 = vcvt.s32.f32 %v5590_v11 }
 0x485   :  { %v7111_v43 = vpack.c.bf16 %v6627_v16, %v6623_v46  ;;  %7384 = vmatpush1.bf16.msra.mxu0 %v7109_v27  ;;  %v6632_v62 = vmul.f32 %v12323_v6, %v6098_v4  ;;  %v6095_v45 = vcvt.s32.f32 %v5583_v59  ;;  %v5585_v42 = vunpack.c.2.s8 %v12400_v9 }
 0x486   :  { %v6099_v47 = vcvt.s32.f32 %v5587_v29  ;;  %v7114_v17 = vpack.c.bf16 %v6634_v58, %v6630_v48  ;;  %v6636_v53 = vmul.f32 %v12323_v6, %v6102_v36  ;;  %v5589_v50 = vunpack.c.3.s8 %v12400_v9 }
 0x487   :  { %7556 = vmatpush1.bf16.msra.mxu1 %v7111_v43  ;;  %v5592_v33 = vunpack.c.0.s8 %v5416_v38  ;;  %v6629_v10 = vmul.f32 %v12327_v57, %v6095_v45  ;;  %v6097_v60 = vcvt.s32.f32 %v5585_v42  ;;  %v5596_v55 = vunpack.c.1.s8 %v5416_v38 }
 0x488   :  { %v6633_v0 = vmul.f32 %v12327_v57, %v6099_v47  ;;  %7385 = vmatprep.subr.bf16.mxu0 %v7114_v17  ;;  %v7116_v20 = vpack.c.bf16 %v6636_v53, %v6632_v62  ;;  %v6101_v22 = vcvt.s32.f32 %v5589_v50  ;;  %v5594_v31 = vunpack.c.0.s8 %v5418_v12  ;;  %v5420_v53 = vld [vmem:[#allocation12 + $0xa8] sm:$0xff] }
 0x489   :  { %v6104_v56 = vcvt.s32.f32 %v5592_v33  ;;  %v6631_v23 = vmul.f32 %v12334_v32, %v6097_v60  ;;  %v6108_v30 = vcvt.s32.f32 %v5596_v55  ;;  %v5598_v9 = vunpack.c.1.s8 %v5418_v12 }
 0x48a   :  { %v7113_v41 = vpack.c.bf16 %v6633_v0, %v6629_v10  ;;  %7557 = vmatprep.subr.bf16.mxu1 %v7116_v20  ;;  %v6635_v35 = vmul.f32 %v12334_v32, %v6101_v22  ;;  %v6106_v37 = vcvt.s32.f32 %v5594_v31  ;;  %v5591_v26 = vunpack.c.0.s8 %v5415_v13 }
 0x48b   :  { %v6638_v18 = vmul.f32 %v12313_v54, %v6104_v56  ;;  %v6642_v21 = vmul.f32 %v12313_v54, %v6108_v30  ;;  %v6110_v15 = vcvt.s32.f32 %v5598_v9  ;;  %v5595_v49 = vunpack.c.1.s8 %v5415_v13 }
 0x48c   :  { %7386 = vmatpush1.bf16.msra.mxu0 %v7113_v41  ;;  %v5593_v8 = vunpack.c.0.s8 %v12422_v51  ;;  %v7115_v63 = vpack.c.bf16 %v6635_v35, %v6631_v23  ;;  %v6640_v3 = vmul.f32 %v12323_v6, %v6106_v37  ;;  %v6103_v1 = vcvt.s32.f32 %v5591_v26  ;;  %v5419_v35 = vld [vmem:[#allocation12 + $0xa0] sm:$0xff] }
 0x48d   :  { %v5597_v24 = vunpack.c.1.s8 %v12422_v51  ;;  %v7118_v2 = vpack.c.bf16 %v6642_v21, %v6638_v18  ;;  %v6644_v46 = vmul.f32 %v12323_v6, %v6110_v15  ;;  %v6107_v7 = vcvt.s32.f32 %v5595_v49  ;;  %v12444_v15 = vld [vmem:[#allocation12 + $0xb0] sm:$0xff] }
 0x48e   :  { %v6105_v16 = vcvt.s32.f32 %v5593_v8  ;;  %7558 = vmatpush1.bf16.msra.mxu1 %v7115_v63  ;;  %v6637_v19 = vmul.f32 %v12327_v57, %v6103_v1  ;;  %v5600_v11 = vunpack.c.2.s8 %v5416_v38  ;;  %v5604_v27 = vunpack.c.3.s8 %v5416_v38 }
 0x48f   :  { %v6109_v14 = vcvt.s32.f32 %v5597_v24  ;;  %7387 = vmatprep.subr.bf16.mxu0 %v7118_v2  ;;  %v7120_v4 = vpack.c.bf16 %v6644_v46, %v6640_v3  ;;  %v6641_v59 = vmul.f32 %v12327_v57, %v6107_v7  ;;  %v5602_v43 = vunpack.c.2.s8 %v5418_v12 }
 0x490   :  { %v6639_v29 = vmul.f32 %v12334_v32, %v6105_v16  ;;  %v6112_v58 = vcvt.s32.f32 %v5600_v11  ;;  %v6116_v36 = vcvt.s32.f32 %v5604_v27  ;;  %v5606_v62 = vunpack.c.3.s8 %v5418_v12  ;;  %v5422_v12 = vld [vmem:[#allocation12 + $0xb8] sm:$0xff] }
 0x491   :  { %v6643_v48 = vmul.f32 %v12334_v32, %v6109_v14  ;;  %7559 = vmatprep.subr.bf16.mxu1 %v7120_v4  ;;  %v7117_v45 = vpack.c.bf16 %v6641_v59, %v6637_v19  ;;  %v6114_v47 = vcvt.s32.f32 %v5602_v43  ;;  %v5599_v42 = vunpack.c.2.s8 %v5415_v13 }
 0x492   :  { %v5603_v17 = vunpack.c.3.s8 %v5415_v13  ;;  %v6646_v38 = vmul.f32 %v12313_v54, %v6112_v58  ;;  %v6650_v33 = vmul.f32 %v12313_v54, %v6116_v36  ;;  %v6118_v10 = vcvt.s32.f32 %v5606_v62 }
 0x493   :  { %v7119_v50 = vpack.c.bf16 %v6643_v48, %v6639_v29  ;;  %7388 = vmatpush1.bf16.msra.mxu0 %v7117_v45  ;;  %v6648_v0 = vmul.f32 %v12323_v6, %v6114_v47  ;;  %v6111_v60 = vcvt.s32.f32 %v5599_v42  ;;  %v5601_v20 = vunpack.c.2.s8 %v12422_v51 }
 0x494   :  { %v6115_v55 = vcvt.s32.f32 %v5603_v17  ;;  %v7122_v22 = vpack.c.bf16 %v6650_v33, %v6646_v38  ;;  %v6652_v56 = vmul.f32 %v12323_v6, %v6118_v10  ;;  %v5605_v13 = vunpack.c.3.s8 %v12422_v51 }
 0x495   :  { %7560 = vmatpush1.bf16.msra.mxu1 %v7119_v50  ;;  %v5608_v31 = vunpack.c.0.s8 %v5420_v53  ;;  %v6645_v41 = vmul.f32 %v12327_v57, %v6111_v60  ;;  %v6113_v30 = vcvt.s32.f32 %v5601_v20  ;;  %v5612_v9 = vunpack.c.1.s8 %v5420_v53 }
 0x496   :  { %v6649_v23 = vmul.f32 %v12327_v57, %v6115_v55  ;;  %7389 = vmatprep.subr.bf16.mxu0 %v7122_v22  ;;  %v7124_v18 = vpack.c.bf16 %v6652_v56, %v6648_v0  ;;  %v6117_v37 = vcvt.s32.f32 %v5605_v13  ;;  %v5610_v21 = vunpack.c.0.s8 %v5422_v12  ;;  %v5424_v56 = vld [vmem:[#allocation12 + $0xc8] sm:$0xff] }
 0x497   :  { %v6120_v26 = vcvt.s32.f32 %v5608_v31  ;;  %v6647_v8 = vmul.f32 %v12334_v32, %v6113_v30  ;;  %v6124_v63 = vcvt.s32.f32 %v5612_v9  ;;  %v5614_v51 = vunpack.c.1.s8 %v5422_v12 }
 0x498   :  { %v7121_v49 = vpack.c.bf16 %v6649_v23, %v6645_v41  ;;  %7561 = vmatprep.subr.bf16.mxu1 %v7124_v18  ;;  %v6651_v3 = vmul.f32 %v12334_v32, %v6117_v37  ;;  %v6122_v24 = vcvt.s32.f32 %v5610_v21  ;;  %v5607_v2 = vunpack.c.0.s8 %v5419_v35 }
 0x499   :  { %v6654_v1 = vmul.f32 %v12313_v54, %v6120_v26  ;;  %v6658_v46 = vmul.f32 %v12313_v54, %v6124_v63  ;;  %v6126_v7 = vcvt.s32.f32 %v5614_v51  ;;  %v5611_v16 = vunpack.c.1.s8 %v5419_v35 }
 0x49a   :  { %7390 = vmatpush1.bf16.msra.mxu0 %v7121_v49  ;;  %v5609_v19 = vunpack.c.0.s8 %v12444_v15  ;;  %v7123_v14 = vpack.c.bf16 %v6651_v3, %v6647_v8  ;;  %v6656_v11 = vmul.f32 %v12323_v6, %v6122_v24  ;;  %v6119_v27 = vcvt.s32.f32 %v5607_v2  ;;  %v5423_v3 = vld [vmem:[#allocation12 + $0xc0] sm:$0xff] }
 0x49b   :  { %v5613_v4 = vunpack.c.1.s8 %v12444_v15  ;;  %v7126_v59 = vpack.c.bf16 %v6658_v46, %v6654_v1  ;;  %v6660_v29 = vmul.f32 %v12323_v6, %v6126_v7  ;;  %v6123_v43 = vcvt.s32.f32 %v5611_v16  ;;  %v12466_v7 = vld [vmem:[#allocation12 + $0xd0] sm:$0xff] }
 0x49c   :  { %v6121_v48 = vcvt.s32.f32 %v5609_v19  ;;  %7562 = vmatpush1.bf16.msra.mxu1 %v7123_v14  ;;  %v6653_v58 = vmul.f32 %v12327_v57, %v6119_v27  ;;  %v5616_v62 = vunpack.c.2.s8 %v5420_v53  ;;  %v5620_v45 = vunpack.c.3.s8 %v5420_v53 }
 0x49d   :  { %v6125_v36 = vcvt.s32.f32 %v5613_v4  ;;  %7391 = vmatprep.subr.bf16.mxu0 %v7126_v59  ;;  %v7128_v47 = vpack.c.bf16 %v6660_v29, %v6656_v11  ;;  %v6657_v42 = vmul.f32 %v12327_v57, %v6123_v43  ;;  %v5618_v50 = vunpack.c.2.s8 %v5422_v12 }
 0x49e   :  { %v6655_v17 = vmul.f32 %v12334_v32, %v6121_v48  ;;  %v6128_v33 = vcvt.s32.f32 %v5616_v62  ;;  %v6132_v10 = vcvt.s32.f32 %v5620_v45  ;;  %v5622_v0 = vunpack.c.3.s8 %v5422_v12  ;;  %v5426_v12 = vld [vmem:[#allocation12 + $0xd8] sm:$0xff] }
 0x49f   :  { %v6659_v38 = vmul.f32 %v12334_v32, %v6125_v36  ;;  %7563 = vmatprep.subr.bf16.mxu1 %v7128_v47  ;;  %v7125_v60 = vpack.c.bf16 %v6657_v42, %v6653_v58  ;;  %v6130_v55 = vcvt.s32.f32 %v5618_v50  ;;  %v5615_v20 = vunpack.c.2.s8 %v5419_v35 }
 0x4a0   :  { %v5619_v22 = vunpack.c.3.s8 %v5419_v35  ;;  %v6662_v53 = vmul.f32 %v12313_v54, %v6128_v33  ;;  %v6666_v31 = vmul.f32 %v12313_v54, %v6132_v10  ;;  %v6134_v41 = vcvt.s32.f32 %v5622_v0 }
 0x4a1   :  { %v7127_v13 = vpack.c.bf16 %v6659_v38, %v6655_v17  ;;  %7392 = vmatpush1.bf16.msra.mxu0 %v7125_v60  ;;  %v6664_v23 = vmul.f32 %v12323_v6, %v6130_v55  ;;  %v6127_v30 = vcvt.s32.f32 %v5615_v20  ;;  %v5617_v18 = vunpack.c.2.s8 %v12444_v15 }
 0x4a2   :  { %v6131_v9 = vcvt.s32.f32 %v5619_v22  ;;  %v7130_v37 = vpack.c.bf16 %v6666_v31, %v6662_v53  ;;  %v6668_v26 = vmul.f32 %v12323_v6, %v6134_v41  ;;  %v5621_v35 = vunpack.c.3.s8 %v12444_v15 }
 0x4a3   :  { %7564 = vmatpush1.bf16.msra.mxu1 %v7127_v13  ;;  %v5624_v21 = vunpack.c.0.s8 %v5424_v56  ;;  %v6661_v49 = vmul.f32 %v12327_v57, %v6127_v30  ;;  %v6129_v63 = vcvt.s32.f32 %v5617_v18  ;;  %v5628_v51 = vunpack.c.1.s8 %v5424_v56 }
 0x4a4   :  { %v6665_v8 = vmul.f32 %v12327_v57, %v6131_v9  ;;  %7393 = vmatprep.subr.bf16.mxu0 %v7130_v37  ;;  %v7132_v1 = vpack.c.bf16 %v6668_v26, %v6664_v23  ;;  %v6133_v24 = vcvt.s32.f32 %v5621_v35  ;;  %v5626_v46 = vunpack.c.0.s8 %v5426_v12  ;;  %v5428_v26 = vld [vmem:[#allocation12 + $0xe8] sm:$0xff] }
 0x4a5   :  { %v6136_v2 = vcvt.s32.f32 %v5624_v21  ;;  %v6663_v19 = vmul.f32 %v12334_v32, %v6129_v63  ;;  %v6140_v14 = vcvt.s32.f32 %v5628_v51  ;;  %v5630_v15 = vunpack.c.1.s8 %v5426_v12 }
 0x4a6   :  { %v7129_v16 = vpack.c.bf16 %v6665_v8, %v6661_v49  ;;  %7565 = vmatprep.subr.bf16.mxu1 %v7132_v1  ;;  %v6667_v11 = vmul.f32 %v12334_v32, %v6133_v24  ;;  %v6138_v4 = vcvt.s32.f32 %v5626_v46  ;;  %v5623_v59 = vunpack.c.0.s8 %v5423_v3 }
 0x4a7   :  { %v6670_v27 = vmul.f32 %v12313_v54, %v6136_v2  ;;  %v6674_v29 = vmul.f32 %v12313_v54, %v6140_v14  ;;  %v6142_v43 = vcvt.s32.f32 %v5630_v15  ;;  %v5627_v48 = vunpack.c.1.s8 %v5423_v3 }
 0x4a8   :  { %7394 = vmatpush1.bf16.msra.mxu0 %v7129_v16  ;;  %v5625_v58 = vunpack.c.0.s8 %v12466_v7  ;;  %v7131_v36 = vpack.c.bf16 %v6667_v11, %v6663_v19  ;;  %v6672_v62 = vmul.f32 %v12323_v6, %v6138_v4  ;;  %v6135_v45 = vcvt.s32.f32 %v5623_v59  ;;  %v5427_v11 = vld [vmem:[#allocation12 + $0xe0] sm:$0xff] }
 0x4a9   :  { %v5629_v47 = vunpack.c.1.s8 %v12466_v7  ;;  %v7134_v42 = vpack.c.bf16 %v6674_v29, %v6670_v27  ;;  %v6676_v17 = vmul.f32 %v12323_v6, %v6142_v43  ;;  %v6139_v50 = vcvt.s32.f32 %v5627_v48  ;;  %v12488_v43 = vld [vmem:[#allocation12 + $0xf0] sm:$0xff] }
 0x4aa   :  { %v6137_v38 = vcvt.s32.f32 %v5625_v58  ;;  %7566 = vmatpush1.bf16.msra.mxu1 %v7131_v36  ;;  %v6669_v33 = vmul.f32 %v12327_v57, %v6135_v45  ;;  %v5632_v0 = vunpack.c.2.s8 %v5424_v56  ;;  %v5636_v60 = vunpack.c.3.s8 %v5424_v56 }
 0x4ab   :  { %v6141_v10 = vcvt.s32.f32 %v5629_v47  ;;  %7395 = vmatprep.subr.bf16.mxu0 %v7134_v42  ;;  %v7136_v55 = vpack.c.bf16 %v6676_v17, %v6672_v62  ;;  %v6673_v20 = vmul.f32 %v12327_v57, %v6139_v50  ;;  %v5634_v13 = vunpack.c.2.s8 %v5426_v12 }
 0x4ac   :  { %v6671_v22 = vmul.f32 %v12334_v32, %v6137_v38  ;;  %v6144_v31 = vcvt.s32.f32 %v5632_v0  ;;  %v6148_v41 = vcvt.s32.f32 %v5636_v60  ;;  %v5638_v23 = vunpack.c.3.s8 %v5426_v12  ;;  %v5430_v12 = vld [vmem:[#allocation12 + $0xf8] sm:$0xff] }
 0x4ad   :  { %v6675_v53 = vmul.f32 %v12334_v32, %v6141_v10  ;;  %7567 = vmatprep.subr.bf16.mxu1 %v7136_v55  ;;  %v7133_v30 = vpack.c.bf16 %v6673_v20, %v6669_v33  ;;  %v6146_v9 = vcvt.s32.f32 %v5634_v13  ;;  %v5631_v18 = vunpack.c.2.s8 %v5423_v3 }
 0x4ae   :  { %v5635_v37 = vunpack.c.3.s8 %v5423_v3  ;;  %v6678_v56 = vmul.f32 %v12313_v54, %v6144_v31  ;;  %v6682_v21 = vmul.f32 %v12313_v54, %v6148_v41  ;;  %v6150_v49 = vcvt.s32.f32 %v5638_v23 }
 0x4af   :  { %v7135_v35 = vpack.c.bf16 %v6675_v53, %v6671_v22  ;;  %7396 = vmatpush1.bf16.msra.mxu0 %v7133_v30  ;;  %v6680_v8 = vmul.f32 %v12323_v6, %v6146_v9  ;;  %v6143_v63 = vcvt.s32.f32 %v5631_v18  ;;  %v5633_v1 = vunpack.c.2.s8 %v12466_v7 }
 0x4b0   :  { %v6147_v51 = vcvt.s32.f32 %v5635_v37  ;;  %v7138_v24 = vpack.c.bf16 %v6682_v21, %v6678_v56  ;;  %v6684_v2 = vmul.f32 %v12323_v6, %v6150_v49  ;;  %v5637_v3 = vunpack.c.3.s8 %v12466_v7 }
 0x4b1   :  { %7568 = vmatpush1.bf16.msra.mxu1 %v7135_v35  ;;  %v5640_v46 = vunpack.c.0.s8 %v5428_v26  ;;  %v6677_v16 = vmul.f32 %v12327_v57, %v6143_v63  ;;  %v6145_v14 = vcvt.s32.f32 %v5633_v1  ;;  %v5644_v15 = vunpack.c.1.s8 %v5428_v26 }
 0x4b2   :  { %v6681_v19 = vmul.f32 %v12327_v57, %v6147_v51  ;;  %7397 = vmatprep.subr.bf16.mxu0 %v7138_v24  ;;  %v7140_v27 = vpack.c.bf16 %v6684_v2, %v6680_v8  ;;  %v6149_v4 = vcvt.s32.f32 %v5637_v3  ;;  %v5642_v29 = vunpack.c.0.s8 %v5430_v12  ;;  %v12502_v2 = vld [vmem:[#allocation12 + $0x108] sm:$0xff] }
 0x4b3   :  { %v6152_v59 = vcvt.s32.f32 %v5640_v46  ;;  %v6679_v58 = vmul.f32 %v12334_v32, %v6145_v14  ;;  %v6156_v36 = vcvt.s32.f32 %v5644_v15  ;;  %v5646_v7 = vunpack.c.1.s8 %v5430_v12 }
 0x4b4   :  { %v7137_v48 = vpack.c.bf16 %v6681_v19, %v6677_v16  ;;  %7569 = vmatprep.subr.bf16.mxu1 %v7140_v27  ;;  %v6683_v62 = vmul.f32 %v12334_v32, %v6149_v4  ;;  %v6154_v47 = vcvt.s32.f32 %v5642_v29  ;;  %v5639_v42 = vunpack.c.0.s8 %v5427_v11  ;;  %v12508_v27 = vld [vmem:[#allocation12 + $0x118] sm:$0xff] }
 0x4b5   :  { %v6686_v45 = vmul.f32 %v12313_v54, %v6152_v59  ;;  %v6690_v17 = vmul.f32 %v12313_v54, %v6156_v36  ;;  %v6158_v50 = vcvt.s32.f32 %v5646_v7  ;;  %v5643_v38 = vunpack.c.1.s8 %v5427_v11 }
 0x4b6   :  { %7398 = vmatpush1.bf16.msra.mxu0 %v7137_v48  ;;  %v5641_v33 = vunpack.c.0.s8 %v12488_v43  ;;  %v7139_v10 = vpack.c.bf16 %v6683_v62, %v6679_v58  ;;  %v6688_v0 = vmul.f32 %v12323_v6, %v6154_v47  ;;  %v6151_v60 = vcvt.s32.f32 %v5639_v42  ;;  %v5431_v62 = vld [vmem:[#allocation12 + $0x100] sm:$0xff] }
 0x4b7   :  { %v5645_v55 = vunpack.c.1.s8 %v12488_v43  ;;  %v7142_v20 = vpack.c.bf16 %v6690_v17, %v6686_v45  ;;  %v6692_v22 = vmul.f32 %v12323_v6, %v6158_v50  ;;  %v6155_v13 = vcvt.s32.f32 %v5643_v38  ;;  %v12517_v50 = vld [vmem:[#allocation12 + $0x110] sm:$0xff] }
 0x4b8   :  { %v6153_v53 = vcvt.s32.f32 %v5641_v33  ;;  %7570 = vmatpush1.bf16.msra.mxu1 %v7139_v10  ;;  %v6685_v31 = vmul.f32 %v12327_v57, %v6151_v60  ;;  %v5648_v23 = vunpack.c.2.s8 %v5428_v26  ;;  %v5652_v30 = vunpack.c.3.s8 %v5428_v26 }
 0x4b9   :  { %v6157_v41 = vcvt.s32.f32 %v5645_v55  ;;  %7399 = vmatprep.subr.bf16.mxu0 %v7142_v20  ;;  %v7144_v9 = vpack.c.bf16 %v6692_v22, %v6688_v0  ;;  %v6689_v18 = vmul.f32 %v12327_v57, %v6155_v13  ;;  %v5650_v35 = vunpack.c.2.s8 %v5430_v12 }
 0x4ba   :  { %v6687_v37 = vmul.f32 %v12334_v32, %v6153_v53  ;;  %v6160_v21 = vcvt.s32.f32 %v5648_v23  ;;  %v6164_v49 = vcvt.s32.f32 %v5652_v30  ;;  %v5654_v8 = vunpack.c.3.s8 %v5430_v12 }
 0x4bb   :  { %v6691_v56 = vmul.f32 %v12334_v32, %v6157_v41  ;;  %7571 = vmatprep.subr.bf16.mxu1 %v7144_v9  ;;  %v7141_v63 = vpack.c.bf16 %v6689_v18, %v6685_v31  ;;  %v6162_v51 = vcvt.s32.f32 %v5650_v35  ;;  %v5647_v1 = vunpack.c.2.s8 %v5427_v11 }
 0x4bc   :  { %v5651_v24 = vunpack.c.3.s8 %v5427_v11  ;;  %v6694_v3 = vmul.f32 %v12313_v54, %v6160_v21  ;;  %v6698_v46 = vmul.f32 %v12313_v54, %v6164_v49  ;;  %v6166_v16 = vcvt.s32.f32 %v5654_v8 }
 0x4bd   :  { %v7143_v26 = vpack.c.bf16 %v6691_v56, %v6687_v37  ;;  %7400 = vmatpush1.bf16.msra.mxu0 %v7141_v63  ;;  %v6696_v19 = vmul.f32 %v12323_v6, %v6162_v51  ;;  %v6159_v14 = vcvt.s32.f32 %v5647_v1  ;;  %v5649_v12 = vunpack.c.2.s8 %v12488_v43 }
 0x4be   :  { %v6163_v15 = vcvt.s32.f32 %v5651_v24  ;;  %v7146_v4 = vpack.c.bf16 %v6698_v46, %v6694_v3  ;;  %v6700_v11 = vmul.f32 %v12323_v6, %v6166_v16  ;;  %v5653_v59 = vunpack.c.3.s8 %v12488_v43 }
 0x4bf   :  { %7572 = vmatpush1.bf16.msra.mxu1 %v7143_v26  ;;  %v5656_v29 = vunpack.c.0.s8 %v12502_v2  ;;  %v6693_v48 = vmul.f32 %v12327_v57, %v6159_v14  ;;  %v6161_v36 = vcvt.s32.f32 %v5649_v12  ;;  %v5660_v7 = vunpack.c.1.s8 %v12502_v2 }
 0x4c0   :  { %v6697_v58 = vmul.f32 %v12327_v57, %v6163_v15  ;;  %7401 = vmatprep.subr.bf16.mxu0 %v7146_v4  ;;  %v7148_v45 = vpack.c.bf16 %v6700_v11, %v6696_v19  ;;  %v6165_v47 = vcvt.s32.f32 %v5653_v59  ;;  %v5658_v17 = vunpack.c.0.s8 %v12508_v27  ;;  %v5436_v4 = vld [vmem:[#allocation12 + $0x128] sm:$0xff] }
 0x4c1   :  { %v6168_v42 = vcvt.s32.f32 %v5656_v29  ;;  %v6695_v43 = vmul.f32 %v12334_v32, %v6161_v36  ;;  %v6172_v33 = vcvt.s32.f32 %v5660_v7  ;;  %v5662_v10 = vunpack.c.1.s8 %v12508_v27  ;;  %v5438_v7 = vld [vmem:[#allocation12 + $0x138] sm:$0xff] }
 0x4c2   :  { %v7145_v38 = vpack.c.bf16 %v6697_v58, %v6693_v48  ;;  %7573 = vmatprep.subr.bf16.mxu1 %v7148_v45  ;;  %v6699_v0 = vmul.f32 %v12334_v32, %v6165_v47  ;;  %v6170_v55 = vcvt.s32.f32 %v5658_v17  ;;  %v5655_v20 = vunpack.c.0.s8 %v5431_v62 }
 0x4c3   :  { %v6702_v60 = vmul.f32 %v12313_v54, %v6168_v42  ;;  %v6706_v22 = vmul.f32 %v12313_v54, %v6172_v33  ;;  %v6174_v13 = vcvt.s32.f32 %v5662_v10  ;;  %v5659_v53 = vunpack.c.1.s8 %v5431_v62  ;;  %v5435_v33 = vld [vmem:[#allocation12 + $0x120] sm:$0xff] }
 0x4c4   :  { %7402 = vmatpush1.bf16.msra.mxu0 %v7145_v38  ;;  %v5657_v31 = vunpack.c.0.s8 %v12517_v50  ;;  %v7147_v41 = vpack.c.bf16 %v6699_v0, %v6695_v43  ;;  %v6704_v23 = vmul.f32 %v12323_v6, %v6170_v55  ;;  %v6167_v30 = vcvt.s32.f32 %v5655_v20  ;;  %v12548_v20 = vld [vmem:[#allocation12 + $0x130] sm:$0xff] }
 0x4c5   :  { %v5661_v9 = vunpack.c.1.s8 %v12517_v50  ;;  %v7150_v18 = vpack.c.bf16 %v6706_v22, %v6702_v60  ;;  %v6708_v37 = vmul.f32 %v12323_v6, %v6174_v13  ;;  %v6171_v35 = vcvt.s32.f32 %v5659_v53 }
 0x4c6   :  { %v6169_v56 = vcvt.s32.f32 %v5657_v31  ;;  %7574 = vmatpush1.bf16.msra.mxu1 %v7147_v41  ;;  %v6701_v21 = vmul.f32 %v12327_v57, %v6167_v30  ;;  %v5664_v8 = vunpack.c.2.s8 %v12502_v2  ;;  %v5668_v63 = vunpack.c.3.s8 %v12502_v2 }
 0x4c7   :  { %7404 = vmatmul.mubr.bf16.vlgmr.msra.gmra.mrb[16].mxu0 %v12198_v28  ;;  %v6173_v49 = vcvt.s32.f32 %v5661_v9  ;;  %7414 = vmatprep.subr.bf16.mxu0 %v7150_v18  ;;  %v7152_v51 = vpack.c.bf16 %v6708_v37, %v6704_v23  ;;  %v6705_v1 = vmul.f32 %v12327_v57, %v6171_v35  ;;  %v5666_v26 = vunpack.c.2.s8 %v12508_v27 }
 0x4c8   :  { %7446 = vmatprep.mubr.bf16.mxu0 %v12215_v44  ;;  %v6703_v24 = vmul.f32 %v12334_v32, %v6169_v56  ;;  %v6176_v46 = vcvt.s32.f32 %v5664_v8  ;;  %v6180_v16 = vcvt.s32.f32 %v5668_v63  ;;  %v5670_v19 = vunpack.c.3.s8 %v12508_v27 }
 0x4c9   :  { %v6707_v3 = vmul.f32 %v12334_v32, %v6173_v49  ;;  %7576 = vmatmul.mubr.bf16.vlgmr.msra.gmra.mrb[16].mxu1 %v12198_v28  ;;  %7586 = vmatprep.subr.bf16.mxu1 %v7152_v51  ;;  %v7149_v2 = vpack.c.bf16 %v6705_v1, %v6701_v21  ;;  %v6178_v14 = vcvt.s32.f32 %v5666_v26  ;;  %v5663_v15 = vunpack.c.2.s8 %v5431_v62 }
 0x4ca   :  { %v5667_v12 = vunpack.c.3.s8 %v5431_v62  ;;  %7618 = vmatprep.mubr.bf16.mxu1 %v12215_v44  ;;  %v6710_v59 = vmul.f32 %v12313_v54, %v6176_v46  ;;  %v6714_v29 = vmul.f32 %v12313_v54, %v6180_v16  ;;  %v6182_v48 = vcvt.s32.f32 %v5670_v19 }
 0x4cb   :  { %v7151_v11 = vpack.c.bf16 %v6707_v3, %v6703_v24  ;;  %7415 = vmatpush1.bf16.msra.mxu0 %v7149_v2  ;;  %v6712_v58 = vmul.f32 %v12323_v6, %v6178_v14  ;;  %v6175_v27 = vcvt.s32.f32 %v5663_v15  ;;  %v5665_v28 = vunpack.c.2.s8 %v12517_v50 }
 0x4cc   :  { %v6179_v36 = vcvt.s32.f32 %v5667_v12  ;;  %v7154_v45 = vpack.c.bf16 %v6714_v29, %v6710_v59  ;;  %v6716_v62 = vmul.f32 %v12323_v6, %v6182_v48  ;;  %v5669_v47 = vunpack.c.3.s8 %v12517_v50 }
 0x4cd   :  { %7587 = vmatpush1.bf16.msra.mxu1 %v7151_v11  ;;  %v5672_v44 = vunpack.c.0.s8 %v5436_v4  ;;  %v6709_v42 = vmul.f32 %v12327_v57, %v6175_v27  ;;  %v6177_v38 = vcvt.s32.f32 %v5665_v28  ;;  %v5676_v43 = vunpack.c.1.s8 %v5436_v4  ;;  %v5440_v28 = vld [vmem:[#allocation12 + $0x148] sm:$0xff] }
 0x4ce   :  { %v6713_v17 = vmul.f32 %v12327_v57, %v6179_v36  ;;  %7416 = vmatprep.subr.bf16.mxu0 %v7154_v45  ;;  %v7156_v10 = vpack.c.bf16 %v6716_v62, %v6712_v58  ;;  %v6181_v0 = vcvt.s32.f32 %v5669_v47  ;;  %v5674_v55 = vunpack.c.0.s8 %v5438_v7 }
 0x4cf   :  { %v6184_v60 = vcvt.s32.f32 %v5672_v44  ;;  %v6711_v13 = vmul.f32 %v12334_v32, %v6177_v38  ;;  %v6188_v53 = vcvt.s32.f32 %v5676_v43  ;;  %v5678_v50 = vunpack.c.1.s8 %v5438_v7 }
 0x4d0   :  { %v7153_v22 = vpack.c.bf16 %v6713_v17, %v6709_v42  ;;  %7588 = vmatprep.subr.bf16.mxu1 %v7156_v10  ;;  %v6715_v31 = vmul.f32 %v12334_v32, %v6181_v0  ;;  %v6186_v23 = vcvt.s32.f32 %v5674_v55  ;;  %v5671_v30 = vunpack.c.0.s8 %v5435_v33 }
 0x4d1   :  { %v6718_v41 = vmul.f32 %v12313_v54, %v6184_v60  ;;  %v6722_v9 = vmul.f32 %v12313_v54, %v6188_v53  ;;  %v6190_v18 = vcvt.s32.f32 %v5678_v50  ;;  %v5675_v37 = vunpack.c.1.s8 %v5435_v33  ;;  %v5439_v53 = vld [vmem:[#allocation12 + $0x140] sm:$0xff] }
 0x4d2   :  { %7417 = vmatpush1.bf16.msra.mxu0 %v7153_v22  ;;  %v5673_v35 = vunpack.c.0.s8 %v12548_v20  ;;  %v7155_v56 = vpack.c.bf16 %v6715_v31, %v6711_v13  ;;  %v6720_v21 = vmul.f32 %v12323_v6, %v6186_v23  ;;  %v6183_v49 = vcvt.s32.f32 %v5671_v30  ;;  %v12570_v30 = vld [vmem:[#allocation12 + $0x150] sm:$0xff] }
 0x4d3   :  { %v5677_v8 = vunpack.c.1.s8 %v12548_v20  ;;  %v7158_v63 = vpack.c.bf16 %v6722_v9, %v6718_v41  ;;  %v6724_v51 = vmul.f32 %v12323_v6, %v6190_v18  ;;  %v6187_v1 = vcvt.s32.f32 %v5675_v37 }
 0x4d4   :  { %v6185_v24 = vcvt.s32.f32 %v5673_v35  ;;  %7589 = vmatpush1.bf16.msra.mxu1 %v7155_v56  ;;  %v6717_v26 = vmul.f32 %v12327_v57, %v6183_v49  ;;  %v5680_v46 = vunpack.c.2.s8 %v5436_v4  ;;  %v5684_v16 = vunpack.c.3.s8 %v5436_v4 }
 0x4d5   :  { %v6189_v3 = vcvt.s32.f32 %v5677_v8  ;;  %7418 = vmatprep.subr.bf16.mxu0 %v7158_v63  ;;  %v7160_v19 = vpack.c.bf16 %v6724_v51, %v6720_v21  ;;  %v6721_v2 = vmul.f32 %v12327_v57, %v6187_v1  ;;  %v5682_v15 = vunpack.c.2.s8 %v5438_v7 }
 0x4d6   :  { %v6719_v14 = vmul.f32 %v12334_v32, %v6185_v24  ;;  %v6192_v11 = vcvt.s32.f32 %v5680_v46  ;;  %v6196_v59 = vcvt.s32.f32 %v5684_v16  ;;  %v5686_v29 = vunpack.c.3.s8 %v5438_v7  ;;  %v5442_v7 = vld [vmem:[#allocation12 + $0x158] sm:$0xff] }
 0x4d7   :  { %v6723_v12 = vmul.f32 %v12334_v32, %v6189_v3  ;;  %7590 = vmatprep.subr.bf16.mxu1 %v7160_v19  ;;  %v7157_v48 = vpack.c.bf16 %v6721_v2, %v6717_v26  ;;  %v6194_v58 = vcvt.s32.f32 %v5682_v15  ;;  %v5679_v27 = vunpack.c.2.s8 %v5435_v33 }
 0x4d8   :  { %v5683_v36 = vunpack.c.3.s8 %v5435_v33  ;;  %v6726_v4 = vmul.f32 %v12313_v54, %v6192_v11  ;;  %v6730_v62 = vmul.f32 %v12313_v54, %v6196_v59  ;;  %v6198_v47 = vcvt.s32.f32 %v5686_v29 }
 0x4d9   :  { %v7159_v45 = vpack.c.bf16 %v6723_v12, %v6719_v14  ;;  %7419 = vmatpush1.bf16.msra.mxu0 %v7157_v48  ;;  %v6728_v44 = vmul.f32 %v12323_v6, %v6194_v58  ;;  %v6191_v42 = vcvt.s32.f32 %v5679_v27  ;;  %v5681_v38 = vunpack.c.2.s8 %v12548_v20 }
 0x4da   :  { %v6195_v17 = vcvt.s32.f32 %v5683_v36  ;;  %v7162_v43 = vpack.c.bf16 %v6730_v62, %v6726_v4  ;;  %v6732_v10 = vmul.f32 %v12323_v6, %v6198_v47  ;;  %v5685_v33 = vunpack.c.3.s8 %v12548_v20 }
 0x4db   :  { %7591 = vmatpush1.bf16.msra.mxu1 %v7159_v45  ;;  %v5688_v0 = vunpack.c.0.s8 %v5440_v28  ;;  %v6725_v60 = vmul.f32 %v12327_v57, %v6191_v42  ;;  %v6193_v22 = vcvt.s32.f32 %v5681_v38  ;;  %v5692_v13 = vunpack.c.1.s8 %v5440_v28  ;;  %v5444_v38 = vld [vmem:[#allocation12 + $0x168] sm:$0xff] }
 0x4dc   :  { %v6729_v55 = vmul.f32 %v12327_v57, %v6195_v17  ;;  %7420 = vmatprep.subr.bf16.mxu0 %v7162_v43  ;;  %v7164_v50 = vpack.c.bf16 %v6732_v10, %v6728_v44  ;;  %v6197_v31 = vcvt.s32.f32 %v5685_v33  ;;  %v5690_v23 = vunpack.c.0.s8 %v5442_v7 }
 0x4dd   :  { %v6200_v41 = vcvt.s32.f32 %v5688_v0  ;;  %v6727_v18 = vmul.f32 %v12334_v32, %v6193_v22  ;;  %v6204_v37 = vcvt.s32.f32 %v5692_v13  ;;  %v5694_v20 = vunpack.c.1.s8 %v5442_v7 }
 0x4de   :  { %v7161_v9 = vpack.c.bf16 %v6729_v55, %v6725_v60  ;;  %7592 = vmatprep.subr.bf16.mxu1 %v7164_v50  ;;  %v6731_v35 = vmul.f32 %v12334_v32, %v6197_v31  ;;  %v6202_v21 = vcvt.s32.f32 %v5690_v23  ;;  %v5687_v49 = vunpack.c.0.s8 %v5439_v53 }
 0x4df   :  { %v6734_v56 = vmul.f32 %v12313_v54, %v6200_v41  ;;  %v6738_v8 = vmul.f32 %v12313_v54, %v6204_v37  ;;  %v6206_v63 = vcvt.s32.f32 %v5694_v20  ;;  %v5691_v51 = vunpack.c.1.s8 %v5439_v53  ;;  %v5443_v37 = vld [vmem:[#allocation12 + $0x160] sm:$0xff] }
 0x4e0   :  { %7421 = vmatpush1.bf16.msra.mxu0 %v7161_v9  ;;  %v5689_v1 = vunpack.c.0.s8 %v12570_v30  ;;  %v7163_v24 = vpack.c.bf16 %v6731_v35, %v6727_v18  ;;  %v6736_v26 = vmul.f32 %v12323_v6, %v6202_v21  ;;  %v6199_v3 = vcvt.s32.f32 %v5687_v49  ;;  %v12592_v49 = vld [vmem:[#allocation12 + $0x170] sm:$0xff] }
 0x4e1   :  { %v5693_v46 = vunpack.c.1.s8 %v12570_v30  ;;  %v7166_v16 = vpack.c.bf16 %v6738_v8, %v6734_v56  ;;  %v6740_v19 = vmul.f32 %v12323_v6, %v6206_v63  ;;  %v6203_v2 = vcvt.s32.f32 %v5691_v51 }
 0x4e2   :  { %v6201_v14 = vcvt.s32.f32 %v5689_v1  ;;  %7593 = vmatpush1.bf16.msra.mxu1 %v7163_v24  ;;  %v6733_v15 = vmul.f32 %v12327_v57, %v6199_v3  ;;  %v5696_v11 = vunpack.c.2.s8 %v5440_v28  ;;  %v5700_v59 = vunpack.c.3.s8 %v5440_v28 }
 0x4e3   :  { %v6205_v12 = vcvt.s32.f32 %v5693_v46  ;;  %7422 = vmatprep.subr.bf16.mxu0 %v7166_v16  ;;  %v7168_v29 = vpack.c.bf16 %v6740_v19, %v6736_v26  ;;  %v6737_v48 = vmul.f32 %v12327_v57, %v6203_v2  ;;  %v5698_v27 = vunpack.c.2.s8 %v5442_v7 }
 0x4e4   :  { %v6735_v58 = vmul.f32 %v12334_v32, %v6201_v14  ;;  %v6208_v45 = vcvt.s32.f32 %v5696_v11  ;;  %v6212_v4 = vcvt.s32.f32 %v5700_v59  ;;  %v5702_v62 = vunpack.c.3.s8 %v5442_v7  ;;  %v5446_v7 = vld [vmem:[#allocation12 + $0x178] sm:$0xff] }
 0x4e5   :  { %v6739_v36 = vmul.f32 %v12334_v32, %v6205_v12  ;;  %7594 = vmatprep.subr.bf16.mxu1 %v7168_v29  ;;  %v7165_v47 = vpack.c.bf16 %v6737_v48, %v6733_v15  ;;  %v6210_v44 = vcvt.s32.f32 %v5698_v27  ;;  %v5695_v42 = vunpack.c.2.s8 %v5439_v53 }
 0x4e6   :  { %v5699_v17 = vunpack.c.3.s8 %v5439_v53  ;;  %v6742_v28 = vmul.f32 %v12313_v54, %v6208_v45  ;;  %v6746_v10 = vmul.f32 %v12313_v54, %v6212_v4  ;;  %v6214_v33 = vcvt.s32.f32 %v5702_v62 }
 0x4e7   :  { %v7167_v43 = vpack.c.bf16 %v6739_v36, %v6735_v58  ;;  %7423 = vmatpush1.bf16.msra.mxu0 %v7165_v47  ;;  %v6744_v0 = vmul.f32 %v12323_v6, %v6210_v44  ;;  %v6207_v60 = vcvt.s32.f32 %v5695_v42  ;;  %v5697_v22 = vunpack.c.2.s8 %v12570_v30 }
 0x4e8   :  { %v6211_v55 = vcvt.s32.f32 %v5699_v17  ;;  %v7170_v13 = vpack.c.bf16 %v6746_v10, %v6742_v28  ;;  %v6748_v50 = vmul.f32 %v12323_v6, %v6214_v33  ;;  %v5701_v53 = vunpack.c.3.s8 %v12570_v30 }
 0x4e9   :  { %7595 = vmatpush1.bf16.msra.mxu1 %v7167_v43  ;;  %v5704_v31 = vunpack.c.0.s8 %v5444_v38  ;;  %v6741_v41 = vmul.f32 %v12327_v57, %v6207_v60  ;;  %v6209_v9 = vcvt.s32.f32 %v5697_v22  ;;  %v5708_v18 = vunpack.c.1.s8 %v5444_v38  ;;  %v5448_v22 = vld [vmem:[#allocation12 + $0x188] sm:$0xff] }
 0x4ea   :  { %v6745_v23 = vmul.f32 %v12327_v57, %v6211_v55  ;;  %7424 = vmatprep.subr.bf16.mxu0 %v7170_v13  ;;  %v7172_v20 = vpack.c.bf16 %v6748_v50, %v6744_v0  ;;  %v6213_v35 = vcvt.s32.f32 %v5701_v53  ;;  %v5706_v21 = vunpack.c.0.s8 %v5446_v7 }
 0x4eb   :  { %v6216_v56 = vcvt.s32.f32 %v5704_v31  ;;  %v6743_v63 = vmul.f32 %v12334_v32, %v6209_v9  ;;  %v6220_v51 = vcvt.s32.f32 %v5708_v18  ;;  %v5710_v30 = vunpack.c.1.s8 %v5446_v7 }
 0x4ec   :  { %v7169_v8 = vpack.c.bf16 %v6745_v23, %v6741_v41  ;;  %7596 = vmatprep.subr.bf16.mxu1 %v7172_v20  ;;  %v6747_v1 = vmul.f32 %v12334_v32, %v6213_v35  ;;  %v6218_v26 = vcvt.s32.f32 %v5706_v21  ;;  %v5703_v3 = vunpack.c.0.s8 %v5443_v37 }
 0x4ed   :  { %v6750_v24 = vmul.f32 %v12313_v54, %v6216_v56  ;;  %v6754_v46 = vmul.f32 %v12313_v54, %v6220_v51  ;;  %v6222_v16 = vcvt.s32.f32 %v5710_v30  ;;  %v5707_v19 = vunpack.c.1.s8 %v5443_v37  ;;  %v5447_v51 = vld [vmem:[#allocation12 + $0x180] sm:$0xff] }
 0x4ee   :  { %7425 = vmatpush1.bf16.msra.mxu0 %v7169_v8  ;;  %v5705_v2 = vunpack.c.0.s8 %v12592_v49  ;;  %v7171_v14 = vpack.c.bf16 %v6747_v1, %v6743_v63  ;;  %v6752_v15 = vmul.f32 %v12323_v6, %v6218_v26  ;;  %v6215_v12 = vcvt.s32.f32 %v5703_v3  ;;  %v12614_v3 = vld [vmem:[#allocation12 + $0x190] sm:$0xff] }
 0x4ef   :  { %v5709_v11 = vunpack.c.1.s8 %v12592_v49  ;;  %v7174_v59 = vpack.c.bf16 %v6754_v46, %v6750_v24  ;;  %v6756_v29 = vmul.f32 %v12323_v6, %v6222_v16  ;;  %v6219_v48 = vcvt.s32.f32 %v5707_v19 }
 0x4f0   :  { %v6217_v58 = vcvt.s32.f32 %v5705_v2  ;;  %7597 = vmatpush1.bf16.msra.mxu1 %v7171_v14  ;;  %v6749_v27 = vmul.f32 %v12327_v57, %v6215_v12  ;;  %v5712_v45 = vunpack.c.2.s8 %v5444_v38  ;;  %v5716_v4 = vunpack.c.3.s8 %v5444_v38 }
 0x4f1   :  { %v6221_v36 = vcvt.s32.f32 %v5709_v11  ;;  %7426 = vmatprep.subr.bf16.mxu0 %v7174_v59  ;;  %v7176_v62 = vpack.c.bf16 %v6756_v29, %v6752_v15  ;;  %v6753_v47 = vmul.f32 %v12327_v57, %v6219_v48  ;;  %v5714_v42 = vunpack.c.2.s8 %v5446_v7 }
 0x4f2   :  { %v6751_v44 = vmul.f32 %v12334_v32, %v6217_v58  ;;  %v6224_v43 = vcvt.s32.f32 %v5712_v45  ;;  %v6228_v28 = vcvt.s32.f32 %v5716_v4  ;;  %v5718_v10 = vunpack.c.3.s8 %v5446_v7  ;;  %v5450_v7 = vld [vmem:[#allocation12 + $0x198] sm:$0xff] }
 0x4f3   :  { %v6755_v17 = vmul.f32 %v12334_v32, %v6221_v36  ;;  %7598 = vmatprep.subr.bf16.mxu1 %v7176_v62  ;;  %v7173_v33 = vpack.c.bf16 %v6753_v47, %v6749_v27  ;;  %v6226_v0 = vcvt.s32.f32 %v5714_v42  ;;  %v5711_v60 = vunpack.c.2.s8 %v5443_v37 }
 0x4f4   :  { %v5715_v55 = vunpack.c.3.s8 %v5443_v37  ;;  %v6758_v38 = vmul.f32 %v12313_v54, %v6224_v43  ;;  %v6762_v50 = vmul.f32 %v12313_v54, %v6228_v28  ;;  %v6230_v53 = vcvt.s32.f32 %v5718_v10 }
 0x4f5   :  { %v7175_v13 = vpack.c.bf16 %v6755_v17, %v6751_v44  ;;  %7427 = vmatpush1.bf16.msra.mxu0 %v7173_v33  ;;  %v6760_v31 = vmul.f32 %v12323_v6, %v6226_v0  ;;  %v6223_v41 = vcvt.s32.f32 %v5711_v60  ;;  %v5713_v9 = vunpack.c.2.s8 %v12592_v49 }
 0x4f6   :  { %v6227_v23 = vcvt.s32.f32 %v5715_v55  ;;  %v7178_v18 = vpack.c.bf16 %v6762_v50, %v6758_v38  ;;  %v6764_v20 = vmul.f32 %v12323_v6, %v6230_v53  ;;  %v5717_v37 = vunpack.c.3.s8 %v12592_v49 }
 0x4f7   :  { %7599 = vmatpush1.bf16.msra.mxu1 %v7175_v13  ;;  %v5720_v35 = vunpack.c.0.s8 %v5448_v22  ;;  %v6757_v56 = vmul.f32 %v12327_v57, %v6223_v41  ;;  %v6225_v8 = vcvt.s32.f32 %v5713_v9  ;;  %v5724_v63 = vunpack.c.1.s8 %v5448_v22  ;;  %v5452_v9 = vld [vmem:[#allocation12 + $0x1a8] sm:$0xff] }
 0x4f8   :  { %v6761_v21 = vmul.f32 %v12327_v57, %v6227_v23  ;;  %7428 = vmatprep.subr.bf16.mxu0 %v7178_v18  ;;  %v7180_v30 = vpack.c.bf16 %v6764_v20, %v6760_v31  ;;  %v6229_v1 = vcvt.s32.f32 %v5717_v37  ;;  %v5722_v26 = vunpack.c.0.s8 %v5450_v7 }
 0x4f9   :  { %v6232_v24 = vcvt.s32.f32 %v5720_v35  ;;  %v6759_v16 = vmul.f32 %v12334_v32, %v6225_v8  ;;  %v6236_v19 = vcvt.s32.f32 %v5724_v63  ;;  %v5726_v49 = vunpack.c.1.s8 %v5450_v7 }
 0x4fa   :  { %v7177_v46 = vpack.c.bf16 %v6761_v21, %v6757_v56  ;;  %7600 = vmatprep.subr.bf16.mxu1 %v7180_v30  ;;  %v6763_v2 = vmul.f32 %v12334_v32, %v6229_v1  ;;  %v6234_v15 = vcvt.s32.f32 %v5722_v26  ;;  %v5719_v12 = vunpack.c.0.s8 %v5447_v51 }
 0x4fb   :  { %v6766_v14 = vmul.f32 %v12313_v54, %v6232_v24  ;;  %v6770_v11 = vmul.f32 %v12313_v54, %v6236_v19  ;;  %v6238_v59 = vcvt.s32.f32 %v5726_v49  ;;  %v5723_v29 = vunpack.c.1.s8 %v5447_v51  ;;  %v5451_v19 = vld [vmem:[#allocation12 + $0x1a0] sm:$0xff] }
 0x4fc   :  { %7429 = vmatpush1.bf16.msra.mxu0 %v7177_v46  ;;  %v5721_v48 = vunpack.c.0.s8 %v12614_v3  ;;  %v7179_v58 = vpack.c.bf16 %v6763_v2, %v6759_v16  ;;  %v6768_v27 = vmul.f32 %v12323_v6, %v6234_v15  ;;  %v6231_v36 = vcvt.s32.f32 %v5719_v12  ;;  %v12636_v12 = vld [vmem:[#allocation12 + $0x1b0] sm:$0xff] }
 0x4fd   :  { %v5725_v45 = vunpack.c.1.s8 %v12614_v3  ;;  %v7182_v4 = vpack.c.bf16 %v6770_v11, %v6766_v14  ;;  %v6772_v62 = vmul.f32 %v12323_v6, %v6238_v59  ;;  %v6235_v47 = vcvt.s32.f32 %v5723_v29 }
 0x4fe   :  { %v6233_v44 = vcvt.s32.f32 %v5721_v48  ;;  %7601 = vmatpush1.bf16.msra.mxu1 %v7179_v58  ;;  %v6765_v42 = vmul.f32 %v12327_v57, %v6231_v36  ;;  %v5728_v43 = vunpack.c.2.s8 %v5448_v22  ;;  %v5732_v28 = vunpack.c.3.s8 %v5448_v22 }
 0x4ff   :  { %v6237_v17 = vcvt.s32.f32 %v5725_v45  ;;  %7430 = vmatprep.subr.bf16.mxu0 %v7182_v4  ;;  %v7184_v10 = vpack.c.bf16 %v6772_v62, %v6768_v27  ;;  %v6769_v33 = vmul.f32 %v12327_v57, %v6235_v47  ;;  %v5730_v60 = vunpack.c.2.s8 %v5450_v7 }
 0x500   :  { %v6767_v0 = vmul.f32 %v12334_v32, %v6233_v44  ;;  %v6240_v13 = vcvt.s32.f32 %v5728_v43  ;;  %v6244_v38 = vcvt.s32.f32 %v5732_v28  ;;  %v5734_v50 = vunpack.c.3.s8 %v5450_v7  ;;  %v5454_v7 = vld [vmem:[#allocation12 + $0x1b8] sm:$0xff] }
 0x501   :  { %v6771_v55 = vmul.f32 %v12334_v32, %v6237_v17  ;;  %7602 = vmatprep.subr.bf16.mxu1 %v7184_v10  ;;  %v7181_v53 = vpack.c.bf16 %v6769_v33, %v6765_v42  ;;  %v6242_v31 = vcvt.s32.f32 %v5730_v60  ;;  %v5727_v41 = vunpack.c.2.s8 %v5447_v51 }
 0x502   :  { %v5731_v23 = vunpack.c.3.s8 %v5447_v51  ;;  %v6774_v22 = vmul.f32 %v12313_v54, %v6240_v13  ;;  %v6778_v20 = vmul.f32 %v12313_v54, %v6244_v38  ;;  %v6246_v37 = vcvt.s32.f32 %v5734_v50 }
 0x503   :  { %v7183_v18 = vpack.c.bf16 %v6771_v55, %v6767_v0  ;;  %7431 = vmatpush1.bf16.msra.mxu0 %v7181_v53  ;;  %v6776_v35 = vmul.f32 %v12323_v6, %v6242_v31  ;;  %v6239_v56 = vcvt.s32.f32 %v5727_v41  ;;  %v5729_v8 = vunpack.c.2.s8 %v12614_v3 }
 0x504   :  { %v6243_v21 = vcvt.s32.f32 %v5731_v23  ;;  %v7186_v63 = vpack.c.bf16 %v6778_v20, %v6774_v22  ;;  %v6780_v30 = vmul.f32 %v12323_v6, %v6246_v37  ;;  %v5733_v51 = vunpack.c.3.s8 %v12614_v3 }
 0x505   :  { %7603 = vmatpush1.bf16.msra.mxu1 %v7183_v18  ;;  %v5736_v1 = vunpack.c.0.s8 %v5452_v9  ;;  %v6773_v24 = vmul.f32 %v12327_v57, %v6239_v56  ;;  %v6241_v46 = vcvt.s32.f32 %v5729_v8  ;;  %v5740_v16 = vunpack.c.1.s8 %v5452_v9  ;;  %v5456_v8 = vld [vmem:[#allocation12 + $0x1c8] sm:$0xff] }
 0x506   :  { %v6777_v26 = vmul.f32 %v12327_v57, %v6243_v21  ;;  %7432 = vmatprep.subr.bf16.mxu0 %v7186_v63  ;;  %v7188_v49 = vpack.c.bf16 %v6780_v30, %v6776_v35  ;;  %v6245_v2 = vcvt.s32.f32 %v5733_v51  ;;  %v5738_v15 = vunpack.c.0.s8 %v5454_v7 }
 0x507   :  { %v6248_v14 = vcvt.s32.f32 %v5736_v1  ;;  %v6775_v59 = vmul.f32 %v12334_v32, %v6241_v46  ;;  %v6252_v29 = vcvt.s32.f32 %v5740_v16  ;;  %v5742_v3 = vunpack.c.1.s8 %v5454_v7 }
 0x508   :  { %v7185_v11 = vpack.c.bf16 %v6777_v26, %v6773_v24  ;;  %7604 = vmatprep.subr.bf16.mxu1 %v7188_v49  ;;  %v6779_v48 = vmul.f32 %v12334_v32, %v6245_v2  ;;  %v6250_v27 = vcvt.s32.f32 %v5738_v15  ;;  %v5735_v36 = vunpack.c.0.s8 %v5451_v19 }
 0x509   :  { %v6782_v58 = vmul.f32 %v12313_v54, %v6248_v14  ;;  %v6786_v45 = vmul.f32 %v12313_v54, %v6252_v29  ;;  %v6254_v4 = vcvt.s32.f32 %v5742_v3  ;;  %v5739_v62 = vunpack.c.1.s8 %v5451_v19  ;;  %v5455_v29 = vld [vmem:[#allocation12 + $0x1c0] sm:$0xff] }
 0x50a   :  { %7433 = vmatpush1.bf16.msra.mxu0 %v7185_v11  ;;  %v5737_v47 = vunpack.c.0.s8 %v12636_v12  ;;  %v7187_v44 = vpack.c.bf16 %v6779_v48, %v6775_v59  ;;  %v6784_v42 = vmul.f32 %v12323_v6, %v6250_v27  ;;  %v6247_v17 = vcvt.s32.f32 %v5735_v36  ;;  %v12658_v36 = vld [vmem:[#allocation12 + $0x1d0] sm:$0xff] }
 0x50b   :  { %v5741_v43 = vunpack.c.1.s8 %v12636_v12  ;;  %v7190_v28 = vpack.c.bf16 %v6786_v45, %v6782_v58  ;;  %v6788_v10 = vmul.f32 %v12323_v6, %v6254_v4  ;;  %v6251_v33 = vcvt.s32.f32 %v5739_v62 }
 0x50c   :  { %v6249_v0 = vcvt.s32.f32 %v5737_v47  ;;  %7605 = vmatpush1.bf16.msra.mxu1 %v7187_v44  ;;  %v6781_v60 = vmul.f32 %v12327_v57, %v6247_v17  ;;  %v5744_v13 = vunpack.c.2.s8 %v5452_v9  ;;  %v5748_v38 = vunpack.c.3.s8 %v5452_v9 }
 0x50d   :  { %v6253_v55 = vcvt.s32.f32 %v5741_v43  ;;  %7434 = vmatprep.subr.bf16.mxu0 %v7190_v28  ;;  %v7192_v50 = vpack.c.bf16 %v6788_v10, %v6784_v42  ;;  %v6785_v53 = vmul.f32 %v12327_v57, %v6251_v33  ;;  %v5746_v41 = vunpack.c.2.s8 %v5454_v7 }
 0x50e   :  { %v6783_v31 = vmul.f32 %v12334_v32, %v6249_v0  ;;  %v6256_v18 = vcvt.s32.f32 %v5744_v13  ;;  %v6260_v22 = vcvt.s32.f32 %v5748_v38  ;;  %v5750_v20 = vunpack.c.3.s8 %v5454_v7  ;;  %v5458_v7 = vld [vmem:[#allocation12 + $0x1d8] sm:$0xff] }
 0x50f   :  { %v6787_v23 = vmul.f32 %v12334_v32, %v6253_v55  ;;  %7606 = vmatprep.subr.bf16.mxu1 %v7192_v50  ;;  %v7189_v37 = vpack.c.bf16 %v6785_v53, %v6781_v60  ;;  %v6258_v35 = vcvt.s32.f32 %v5746_v41  ;;  %v5743_v56 = vunpack.c.2.s8 %v5451_v19 }
 0x510   :  { %v5747_v21 = vunpack.c.3.s8 %v5451_v19  ;;  %v6790_v9 = vmul.f32 %v12313_v54, %v6256_v18  ;;  %v6794_v30 = vmul.f32 %v12313_v54, %v6260_v22  ;;  %v6262_v51 = vcvt.s32.f32 %v5750_v20 }
 0x511   :  { %v7191_v63 = vpack.c.bf16 %v6787_v23, %v6783_v31  ;;  %7435 = vmatpush1.bf16.msra.mxu0 %v7189_v37  ;;  %v6792_v1 = vmul.f32 %v12323_v6, %v6258_v35  ;;  %v6255_v24 = vcvt.s32.f32 %v5743_v56  ;;  %v5745_v46 = vunpack.c.2.s8 %v12636_v12 }
 0x512   :  { %v6259_v26 = vcvt.s32.f32 %v5747_v21  ;;  %v7194_v16 = vpack.c.bf16 %v6794_v30, %v6790_v9  ;;  %v6796_v49 = vmul.f32 %v12323_v6, %v6262_v51  ;;  %v5749_v19 = vunpack.c.3.s8 %v12636_v12 }
 0x513   :  { %7607 = vmatpush1.bf16.msra.mxu1 %v7191_v63  ;;  %v5752_v2 = vunpack.c.0.s8 %v5456_v8  ;;  %v6789_v14 = vmul.f32 %v12327_v57, %v6255_v24  ;;  %v6257_v11 = vcvt.s32.f32 %v5745_v46  ;;  %v5756_v59 = vunpack.c.1.s8 %v5456_v8  ;;  %v5460_v46 = vld [vmem:[#allocation12 + $0x1e8] sm:$0xff] }
 0x514   :  { %v6793_v15 = vmul.f32 %v12327_v57, %v6259_v26  ;;  %7436 = vmatprep.subr.bf16.mxu0 %v7194_v16  ;;  %v7196_v3 = vpack.c.bf16 %v6796_v49, %v6792_v1  ;;  %v6261_v48 = vcvt.s32.f32 %v5749_v19  ;;  %v5754_v27 = vunpack.c.0.s8 %v5458_v7 }
 0x515   :  { %v6264_v58 = vcvt.s32.f32 %v5752_v2  ;;  %v6791_v4 = vmul.f32 %v12334_v32, %v6257_v11  ;;  %v6268_v62 = vcvt.s32.f32 %v5756_v59  ;;  %v5758_v12 = vunpack.c.1.s8 %v5458_v7 }
 0x516   :  { %v7193_v45 = vpack.c.bf16 %v6793_v15, %v6789_v14  ;;  %7608 = vmatprep.subr.bf16.mxu1 %v7196_v3  ;;  %v6795_v47 = vmul.f32 %v12334_v32, %v6261_v48  ;;  %v6266_v42 = vcvt.s32.f32 %v5754_v27  ;;  %v5751_v17 = vunpack.c.0.s8 %v5455_v29 }
 0x517   :  { %v6798_v44 = vmul.f32 %v12313_v54, %v6264_v58  ;;  %v6802_v43 = vmul.f32 %v12313_v54, %v6268_v62  ;;  %v6270_v28 = vcvt.s32.f32 %v5758_v12  ;;  %v5755_v10 = vunpack.c.1.s8 %v5455_v29  ;;  %v12682_v62 = vld [vmem:[#allocation12 + $0x1e0] sm:$0xff] }
 0x518   :  { %7437 = vmatpush1.bf16.msra.mxu0 %v7193_v45  ;;  %v5753_v33 = vunpack.c.0.s8 %v12658_v36  ;;  %v7195_v0 = vpack.c.bf16 %v6795_v47, %v6791_v4  ;;  %v6800_v60 = vmul.f32 %v12323_v6, %v6266_v42  ;;  %v6263_v55 = vcvt.s32.f32 %v5751_v17  ;;  %v12685_v17 = vld [vmem:[#allocation12 + $0x1f0] sm:$0xff] }
 0x519   :  { %v5757_v13 = vunpack.c.1.s8 %v12658_v36  ;;  %v7198_v38 = vpack.c.bf16 %v6802_v43, %v6798_v44  ;;  %v6804_v50 = vmul.f32 %v12323_v6, %v6270_v28  ;;  %v6267_v53 = vcvt.s32.f32 %v5755_v10 }
 0x51a   :  { %v6265_v31 = vcvt.s32.f32 %v5753_v33  ;;  %7609 = vmatpush1.bf16.msra.mxu1 %v7195_v0  ;;  %v6797_v41 = vmul.f32 %v12327_v57, %v6263_v55  ;;  %v5760_v18 = vunpack.c.2.s8 %v5456_v8  ;;  %v5764_v22 = vunpack.c.3.s8 %v5456_v8 }
 0x51b   :  { %v6269_v23 = vcvt.s32.f32 %v5757_v13  ;;  %7438 = vmatprep.subr.bf16.mxu0 %v7198_v38  ;;  %v7200_v20 = vpack.c.bf16 %v6804_v50, %v6800_v60  ;;  %v6801_v37 = vmul.f32 %v12327_v57, %v6267_v53  ;;  %v5762_v56 = vunpack.c.2.s8 %v5458_v7 }
 0x51c   :  { %v6799_v35 = vmul.f32 %v12334_v32, %v6265_v31  ;;  %v6272_v63 = vcvt.s32.f32 %v5760_v18  ;;  %v6276_v9 = vcvt.s32.f32 %v5764_v22  ;;  %v5766_v30 = vunpack.c.3.s8 %v5458_v7  ;;  %v12676_v7 = vld [vmem:[#allocation12 + $0x1f8] sm:$0xff] }
 0x51d   :  { %v6803_v21 = vmul.f32 %v12334_v32, %v6269_v23  ;;  %7610 = vmatprep.subr.bf16.mxu1 %v7200_v20  ;;  %v7197_v51 = vpack.c.bf16 %v6801_v37, %v6797_v41  ;;  %v6274_v1 = vcvt.s32.f32 %v5762_v56  ;;  %v5759_v24 = vunpack.c.2.s8 %v5455_v29 }
 0x51e   :  { %v5763_v26 = vunpack.c.3.s8 %v5455_v29  ;;  %v6806_v8 = vmul.f32 %v12313_v54, %v6272_v63  ;;  %v6810_v49 = vmul.f32 %v12313_v54, %v6276_v9  ;;  %v6278_v19 = vcvt.s32.f32 %v5766_v30 }
 0x51f   :  { %v7199_v16 = vpack.c.bf16 %v6803_v21, %v6799_v35  ;;  %7439 = vmatpush1.bf16.msra.mxu0 %v7197_v51  ;;  %v6808_v2 = vmul.f32 %v12323_v6, %v6274_v1  ;;  %v6271_v14 = vcvt.s32.f32 %v5759_v24  ;;  %v5761_v11 = vunpack.c.2.s8 %v12658_v36 }
 0x520   :  { %v6275_v15 = vcvt.s32.f32 %v5763_v26  ;;  %v7202_v59 = vpack.c.bf16 %v6810_v49, %v6806_v8  ;;  %v6812_v29 = vmul.f32 %v12323_v6, %v6278_v19  ;;  %v5765_v3 = vunpack.c.3.s8 %v12658_v36 }
 0x521   :  { %7611 = vmatpush1.bf16.msra.mxu1 %v7199_v16  ;;  %v5768_v48 = vunpack.c.0.s8 %v5460_v46  ;;  %v6805_v58 = vmul.f32 %v12327_v57, %v6271_v14  ;;  %v6273_v45 = vcvt.s32.f32 %v5761_v11  ;;  %v5772_v4 = vunpack.c.1.s8 %v5460_v46 }
 0x522   :  { %v6809_v27 = vmul.f32 %v12327_v57, %v6275_v15  ;;  %7440 = vmatprep.subr.bf16.mxu0 %v7202_v59  ;;  %v7204_v12 = vpack.c.bf16 %v6812_v29, %v6808_v2  ;;  %v6277_v47 = vcvt.s32.f32 %v5765_v3  ;;  %v5770_v42 = vunpack.c.0.s8 %v12676_v7  ;;  %v12712_v29 = vld [vmem:[#allocation12 + $0x208] sm:$0xff] }
 0x523   :  { %v6280_v44 = vcvt.s32.f32 %v5768_v48  ;;  %v6807_v36 = vmul.f32 %v12334_v32, %v6273_v45  ;;  %v6284_v28 = vcvt.s32.f32 %v5772_v4  ;;  %v5774_v10 = vunpack.c.1.s8 %v12676_v7 }
 0x524   :  { %v7201_v43 = vpack.c.bf16 %v6809_v27, %v6805_v58  ;;  %7612 = vmatprep.subr.bf16.mxu1 %v7204_v12  ;;  %v6811_v33 = vmul.f32 %v12334_v32, %v6277_v47  ;;  %v6282_v60 = vcvt.s32.f32 %v5770_v42  ;;  %v5767_v55 = vunpack.c.0.s8 %v12682_v62 }
 0x525   :  { %v6814_v0 = vmul.f32 %v12313_v54, %v6280_v44  ;;  %v6818_v13 = vmul.f32 %v12313_v54, %v6284_v28  ;;  %v6286_v38 = vcvt.s32.f32 %v5774_v10  ;;  %v5771_v50 = vunpack.c.1.s8 %v12682_v62 }
 0x526   :  { %7441 = vmatpush1.bf16.msra.mxu0 %v7201_v43  ;;  %v5769_v53 = vunpack.c.0.s8 %v12685_v17  ;;  %v7203_v31 = vpack.c.bf16 %v6811_v33, %v6807_v36  ;;  %v6816_v41 = vmul.f32 %v12323_v6, %v6282_v60  ;;  %v6279_v23 = vcvt.s32.f32 %v5767_v55  ;;  %v12726_v43 = vld [vmem:[#allocation12 + $0x218] sm:$0xff] }
 0x527   :  { %v5773_v18 = vunpack.c.1.s8 %v12685_v17  ;;  %v7206_v22 = vpack.c.bf16 %v6818_v13, %v6814_v0  ;;  %v6820_v20 = vmul.f32 %v12323_v6, %v6286_v38  ;;  %v6283_v37 = vcvt.s32.f32 %v5771_v50  ;;  %v5463_v50 = vld [vmem:[#allocation12 + $0x200] sm:$0xff] }
 0x528   :  { %v6281_v35 = vcvt.s32.f32 %v5769_v53  ;;  %7613 = vmatpush1.bf16.msra.mxu1 %v7203_v31  ;;  %v6813_v56 = vmul.f32 %v12327_v57, %v6279_v23  ;;  %v5776_v63 = vunpack.c.2.s8 %v5460_v46  ;;  %v5780_v9 = vunpack.c.3.s8 %v5460_v46 }
 0x529   :  { %v6285_v21 = vcvt.s32.f32 %v5773_v18  ;;  %7442 = vmatprep.subr.bf16.mxu0 %v7206_v22  ;;  %v7208_v30 = vpack.c.bf16 %v6820_v20, %v6816_v41  ;;  %v6817_v51 = vmul.f32 %v12327_v57, %v6283_v37  ;;  %v5778_v24 = vunpack.c.2.s8 %v12676_v7  ;;  %v12702_v26 = vpop.f32.mrb[12].mxu0  ;;  %v12737_v18 = vld [vmem:[#allocation12 + $0x210] sm:$0xff] }
 0x52a   :  { %v6815_v1 = vmul.f32 %v12334_v32, %v6281_v35  ;;  %v6288_v8 = vcvt.s32.f32 %v5776_v63  ;;  %v6292_v49 = vcvt.s32.f32 %v5780_v9  ;;  %v5782_v19 = vunpack.c.3.s8 %v12676_v7  ;;  %v12708_v14 = vpop.f32.mrb[13].mxu0 }
 0x52b   :  { %v6819_v16 = vmul.f32 %v12334_v32, %v6285_v21  ;;  %v12706_v2 = vpop.f32.mrb[12].mxu1  ;;  %7614 = vmatprep.subr.bf16.mxu1 %v7208_v30  ;;  %v7205_v46 = vpack.c.bf16 %v6817_v51, %v6813_v56  ;;  %v6290_v15 = vcvt.s32.f32 %v5778_v24  ;;  %v5775_v11 = vunpack.c.2.s8 %v12682_v62  ;;  %v12716_v48 = vpop.f32.mrb[14].mxu0 }
 0x52c   :  { %v5779_v59 = vunpack.c.3.s8 %v12682_v62  ;;  %v12714_v3 = vpop.f32.mrb[13].mxu1  ;;  %v6822_v7 = vmul.f32 %v12313_v54, %v6288_v8  ;;  %v6826_v27 = vmul.f32 %v12313_v54, %v6292_v49  ;;  %v6294_v45 = vcvt.s32.f32 %v5782_v19  ;;  %v12722_v12 = vpop.f32.mrb[15].mxu0 }
 0x52d   :  { %v7207_v58 = vpack.c.bf16 %v6819_v16, %v6815_v1  ;;  %v12720_v4 = vpop.f32.mrb[14].mxu1  ;;  %7443 = vmatpush1.bf16.msra.mxu0 %v7205_v46  ;;  %v6824_v47 = vmul.f32 %v12323_v6, %v6290_v15  ;;  %v6287_v62 = vcvt.s32.f32 %v5775_v11  ;;  %v5777_v42 = vunpack.c.2.s8 %v12685_v17 }
 0x52e   :  { %v6291_v44 = vcvt.s32.f32 %v5779_v59  ;;  %v12728_v36 = vpop.f32.mrb[15].mxu1  ;;  %v7210_v28 = vpack.c.bf16 %v6826_v27, %v6822_v7  ;;  %v6828_v10 = vmul.f32 %v12323_v6, %v6294_v45  ;;  %v5781_v33 = vunpack.c.3.s8 %v12685_v17 }
 0x52f   :  { %7615 = vmatpush1.bf16.msra.mxu1 %v7207_v58  ;;  %v5784_v0 = vunpack.c.0.s8 %v12712_v29  ;;  %v6821_v60 = vmul.f32 %v12327_v57, %v6287_v62  ;;  %v6289_v13 = vcvt.s32.f32 %v5777_v42  ;;  %v5788_v38 = vunpack.c.1.s8 %v12712_v29 }
 0x530   :  { %v6825_v55 = vmul.f32 %v12327_v57, %v6291_v44  ;;  %7444 = vmatprep.subr.bf16.mxu0 %v7210_v28  ;;  %v7212_v53 = vpack.c.bf16 %v6828_v10, %v6824_v47  ;;  %v6293_v31 = vcvt.s32.f32 %v5781_v33  ;;  %v5786_v23 = vunpack.c.0.s8 %v12726_v43 }
 0x531   :  { %v6296_v41 = vcvt.s32.f32 %v5784_v0  ;;  %v6823_v17 = vmul.f32 %v12334_v32, %v6289_v13  ;;  %v6300_v20 = vcvt.s32.f32 %v5788_v38  ;;  %v5790_v37 = vunpack.c.1.s8 %v12726_v43  ;;  %v5468_v13 = vld [vmem:[#allocation12 + $0x228] sm:$0xff] }
 0x532   :  { %v7209_v22 = vpack.c.bf16 %v6825_v55, %v6821_v60  ;;  %7616 = vmatprep.subr.bf16.mxu1 %v7212_v53  ;;  %v6827_v35 = vmul.f32 %v12334_v32, %v6293_v31  ;;  %v6298_v21 = vcvt.s32.f32 %v5786_v23  ;;  %v5783_v63 = vunpack.c.0.s8 %v5463_v50 }
 0x533   :  { %v6830_v56 = vmul.f32 %v12313_v54, %v6296_v41  ;;  %v6834_v9 = vmul.f32 %v12313_v54, %v6300_v20  ;;  %v6302_v30 = vcvt.s32.f32 %v5790_v37  ;;  %v5787_v51 = vunpack.c.1.s8 %v5463_v50 }
 0x534   :  { %7445 = vmatpush1.bf16.msra.mxu0 %v7209_v22  ;;  %v5785_v1 = vunpack.c.0.s8 %v12737_v18  ;;  %v7211_v24 = vpack.c.bf16 %v6827_v35, %v6823_v17  ;;  %v6832_v16 = vmul.f32 %v12323_v6, %v6298_v21  ;;  %v6295_v8 = vcvt.s32.f32 %v5783_v63 }
 0x535   :  { %v5789_v49 = vunpack.c.1.s8 %v12737_v18  ;;  %v7214_v19 = vpack.c.bf16 %v6834_v9, %v6830_v56  ;;  %v6836_v46 = vmul.f32 %v12323_v6, %v6302_v30  ;;  %v6299_v15 = vcvt.s32.f32 %v5787_v51  ;;  %v5467_v30 = vld [vmem:[#allocation12 + $0x220] sm:$0xff] }
 0x536   :  { %v6297_v11 = vcvt.s32.f32 %v5785_v1  ;;  %7617 = vmatpush1.bf16.msra.mxu1 %v7211_v24  ;;  %v6829_v59 = vmul.f32 %v12327_v57, %v6295_v8  ;;  %v5792_v7 = vunpack.c.2.s8 %v12712_v29  ;;  %v5796_v27 = vunpack.c.3.s8 %v12712_v29  ;;  %v12766_v8 = vld [vmem:[#allocation12 + $0x230] sm:$0xff] }
 0x537   :  { %7447 = vmatmul.mubr.bf16.vlgmr.msra.gmra.mrb[16].mxu0 %v12200_v61  ;;  %v6301_v58 = vcvt.s32.f32 %v5789_v49  ;;  %7457 = vmatprep.subr.bf16.mxu0 %v7214_v19  ;;  %v7216_v45 = vpack.c.bf16 %v6836_v46, %v6832_v16  ;;  %v6833_v47 = vmul.f32 %v12327_v57, %v6299_v15  ;;  %v5794_v44 = vunpack.c.2.s8 %v12726_v43 }
 0x538   :  { %v6831_v62 = vmul.f32 %v12334_v32, %v6297_v11  ;;  %v6304_v28 = vcvt.s32.f32 %v5792_v7  ;;  %v6308_v10 = vcvt.s32.f32 %v5796_v27  ;;  %v5798_v33 = vunpack.c.3.s8 %v12726_v43 }
 0x539   :  { %v6835_v42 = vmul.f32 %v12334_v32, %v6301_v58  ;;  %7619 = vmatmul.mubr.bf16.vlgmr.msra.gmra.mrb[16].mxu1 %v12200_v61  ;;  %7629 = vmatprep.subr.bf16.mxu1 %v7216_v45  ;;  %v7213_v0 = vpack.c.bf16 %v6833_v47, %v6829_v59  ;;  %v6306_v60 = vcvt.s32.f32 %v5794_v44  ;;  %v5791_v29 = vunpack.c.2.s8 %v5463_v50  ;;  %v5470_v61 = vld [vmem:[#allocation12 + $0x238] sm:$0xff] }
 0x53a   :  { %v5795_v55 = vunpack.c.3.s8 %v5463_v50  ;;  %v6838_v53 = vmul.f32 %v12313_v54, %v6304_v28  ;;  %v6842_v31 = vmul.f32 %v12313_v54, %v6308_v10  ;;  %v6310_v41 = vcvt.s32.f32 %v5798_v33 }
 0x53b   :  { %v7215_v38 = vpack.c.bf16 %v6835_v42, %v6831_v62  ;;  %7458 = vmatpush1.bf16.msra.mxu0 %v7213_v0  ;;  %v6840_v23 = vmul.f32 %v12323_v6, %v6306_v60  ;;  %v6303_v22 = vcvt.s32.f32 %v5791_v29  ;;  %v5793_v43 = vunpack.c.2.s8 %v12737_v18 }
 0x53c   :  { %v6307_v17 = vcvt.s32.f32 %v5795_v55  ;;  %v7218_v20 = vpack.c.bf16 %v6842_v31, %v6838_v53  ;;  %v6844_v37 = vmul.f32 %v12323_v6, %v6310_v41  ;;  %v5797_v50 = vunpack.c.3.s8 %v12737_v18 }
 0x53d   :  { %7630 = vmatpush1.bf16.msra.mxu1 %v7215_v38  ;;  %v5800_v35 = vunpack.c.0.s8 %v5468_v13  ;;  %v6837_v56 = vmul.f32 %v12327_v57, %v6303_v22  ;;  %v6305_v63 = vcvt.s32.f32 %v5793_v43  ;;  %v5804_v9 = vunpack.c.1.s8 %v5468_v13 }
 0x53e   :  { %v6841_v21 = vmul.f32 %v12327_v57, %v6307_v17  ;;  %7459 = vmatprep.subr.bf16.mxu0 %v7218_v20  ;;  %v7220_v51 = vpack.c.bf16 %v6844_v37, %v6840_v23  ;;  %v6309_v1 = vcvt.s32.f32 %v5797_v50  ;;  %v5802_v16 = vunpack.c.0.s8 %v5470_v61 }
 0x53f   :  { %v6312_v24 = vcvt.s32.f32 %v5800_v35  ;;  %v6839_v19 = vmul.f32 %v12334_v32, %v6305_v63  ;;  %v6316_v46 = vcvt.s32.f32 %v5804_v9  ;;  %v5806_v18 = vunpack.c.1.s8 %v5470_v61  ;;  %v5472_v63 = vld [vmem:[#allocation12 + $0x248] sm:$0xff] }
 0x540   :  { %v7217_v49 = vpack.c.bf16 %v6841_v21, %v6837_v56  ;;  %7631 = vmatprep.subr.bf16.mxu1 %v7220_v51  ;;  %v6843_v15 = vmul.f32 %v12334_v32, %v6309_v1  ;;  %v6314_v59 = vcvt.s32.f32 %v5802_v16  ;;  %v5799_v58 = vunpack.c.0.s8 %v5467_v30 }
 0x541   :  { %v6846_v11 = vmul.f32 %v12313_v54, %v6312_v24  ;;  %v6850_v7 = vmul.f32 %v12313_v54, %v6316_v46  ;;  %v6318_v27 = vcvt.s32.f32 %v5806_v18  ;;  %v5803_v45 = vunpack.c.1.s8 %v5467_v30 }
 0x542   :  { %7460 = vmatpush1.bf16.msra.mxu0 %v7217_v49  ;;  %v5801_v47 = vunpack.c.0.s8 %v12766_v8  ;;  %v7219_v62 = vpack.c.bf16 %v6843_v15, %v6839_v19  ;;  %v6848_v44 = vmul.f32 %v12323_v6, %v6314_v59  ;;  %v6311_v42 = vcvt.s32.f32 %v5799_v58 }
 0x543   :  { %v5805_v28 = vunpack.c.1.s8 %v12766_v8  ;;  %v7222_v10 = vpack.c.bf16 %v6850_v7, %v6846_v11  ;;  %v6852_v33 = vmul.f32 %v12323_v6, %v6318_v27  ;;  %v6315_v0 = vcvt.s32.f32 %v5803_v45  ;;  %v5471_v27 = vld [vmem:[#allocation12 + $0x240] sm:$0xff] }
 0x544   :  { %v6313_v60 = vcvt.s32.f32 %v5801_v47  ;;  %7632 = vmatpush1.bf16.msra.mxu1 %v7219_v62  ;;  %v6845_v29 = vmul.f32 %v12327_v57, %v6311_v42  ;;  %v5808_v38 = vunpack.c.2.s8 %v5468_v13  ;;  %v5812_v53 = vunpack.c.3.s8 %v5468_v13  ;;  %v12788_v42 = vld [vmem:[#allocation12 + $0x250] sm:$0xff] }
 0x545   :  { %v6317_v55 = vcvt.s32.f32 %v5805_v28  ;;  %7461 = vmatprep.subr.bf16.mxu0 %v7222_v10  ;;  %v7224_v31 = vpack.c.bf16 %v6852_v33, %v6848_v44  ;;  %v6849_v41 = vmul.f32 %v12327_v57, %v6315_v0  ;;  %v5810_v22 = vunpack.c.2.s8 %v5470_v61 }
 0x546   :  { %v6847_v23 = vmul.f32 %v12334_v32, %v6313_v60  ;;  %v6320_v43 = vcvt.s32.f32 %v5808_v38  ;;  %v6324_v20 = vcvt.s32.f32 %v5812_v53  ;;  %v5814_v37 = vunpack.c.3.s8 %v5470_v61  ;;  %v5474_v61 = vld [vmem:[#allocation12 + $0x258] sm:$0xff] }
 0x547   :  { %v6851_v17 = vmul.f32 %v12334_v32, %v6317_v55  ;;  %7633 = vmatprep.subr.bf16.mxu1 %v7224_v31  ;;  %v7221_v50 = vpack.c.bf16 %v6849_v41, %v6845_v29  ;;  %v6322_v35 = vcvt.s32.f32 %v5810_v22  ;;  %v5807_v56 = vunpack.c.2.s8 %v5467_v30 }
 0x548   :  { %v5811_v21 = vunpack.c.3.s8 %v5467_v30  ;;  %v6854_v13 = vmul.f32 %v12313_v54, %v6320_v43  ;;  %v6858_v51 = vmul.f32 %v12313_v54, %v6324_v20  ;;  %v6326_v1 = vcvt.s32.f32 %v5814_v37 }
 0x549   :  { %v7223_v9 = vpack.c.bf16 %v6851_v17, %v6847_v23  ;;  %7462 = vmatpush1.bf16.msra.mxu0 %v7221_v50  ;;  %v6856_v24 = vmul.f32 %v12323_v6, %v6322_v35  ;;  %v6319_v16 = vcvt.s32.f32 %v5807_v56  ;;  %v5809_v19 = vunpack.c.2.s8 %v12766_v8 }
 0x54a   :  { %v6323_v49 = vcvt.s32.f32 %v5811_v21  ;;  %v7226_v46 = vpack.c.bf16 %v6858_v51, %v6854_v13  ;;  %v6860_v18 = vmul.f32 %v12323_v6, %v6326_v1  ;;  %v5813_v30 = vunpack.c.3.s8 %v12766_v8 }
 0x54b   :  { %7634 = vmatpush1.bf16.msra.mxu1 %v7223_v9  ;;  %v5816_v15 = vunpack.c.0.s8 %v5472_v63  ;;  %v6853_v11 = vmul.f32 %v12327_v57, %v6319_v16  ;;  %v6321_v58 = vcvt.s32.f32 %v5809_v19  ;;  %v5820_v7 = vunpack.c.1.s8 %v5472_v63 }
 0x54c   :  { %v6857_v59 = vmul.f32 %v12327_v57, %v6323_v49  ;;  %7463 = vmatprep.subr.bf16.mxu0 %v7226_v46  ;;  %v7228_v45 = vpack.c.bf16 %v6860_v18, %v6856_v24  ;;  %v6325_v47 = vcvt.s32.f32 %v5813_v30  ;;  %v5818_v44 = vunpack.c.0.s8 %v5474_v61 }
 0x54d   :  { %v6328_v62 = vcvt.s32.f32 %v5816_v15  ;;  %v6855_v10 = vmul.f32 %v12334_v32, %v6321_v58  ;;  %v6332_v33 = vcvt.s32.f32 %v5820_v7  ;;  %v5822_v8 = vunpack.c.1.s8 %v5474_v61  ;;  %v5476_v58 = vld [vmem:[#allocation12 + $0x268] sm:$0xff] }
 0x54e   :  { %v7225_v28 = vpack.c.bf16 %v6857_v59, %v6853_v11  ;;  %7635 = vmatprep.subr.bf16.mxu1 %v7228_v45  ;;  %v6859_v0 = vmul.f32 %v12334_v32, %v6325_v47  ;;  %v6330_v29 = vcvt.s32.f32 %v5818_v44  ;;  %v5815_v55 = vunpack.c.0.s8 %v5471_v27 }
 0x54f   :  { %v6862_v60 = vmul.f32 %v12313_v54, %v6328_v62  ;;  %v6866_v38 = vmul.f32 %v12313_v54, %v6332_v33  ;;  %v6334_v53 = vcvt.s32.f32 %v5822_v8  ;;  %v5819_v31 = vunpack.c.1.s8 %v5471_v27 }
 0x550   :  { %7464 = vmatpush1.bf16.msra.mxu0 %v7225_v28  ;;  %v5817_v41 = vunpack.c.0.s8 %v12788_v42  ;;  %v7227_v23 = vpack.c.bf16 %v6859_v0, %v6855_v10  ;;  %v6864_v22 = vmul.f32 %v12323_v6, %v6330_v29  ;;  %v6327_v17 = vcvt.s32.f32 %v5815_v55 }
 0x551   :  { %v5821_v43 = vunpack.c.1.s8 %v12788_v42  ;;  %v7230_v20 = vpack.c.bf16 %v6866_v38, %v6862_v60  ;;  %v6868_v37 = vmul.f32 %v12323_v6, %v6334_v53  ;;  %v6331_v50 = vcvt.s32.f32 %v5819_v31  ;;  %v5475_v53 = vld [vmem:[#allocation12 + $0x260] sm:$0xff] }
 0x552   :  { %v6329_v35 = vcvt.s32.f32 %v5817_v41  ;;  %7636 = vmatpush1.bf16.msra.mxu1 %v7227_v23  ;;  %v6861_v56 = vmul.f32 %v12327_v57, %v6327_v17  ;;  %v5824_v9 = vunpack.c.2.s8 %v5472_v63  ;;  %v5828_v13 = vunpack.c.3.s8 %v5472_v63  ;;  %v12810_v17 = vld [vmem:[#allocation12 + $0x270] sm:$0xff] }
 0x553   :  { %v6333_v21 = vcvt.s32.f32 %v5821_v43  ;;  %7465 = vmatprep.subr.bf16.mxu0 %v7230_v20  ;;  %v7232_v51 = vpack.c.bf16 %v6868_v37, %v6864_v22  ;;  %v6865_v1 = vmul.f32 %v12327_v57, %v6331_v50  ;;  %v5826_v16 = vunpack.c.2.s8 %v5474_v61 }
 0x554   :  { %v6863_v24 = vmul.f32 %v12334_v32, %v6329_v35  ;;  %v6336_v19 = vcvt.s32.f32 %v5824_v9  ;;  %v6340_v46 = vcvt.s32.f32 %v5828_v13  ;;  %v5830_v18 = vunpack.c.3.s8 %v5474_v61  ;;  %v5478_v61 = vld [vmem:[#allocation12 + $0x278] sm:$0xff] }
 0x555   :  { %v6867_v49 = vmul.f32 %v12334_v32, %v6333_v21  ;;  %7637 = vmatprep.subr.bf16.mxu1 %v7232_v51  ;;  %v7229_v30 = vpack.c.bf16 %v6865_v1, %v6861_v56  ;;  %v6338_v15 = vcvt.s32.f32 %v5826_v16  ;;  %v5823_v11 = vunpack.c.2.s8 %v5471_v27 }
 0x556   :  { %v5827_v59 = vunpack.c.3.s8 %v5471_v27  ;;  %v6870_v63 = vmul.f32 %v12313_v54, %v6336_v19  ;;  %v6874_v45 = vmul.f32 %v12313_v54, %v6340_v46  ;;  %v6342_v47 = vcvt.s32.f32 %v5830_v18 }
 0x557   :  { %v7231_v7 = vpack.c.bf16 %v6867_v49, %v6863_v24  ;;  %7466 = vmatpush1.bf16.msra.mxu0 %v7229_v30  ;;  %v6872_v62 = vmul.f32 %v12323_v6, %v6338_v15  ;;  %v6335_v44 = vcvt.s32.f32 %v5823_v11  ;;  %v5825_v10 = vunpack.c.2.s8 %v12788_v42 }
 0x558   :  { %v6339_v28 = vcvt.s32.f32 %v5827_v59  ;;  %v7234_v33 = vpack.c.bf16 %v6874_v45, %v6870_v63  ;;  %v6876_v8 = vmul.f32 %v12323_v6, %v6342_v47  ;;  %v5829_v27 = vunpack.c.3.s8 %v12788_v42 }
 0x559   :  { %7638 = vmatpush1.bf16.msra.mxu1 %v7231_v7  ;;  %v5832_v0 = vunpack.c.0.s8 %v5476_v58  ;;  %v6869_v60 = vmul.f32 %v12327_v57, %v6335_v44  ;;  %v6337_v55 = vcvt.s32.f32 %v5825_v10  ;;  %v5836_v38 = vunpack.c.1.s8 %v5476_v58 }
 0x55a   :  { %v6873_v29 = vmul.f32 %v12327_v57, %v6339_v28  ;;  %7467 = vmatprep.subr.bf16.mxu0 %v7234_v33  ;;  %v7236_v31 = vpack.c.bf16 %v6876_v8, %v6872_v62  ;;  %v6341_v41 = vcvt.s32.f32 %v5829_v27  ;;  %v5834_v22 = vunpack.c.0.s8 %v5478_v61 }
 0x55b   :  { %v6344_v23 = vcvt.s32.f32 %v5832_v0  ;;  %v6871_v20 = vmul.f32 %v12334_v32, %v6337_v55  ;;  %v6348_v37 = vcvt.s32.f32 %v5836_v38  ;;  %v5838_v42 = vunpack.c.1.s8 %v5478_v61  ;;  %v5480_v55 = vld [vmem:[#allocation12 + $0x288] sm:$0xff] }
 0x55c   :  { %v7233_v43 = vpack.c.bf16 %v6873_v29, %v6869_v60  ;;  %7639 = vmatprep.subr.bf16.mxu1 %v7236_v31  ;;  %v6875_v50 = vmul.f32 %v12334_v32, %v6341_v41  ;;  %v6346_v56 = vcvt.s32.f32 %v5834_v22  ;;  %v5831_v21 = vunpack.c.0.s8 %v5475_v53 }
 0x55d   :  { %v6878_v35 = vmul.f32 %v12313_v54, %v6344_v23  ;;  %v6882_v9 = vmul.f32 %v12313_v54, %v6348_v37  ;;  %v6350_v13 = vcvt.s32.f32 %v5838_v42  ;;  %v5835_v51 = vunpack.c.1.s8 %v5475_v53 }
 0x55e   :  { %7468 = vmatpush1.bf16.msra.mxu0 %v7233_v43  ;;  %v5833_v1 = vunpack.c.0.s8 %v12810_v17  ;;  %v7235_v24 = vpack.c.bf16 %v6875_v50, %v6871_v20  ;;  %v6880_v16 = vmul.f32 %v12323_v6, %v6346_v56  ;;  %v6343_v49 = vcvt.s32.f32 %v5831_v21 }
 0x55f   :  { %v5837_v19 = vunpack.c.1.s8 %v12810_v17  ;;  %v7238_v46 = vpack.c.bf16 %v6882_v9, %v6878_v35  ;;  %v6884_v18 = vmul.f32 %v12323_v6, %v6350_v13  ;;  %v6347_v30 = vcvt.s32.f32 %v5835_v51  ;;  %v5479_v13 = vld [vmem:[#allocation12 + $0x280] sm:$0xff] }
 0x560   :  { %v6345_v15 = vcvt.s32.f32 %v5833_v1  ;;  %7640 = vmatpush1.bf16.msra.mxu1 %v7235_v24  ;;  %v6877_v11 = vmul.f32 %v12327_v57, %v6343_v49  ;;  %v5840_v7 = vunpack.c.2.s8 %v5476_v58  ;;  %v5844_v63 = vunpack.c.3.s8 %v5476_v58  ;;  %v12832_v49 = vld [vmem:[#allocation12 + $0x290] sm:$0xff] }
 0x561   :  { %v6349_v59 = vcvt.s32.f32 %v5837_v19  ;;  %7469 = vmatprep.subr.bf16.mxu0 %v7238_v46  ;;  %v7240_v45 = vpack.c.bf16 %v6884_v18, %v6880_v16  ;;  %v6881_v47 = vmul.f32 %v12327_v57, %v6347_v30  ;;  %v5842_v44 = vunpack.c.2.s8 %v5478_v61 }
 0x562   :  { %v6879_v62 = vmul.f32 %v12334_v32, %v6345_v15  ;;  %v6352_v10 = vcvt.s32.f32 %v5840_v7  ;;  %v6356_v33 = vcvt.s32.f32 %v5844_v63  ;;  %v5846_v8 = vunpack.c.3.s8 %v5478_v61  ;;  %v5482_v61 = vld [vmem:[#allocation12 + $0x298] sm:$0xff] }
 0x563   :  { %v6883_v28 = vmul.f32 %v12334_v32, %v6349_v59  ;;  %7641 = vmatprep.subr.bf16.mxu1 %v7240_v45  ;;  %v7237_v27 = vpack.c.bf16 %v6881_v47, %v6877_v11  ;;  %v6354_v0 = vcvt.s32.f32 %v5842_v44  ;;  %v5839_v60 = vunpack.c.2.s8 %v5475_v53 }
 0x564   :  { %v5843_v29 = vunpack.c.3.s8 %v5475_v53  ;;  %v6886_v58 = vmul.f32 %v12313_v54, %v6352_v10  ;;  %v6890_v31 = vmul.f32 %v12313_v54, %v6356_v33  ;;  %v6358_v41 = vcvt.s32.f32 %v5846_v8 }
 0x565   :  { %v7239_v38 = vpack.c.bf16 %v6883_v28, %v6879_v62  ;;  %7470 = vmatpush1.bf16.msra.mxu0 %v7237_v27  ;;  %v6888_v23 = vmul.f32 %v12323_v6, %v6354_v0  ;;  %v6351_v22 = vcvt.s32.f32 %v5839_v60  ;;  %v5841_v20 = vunpack.c.2.s8 %v12810_v17 }
 0x566   :  { %v6355_v43 = vcvt.s32.f32 %v5843_v29  ;;  %v7242_v37 = vpack.c.bf16 %v6890_v31, %v6886_v58  ;;  %v6892_v42 = vmul.f32 %v12323_v6, %v6358_v41  ;;  %v5845_v53 = vunpack.c.3.s8 %v12810_v17 }
 0x567   :  { %7642 = vmatpush1.bf16.msra.mxu1 %v7239_v38  ;;  %v5848_v50 = vunpack.c.0.s8 %v5480_v55  ;;  %v6885_v35 = vmul.f32 %v12327_v57, %v6351_v22  ;;  %v6353_v21 = vcvt.s32.f32 %v5841_v20  ;;  %v5852_v9 = vunpack.c.1.s8 %v5480_v55 }
 0x568   :  { %v6889_v56 = vmul.f32 %v12327_v57, %v6355_v43  ;;  %7471 = vmatprep.subr.bf16.mxu0 %v7242_v37  ;;  %v7244_v51 = vpack.c.bf16 %v6892_v42, %v6888_v23  ;;  %v6357_v1 = vcvt.s32.f32 %v5845_v53  ;;  %v5850_v16 = vunpack.c.0.s8 %v5482_v61 }
 0x569   :  { %v6360_v24 = vcvt.s32.f32 %v5848_v50  ;;  %v6887_v46 = vmul.f32 %v12334_v32, %v6353_v21  ;;  %v6364_v18 = vcvt.s32.f32 %v5852_v9  ;;  %v5854_v17 = vunpack.c.1.s8 %v5482_v61  ;;  %v5484_v21 = vld [vmem:[#allocation12 + $0x2a8] sm:$0xff] }
 0x56a   :  { %v7241_v19 = vpack.c.bf16 %v6889_v56, %v6885_v35  ;;  %7643 = vmatprep.subr.bf16.mxu1 %v7244_v51  ;;  %v6891_v30 = vmul.f32 %v12334_v32, %v6357_v1  ;;  %v6362_v11 = vcvt.s32.f32 %v5850_v16  ;;  %v5847_v59 = vunpack.c.0.s8 %v5479_v13 }
 0x56b   :  { %v6894_v15 = vmul.f32 %v12313_v54, %v6360_v24  ;;  %v6898_v7 = vmul.f32 %v12313_v54, %v6364_v18  ;;  %v6366_v63 = vcvt.s32.f32 %v5854_v17  ;;  %v5851_v45 = vunpack.c.1.s8 %v5479_v13 }
 0x56c   :  { %7472 = vmatpush1.bf16.msra.mxu0 %v7241_v19  ;;  %v5849_v47 = vunpack.c.0.s8 %v12832_v49  ;;  %v7243_v62 = vpack.c.bf16 %v6891_v30, %v6887_v46  ;;  %v6896_v44 = vmul.f32 %v12323_v6, %v6362_v11  ;;  %v6359_v28 = vcvt.s32.f32 %v5847_v59 }
 0x56d   :  { %v5853_v10 = vunpack.c.1.s8 %v12832_v49  ;;  %v7246_v33 = vpack.c.bf16 %v6898_v7, %v6894_v15  ;;  %v6900_v8 = vmul.f32 %v12323_v6, %v6366_v63  ;;  %v6363_v27 = vcvt.s32.f32 %v5851_v45  ;;  %v5483_v63 = vld [vmem:[#allocation12 + $0x2a0] sm:$0xff] }
 0x56e   :  { %v6361_v0 = vcvt.s32.f32 %v5849_v47  ;;  %7644 = vmatpush1.bf16.msra.mxu1 %v7243_v62  ;;  %v6893_v60 = vmul.f32 %v12327_v57, %v6359_v28  ;;  %v5856_v38 = vunpack.c.2.s8 %v5480_v55  ;;  %v5860_v58 = vunpack.c.3.s8 %v5480_v55  ;;  %v12854_v28 = vld [vmem:[#allocation12 + $0x2b0] sm:$0xff] }
 0x56f   :  { %v6365_v29 = vcvt.s32.f32 %v5853_v10  ;;  %7473 = vmatprep.subr.bf16.mxu0 %v7246_v33  ;;  %v7248_v31 = vpack.c.bf16 %v6900_v8, %v6896_v44  ;;  %v6897_v41 = vmul.f32 %v12327_v57, %v6363_v27  ;;  %v5858_v22 = vunpack.c.2.s8 %v5482_v61 }
 0x570   :  { %v6895_v23 = vmul.f32 %v12334_v32, %v6361_v0  ;;  %v6368_v20 = vcvt.s32.f32 %v5856_v38  ;;  %v6372_v37 = vcvt.s32.f32 %v5860_v58  ;;  %v5862_v42 = vunpack.c.3.s8 %v5482_v61  ;;  %v5486_v61 = vld [vmem:[#allocation12 + $0x2b8] sm:$0xff] }
 0x571   :  { %v6899_v43 = vmul.f32 %v12334_v32, %v6365_v29  ;;  %7645 = vmatprep.subr.bf16.mxu1 %v7248_v31  ;;  %v7245_v53 = vpack.c.bf16 %v6897_v41, %v6893_v60  ;;  %v6370_v50 = vcvt.s32.f32 %v5858_v22  ;;  %v5855_v35 = vunpack.c.2.s8 %v5479_v13 }
 0x572   :  { %v5859_v56 = vunpack.c.3.s8 %v5479_v13  ;;  %v6902_v55 = vmul.f32 %v12313_v54, %v6368_v20  ;;  %v6906_v51 = vmul.f32 %v12313_v54, %v6372_v37  ;;  %v6374_v1 = vcvt.s32.f32 %v5862_v42 }
 0x573   :  { %v7247_v9 = vpack.c.bf16 %v6899_v43, %v6895_v23  ;;  %7474 = vmatpush1.bf16.msra.mxu0 %v7245_v53  ;;  %v6904_v24 = vmul.f32 %v12323_v6, %v6370_v50  ;;  %v6367_v16 = vcvt.s32.f32 %v5855_v35  ;;  %v5857_v46 = vunpack.c.2.s8 %v12832_v49 }
 0x574   :  { %v6371_v19 = vcvt.s32.f32 %v5859_v56  ;;  %v7250_v18 = vpack.c.bf16 %v6906_v51, %v6902_v55  ;;  %v6908_v17 = vmul.f32 %v12323_v6, %v6374_v1  ;;  %v5861_v13 = vunpack.c.3.s8 %v12832_v49 }
 0x575   :  { %7646 = vmatpush1.bf16.msra.mxu1 %v7247_v9  ;;  %v5864_v30 = vunpack.c.0.s8 %v5484_v21  ;;  %v6901_v15 = vmul.f32 %v12327_v57, %v6367_v16  ;;  %v6369_v59 = vcvt.s32.f32 %v5857_v46  ;;  %v5868_v7 = vunpack.c.1.s8 %v5484_v21 }
 0x576   :  { %v6905_v11 = vmul.f32 %v12327_v57, %v6371_v19  ;;  %7475 = vmatprep.subr.bf16.mxu0 %v7250_v18  ;;  %v7252_v45 = vpack.c.bf16 %v6908_v17, %v6904_v24  ;;  %v6373_v47 = vcvt.s32.f32 %v5861_v13  ;;  %v5866_v44 = vunpack.c.0.s8 %v5486_v61 }
 0x577   :  { %v6376_v62 = vcvt.s32.f32 %v5864_v30  ;;  %v6903_v33 = vmul.f32 %v12334_v32, %v6369_v59  ;;  %v6380_v8 = vcvt.s32.f32 %v5868_v7  ;;  %v5870_v49 = vunpack.c.1.s8 %v5486_v61  ;;  %v5488_v59 = vld [vmem:[#allocation12 + $0x2c8] sm:$0xff] }
 0x578   :  { %v7249_v10 = vpack.c.bf16 %v6905_v11, %v6901_v15  ;;  %7647 = vmatprep.subr.bf16.mxu1 %v7252_v45  ;;  %v6907_v27 = vmul.f32 %v12334_v32, %v6373_v47  ;;  %v6378_v60 = vcvt.s32.f32 %v5866_v44  ;;  %v5863_v29 = vunpack.c.0.s8 %v5483_v63 }
 0x579   :  { %v6910_v0 = vmul.f32 %v12313_v54, %v6376_v62  ;;  %v6914_v38 = vmul.f32 %v12313_v54, %v6380_v8  ;;  %v6382_v58 = vcvt.s32.f32 %v5870_v49  ;;  %v5867_v31 = vunpack.c.1.s8 %v5483_v63 }
 0x57a   :  { %7476 = vmatpush1.bf16.msra.mxu0 %v7249_v10  ;;  %v5865_v41 = vunpack.c.0.s8 %v12854_v28  ;;  %v7251_v23 = vpack.c.bf16 %v6907_v27, %v6903_v33  ;;  %v6912_v22 = vmul.f32 %v12323_v6, %v6378_v60  ;;  %v6375_v43 = vcvt.s32.f32 %v5863_v29 }
 0x57b   :  { %v5869_v20 = vunpack.c.1.s8 %v12854_v28  ;;  %v7254_v37 = vpack.c.bf16 %v6914_v38, %v6910_v0  ;;  %v6916_v42 = vmul.f32 %v12323_v6, %v6382_v58  ;;  %v6379_v53 = vcvt.s32.f32 %v5867_v31  ;;  %v5487_v58 = vld [vmem:[#allocation12 + $0x2c0] sm:$0xff] }
 0x57c   :  { %v6377_v50 = vcvt.s32.f32 %v5865_v41  ;;  %7648 = vmatpush1.bf16.msra.mxu1 %v7251_v23  ;;  %v6909_v35 = vmul.f32 %v12327_v57, %v6375_v43  ;;  %v5872_v9 = vunpack.c.2.s8 %v5484_v21  ;;  %v5876_v55 = vunpack.c.3.s8 %v5484_v21  ;;  %v12876_v43 = vld [vmem:[#allocation12 + $0x2d0] sm:$0xff] }
 0x57d   :  { %v6381_v56 = vcvt.s32.f32 %v5869_v20  ;;  %7477 = vmatprep.subr.bf16.mxu0 %v7254_v37  ;;  %v7256_v51 = vpack.c.bf16 %v6916_v42, %v6912_v22  ;;  %v6913_v1 = vmul.f32 %v12327_v57, %v6379_v53  ;;  %v5874_v16 = vunpack.c.2.s8 %v5486_v61 }
 0x57e   :  { %v6911_v24 = vmul.f32 %v12334_v32, %v6377_v50  ;;  %v6384_v46 = vcvt.s32.f32 %v5872_v9  ;;  %v6388_v18 = vcvt.s32.f32 %v5876_v55  ;;  %v5878_v17 = vunpack.c.3.s8 %v5486_v61  ;;  %v5490_v61 = vld [vmem:[#allocation12 + $0x2d8] sm:$0xff] }
 0x57f   :  { %v6915_v19 = vmul.f32 %v12334_v32, %v6381_v56  ;;  %7649 = vmatprep.subr.bf16.mxu1 %v7256_v51  ;;  %v7253_v13 = vpack.c.bf16 %v6913_v1, %v6909_v35  ;;  %v6386_v30 = vcvt.s32.f32 %v5874_v16  ;;  %v5871_v15 = vunpack.c.2.s8 %v5483_v63 }
 0x580   :  { %v5875_v11 = vunpack.c.3.s8 %v5483_v63  ;;  %v6918_v21 = vmul.f32 %v12313_v54, %v6384_v46  ;;  %v6922_v45 = vmul.f32 %v12313_v54, %v6388_v18  ;;  %v6390_v47 = vcvt.s32.f32 %v5878_v17 }
 0x581   :  { %v7255_v7 = vpack.c.bf16 %v6915_v19, %v6911_v24  ;;  %7478 = vmatpush1.bf16.msra.mxu0 %v7253_v13  ;;  %v6920_v62 = vmul.f32 %v12323_v6, %v6386_v30  ;;  %v6383_v44 = vcvt.s32.f32 %v5871_v15  ;;  %v5873_v33 = vunpack.c.2.s8 %v12854_v28 }
 0x582   :  { %v6387_v10 = vcvt.s32.f32 %v5875_v11  ;;  %v7258_v8 = vpack.c.bf16 %v6922_v45, %v6918_v21  ;;  %v6924_v49 = vmul.f32 %v12323_v6, %v6390_v47  ;;  %v5877_v63 = vunpack.c.3.s8 %v12854_v28 }
 0x583   :  { %7650 = vmatpush1.bf16.msra.mxu1 %v7255_v7  ;;  %v5880_v27 = vunpack.c.0.s8 %v5488_v59  ;;  %v6917_v0 = vmul.f32 %v12327_v57, %v6383_v44  ;;  %v6385_v29 = vcvt.s32.f32 %v5873_v33  ;;  %v5884_v38 = vunpack.c.1.s8 %v5488_v59 }
 0x584   :  { %v6921_v60 = vmul.f32 %v12327_v57, %v6387_v10  ;;  %7479 = vmatprep.subr.bf16.mxu0 %v7258_v8  ;;  %v7260_v31 = vpack.c.bf16 %v6924_v49, %v6920_v62  ;;  %v6389_v41 = vcvt.s32.f32 %v5877_v63  ;;  %v5882_v22 = vunpack.c.0.s8 %v5490_v61 }
 0x585   :  { %v6392_v23 = vcvt.s32.f32 %v5880_v27  ;;  %v6919_v37 = vmul.f32 %v12334_v32, %v6385_v29  ;;  %v6396_v42 = vcvt.s32.f32 %v5884_v38  ;;  %v5886_v28 = vunpack.c.1.s8 %v5490_v61 }
 0x586   :  { %v7257_v20 = vpack.c.bf16 %v6921_v60, %v6917_v0  ;;  %7651 = vmatprep.subr.bf16.mxu1 %v7260_v31  ;;  %v6923_v53 = vmul.f32 %v12334_v32, %v6389_v41  ;;  %v6394_v35 = vcvt.s32.f32 %v5882_v22  ;;  %v5879_v56 = vunpack.c.0.s8 %v5487_v58 }
 0x587   :  { %v6926_v50 = vmul.f32 %v12313_v54, %v6392_v23  ;;  %v6930_v9 = vmul.f32 %v12313_v54, %v6396_v42  ;;  %v6398_v55 = vcvt.s32.f32 %v5886_v28  ;;  %v5883_v51 = vunpack.c.1.s8 %v5487_v58  ;;  %v13849_v28 = vld [vmem:[#allocation69_spill] sm:$0xff] }
 0x588   :  { %7480 = vmatpush1.bf16.msra.mxu0 %v7257_v20  ;;  %v5881_v1 = vunpack.c.0.s8 %v12876_v43  ;;  %v7259_v24 = vpack.c.bf16 %v6923_v53, %v6919_v37  ;;  %v6928_v16 = vmul.f32 %v12323_v6, %v6394_v35  ;;  %v6391_v19 = vcvt.s32.f32 %v5879_v56 }
 0x589   :  { %v5885_v46 = vunpack.c.1.s8 %v12876_v43  ;;  %v7262_v18 = vpack.c.bf16 %v6930_v9, %v6926_v50  ;;  %v6932_v17 = vmul.f32 %v12323_v6, %v6398_v55  ;;  %v6395_v13 = vcvt.s32.f32 %v5883_v51 }
 0x58a   :  { %v6393_v30 = vcvt.s32.f32 %v5881_v1  ;;  %7652 = vmatpush1.bf16.msra.mxu1 %v7259_v24  ;;  %v6925_v15 = vmul.f32 %v12327_v57, %v6391_v19  ;;  %v5888_v7 = vunpack.c.2.s8 %v5488_v59  ;;  %v5892_v21 = vunpack.c.3.s8 %v5488_v59  ;;  %v13850_v24 = vld [vmem:[#allocation73_spill] sm:$0xff]  ;;  %v12902_v19 = vld [vmem:[#allocation12 + $0x2e8] sm:$0xff] }
 0x58b   :  { %v6397_v11 = vcvt.s32.f32 %v5885_v46  ;;  %7481 = vmatprep.subr.bf16.mxu0 %v7262_v18  ;;  %v7264_v45 = vpack.c.bf16 %v6932_v17, %v6928_v16  ;;  %v6929_v47 = vmul.f32 %v12327_v57, %v6395_v13  ;;  %v5890_v44 = vunpack.c.2.s8 %v5490_v61 }
 0x58c   :  { %v6927_v62 = vmul.f32 %v12334_v32, %v6393_v30  ;;  %v6400_v33 = vcvt.s32.f32 %v5888_v7  ;;  %v6404_v8 = vcvt.s32.f32 %v5892_v21  ;;  %v5894_v49 = vunpack.c.3.s8 %v5490_v61 }
 0x58d   :  { %v6931_v10 = vmul.f32 %v12334_v32, %v6397_v11  ;;  %7653 = vmatprep.subr.bf16.mxu1 %v7264_v45  ;;  %v7261_v63 = vpack.c.bf16 %v6929_v47, %v6925_v15  ;;  %v6402_v27 = vcvt.s32.f32 %v5890_v44  ;;  %v5887_v0 = vunpack.c.2.s8 %v5487_v58 }
 0x58e   :  { %v5891_v60 = vunpack.c.3.s8 %v5487_v58  ;;  %v6934_v59 = vmul.f32 %v12313_v54, %v6400_v33  ;;  %v6938_v38 = vmul.f32 %v12313_v54, %v6404_v8  ;;  %v6406_v31 = vcvt.s32.f32 %v5894_v49  ;;  %v8380_v58 = vld [vmem:[#allocation11] sm:$0xff]  ;;  %v5491_v33 = vld [vmem:[#allocation12 + $0x2e0] sm:$0xff] }
 0x58f   :  { %v7263_v29 = vpack.c.bf16 %v6931_v10, %v6927_v62  ;;  %7482 = vmatpush1.bf16.msra.mxu0 %v7261_v63  ;;  %v6936_v41 = vmul.f32 %v12323_v6, %v6402_v27  ;;  %v6399_v23 = vcvt.s32.f32 %v5887_v0  ;;  %v5889_v20 = vunpack.c.2.s8 %v12876_v43  ;;  %v12921_v63 = vld [vmem:[#allocation12 + $0x2f0] sm:$0xff] }
 0x590   :  { %v6403_v22 = vcvt.s32.f32 %v5891_v60  ;;  %v7266_v61 = vpack.c.bf16 %v6938_v38, %v6934_v59  ;;  %v6940_v37 = vmul.f32 %v12323_v6, %v6406_v31  ;;  %v5893_v42 = vunpack.c.3.s8 %v12876_v43 }
 0x591   :  { %7654 = vmatpush1.bf16.msra.mxu1 %v7263_v29  ;;  %v4674_v53 = vrot.slane %v8380_v58, %v13849_v28  ;;  %v6933_v50 = vmul.f32 %v12327_v57, %v6399_v23  ;;  %v6401_v56 = vcvt.s32.f32 %v5889_v20  ;;  %v4682_v9 = vrot.slane %v8380_v58, %v11522_v25 }
 0x592   :  { %v6937_v35 = vmul.f32 %v12327_v57, %v6403_v22  ;;  %7483 = vmatprep.subr.bf16.mxu0 %v7266_v61  ;;  %v7268_v55 = vpack.c.bf16 %v6940_v37, %v6936_v41  ;;  %v6405_v51 = vcvt.s32.f32 %v5893_v42  ;;  %v4678_v16 = vrot.slane %v8380_v58, %v13850_v24 }
 0x593   :  { %v8240_v1 = vadd.f32 %v12702_v26, %v4674_v53  ;;  %v6935_v46 = vmul.f32 %v12334_v32, %v6401_v56  ;;  %v8244_v18 = vadd.f32 %v12706_v2, %v4682_v9  ;;  %v4686_v17 = vrot.slane %v8380_v58, %v11542_v34  ;;  %v12910_v26 = vld [vmem:[#allocation12 + $0x2f8] sm:$0xff] }
 0x594   :  { %v7265_v43 = vpack.c.bf16 %v6937_v35, %v6933_v50  ;;  %7655 = vmatprep.subr.bf16.mxu1 %v7268_v55  ;;  %v6939_v13 = vmul.f32 %v12334_v32, %v6405_v51  ;;  %v8241_v30 = vadd.f32 %v12708_v14, %v4678_v16  ;;  %v8242_v15 = vadd.f32 %v12716_v48, %v4674_v53 }
 0x595   :  { %v5387_v25 = vmax.f32 %v8240_v1, 0.0  ;;  %v5389_v11 = vmax.f32 %v8244_v18, 0.0  ;;  %v8245_v7 = vadd.f32 %v12714_v3, %v4686_v17  ;;  %v8246_v21 = vadd.f32 %v12720_v4, %v4682_v9 }
 0x596   :  { %7484 = vmatpush1.bf16.msra.mxu0 %v7265_v43  ;;  %v5896_v2 = vunpack.c.0.s8 %v12902_v19  ;;  %v7267_v45 = vpack.c.bf16 %v6939_v13, %v6935_v46  ;;  %v5388_v34 = vmax.f32 %v8241_v30, 0.0  ;;  %v5395_v47 = vmax.f32 %v8242_v15, 0.0 }
 0x597   :  { %v5900_v62 = vunpack.c.1.s8 %v12902_v19  ;;  %v5390_v44 = vmax.f32 %v8245_v7, 0.0  ;;  %v5397_v10 = vmax.f32 %v8246_v21, 0.0  ;;  %v5898_v48 = vunpack.c.0.s8 %v12910_v26 }
 0x598   :  { %v6408_v14 = vcvt.s32.f32 %v5896_v2  ;;  %7656 = vmatpush1.bf16.msra.mxu1 %v7267_v45  ;;  %v12917_v8 = vpack.c.bf16 %v5395_v47, %v5387_v25  ;;  %v5902_v3 = vunpack.c.1.s8 %v12910_v26  ;;  %v8243_v4 = vadd.f32 %v12722_v12, %v4678_v16  ;;  %v5496_v2 = vld [vmem:[#allocation12 + $0x308] sm:$0xff] }
 0x599   :  { %v6412_v49 = vcvt.s32.f32 %v5900_v62  ;;  %v12923_v27 = vpack.c.bf16 %v5397_v10, %v5389_v11  ;;  %v6410_v60 = vcvt.s32.f32 %v5898_v48  ;;  %v8247_v29 = vadd.f32 %v12728_v36, %v4686_v17  ;;  %v12946_v62 = vld [vmem:[#allocation12 + $0x318] sm:$0xff] }
 0x59a   :  { %v6942_v0 = vmul.f32 %v12313_v54, %v6408_v14  ;;  %v6414_v38 = vcvt.s32.f32 %v5902_v3  ;;  %v5396_v31 = vmax.f32 %v8243_v4, 0.0  ;;  %v5895_v41 = vunpack.c.0.s8 %v5491_v33 }
 0x59b   :  { %v6946_v59 = vmul.f32 %v12313_v54, %v6412_v49  ;;  %v6944_v23 = vmul.f32 %v12323_v6, %v6410_v60  ;;  %v5398_v22 = vmax.f32 %v8247_v29, 0.0  ;;  %v5899_v20 = vunpack.c.1.s8 %v5491_v33 }
 0x59c   :  { %v5897_v12 = vunpack.c.0.s8 %v12921_v63  ;;  %v6948_v37 = vmul.f32 %v12323_v6, %v6414_v38  ;;  %v7346_v42 = vpack.c.bf16 %v5396_v31, %v5388_v34  ;;  %v6407_v58 = vcvt.s32.f32 %v5895_v41  ;;  %v12954_v31 = vld [vmem:[#allocation12 + $0x310] sm:$0xff] }
 0x59d   :  { %v7270_v61 = vpack.c.bf16 %v6946_v59, %v6942_v0  ;;  %v12931_v28 = vpack.c.bf16 %v5398_v22, %v5390_v44  ;;  %v6411_v53 = vcvt.s32.f32 %v5899_v20  ;;  %v5901_v36 = vunpack.c.1.s8 %v12921_v63  ;;  %v5495_v0 = vld [vmem:[#allocation12 + $0x300] sm:$0xff] }
 0x59e   :  { %v6409_v50 = vcvt.s32.f32 %v5897_v12  ;;  %v7272_v35 = vpack.c.bf16 %v6948_v37, %v6944_v23  ;;  %v6941_v56 = vmul.f32 %v12327_v57, %v6407_v58  ;;  %v5904_v9 = vunpack.c.2.s8 %v12902_v19  ;;  %7489 = vmatprep.mubr.bf16.mxu0 %v7346_v42  ;;  %7661 = vmatprep.mubr.bf16.mxu1 %v7346_v42 }
 0x59f   :  { %7485 = vmatprep.subr.bf16.mxu0 %v7270_v61  ;;  %v5908_v55 = vunpack.c.3.s8 %v12902_v19  ;;  %v6945_v51 = vmul.f32 %v12327_v57, %v6411_v53  ;;  %v6413_v1 = vcvt.s32.f32 %v5901_v36  ;;  %v5906_v16 = vunpack.c.2.s8 %v12910_v26 }
 0x5a0   :  { %v6943_v24 = vmul.f32 %v12334_v32, %v6409_v50  ;;  %7657 = vmatprep.subr.bf16.mxu1 %v7272_v35  ;;  %v6416_v43 = vcvt.s32.f32 %v5904_v9  ;;  %v5910_v18 = vunpack.c.3.s8 %v12910_v26  ;;  %v5903_v17 = vunpack.c.2.s8 %v5491_v33 }
 0x5a1   :  { %v6420_v46 = vcvt.s32.f32 %v5908_v55  ;;  %v7269_v13 = vpack.c.bf16 %v6945_v51, %v6941_v56  ;;  %v6947_v25 = vmul.f32 %v12334_v32, %v6413_v1  ;;  %v6418_v30 = vcvt.s32.f32 %v5906_v16 }
 0x5a2   :  { %v5907_v19 = vunpack.c.3.s8 %v5491_v33  ;;  %v6950_v15 = vmul.f32 %v12313_v54, %v6416_v43  ;;  %v6422_v7 = vcvt.s32.f32 %v5910_v18  ;;  %v6415_v21 = vcvt.s32.f32 %v5903_v17 }
 0x5a3   :  { %v6954_v11 = vmul.f32 %v12313_v54, %v6420_v46  ;;  %7486 = vmatpush1.bf16.msra.mxu0 %v7269_v13  ;;  %v7271_v45 = vpack.c.bf16 %v6947_v25, %v6943_v24  ;;  %v6952_v34 = vmul.f32 %v12323_v6, %v6418_v30  ;;  %v5905_v26 = vunpack.c.2.s8 %v12921_v63 }
 0x5a4   :  { %v6419_v47 = vcvt.s32.f32 %v5907_v19  ;;  %v6956_v10 = vmul.f32 %v12323_v6, %v6422_v7  ;;  %v6949_v14 = vmul.f32 %v12327_v57, %v6415_v21  ;;  %v5909_v48 = vunpack.c.3.s8 %v12921_v63 }
 0x5a5   :  { %v7274_v44 = vpack.c.bf16 %v6954_v11, %v6950_v15  ;;  %7658 = vmatpush1.bf16.msra.mxu1 %v7271_v45  ;;  %v6417_v49 = vcvt.s32.f32 %v5905_v26  ;;  %v5912_v3 = vunpack.c.0.s8 %v5496_v2  ;;  %v5916_v4 = vunpack.c.1.s8 %v5496_v2 }
 0x5a6   :  { %v6953_v33 = vmul.f32 %v12327_v57, %v6419_v47  ;;  %v7276_v60 = vpack.c.bf16 %v6956_v10, %v6952_v34  ;;  %v6421_v29 = vcvt.s32.f32 %v5909_v48  ;;  %v5914_v59 = vunpack.c.0.s8 %v12946_v62 }
 0x5a7   :  { %7487 = vmatprep.subr.bf16.mxu0 %v7274_v44  ;;  %v5918_v38 = vunpack.c.1.s8 %v12946_v62  ;;  %v6951_v23 = vmul.f32 %v12334_v32, %v6417_v49  ;;  %v6424_v63 = vcvt.s32.f32 %v5912_v3  ;;  %v6428_v22 = vcvt.s32.f32 %v5916_v4  ;;  %v5502_v49 = vld [vmem:[#allocation12 + $0x338] sm:$0xff] }
 0x5a8   :  { %v7273_v41 = vpack.c.bf16 %v6953_v33, %v6949_v14  ;;  %7659 = vmatprep.subr.bf16.mxu1 %v7276_v60  ;;  %v6955_v20 = vmul.f32 %v12334_v32, %v6421_v29  ;;  %v6426_v12 = vcvt.s32.f32 %v5914_v59  ;;  %v5911_v37 = vunpack.c.0.s8 %v5495_v0  ;;  %v5500_v14 = vld [vmem:[#allocation12 + $0x328] sm:$0xff] }
 0x5a9   :  { %v6430_v61 = vcvt.s32.f32 %v5918_v38  ;;  %v6958_v42 = vmul.f32 %v12313_v54, %v6424_v63  ;;  %v6962_v58 = vmul.f32 %v12313_v54, %v6428_v22  ;;  %v5915_v53 = vunpack.c.1.s8 %v5495_v0 }
 0x5aa   :  { %7488 = vmatpush1.bf16.msra.mxu0 %v7273_v41  ;;  %v5913_v36 = vunpack.c.0.s8 %v12954_v31  ;;  %v7275_v50 = vpack.c.bf16 %v6955_v20, %v6951_v23  ;;  %v6960_v35 = vmul.f32 %v12323_v6, %v6426_v12  ;;  %v6423_v9 = vcvt.s32.f32 %v5911_v37  ;;  %v5499_v41 = vld [vmem:[#allocation12 + $0x320] sm:$0xff]  ;;  %v12982_v12 = vld [vmem:[#allocation12 + $0x330] sm:$0xff] }
 0x5ab   :  { %v6964_v56 = vmul.f32 %v12323_v6, %v6430_v61  ;;  %v7278_v55 = vpack.c.bf16 %v6962_v58, %v6958_v42  ;;  %v6427_v51 = vcvt.s32.f32 %v5915_v53  ;;  %v5917_v1 = vunpack.c.1.s8 %v12954_v31 }
 0x5ac   :  { %v6425_v24 = vcvt.s32.f32 %v5913_v36  ;;  %7660 = vmatpush1.bf16.msra.mxu1 %v7275_v50  ;;  %v6957_v43 = vmul.f32 %v12327_v57, %v6423_v9  ;;  %v5920_v46 = vunpack.c.2.s8 %v5496_v2  ;;  %v5924_v18 = vunpack.c.3.s8 %v5496_v2 }
 0x5ad   :  { %v7280_v16 = vpack.c.bf16 %v6964_v56, %v6960_v35  ;;  %7490 = vmatmul.mubr.bf16.vlgmr.msra.gmra.mrb[16].mxu0 %v12917_v8  ;;  %7500 = vmatprep.subr.bf16.mxu0 %v7278_v55  ;;  %v6961_v17 = vmul.f32 %v12327_v57, %v6427_v51  ;;  %v6429_v13 = vcvt.s32.f32 %v5917_v1  ;;  %v5922_v30 = vunpack.c.2.s8 %v12946_v62 }
 0x5ae   :  { %v6959_v25 = vmul.f32 %v12334_v32, %v6425_v24  ;;  %7532 = vmatprep.mubr.bf16.mxu0 %v12931_v28  ;;  %v6432_v19 = vcvt.s32.f32 %v5920_v46  ;;  %v6436_v15 = vcvt.s32.f32 %v5924_v18  ;;  %v5926_v11 = vunpack.c.3.s8 %v12946_v62 }
 0x5af   :  { %7672 = vmatprep.subr.bf16.mxu1 %v7280_v16  ;;  %v5919_v7 = vunpack.c.2.s8 %v5495_v0  ;;  %v7277_v21 = vpack.c.bf16 %v6961_v17, %v6957_v43  ;;  %7662 = vmatmul.mubr.bf16.vlgmr.msra.gmra.mrb[16].mxu1 %v12917_v8  ;;  %v6963_v2 = vmul.f32 %v12334_v32, %v6429_v13  ;;  %v6434_v45 = vcvt.s32.f32 %v5922_v30 }
 0x5b0   :  { %v5923_v34 = vunpack.c.3.s8 %v5495_v0  ;;  %7704 = vmatprep.mubr.bf16.mxu1 %v12931_v28  ;;  %v6966_v47 = vmul.f32 %v12313_v54, %v6432_v19  ;;  %v6970_v26 = vmul.f32 %v12313_v54, %v6436_v15  ;;  %v6438_v44 = vcvt.s32.f32 %v5926_v11 }
 0x5b1   :  { %v6431_v10 = vcvt.s32.f32 %v5919_v7  ;;  %7501 = vmatpush1.bf16.msra.mxu0 %v7277_v21  ;;  %v7279_v48 = vpack.c.bf16 %v6963_v2, %v6959_v25  ;;  %v6968_v62 = vmul.f32 %v12323_v6, %v6434_v45  ;;  %v5921_v8 = vunpack.c.2.s8 %v12954_v31 }
 0x5b2   :  { %v6435_v33 = vcvt.s32.f32 %v5923_v34  ;;  %v7282_v3 = vpack.c.bf16 %v6970_v26, %v6966_v47  ;;  %v6972_v4 = vmul.f32 %v12323_v6, %v6438_v44  ;;  %v5925_v0 = vunpack.c.3.s8 %v12954_v31 }
 0x5b3   :  { %v6965_v28 = vmul.f32 %v12327_v57, %v6431_v10  ;;  %7673 = vmatpush1.bf16.msra.mxu1 %v7279_v48  ;;  %v6433_v29 = vcvt.s32.f32 %v5921_v8  ;;  %v5928_v59 = vunpack.c.0.s8 %v5500_v14  ;;  %v5932_v38 = vunpack.c.1.s8 %v5500_v14 }
 0x5b4   :  { %v6969_v60 = vmul.f32 %v12327_v57, %v6435_v33  ;;  %7502 = vmatprep.subr.bf16.mxu0 %v7282_v3  ;;  %v7284_v23 = vpack.c.bf16 %v6972_v4, %v6968_v62  ;;  %v6437_v63 = vcvt.s32.f32 %v5925_v0  ;;  %v5930_v22 = vunpack.c.0.s8 %v5502_v49  ;;  %v5504_v3 = vld [vmem:[#allocation12 + $0x348] sm:$0xff] }
 0x5b5   :  { %v5934_v20 = vunpack.c.1.s8 %v5502_v49  ;;  %v6967_v37 = vmul.f32 %v12334_v32, %v6433_v29  ;;  %v6440_v42 = vcvt.s32.f32 %v5928_v59  ;;  %v6444_v58 = vcvt.s32.f32 %v5932_v38 }
 0x5b6   :  { %v7281_v61 = vpack.c.bf16 %v6969_v60, %v6965_v28  ;;  %7674 = vmatprep.subr.bf16.mxu1 %v7284_v23  ;;  %v6971_v31 = vmul.f32 %v12334_v32, %v6437_v63  ;;  %v6442_v53 = vcvt.s32.f32 %v5930_v22  ;;  %v5927_v50 = vunpack.c.0.s8 %v5499_v41  ;;  %v5506_v60 = vld [vmem:[#allocation12 + $0x358] sm:$0xff] }
 0x5b7   :  { %v6446_v36 = vcvt.s32.f32 %v5934_v20  ;;  %v6974_v35 = vmul.f32 %v12313_v54, %v6440_v42  ;;  %v6978_v56 = vmul.f32 %v12313_v54, %v6444_v58  ;;  %v5931_v9 = vunpack.c.1.s8 %v5499_v41 }
 0x5b8   :  { %7503 = vmatpush1.bf16.msra.mxu0 %v7281_v61  ;;  %v5929_v55 = vunpack.c.0.s8 %v12982_v12  ;;  %v7283_v51 = vpack.c.bf16 %v6971_v31, %v6967_v37  ;;  %v6976_v1 = vmul.f32 %v12323_v6, %v6442_v53  ;;  %v6439_v16 = vcvt.s32.f32 %v5927_v50  ;;  %v5503_v61 = vld [vmem:[#allocation12 + $0x340] sm:$0xff]  ;;  %v13004_v53 = vld [vmem:[#allocation12 + $0x350] sm:$0xff] }
 0x5b9   :  { %v6980_v24 = vmul.f32 %v12323_v6, %v6446_v36  ;;  %v7286_v43 = vpack.c.bf16 %v6978_v56, %v6974_v35  ;;  %v6443_v46 = vcvt.s32.f32 %v5931_v9  ;;  %v5933_v18 = vunpack.c.1.s8 %v12982_v12 }
 0x5ba   :  { %v6441_v17 = vcvt.s32.f32 %v5929_v55  ;;  %7675 = vmatpush1.bf16.msra.mxu1 %v7283_v51  ;;  %v6973_v25 = vmul.f32 %v12327_v57, %v6439_v16  ;;  %v5936_v30 = vunpack.c.2.s8 %v5500_v14  ;;  %v5940_v19 = vunpack.c.3.s8 %v5500_v14 }
 0x5bb   :  { %v7288_v13 = vpack.c.bf16 %v6980_v24, %v6976_v1  ;;  %7504 = vmatprep.subr.bf16.mxu0 %v7286_v43  ;;  %v6977_v15 = vmul.f32 %v12327_v57, %v6443_v46  ;;  %v6445_v11 = vcvt.s32.f32 %v5933_v18  ;;  %v5938_v21 = vunpack.c.2.s8 %v5502_v49 }
 0x5bc   :  { %v6975_v7 = vmul.f32 %v12334_v32, %v6441_v17  ;;  %v6448_v2 = vcvt.s32.f32 %v5936_v30  ;;  %v6452_v45 = vcvt.s32.f32 %v5940_v19  ;;  %v5942_v34 = vunpack.c.3.s8 %v5502_v49 }
 0x5bd   :  { %7676 = vmatprep.subr.bf16.mxu1 %v7288_v13  ;;  %v5935_v47 = vunpack.c.2.s8 %v5499_v41  ;;  %v7285_v26 = vpack.c.bf16 %v6977_v15, %v6973_v25  ;;  %v6979_v44 = vmul.f32 %v12334_v32, %v6445_v11  ;;  %v6450_v10 = vcvt.s32.f32 %v5938_v21 }
 0x5be   :  { %v5939_v48 = vunpack.c.3.s8 %v5499_v41  ;;  %v6982_v62 = vmul.f32 %v12313_v54, %v6448_v2  ;;  %v6986_v14 = vmul.f32 %v12313_v54, %v6452_v45  ;;  %v6454_v33 = vcvt.s32.f32 %v5942_v34 }
 0x5bf   :  { %v6447_v8 = vcvt.s32.f32 %v5935_v47  ;;  %7505 = vmatpush1.bf16.msra.mxu0 %v7285_v26  ;;  %v7287_v4 = vpack.c.bf16 %v6979_v44, %v6975_v7  ;;  %v6984_v28 = vmul.f32 %v12323_v6, %v6450_v10  ;;  %v5937_v49 = vunpack.c.2.s8 %v12982_v12 }
 0x5c0   :  { %v6451_v0 = vcvt.s32.f32 %v5939_v48  ;;  %v7290_v29 = vpack.c.bf16 %v6986_v14, %v6982_v62  ;;  %v6988_v59 = vmul.f32 %v12323_v6, %v6454_v33  ;;  %v5941_v41 = vunpack.c.3.s8 %v12982_v12 }
 0x5c1   :  { %v6981_v38 = vmul.f32 %v12327_v57, %v6447_v8  ;;  %7677 = vmatpush1.bf16.msra.mxu1 %v7287_v4  ;;  %v6449_v63 = vcvt.s32.f32 %v5937_v49  ;;  %v5944_v22 = vunpack.c.0.s8 %v5504_v3  ;;  %v5948_v20 = vunpack.c.1.s8 %v5504_v3 }
 0x5c2   :  { %v6985_v23 = vmul.f32 %v12327_v57, %v6451_v0  ;;  %7506 = vmatprep.subr.bf16.mxu0 %v7290_v29  ;;  %v7292_v37 = vpack.c.bf16 %v6988_v59, %v6984_v28  ;;  %v6453_v42 = vcvt.s32.f32 %v5941_v41  ;;  %v5946_v58 = vunpack.c.0.s8 %v5506_v60  ;;  %v5508_v29 = vld [vmem:[#allocation12 + $0x368] sm:$0xff] }
 0x5c3   :  { %v5950_v31 = vunpack.c.1.s8 %v5506_v60  ;;  %v6983_v50 = vmul.f32 %v12334_v32, %v6449_v63  ;;  %v6456_v35 = vcvt.s32.f32 %v5944_v22  ;;  %v6460_v56 = vcvt.s32.f32 %v5948_v20 }
 0x5c4   :  { %v7289_v36 = vpack.c.bf16 %v6985_v23, %v6981_v38  ;;  %7678 = vmatprep.subr.bf16.mxu1 %v7292_v37  ;;  %v6987_v12 = vmul.f32 %v12334_v32, %v6453_v42  ;;  %v6458_v9 = vcvt.s32.f32 %v5946_v58  ;;  %v5943_v51 = vunpack.c.0.s8 %v5503_v61  ;;  %v5510_v23 = vld [vmem:[#allocation12 + $0x378] sm:$0xff] }
 0x5c5   :  { %v6462_v55 = vcvt.s32.f32 %v5950_v31  ;;  %v6990_v1 = vmul.f32 %v12313_v54, %v6456_v35  ;;  %v6994_v24 = vmul.f32 %v12313_v54, %v6460_v56  ;;  %v5947_v16 = vunpack.c.1.s8 %v5503_v61 }
 0x5c6   :  { %7507 = vmatpush1.bf16.msra.mxu0 %v7289_v36  ;;  %v5945_v43 = vunpack.c.0.s8 %v13004_v53  ;;  %v7291_v46 = vpack.c.bf16 %v6987_v12, %v6983_v50  ;;  %v6992_v18 = vmul.f32 %v12323_v6, %v6458_v9  ;;  %v6455_v13 = vcvt.s32.f32 %v5943_v51  ;;  %v5507_v36 = vld [vmem:[#allocation12 + $0x360] sm:$0xff]  ;;  %v13026_v9 = vld [vmem:[#allocation12 + $0x370] sm:$0xff] }
 0x5c7   :  { %v6996_v17 = vmul.f32 %v12323_v6, %v6462_v55  ;;  %v7294_v25 = vpack.c.bf16 %v6994_v24, %v6990_v1  ;;  %v6459_v30 = vcvt.s32.f32 %v5947_v16  ;;  %v5949_v19 = vunpack.c.1.s8 %v13004_v53 }
 0x5c8   :  { %v6457_v15 = vcvt.s32.f32 %v5945_v43  ;;  %7679 = vmatpush1.bf16.msra.mxu1 %v7291_v46  ;;  %v6989_v7 = vmul.f32 %v12327_v57, %v6455_v13  ;;  %v5952_v21 = vunpack.c.2.s8 %v5504_v3  ;;  %v5956_v2 = vunpack.c.3.s8 %v5504_v3 }
 0x5c9   :  { %v7296_v11 = vpack.c.bf16 %v6996_v17, %v6992_v18  ;;  %7508 = vmatprep.subr.bf16.mxu0 %v7294_v25  ;;  %v6993_v45 = vmul.f32 %v12327_v57, %v6459_v30  ;;  %v6461_v34 = vcvt.s32.f32 %v5949_v19  ;;  %v5954_v26 = vunpack.c.2.s8 %v5506_v60 }
 0x5ca   :  { %v6991_v47 = vmul.f32 %v12334_v32, %v6457_v15  ;;  %v6464_v44 = vcvt.s32.f32 %v5952_v21  ;;  %v6468_v10 = vcvt.s32.f32 %v5956_v2  ;;  %v5958_v48 = vunpack.c.3.s8 %v5506_v60 }
 0x5cb   :  { %7680 = vmatprep.subr.bf16.mxu1 %v7296_v11  ;;  %v5951_v62 = vunpack.c.2.s8 %v5503_v61  ;;  %v7293_v14 = vpack.c.bf16 %v6993_v45, %v6989_v7  ;;  %v6995_v33 = vmul.f32 %v12334_v32, %v6461_v34  ;;  %v6466_v8 = vcvt.s32.f32 %v5954_v26 }
 0x5cc   :  { %v5955_v4 = vunpack.c.3.s8 %v5503_v61  ;;  %v6998_v28 = vmul.f32 %v12313_v54, %v6464_v44  ;;  %v7002_v3 = vmul.f32 %v12313_v54, %v6468_v10  ;;  %v6470_v0 = vcvt.s32.f32 %v5958_v48 }
 0x5cd   :  { %v6463_v49 = vcvt.s32.f32 %v5951_v62  ;;  %7509 = vmatpush1.bf16.msra.mxu0 %v7293_v14  ;;  %v7295_v59 = vpack.c.bf16 %v6995_v33, %v6991_v47  ;;  %v7000_v38 = vmul.f32 %v12323_v6, %v6466_v8  ;;  %v5953_v60 = vunpack.c.2.s8 %v13004_v53 }
 0x5ce   :  { %v6467_v41 = vcvt.s32.f32 %v5955_v4  ;;  %v7298_v63 = vpack.c.bf16 %v7002_v3, %v6998_v28  ;;  %v7004_v22 = vmul.f32 %v12323_v6, %v6470_v0  ;;  %v5957_v61 = vunpack.c.3.s8 %v13004_v53 }
 0x5cf   :  { %v6997_v20 = vmul.f32 %v12327_v57, %v6463_v49  ;;  %7681 = vmatpush1.bf16.msra.mxu1 %v7295_v59  ;;  %v6465_v42 = vcvt.s32.f32 %v5953_v60  ;;  %v5960_v58 = vunpack.c.0.s8 %v5508_v29  ;;  %v5964_v31 = vunpack.c.1.s8 %v5508_v29 }
 0x5d0   :  { %v7001_v37 = vmul.f32 %v12327_v57, %v6467_v41  ;;  %7510 = vmatprep.subr.bf16.mxu0 %v7298_v63  ;;  %v7300_v50 = vpack.c.bf16 %v7004_v22, %v7000_v38  ;;  %v6469_v35 = vcvt.s32.f32 %v5957_v61  ;;  %v5962_v56 = vunpack.c.0.s8 %v5510_v23  ;;  %v5512_v63 = vld [vmem:[#allocation12 + $0x388] sm:$0xff] }
 0x5d1   :  { %v5966_v12 = vunpack.c.1.s8 %v5510_v23  ;;  %v6999_v51 = vmul.f32 %v12334_v32, %v6465_v42  ;;  %v6472_v1 = vcvt.s32.f32 %v5960_v58  ;;  %v6476_v24 = vcvt.s32.f32 %v5964_v31 }
 0x5d2   :  { %v7297_v55 = vpack.c.bf16 %v7001_v37, %v6997_v20  ;;  %7682 = vmatprep.subr.bf16.mxu1 %v7300_v50  ;;  %v7003_v53 = vmul.f32 %v12334_v32, %v6469_v35  ;;  %v6474_v16 = vcvt.s32.f32 %v5962_v56  ;;  %v5959_v46 = vunpack.c.0.s8 %v5507_v36  ;;  %v5514_v37 = vld [vmem:[#allocation12 + $0x398] sm:$0xff] }
 0x5d3   :  { %v6478_v43 = vcvt.s32.f32 %v5966_v12  ;;  %v7006_v18 = vmul.f32 %v12313_v54, %v6472_v1  ;;  %v7010_v17 = vmul.f32 %v12313_v54, %v6476_v24  ;;  %v5963_v13 = vunpack.c.1.s8 %v5507_v36 }
 0x5d4   :  { %7511 = vmatpush1.bf16.msra.mxu0 %v7297_v55  ;;  %v5961_v25 = vunpack.c.0.s8 %v13026_v9  ;;  %v7299_v30 = vpack.c.bf16 %v7003_v53, %v6999_v51  ;;  %v7008_v19 = vmul.f32 %v12323_v6, %v6474_v16  ;;  %v6471_v11 = vcvt.s32.f32 %v5959_v46  ;;  %v5511_v55 = vld [vmem:[#allocation12 + $0x380] sm:$0xff]  ;;  %v13048_v16 = vld [vmem:[#allocation12 + $0x390] sm:$0xff] }
 0x5d5   :  { %v7012_v15 = vmul.f32 %v12323_v6, %v6478_v43  ;;  %v7302_v7 = vpack.c.bf16 %v7010_v17, %v7006_v18  ;;  %v6475_v21 = vcvt.s32.f32 %v5963_v13  ;;  %v5965_v2 = vunpack.c.1.s8 %v13026_v9 }
 0x5d6   :  { %v6473_v45 = vcvt.s32.f32 %v5961_v25  ;;  %7683 = vmatpush1.bf16.msra.mxu1 %v7299_v30  ;;  %v7005_v47 = vmul.f32 %v12327_v57, %v6471_v11  ;;  %v5968_v26 = vunpack.c.2.s8 %v5508_v29  ;;  %v5972_v44 = vunpack.c.3.s8 %v5508_v29 }
 0x5d7   :  { %v7304_v34 = vpack.c.bf16 %v7012_v15, %v7008_v19  ;;  %7512 = vmatprep.subr.bf16.mxu0 %v7302_v7  ;;  %v7009_v10 = vmul.f32 %v12327_v57, %v6475_v21  ;;  %v6477_v48 = vcvt.s32.f32 %v5965_v2  ;;  %v5970_v14 = vunpack.c.2.s8 %v5510_v23 }
 0x5d8   :  { %v7007_v62 = vmul.f32 %v12334_v32, %v6473_v45  ;;  %v6480_v33 = vcvt.s32.f32 %v5968_v26  ;;  %v6484_v8 = vcvt.s32.f32 %v5972_v44  ;;  %v5974_v4 = vunpack.c.3.s8 %v5510_v23 }
 0x5d9   :  { %7684 = vmatprep.subr.bf16.mxu1 %v7304_v34  ;;  %v5967_v28 = vunpack.c.2.s8 %v5507_v36  ;;  %v7301_v3 = vpack.c.bf16 %v7009_v10, %v7005_v47  ;;  %v7011_v0 = vmul.f32 %v12334_v32, %v6477_v48  ;;  %v6482_v49 = vcvt.s32.f32 %v5970_v14 }
 0x5da   :  { %v5971_v59 = vunpack.c.3.s8 %v5507_v36  ;;  %v7014_v38 = vmul.f32 %v12313_v54, %v6480_v33  ;;  %v7018_v29 = vmul.f32 %v12313_v54, %v6484_v8  ;;  %v6486_v41 = vcvt.s32.f32 %v5974_v4 }
 0x5db   :  { %v6479_v60 = vcvt.s32.f32 %v5967_v28  ;;  %7513 = vmatpush1.bf16.msra.mxu0 %v7301_v3  ;;  %v7303_v22 = vpack.c.bf16 %v7011_v0, %v7007_v62  ;;  %v7016_v20 = vmul.f32 %v12323_v6, %v6482_v49  ;;  %v5969_v23 = vunpack.c.2.s8 %v13026_v9 }
 0x5dc   :  { %v6483_v61 = vcvt.s32.f32 %v5971_v59  ;;  %v7306_v42 = vpack.c.bf16 %v7018_v29, %v7014_v38  ;;  %v7020_v58 = vmul.f32 %v12323_v6, %v6486_v41  ;;  %v5973_v36 = vunpack.c.3.s8 %v13026_v9 }
 0x5dd   :  { %v7013_v31 = vmul.f32 %v12327_v57, %v6479_v60  ;;  %7685 = vmatpush1.bf16.msra.mxu1 %v7303_v22  ;;  %v6481_v35 = vcvt.s32.f32 %v5969_v23  ;;  %v5976_v56 = vunpack.c.0.s8 %v5512_v63  ;;  %v5980_v12 = vunpack.c.1.s8 %v5512_v63 }
 0x5de   :  { %v7017_v50 = vmul.f32 %v12327_v57, %v6483_v61  ;;  %7514 = vmatprep.subr.bf16.mxu0 %v7306_v42  ;;  %v7308_v51 = vpack.c.bf16 %v7020_v58, %v7016_v20  ;;  %v6485_v1 = vcvt.s32.f32 %v5973_v36  ;;  %v5978_v24 = vunpack.c.0.s8 %v5514_v37  ;;  %v5516_v42 = vld [vmem:[#allocation12 + $0x3a8] sm:$0xff] }
 0x5df   :  { %v5982_v53 = vunpack.c.1.s8 %v5514_v37  ;;  %v7015_v46 = vmul.f32 %v12334_v32, %v6481_v35  ;;  %v6488_v18 = vcvt.s32.f32 %v5976_v56  ;;  %v6492_v17 = vcvt.s32.f32 %v5980_v12 }
 0x5e0   :  { %v7305_v43 = vpack.c.bf16 %v7017_v50, %v7013_v31  ;;  %7686 = vmatprep.subr.bf16.mxu1 %v7308_v51  ;;  %v7019_v9 = vmul.f32 %v12334_v32, %v6485_v1  ;;  %v6490_v13 = vcvt.s32.f32 %v5978_v24  ;;  %v5975_v30 = vunpack.c.0.s8 %v5511_v55  ;;  %v5518_v50 = vld [vmem:[#allocation12 + $0x3b8] sm:$0xff] }
 0x5e1   :  { %v6494_v25 = vcvt.s32.f32 %v5982_v53  ;;  %v7022_v19 = vmul.f32 %v12313_v54, %v6488_v18  ;;  %v7026_v15 = vmul.f32 %v12313_v54, %v6492_v17  ;;  %v5979_v11 = vunpack.c.1.s8 %v5511_v55 }
 0x5e2   :  { %7515 = vmatpush1.bf16.msra.mxu0 %v7305_v43  ;;  %v5977_v7 = vunpack.c.0.s8 %v13048_v16  ;;  %v7307_v21 = vpack.c.bf16 %v7019_v9, %v7015_v46  ;;  %v7024_v2 = vmul.f32 %v12323_v6, %v6490_v13  ;;  %v6487_v34 = vcvt.s32.f32 %v5975_v30  ;;  %v5515_v43 = vld [vmem:[#allocation12 + $0x3a0] sm:$0xff]  ;;  %v13070_v13 = vld [vmem:[#allocation12 + $0x3b0] sm:$0xff] }
 0x5e3   :  { %v7028_v45 = vmul.f32 %v12323_v6, %v6494_v25  ;;  %v7310_v47 = vpack.c.bf16 %v7026_v15, %v7022_v19  ;;  %v6491_v26 = vcvt.s32.f32 %v5979_v11  ;;  %v5981_v44 = vunpack.c.1.s8 %v13048_v16 }
 0x5e4   :  { %v6489_v10 = vcvt.s32.f32 %v5977_v7  ;;  %7687 = vmatpush1.bf16.msra.mxu1 %v7307_v21  ;;  %v7021_v62 = vmul.f32 %v12327_v57, %v6487_v34  ;;  %v5984_v14 = vunpack.c.2.s8 %v5512_v63  ;;  %v5988_v33 = vunpack.c.3.s8 %v5512_v63 }
 0x5e5   :  { %v7312_v48 = vpack.c.bf16 %v7028_v45, %v7024_v2  ;;  %7516 = vmatprep.subr.bf16.mxu0 %v7310_v47  ;;  %v7025_v8 = vmul.f32 %v12327_v57, %v6491_v26  ;;  %v6493_v4 = vcvt.s32.f32 %v5981_v44  ;;  %v5986_v3 = vunpack.c.2.s8 %v5514_v37 }
 0x5e6   :  { %v7023_v28 = vmul.f32 %v12334_v32, %v6489_v10  ;;  %v6496_v0 = vcvt.s32.f32 %v5984_v14  ;;  %v6500_v49 = vcvt.s32.f32 %v5988_v33  ;;  %v5990_v59 = vunpack.c.3.s8 %v5514_v37 }
 0x5e7   :  { %7688 = vmatprep.subr.bf16.mxu1 %v7312_v48  ;;  %v5983_v38 = vunpack.c.2.s8 %v5511_v55  ;;  %v7309_v29 = vpack.c.bf16 %v7025_v8, %v7021_v62  ;;  %v7027_v41 = vmul.f32 %v12334_v32, %v6493_v4  ;;  %v6498_v60 = vcvt.s32.f32 %v5986_v3 }
 0x5e8   :  { %v5987_v22 = vunpack.c.3.s8 %v5511_v55  ;;  %v7030_v20 = vmul.f32 %v12313_v54, %v6496_v0  ;;  %v7034_v63 = vmul.f32 %v12313_v54, %v6500_v49  ;;  %v6502_v61 = vcvt.s32.f32 %v5990_v59 }
 0x5e9   :  { %v6495_v23 = vcvt.s32.f32 %v5983_v38  ;;  %7517 = vmatpush1.bf16.msra.mxu0 %v7309_v29  ;;  %v7311_v58 = vpack.c.bf16 %v7027_v41, %v7023_v28  ;;  %v7032_v31 = vmul.f32 %v12323_v6, %v6498_v60  ;;  %v5985_v37 = vunpack.c.2.s8 %v13048_v16 }
 0x5ea   :  { %v6499_v36 = vcvt.s32.f32 %v5987_v22  ;;  %v7314_v35 = vpack.c.bf16 %v7034_v63, %v7030_v20  ;;  %v7036_v56 = vmul.f32 %v12323_v6, %v6502_v61  ;;  %v5989_v55 = vunpack.c.3.s8 %v13048_v16 }
 0x5eb   :  { %v7029_v12 = vmul.f32 %v12327_v57, %v6495_v23  ;;  %7689 = vmatpush1.bf16.msra.mxu1 %v7311_v58  ;;  %v6497_v1 = vcvt.s32.f32 %v5985_v37  ;;  %v5992_v24 = vunpack.c.0.s8 %v5516_v42  ;;  %v5996_v53 = vunpack.c.1.s8 %v5516_v42 }
 0x5ec   :  { %v7033_v51 = vmul.f32 %v12327_v57, %v6499_v36  ;;  %7518 = vmatprep.subr.bf16.mxu0 %v7314_v35  ;;  %v7316_v46 = vpack.c.bf16 %v7036_v56, %v7032_v31  ;;  %v6501_v18 = vcvt.s32.f32 %v5989_v55  ;;  %v5994_v17 = vunpack.c.0.s8 %v5518_v50  ;;  %v5520_v35 = vld [vmem:[#allocation12 + $0x3c8] sm:$0xff] }
 0x5ed   :  { %v5998_v9 = vunpack.c.1.s8 %v5518_v50  ;;  %v7031_v30 = vmul.f32 %v12334_v32, %v6497_v1  ;;  %v6504_v19 = vcvt.s32.f32 %v5992_v24  ;;  %v6508_v15 = vcvt.s32.f32 %v5996_v53 }
 0x5ee   :  { %v7313_v25 = vpack.c.bf16 %v7033_v51, %v7029_v12  ;;  %7690 = vmatprep.subr.bf16.mxu1 %v7316_v46  ;;  %v7035_v16 = vmul.f32 %v12334_v32, %v6501_v18  ;;  %v6506_v11 = vcvt.s32.f32 %v5994_v17  ;;  %v5991_v21 = vunpack.c.0.s8 %v5515_v43  ;;  %v5522_v51 = vld [vmem:[#allocation12 + $0x3d8] sm:$0xff] }
 0x5ef   :  { %v6510_v7 = vcvt.s32.f32 %v5998_v9  ;;  %v7038_v2 = vmul.f32 %v12313_v54, %v6504_v19  ;;  %v7042_v45 = vmul.f32 %v12313_v54, %v6508_v15  ;;  %v5995_v34 = vunpack.c.1.s8 %v5515_v43 }
 0x5f0   :  { %7519 = vmatpush1.bf16.msra.mxu0 %v7313_v25  ;;  %v5993_v47 = vunpack.c.0.s8 %v13070_v13  ;;  %v7315_v26 = vpack.c.bf16 %v7035_v16, %v7031_v30  ;;  %v7040_v44 = vmul.f32 %v12323_v6, %v6506_v11  ;;  %v6503_v48 = vcvt.s32.f32 %v5991_v21  ;;  %v5519_v25 = vld [vmem:[#allocation12 + $0x3c0] sm:$0xff]  ;;  %v13092_v11 = vld [vmem:[#allocation12 + $0x3d0] sm:$0xff] }
 0x5f1   :  { %v7044_v10 = vmul.f32 %v12323_v6, %v6510_v7  ;;  %v7318_v62 = vpack.c.bf16 %v7042_v45, %v7038_v2  ;;  %v6507_v14 = vcvt.s32.f32 %v5995_v34  ;;  %v5997_v33 = vunpack.c.1.s8 %v13070_v13 }
 0x5f2   :  { %v6505_v8 = vcvt.s32.f32 %v5993_v47  ;;  %7691 = vmatpush1.bf16.msra.mxu1 %v7315_v26  ;;  %v7037_v28 = vmul.f32 %v12327_v57, %v6503_v48  ;;  %v6000_v3 = vunpack.c.2.s8 %v5516_v42  ;;  %v6004_v0 = vunpack.c.3.s8 %v5516_v42 }
 0x5f3   :  { %v7320_v4 = vpack.c.bf16 %v7044_v10, %v7040_v44  ;;  %7520 = vmatprep.subr.bf16.mxu0 %v7318_v62  ;;  %v7041_v49 = vmul.f32 %v12327_v57, %v6507_v14  ;;  %v6509_v59 = vcvt.s32.f32 %v5997_v33  ;;  %v6002_v29 = vunpack.c.2.s8 %v5518_v50 }
 0x5f4   :  { %v7039_v38 = vmul.f32 %v12334_v32, %v6505_v8  ;;  %v6512_v41 = vcvt.s32.f32 %v6000_v3  ;;  %v6516_v60 = vcvt.s32.f32 %v6004_v0  ;;  %v6006_v22 = vunpack.c.3.s8 %v5518_v50 }
 0x5f5   :  { %7692 = vmatprep.subr.bf16.mxu1 %v7320_v4  ;;  %v5999_v20 = vunpack.c.2.s8 %v5515_v43  ;;  %v7317_v63 = vpack.c.bf16 %v7041_v49, %v7037_v28  ;;  %v7043_v61 = vmul.f32 %v12334_v32, %v6509_v59  ;;  %v6514_v23 = vcvt.s32.f32 %v6002_v29 }
 0x5f6   :  { %v6003_v58 = vunpack.c.3.s8 %v5515_v43  ;;  %v7046_v31 = vmul.f32 %v12313_v54, %v6512_v41  ;;  %v7050_v42 = vmul.f32 %v12313_v54, %v6516_v60  ;;  %v6518_v36 = vcvt.s32.f32 %v6006_v22 }
 0x5f7   :  { %v6511_v37 = vcvt.s32.f32 %v5999_v20  ;;  %7521 = vmatpush1.bf16.msra.mxu0 %v7317_v63  ;;  %v7319_v56 = vpack.c.bf16 %v7043_v61, %v7039_v38  ;;  %v7048_v12 = vmul.f32 %v12323_v6, %v6514_v23  ;;  %v6001_v50 = vunpack.c.2.s8 %v13070_v13 }
 0x5f8   :  { %v6515_v55 = vcvt.s32.f32 %v6003_v58  ;;  %v7322_v1 = vpack.c.bf16 %v7050_v42, %v7046_v31  ;;  %v7052_v24 = vmul.f32 %v12323_v6, %v6518_v36  ;;  %v6005_v43 = vunpack.c.3.s8 %v13070_v13 }
 0x5f9   :  { %v7045_v53 = vmul.f32 %v12327_v57, %v6511_v37  ;;  %7693 = vmatpush1.bf16.msra.mxu1 %v7319_v56  ;;  %v6513_v18 = vcvt.s32.f32 %v6001_v50  ;;  %v6008_v17 = vunpack.c.0.s8 %v5520_v35  ;;  %v6012_v9 = vunpack.c.1.s8 %v5520_v35 }
 0x5fa   :  { %v7049_v46 = vmul.f32 %v12327_v57, %v6515_v55  ;;  %7522 = vmatprep.subr.bf16.mxu0 %v7322_v1  ;;  %v7324_v30 = vpack.c.bf16 %v7052_v24, %v7048_v12  ;;  %v6517_v19 = vcvt.s32.f32 %v6005_v43  ;;  %v6010_v15 = vunpack.c.0.s8 %v5522_v51  ;;  %v5524_v1 = vld [vmem:[#allocation12 + $0x3e8] sm:$0xff] }
 0x5fb   :  { %v6014_v16 = vunpack.c.1.s8 %v5522_v51  ;;  %v7047_v21 = vmul.f32 %v12334_v32, %v6513_v18  ;;  %v6520_v2 = vcvt.s32.f32 %v6008_v17  ;;  %v6524_v45 = vcvt.s32.f32 %v6012_v9 }
 0x5fc   :  { %v7321_v7 = vpack.c.bf16 %v7049_v46, %v7045_v53  ;;  %7694 = vmatprep.subr.bf16.mxu1 %v7324_v30  ;;  %v7051_v13 = vmul.f32 %v12334_v32, %v6517_v19  ;;  %v6522_v34 = vcvt.s32.f32 %v6010_v15  ;;  %v6007_v26 = vunpack.c.0.s8 %v5519_v25  ;;  %v5526_v46 = vld [vmem:[#allocation12 + $0x3f8] sm:$0xff] }
 0x5fd   :  { %v6526_v47 = vcvt.s32.f32 %v6014_v16  ;;  %v7054_v44 = vmul.f32 %v12313_v54, %v6520_v2  ;;  %v7058_v10 = vmul.f32 %v12313_v54, %v6524_v45  ;;  %v6011_v48 = vunpack.c.1.s8 %v5519_v25 }
 0x5fe   :  { %7523 = vmatpush1.bf16.msra.mxu0 %v7321_v7  ;;  %v6009_v62 = vunpack.c.0.s8 %v13092_v11  ;;  %v7323_v14 = vpack.c.bf16 %v7051_v13, %v7047_v21  ;;  %v7056_v33 = vmul.f32 %v12323_v6, %v6522_v34  ;;  %v6519_v4 = vcvt.s32.f32 %v6007_v26  ;;  %v5523_v7 = vld [vmem:[#allocation12 + $0x3e0] sm:$0xff]  ;;  %v5525_v34 = vld [vmem:[#allocation12 + $0x3f0] sm:$0xff] }
 0x5ff   :  { %v7060_v8 = vmul.f32 %v12323_v6, %v6526_v47  ;;  %v7326_v28 = vpack.c.bf16 %v7058_v10, %v7054_v44  ;;  %v6523_v3 = vcvt.s32.f32 %v6011_v48  ;;  %v6013_v0 = vunpack.c.1.s8 %v13092_v11 }
 0x600   :  { %v6521_v49 = vcvt.s32.f32 %v6009_v62  ;;  %7695 = vmatpush1.bf16.msra.mxu1 %v7323_v14  ;;  %v7053_v38 = vmul.f32 %v12327_v57, %v6519_v4  ;;  %v6016_v29 = vunpack.c.2.s8 %v5520_v35  ;;  %v6020_v41 = vunpack.c.3.s8 %v5520_v35 }
 0x601   :  { %v7328_v59 = vpack.c.bf16 %v7060_v8, %v7056_v33  ;;  %7524 = vmatprep.subr.bf16.mxu0 %v7326_v28  ;;  %v7057_v60 = vmul.f32 %v12327_v57, %v6523_v3  ;;  %v6525_v22 = vcvt.s32.f32 %v6013_v0  ;;  %v6018_v63 = vunpack.c.2.s8 %v5522_v51 }
 0x602   :  { %v7055_v20 = vmul.f32 %v12334_v32, %v6521_v49  ;;  %v6528_v61 = vcvt.s32.f32 %v6016_v29  ;;  %v6532_v23 = vcvt.s32.f32 %v6020_v41  ;;  %v6022_v58 = vunpack.c.3.s8 %v5522_v51 }
 0x603   :  { %7696 = vmatprep.subr.bf16.mxu1 %v7328_v59  ;;  %v6015_v31 = vunpack.c.2.s8 %v5519_v25  ;;  %v7325_v42 = vpack.c.bf16 %v7057_v60, %v7053_v38  ;;  %v7059_v36 = vmul.f32 %v12334_v32, %v6525_v22  ;;  %v6530_v37 = vcvt.s32.f32 %v6018_v63 }
 0x604   :  { %v6019_v56 = vunpack.c.3.s8 %v5519_v25  ;;  %v7062_v12 = vmul.f32 %v12313_v54, %v6528_v61  ;;  %v7066_v35 = vmul.f32 %v12313_v54, %v6532_v23  ;;  %v6534_v55 = vcvt.s32.f32 %v6022_v58 }
 0x605   :  { %v6527_v50 = vcvt.s32.f32 %v6015_v31  ;;  %7525 = vmatpush1.bf16.msra.mxu0 %v7325_v42  ;;  %v7327_v24 = vpack.c.bf16 %v7059_v36, %v7055_v20  ;;  %v7064_v53 = vmul.f32 %v12323_v6, %v6530_v37  ;;  %v6017_v51 = vunpack.c.2.s8 %v13092_v11 }
 0x606   :  { %v6531_v43 = vcvt.s32.f32 %v6019_v56  ;;  %v7330_v18 = vpack.c.bf16 %v7066_v35, %v7062_v12  ;;  %v7068_v17 = vmul.f32 %v12323_v6, %v6534_v55  ;;  %v6021_v25 = vunpack.c.3.s8 %v13092_v11 }
 0x607   :  { %v7061_v9 = vmul.f32 %v12327_v57, %v6527_v50  ;;  %7697 = vmatpush1.bf16.msra.mxu1 %v7327_v24  ;;  %v6529_v19 = vcvt.s32.f32 %v6017_v51  ;;  %v6024_v15 = vunpack.c.0.s8 %v5524_v1  ;;  %v6028_v16 = vunpack.c.1.s8 %v5524_v1 }
 0x608   :  { %v7065_v30 = vmul.f32 %v12327_v57, %v6531_v43  ;;  %7526 = vmatprep.subr.bf16.mxu0 %v7330_v18  ;;  %v7332_v21 = vpack.c.bf16 %v7068_v17, %v7064_v53  ;;  %v6533_v2 = vcvt.s32.f32 %v6021_v25  ;;  %v6026_v45 = vunpack.c.0.s8 %v5526_v46 }
 0x609   :  { %v6030_v13 = vunpack.c.1.s8 %v5526_v46  ;;  %v7063_v26 = vmul.f32 %v12334_v32, %v6529_v19  ;;  %v6536_v44 = vcvt.s32.f32 %v6024_v15  ;;  %v6540_v10 = vcvt.s32.f32 %v6028_v16 }
 0x60a   :  { %v7329_v47 = vpack.c.bf16 %v7065_v30, %v7061_v9  ;;  %7698 = vmatprep.subr.bf16.mxu1 %v7332_v21  ;;  %v7067_v11 = vmul.f32 %v12334_v32, %v6533_v2  ;;  %v6538_v48 = vcvt.s32.f32 %v6026_v45  ;;  %v6023_v14 = vunpack.c.0.s8 %v5523_v7  ;;  %v8344_v2 = vld [vmem:[#allocation15 + $0x40] sm:$0xff]  }
 0x60b   :  { %v6542_v62 = vcvt.s32.f32 %v6030_v13  ;;  %v7070_v33 = vmul.f32 %v12313_v54, %v6536_v44  ;;  %v7074_v8 = vmul.f32 %v12313_v54, %v6540_v10  ;;  %v6027_v4 = vunpack.c.1.s8 %v5523_v7  ;;  %v8349_v10 = vld [vmem:[#allocation15 + $0xc8] sm:$0xff]  }
 0x60c   :  { %7527 = vmatpush1.bf16.msra.mxu0 %v7329_v47  ;;  %v6025_v28 = vunpack.c.0.s8 %v5525_v34  ;;  %v7331_v3 = vpack.c.bf16 %v7067_v11, %v7063_v26  ;;  %v7072_v0 = vmul.f32 %v12323_v6, %v6538_v48  ;;  %v6535_v59 = vcvt.s32.f32 %v6023_v14  ;;  %v8345_v26 = vld [vmem:[#allocation15 + $0xc0] sm:$0xff]   ;;  %v8350_v11 = vld [vmem:[#allocation15 + $0x8] sm:$0xff]   ;;  %v8352_v48 = vld [vmem:[#allocation15 + $0x50] sm:$0xff]  }
 0x60d   :  { %v7076_v49 = vmul.f32 %v12323_v6, %v6542_v62  ;;  %v7334_v38 = vpack.c.bf16 %v7074_v8, %v7070_v33  ;;  %v6539_v29 = vcvt.s32.f32 %v6027_v4  ;;  %v6029_v41 = vunpack.c.1.s8 %v5525_v34  ;;  %v8353_v62 = vld [vmem:[#allocation15 + $0xd0] sm:$0xff]   ;;  %v8356_v33 = vld [vmem:[#allocation15 + $0x58] sm:$0xff]  }
 0x60e   :  { %v6537_v60 = vcvt.s32.f32 %v6025_v28  ;;  %7699 = vmatpush1.bf16.msra.mxu1 %v7331_v3  ;;  %v7069_v20 = vmul.f32 %v12327_v57, %v6535_v59  ;;  %v6032_v63 = vunpack.c.2.s8 %v5524_v1  ;;  %v6036_v61 = vunpack.c.3.s8 %v5524_v1  ;;  %v8354_v14 = vld [vmem:[#allocation15 + $0x10] sm:$0xff]   ;;  %v8357_v4 = vld [vmem:[#allocation15 + $0xd8] sm:$0xff]   ;;  %v8360_v3 = vld [vmem:[#allocation15 + $0x60] sm:$0xff]  }
 0x60f   :  { %v7336_v22 = vpack.c.bf16 %v7076_v49, %v7072_v0  ;;  %7528 = vmatprep.subr.bf16.mxu0 %v7334_v38  ;;  %v7073_v23 = vmul.f32 %v12327_v57, %v6539_v29  ;;  %v6541_v58 = vcvt.s32.f32 %v6029_v41  ;;  %v6034_v42 = vunpack.c.2.s8 %v5526_v46  ;;  %v8355_v8 = vld [vmem:[#allocation15 + $0x90] sm:$0xff]   ;;  %v8358_v28 = vld [vmem:[#allocation15 + $0x18] sm:$0xff]   ;;  %v8362_v49 = vld [vmem:[#allocation15 + $0x20] sm:$0xff]  }
 0x610   :  { %v7071_v31 = vmul.f32 %v12334_v32, %v6537_v60  ;;  %v6544_v36 = vcvt.s32.f32 %v6032_v63  ;;  %v6548_v37 = vcvt.s32.f32 %v6036_v61  ;;  %v6038_v56 = vunpack.c.3.s8 %v5526_v46  ;;  %v8359_v0 = vld [vmem:[#allocation15 + $0x98] sm:$0xff]   ;;  %v8364_v59 = vld [vmem:[#allocation15 + $0x68] sm:$0xff]   ;;  %v8363_v38 = vld [vmem:[#allocation15 + $0xa0] sm:$0xff]  }
 0x611   :  { %7700 = vmatprep.subr.bf16.mxu1 %v7336_v22  ;;  %v6031_v12 = vunpack.c.2.s8 %v5523_v7  ;;  %v7333_v35 = vpack.c.bf16 %v7073_v23, %v7069_v20  ;;  %v7075_v55 = vmul.f32 %v12334_v32, %v6541_v58  ;;  %v6546_v50 = vcvt.s32.f32 %v6034_v42  ;;  %v8365_v29 = vld [vmem:[#allocation15 + $0xe8] sm:$0xff]   ;;  %v8368_v22 = vld [vmem:[#allocation15 + $0x70] sm:$0xff]   ;;  %v8372_v23 = vld [vmem:[#allocation15 + $0x78] sm:$0xff]  }
 0x612   :  { %v6035_v24 = vunpack.c.3.s8 %v5523_v7  ;;  %v7078_v53 = vmul.f32 %v12313_v54, %v6544_v36  ;;  %v7082_v1 = vmul.f32 %v12313_v54, %v6548_v37  ;;  %v6550_v43 = vcvt.s32.f32 %v6038_v56  ;;  %v8366_v41 = vld [vmem:[#allocation15 + $0x28] sm:$0xff]   ;;  %v8369_v20 = vld [vmem:[#allocation15 + $0xf0] sm:$0xff]   ;;  %v8373_v58 = vld [vmem:[#allocation15 + $0xf8] sm:$0xff]  }
 0x613   :  { %v6543_v51 = vcvt.s32.f32 %v6031_v12  ;;  %7529 = vmatpush1.bf16.msra.mxu0 %v7333_v35  ;;  %v7335_v18 = vpack.c.bf16 %v7075_v55, %v7071_v31  ;;  %v7080_v17 = vmul.f32 %v12323_v6, %v6546_v50  ;;  %v6033_v25 = vunpack.c.2.s8 %v5525_v34  ;;  %v8367_v60 = vld [vmem:[#allocation15 + $0xa8] sm:$0xff]   ;;  %v8370_v63 = vld [vmem:[#allocation15 + $0x30] sm:$0xff]   ;;  %v8374_v31 = vld [vmem:[#allocation15 + $0x38] sm:$0xff]  }
 0x614   :  { %v6547_v9 = vcvt.s32.f32 %v6035_v24  ;;  %v7338_v30 = vpack.c.bf16 %v7082_v1, %v7078_v53  ;;  %v7084_v46 = vmul.f32 %v12323_v6, %v6550_v43  ;;  %v6037_v15 = vunpack.c.3.s8 %v5525_v34  ;;  %v8346_v6 = vld [vmem:[#allocation15] sm:$0xff]   ;;  %v8348_v34 = vld [vmem:[#allocation15 + $0x48] sm:$0xff]   ;;  %v8371_v61 = vld [vmem:[#allocation15 + $0xb0] sm:$0xff]  }
 0x615   :  { %v7077_v19 = vmul.f32 %v12327_v57, %v6543_v51  ;;  %7701 = vmatpush1.bf16.msra.mxu1 %v7335_v18  ;;  %v6545_v7 = vcvt.s32.f32 %v6033_v25  ;;  %v8375_v42 = vld [vmem:[#allocation15 + $0xb8] sm:$0xff]  }
 0x616   :  { %v7081_v16 = vmul.f32 %v12327_v57, %v6547_v9  ;;  %7530 = vmatprep.subr.bf16.mxu0 %v7338_v30  ;;  %v7340_v54 = vpack.c.bf16 %v7084_v46, %v7080_v17  ;;  %v6549_v21 = vcvt.s32.f32 %v6037_v15  ;;  %v8347_v57 = vld [vmem:[#allocation15 + $0x80] sm:$0xff]   ;;  %v7349_v36 = vld [vmem:[#allocation14] sm:$0xf] }
 0x617   :  { %v7079_v13 = vmul.f32 %v12334_v32, %v6545_v7  ;;  %v7354_v37 = vrot.slane %v7349_v36, %v13845_v40  ;;  %v7358_v56 = vrot.slane %v7349_v36, %v13847_v5  ;;  %v7362_v35 = vrot.slane %v7349_v36, %v13846_v39 }
 0x618   :  { %v7337_v45 = vpack.c.bf16 %v7081_v16, %v7077_v19  ;;  %7702 = vmatprep.subr.bf16.mxu1 %v7340_v54  ;;  %v7083_v47 = vmul.f32 %v12334_v32, %v6549_v21  ;;  %v8351_v32 = vld [vmem:[#allocation15 + $0x88] sm:$0xff]   ;;  %v7366_v24 = vrot.slane %v7349_v36, %v13848_v52 }
 0x61a   :  { %7531 = vmatpush1.bf16.msra.mxu0 %v7337_v45  ;;  %v7339_v44 = vpack.c.bf16 %v7083_v47, %v7079_v13 }
 0x61b   :  { %8188 = vmatprep.subr.bf16.mxu0 %v8344_v2 }
 0x61c   :  { %7703 = vmatpush1.bf16.msra.mxu1 %v7339_v44  ;;  %v8155_v44 = vld [vmem:[%s13163_s10] ss:$0 sm:$0xff] }
 0x61d   :  { %7533 = vmatmul.mubr.bf16.vlgmr.msra.gmra.mrb[16].mxu0 %v12923_v27  ;;  %8210 = vmatprep.subr.bf16.mxu1 %v8345_v26 }
 0x61e   :  { %8189 = vmatpush3.bf16.msra.mxu0 %v8346_v6 }
 0x61f   :  { %8190 = vmatprep.subr.bf16.mxu0 %v8348_v34  ;;  %7705 = vmatmul.mubr.bf16.vlgmr.msra.gmra.mrb[16].mxu1 %v12923_v27  ;;  %v8361_v27 = vld [vmem:[#allocation15 + $0xe0] sm:$0xff]  }
 0x620   :  { %8211 = vmatpush3.bf16.msra.mxu1 %v8347_v57 }
 0x621   :  { %8212 = vmatprep.subr.bf16.mxu1 %v8349_v10 }
 0x622   :  { %8191 = vmatpush3.bf16.msra.mxu0 %v8350_v11 }
 0x623   :  { %8192 = vmatprep.subr.bf16.mxu0 %v8352_v48 }
 0x624   :  { %8213 = vmatpush3.bf16.msra.mxu1 %v8351_v32 }
 0x625   :  { %8214 = vmatprep.subr.bf16.mxu1 %v8353_v62 }
 0x626   :  { %8193 = vmatpush3.bf16.msra.mxu0 %v8354_v14 }
 0x627   :  { %8194 = vmatprep.subr.bf16.mxu0 %v8356_v33 }
 0x628   :  { %8215 = vmatpush3.bf16.msra.mxu1 %v8355_v8 }
 0x629   :  { %8216 = vmatprep.subr.bf16.mxu1 %v8357_v4 }
 0x62a   :  { %8195 = vmatpush3.bf16.msra.mxu0 %v8358_v28 }
 0x62b   :  { %8196 = vmatprep.subr.bf16.mxu0 %v8360_v3 }
 0x62c   :  { %8217 = vmatpush3.bf16.msra.mxu1 %v8359_v0 }
 0x62d   :  { %8218 = vmatprep.subr.bf16.mxu1 %v8361_v27 }
 0x62e   :  { %8197 = vmatpush3.bf16.msra.mxu0 %v8362_v49 }
 0x62f   :  { %8198 = vmatprep.subr.bf16.mxu0 %v8364_v59 }
 0x630   :  { %8219 = vmatpush3.bf16.msra.mxu1 %v8363_v38 }
 0x631   :  { %8220 = vmatprep.subr.bf16.mxu1 %v8365_v29 }
 0x632   :  { %8199 = vmatpush3.bf16.msra.mxu0 %v8366_v41 }
 0x633   :  { %8200 = vmatprep.subr.bf16.mxu0 %v8368_v22 }
 0x634   :  { %8221 = vmatpush3.bf16.msra.mxu1 %v8367_v60 }
 0x635   :  { %8222 = vmatprep.subr.bf16.mxu1 %v8369_v20 }
 0x636   :  { %8201 = vmatpush3.bf16.msra.mxu0 %v8370_v63 }
 0x637   :  { %8202 = vmatprep.subr.bf16.mxu0 %v8372_v23 }
 0x638   :  { %8223 = vmatpush3.bf16.msra.mxu1 %v8371_v61 }
 0x639   :  { %8224 = vmatprep.subr.bf16.mxu1 %v8373_v58 }
 0x63a   :  { %8203 = vmatpush3.bf16.msra.mxu0 %v8374_v31 }
 0x63c   :  { %8225 = vmatpush3.bf16.msra.mxu1 %v8375_v42 }
 0x6f0   :  { %v7534_v12 = vpop.f32.mrb[16].mxu0 }
 0x6f1   :  { %v8248_v55 = vadd.f32 %v7534_v12, %v7354_v37  ;;  %v7536_v50 = vpop.f32.mrb[17].mxu0 }
 0x6f2   :  { %v8249_v53 = vadd.f32 %v7536_v50, %v7358_v56  ;;  %v7538_v1 = vpop.f32.mrb[18].mxu0  ;;  %v7706_v43 = vpop.f32.mrb[16].mxu1 }
 0x6f3   :  { %v8250_v51 = vadd.f32 %v7538_v1, %v7354_v37  ;;  %v7540_v18 = vpop.f32.mrb[19].mxu0  ;;  %v8252_v17 = vadd.f32 %v7706_v43, %v7362_v35  ;;  %v7708_v9 = vpop.f32.mrb[17].mxu1  ;;  %v7715_v30 = vmax.f32 %v8248_v55, 0.0 }
 0x6f4   :  { %v8251_v25 = vadd.f32 %v7540_v18, %v7358_v56  ;;  %v8253_v46 = vadd.f32 %v7708_v9, %v7366_v24  ;;  %v7710_v19 = vpop.f32.mrb[18].mxu1  ;;  %v7716_v5 = vmax.f32 %v8249_v53, 0.0 }
 0x6f5   :  { %v7719_v40 = vmax.f32 %v8250_v51, 0.0  ;;  %v8254_v15 = vadd.f32 %v7710_v19, %v7362_v35  ;;  %v7712_v39 = vpop.f32.mrb[19].mxu1  ;;  %v7717_v21 = vmax.f32 %v8252_v17, 0.0 }
 0x6f6   :  { %v7720_v16 = vmax.f32 %v8251_v25, 0.0  ;;  %v8255_v54 = vadd.f32 %v7712_v39, %v7366_v24  ;;  %v7718_v45 = vmax.f32 %v8253_v46, 0.0 }
 0x6f7   :  { %v7723_v7 = vpack.c.bf16 %v7719_v40, %v7715_v30  ;;  %v7721_v52 = vmax.f32 %v8254_v15, 0.0 }
 0x6f8   :  { %v7724_v2 = vpack.c.bf16 %v7720_v16, %v7716_v5  ;;  %v7722_v13 = vmax.f32 %v8255_v54, 0.0 }
 0x6f9   :  { %v7725_v47 = vpack.c.bf16 %v7721_v52, %v7717_v21 }
 0x6fa   :  { %8022 = vmatprep.mubr.bf16.mxu0 %v7724_v2  ;;  %v7726_v26 = vpack.c.bf16 %v7722_v13, %v7718_v45 }
 0x6fb   :  { %8023 = vmatmul.mubr.bf16.vlgmr.msra.gmra.mrb[20].mxu0 %v7723_v7 }
 0x6fc   :  { %8062 = vmatprep.mubr.bf16.mxu1 %v7726_v26 }
 0x6fd   :  { %8063 = vmatmul.mubr.bf16.vlgmr.msra.gmra.mrb[20].mxu1 %v7725_v47 }
 0x7ce   :  { %v8204_v6 = vpop.f32.mrb[20].mxu0 }
 0x7cf   :  { %v8205_v34 = vpop.f32.mrb[21].mxu0 }
 0x7d0   :  { %v8206_v57 = vadd.f32 %v8205_v34, %v8204_v6  ;;  %v8207_v10 = vpop.f32.mrb[22].mxu0  ;;  %v8226_v11 = vpop.f32.mrb[20].mxu1 }
 0x7d1   :  { %v8208_v48 = vpop.f32.mrb[23].mxu0  ;;  %v8227_v62 = vpop.f32.mrb[21].mxu1 }
 0x7d2   :  { %v8025_v32 = vadd.f32 %v8206_v57, %v8155_v44  ;;  %v8228_v14 = vadd.f32 %v8227_v62, %v8226_v11  ;;  %v8229_v33 = vpop.f32.mrb[22].mxu1 }
 0x7d3   :  { %v8230_v8 = vpop.f32.mrb[23].mxu1 }
 0x7d4   :  { %v8065_v4 = vadd.f32 %v8228_v14, %v8025_v32 }
 0x7d6   :  { %8071 = vst.msk [vmem:[#allocation17] sm:$0xf] %vm8070_vm1, %v8065_v4 }
 0x7d7   :  { %8568 = shalt.err (!%p8565_p12)
}
 0x7d8   :  { %s8569_s30 = scalar_lea.hbm %s13164_s11, 64 }
 0x7d9   :  { %p8570_p13 = scmp.ne.s32.totalorder %s13164_s11, %s8569_s30  ;;  %p8573_p0 = scmp.lt.u32.totalorder %s8569_s30, %s13164_s11 }
 0x7db   :  { %p8575_p1 = pnand %p8573_p0, %p8570_p13 }
 0x7dd   :  { %8578 = shalt.err (!%p8575_p1)
}
 0x7de   :  { %8081 = dma.vmem_to_hbm [thread:$0]  %s8079_s21, 64, %s13164_s11, [#allocation5]  }
 0x7df   :  { %8589 = dma.done.wait [#allocation5], 64  }
 0x7e0   :  { %8590 = vsyncadd [#allocation5], 4294967232 }
 0x7e1   :  { %8085 = vsyncpa [#allocation4], 1 }
 0x7e2   :  { %8086 = vsyncpa [#allocation7], 1 }
 0x7e3   :  { %8087 = vsyncpa [#allocation10], 1 }
 0x7e4   :  { %8088 = vsyncpa [#allocation13], 1 }
 0x7e5   :  { %8089 = vsyncpa [#allocation16], 1 }
 0x7e6   :  { %8090 = vsyncpa [#allocation5], 1 }

</bundles_post_ra>
